<compile_context>
chip_gen: v5e
topology: v5e:2x2
jax: 0.10.0
libtpu: 0.0.40
codegen_flags: <defaults>
</compile_context>

<pallas_src>
import functools

import jax
import jax.numpy as jnp
from jax.experimental import pallas as pl
from jax.experimental.pallas import tpu as pltpu


# ----------------------------------------------------------------------------
# hardware / tiling helpers
# ----------------------------------------------------------------------------
def _round_up(x, m):
    return ((x + m - 1) // m) * m


def _vmem_phys():
    """Physical VMEM bytes for this TPU generation (conservative fallback)."""
    try:
        info = pltpu.get_tpu_info()
        for name in ("vmem_capacity_bytes", "vmem_bytes", "vmem_size_bytes"):
            v = getattr(info, name, None)
            if v:
                return int(v)
    except Exception:
        pass
    return 64 * 1024 * 1024          # v7x per-core size (smallest generation)


def _row_tile(H, bytes_per_row, budget_bytes):
    """Largest divisor of H whose per-block footprint fits the byte budget.

    TODO(synk): move to pl.cdiv + tail masking so awkward H cannot degrade
    to tiny tiles."""
    cap = max(1, int(budget_bytes // max(1, bytes_per_row)))
    cap = min(cap, H)
    for d in range(cap, 0, -1):
        if H % d == 0:
            return d
    return 1


def _cparams(sem, est_bytes, vmem_phys):
    """dimension_semantics + generation-aware VMEM limit (<= 0.8x physical)."""
    cap = int(0.8 * vmem_phys)
    vmem = None
    if est_bytes > 12 * 1024 * 1024:
        vmem = int(min(max(2 * est_bytes, 32 * 1024 * 1024), cap))
    return pltpu.CompilerParams(dimension_semantics=sem, vmem_limit_bytes=vmem)


def _plane_spec(block_shape, index_map, plane_bytes_2buf, vmem_phys):
    """BlockSpec for a per-batch resident plane (block index changes with n
    only).  When double buffering the plane would eat a large VMEM fraction
    (v7x: 64 MiB physical), request single buffering to halve the footprint.
    TODO(synk): planes that do not fit even single-buffered need
    memory_space=pl.ANY + manual halo-strip DMA streaming."""
    if plane_bytes_2buf > vmem_phys // 8:
        try:
            return pl.BlockSpec(block_shape, index_map,
                                pipeline_mode=pl.Buffered(1))
        except Exception:
            pass
    return pl.BlockSpec(block_shape, index_map)


# ----------------------------------------------------------------------------
# Kernel A: fused ConvTranspose2d(2,2) + AttentionGate + channel concat
# ----------------------------------------------------------------------------
def _up_gate_cat_kernel(x_ref, s_ref, wup_ref, bup_ref, wgx_ref, bgx_ref,
                        wpsi_ref, bpsib_ref, o_ref):
    _, th, W, Cin = x_ref.shape
    C2 = wgx_ref.shape[-1]                       # 2 * Cout (both dx quadrants)
    Cout = C2 // 2
    rows = th * W

    x2 = x_ref[...].reshape(rows, Cin)           # bf16
    s2 = s_ref[...].reshape(rows, C2)            # bf16, lanes [s_dx0 | s_dx1]

    # ConvTranspose2d taps for this dy, both dx quadrants in ONE matmul:
    # wup columns ordered (dx, Cout) -> lanes [up_dx0 | up_dx1].
    up2 = jnp.dot(x2, wup_ref[0],
                  preferred_element_type=jnp.float32) + bup_ref[...]

    # Attention gate, both quadrants fused via block-diagonal stacked weights:
    #   f = relu(up @ Wg + skip @ Wx + (bg + bx))
    f2 = (jnp.dot(up2.astype(jnp.bfloat16), wgx_ref[0],
                  preferred_element_type=jnp.float32)
          + jnp.dot(s2, wgx_ref[1], preferred_element_type=jnp.float32)
          + bgx_ref[...])
    f2 = jnp.maximum(f2, 0.0)

    # psi broadcast to Cout lanes per quadrant via a column-tiled
    # block-diagonal psi weight -> alpha is lane-aligned with the skip.
    psi = jnp.dot(f2.astype(jnp.bfloat16), wpsi_ref[...],
                  preferred_element_type=jnp.float32) + bpsib_ref[...]
    alpha = jax.nn.sigmoid(psi)
    gated = s2.astype(jnp.float32) * alpha

    # cat([up, gated]) per dx quadrant -> output lanes [up0 | g0 | up1 | g1];
    # write directly into o_ref lane slices (no vreg concat / repack).
    dt = o_ref.dtype
    o_ref[:, :, :, :, 0 * Cout:1 * Cout] = (
        up2[:, :Cout].reshape(1, th, 1, W, Cout).astype(dt))
    o_ref[:, :, :, :, 1 * Cout:2 * Cout] = (
        gated[:, :Cout].reshape(1, th, 1, W, Cout).astype(dt))
    o_ref[:, :, :, :, 2 * Cout:3 * Cout] = (
        up2[:, Cout:].reshape(1, th, 1, W, Cout).astype(dt))
    o_ref[:, :, :, :, 3 * Cout:4 * Cout] = (
        gated[:, Cout:].reshape(1, th, 1, W, Cout).astype(dt))


def up_gate_cat(x, skip, lp, vmem_phys):
    """x: (N,H,W,Cin) bf16; skip: (N,2H,2W,Cout) bf16 -> (N,2H,2W,2*Cout) bf16."""
    N, H, W, Cin = x.shape
    Cout = lp["up_b"].shape[0]
    C2 = 2 * Cout

    # --- weight layout glue (bf16 MXU operands, f32 biases) ---
    # PyTorch ConvTranspose2d weight (Cin, Cout, dy, dx) -> (dy, Cin, dx*Cout+c)
    wup = jnp.transpose(lp["up_w"], (2, 0, 3, 1)).reshape(2, Cin, C2)
    wup = wup.astype(jnp.bfloat16)
    bup = jnp.tile(lp["up_b"].astype(jnp.float32), 2).reshape(1, C2)
    z = jnp.zeros((Cout, Cout), jnp.float32)
    wg2 = jnp.block([[lp["wg"], z], [z, lp["wg"]]])
    wx2 = jnp.block([[lp["wx"], z], [z, lp["wx"]]])
    wgx = jnp.stack([wg2, wx2]).astype(jnp.bfloat16)             # (2, C2, C2)
    bgx = jnp.tile((lp["bg"] + lp["bx"]).astype(jnp.float32), 2).reshape(1, C2)
    wpsi_t = jnp.tile(lp["wpsi"].astype(jnp.float32), (1, Cout))  # (Cout, Cout)
    wpsib = jnp.block([[wpsi_t, z], [z, wpsi_t]]).astype(jnp.bfloat16)
    bpsib = jnp.full((1, C2), lp["bpsi"][0], jnp.float32)

    # (N,2H,2W,Cout) -> (N,H,2,W,2*Cout): pure reshape (dx packed into lanes).
    skip5 = skip.reshape(N, H, 2, W, C2)

    # Row-tile from a per-generation VMEM byte budget.
    per_row = W * (2 * 2 * Cin          # x block, double-buffered, bf16
                   + 2 * 2 * C2         # skip block
                   + 2 * 2 * 2 * C2     # out block
                   + 6 * 4 * C2)        # live f32 intermediates (rough)
    th = _row_tile(H, per_row, max(per_row, vmem_phys // 4))
    grid = (N, H // th, 2)              # all parallel (>=4 steps -> megacore)

    est = per_row * th + (Cin * C2 + 3 * C2 * C2) * 2 + (64 << 10)

    out5 = pl.pallas_call(
        _up_gate_cat_kernel,
        out_shape=jax.ShapeDtypeStruct((N, H, 2, W, 2 * C2), jnp.bfloat16),
        grid=grid,
        in_specs=[
            pl.BlockSpec((1, th, W, Cin), lambda n, hb, dy: (n, hb, 0, 0)),
            pl.BlockSpec((1, th, 1, W, C2), lambda n, hb, dy: (n, hb, dy, 0, 0)),
            pl.BlockSpec((1, Cin, C2), lambda n, hb, dy: (dy, 0, 0)),
            pl.BlockSpec((1, C2), lambda n, hb, dy: (0, 0)),
            pl.BlockSpec((2, C2, C2), lambda n, hb, dy: (0, 0, 0)),
            pl.BlockSpec((1, C2), lambda n, hb, dy: (0, 0)),
            pl.BlockSpec((C2, C2), lambda n, hb, dy: (0, 0)),
            pl.BlockSpec((1, C2), lambda n, hb, dy: (0, 0)),
        ],
        out_specs=pl.BlockSpec((1, th, 1, W, 2 * C2),
                               lambda n, hb, dy: (n, hb, dy, 0, 0)),
        compiler_params=_cparams(("parallel", "parallel", "parallel"),
                                 est, vmem_phys),
    )(x, skip5, wup, bup, wgx, bgx, wpsib, bpsib)

    # (N,H,2,W,2,2*Cout) flattened layout -> standard NHWC; pure reshape.
    return out5.reshape(N, 2 * H, 2 * W, C2)


# ----------------------------------------------------------------------------
# Kernel B: 3x3 conv (padding=1) + ReLU
#   flattened row-stride trick: per dy the strip is contiguous; the 3 dx taps
#   are folded into the matmul K dimension (K = 3*Cin, 3 matmuls per block).
# ----------------------------------------------------------------------------
def _conv3x3_relu_kernel(xp_ref, w_ref, b_ref, o_ref, *, tr, w_valid):
    i = pl.program_id(1)
    _, _, Wp, Cin = xp_ref.shape             # padded plane: (1, H+3, Wp, Cin)
    Cout = w_ref.shape[-1]
    row0 = i * tr
    L = tr * Wp                              # outputs computed at Wp stride

    acc = jnp.zeros((L, Cout), jnp.float32)
    for dy in range(3):                      # static 3-tap unroll over dy
        strip = xp_ref[0, pl.ds(row0 + dy, tr + 1), :, :]        # (tr+1,Wp,Cin)
        flat = strip.reshape((tr + 1) * Wp, Cin)
        # dx taps folded into lanes: patch[f] = [flat[f], flat[f+1], flat[f+2]]
        patch = jnp.concatenate(
            [flat[0:L], flat[1:L + 1], flat[2:L + 2]], axis=-1)  # (L, 3*Cin)
        acc = acc + jnp.dot(patch, w_ref[dy],
                            preferred_element_type=jnp.float32)
    y = jnp.maximum(acc + b_ref[...], 0.0)                       # f32 epilogue
    y = y.reshape(tr, Wp, Cout)[:, :w_valid, :]                  # drop junk cols
    o_ref[...] = y.reshape(o_ref.shape).astype(o_ref.dtype)


def conv3x3_relu(x, w_pt, b, vmem_phys, out_dtype=jnp.bfloat16):
    """x: (N,H,W,Cin); w_pt: (Cout,Cin,3,3) PyTorch layout."""
    N, H, W, Cin = x.shape
    Cout = w_pt.shape[0]
    Wp = _round_up(W + 2, 8)                 # padded width, sublane multiple

    # Weight rows ordered (dx, cin) to match the lane-folded patch.
    w9 = jnp.transpose(w_pt, (2, 3, 1, 0)).reshape(3, 3 * Cin, Cout)
    w9 = w9.astype(jnp.bfloat16)
    b2 = b.astype(jnp.float32).reshape(1, Cout)

    # Zero-pad ONCE in bf16: +1 top / +2 bottom rows (the extra bottom row
    # keeps the in-kernel (tr+1)-row strip loads in bounds), width rounded up.
    xp = jnp.pad(x.astype(jnp.bfloat16),
                 ((0, 0), (1, 2), (1, Wp - W - 1), (0, 0)))

    obytes = jnp.dtype(out_dtype).itemsize
    plane2 = 2 * (H + 3) * Wp * Cin * 2      # double-buffered resident plane
    per_row = (Wp * (2 * Cin                 # dy strip (bf16)
                     + 2 * 3 * Cin           # lane-folded patch (bf16)
                     + 2 * 4 * Cout)         # f32 accumulator + epilogue
               + 2 * W * Cout * obytes)      # double-buffered output block
    budget = max(per_row, vmem_phys // 4 - plane2)
    tr = _row_tile(H, per_row, budget)
    grid = (N, H // tr)

    est = plane2 + per_row * tr + 9 * Cin * Cout * 2 + (64 << 10)

    kernel = functools.partial(_conv3x3_relu_kernel, tr=tr, w_valid=W)
    return pl.pallas_call(
        kernel,
        out_shape=jax.ShapeDtypeStruct((N, H, W, Cout), out_dtype),
        grid=grid,
        in_specs=[
            _plane_spec((1, H + 3, Wp, Cin), lambda n, i: (n, 0, 0, 0),
                        plane2, vmem_phys),
            pl.BlockSpec((3, 3 * Cin, Cout), lambda n, i: (0, 0, 0)),
            pl.BlockSpec((1, Cout), lambda n, i: (0, 0)),
        ],
        out_specs=pl.BlockSpec((1, tr, W, Cout), lambda n, i: (n, i, 0, 0)),
        compiler_params=_cparams(("parallel", "parallel"), est, vmem_phys),
    )(xp, w9, b2)


# ----------------------------------------------------------------------------
# Parameter init (deterministic, PyTorch shapes)
# ----------------------------------------------------------------------------
def init_params(key, base_channels, num_layers):
    params = []
    in_ch = base_channels * 2 ** num_layers
    for i in range(num_layers):
        out_ch = base_channels * 2 ** (num_layers - (i + 1))
        keys = jax.random.split(jax.random.fold_in(key, i), 16)
        layer = {
            # ConvTranspose2d(in_ch, out_ch, 2, 2): weight (Cin, Cout, 2, 2)
            "up_w": 0.1 * jax.random.normal(keys[0], (in_ch, out_ch, 2, 2), jnp.float32),
            "up_b": 0.1 * jax.random.normal(keys[1], (out_ch,), jnp.float32),
            # AttentionGate(out_ch, out_ch, out_ch): 1x1 convs -> dense matrices
            "wg": 0.1 * jax.random.normal(keys[2], (out_ch, out_ch), jnp.float32),
            "bg": 0.1 * jax.random.normal(keys[3], (out_ch,), jnp.float32),
            "wx": 0.1 * jax.random.normal(keys[4], (out_ch, out_ch), jnp.float32),
            "bx": 0.1 * jax.random.normal(keys[5], (out_ch,), jnp.float32),
            "wpsi": 0.1 * jax.random.normal(keys[6], (out_ch, 1), jnp.float32),
            "bpsi": 0.1 * jax.random.normal(keys[7], (1,), jnp.float32),
            # DoubleConv block: Conv(2*out_ch -> out_ch), Conv(out_ch -> out_ch)
            "c1_w": 0.1 * jax.random.normal(keys[8], (out_ch, 2 * out_ch, 3, 3), jnp.float32),
            "c1_b": 0.1 * jax.random.normal(keys[9], (out_ch,), jnp.float32),
            "c2_w": 0.1 * jax.random.normal(keys[10], (out_ch, out_ch, 3, 3), jnp.float32),
            "c2_b": 0.1 * jax.random.normal(keys[11], (out_ch,), jnp.float32),
        }
        params.append(layer)
        in_ch = out_ch
    return params


# ----------------------------------------------------------------------------
# Full forward pass (matches UnetDecoderAttention.forward)
# ----------------------------------------------------------------------------
def unet_decoder_attention(params, x_nchw, skip_connections_nchw):
    vmem_phys = _vmem_phys()
    # NCHW -> NHWC; bf16 for all matmul-only consumers (f32 epilogues inside).
    x = jnp.transpose(x_nchw, (0, 2, 3, 1)).astype(jnp.bfloat16)
    skips = [jnp.transpose(s, (0, 2, 3, 1)).astype(jnp.bfloat16)
             for s in skip_connections_nchw]
    n_layers = len(params)
    for li, layer in enumerate(params):
        skip = skips.pop()                                  # deepest skip first
        x = up_gate_cat(x, skip, layer, vmem_phys)          # up + gate + concat
        x = conv3x3_relu(x, layer["c1_w"], layer["c1_b"], vmem_phys, jnp.bfloat16)
        last = (li == n_layers - 1)
        x = conv3x3_relu(x, layer["c2_w"], layer["c2_b"], vmem_phys,
                         jnp.float32 if last else jnp.bfloat16)
    return jnp.transpose(x, (0, 3, 1, 2))                   # back to NCHW


# ----------------------------------------------------------------------------
if __name__ == "__main__":
    base_channels, num_layers = 4, 2
    batch, bottleneck_hw = 2, 4

    key = jax.random.PRNGKey(0)
    k_x, k_s0, k_s1, k_p = jax.random.split(key, 4)

    params = init_params(k_p, base_channels, num_layers)

    # Bottleneck input: (N, base*2^L, h, w) = (2, 16, 4, 4), NCHW.
    x = jax.random.normal(k_x, (batch, base_channels * 2 ** num_layers,
                                bottleneck_hw, bottleneck_hw), jnp.float32)
    # Skip connections ordered shallow -> deep (forward pops the deepest first):
    #   layer 0 uses (2, 8, 8, 8), layer 1 uses (2, 4, 16, 16).
    skips = [
        jax.random.normal(k_s1, (batch, 4, 16, 16), jnp.float32),
        jax.random.normal(k_s0, (batch, 8, 8, 8), jnp.float32),
    ]

    fwd = jax.jit(unet_decoder_attention)
    out = fwd(params, x, list(skips))
    out = jax.block_until_ready(out)

    assert out.shape == (batch, base_channels, 16, 16), out.shape
    assert out.dtype == jnp.float32
    assert bool(jnp.all(jnp.isfinite(out)))
    print("KERNEL_OK")
</pallas_src>

<mosaic_0001>
module attributes {stable_mosaic.version = 11 : i64} {
  func.func @_up_gate_cat_kernel(%arg0: i32, %arg1: i32, %arg2: i32, %arg3: memref<1x4x4x16xbf16, #tpu.memory_space<vmem>>, %arg4: memref<1x4x1x4x16xbf16, #tpu.memory_space<vmem>>, %arg5: memref<1x16x16xbf16, #tpu.memory_space<vmem>>, %arg6: memref<1x16xf32, #tpu.memory_space<vmem>>, %arg7: memref<2x16x16xbf16, #tpu.memory_space<vmem>>, %arg8: memref<1x16xf32, #tpu.memory_space<vmem>>, %arg9: memref<16x16xbf16, #tpu.memory_space<vmem>>, %arg10: memref<1x16xf32, #tpu.memory_space<vmem>>, %arg11: memref<1x4x1x4x32xbf16, #tpu.memory_space<vmem>>) attributes {dimension_semantics = [#tpu.dimension_semantics<parallel>, #tpu.dimension_semantics<parallel>, #tpu.dimension_semantics<parallel>], iteration_bounds = array<i64: 2, 1, 2>, scalar_prefetch = 0 : i64, scratch_operands = 0 : i64, tpu.core_type = #tpu.core_type<tc>, window_params = [{transform_indices = @transform_0, window_bounds = array<i64: 1, 4, 4, 16>}, {transform_indices = @transform_1, window_bounds = array<i64: 1, 4, 1, 4, 16>}, {transform_indices = @transform_2, window_bounds = array<i64: 1, 16, 16>}, {pipeline_mode = #tpu.pipeline_mode<synchronous>, transform_indices = @transform_3, window_bounds = array<i64: 1, 16>}, {pipeline_mode = #tpu.pipeline_mode<synchronous>, transform_indices = @transform_4, window_bounds = array<i64: 2, 16, 16>}, {pipeline_mode = #tpu.pipeline_mode<synchronous>, transform_indices = @transform_5, window_bounds = array<i64: 1, 16>}, {pipeline_mode = #tpu.pipeline_mode<synchronous>, transform_indices = @transform_6, window_bounds = array<i64: 16, 16>}, {pipeline_mode = #tpu.pipeline_mode<synchronous>, transform_indices = @transform_7, window_bounds = array<i64: 1, 16>}, {transform_indices = @transform_8, window_bounds = array<i64: 1, 4, 1, 4, 32>}]} {
    %c0 = arith.constant 0 : index
    %c0_0 = arith.constant 0 : index
    %c0_1 = arith.constant 0 : index
    %c0_2 = arith.constant 0 : index
    %0 = vector.load %arg3[%c0, %c0_0, %c0_1, %c0_2] : memref<1x4x4x16xbf16, #tpu.memory_space<vmem>>, vector<1x4x4x16xbf16>
    %1 = vector.shape_cast %0 : vector<1x4x4x16xbf16> to vector<16x16xbf16>
    %c0_3 = arith.constant 0 : index
    %c0_4 = arith.constant 0 : index
    %c0_5 = arith.constant 0 : index
    %c0_6 = arith.constant 0 : index
    %c0_7 = arith.constant 0 : index
    %2 = vector.load %arg4[%c0_3, %c0_4, %c0_5, %c0_6, %c0_7] : memref<1x4x1x4x16xbf16, #tpu.memory_space<vmem>>, vector<1x4x1x4x16xbf16>
    %3 = vector.shape_cast %2 : vector<1x4x1x4x16xbf16> to vector<16x16xbf16>
    %c0_8 = arith.constant 0 : index
    %c0_9 = arith.constant 0 : index
    %c0_10 = arith.constant 0 : index
    %4 = vector.load %arg5[%c0_8, %c0_9, %c0_10] : memref<1x16x16xbf16, #tpu.memory_space<vmem>>, vector<1x16x16xbf16>
    %5 = vector.shape_cast %4 : vector<1x16x16xbf16> to vector<16x16xbf16>
    %cst = arith.constant dense<0.000000e+00> : vector<16x16xf32>
    %6 = tpu.matmul %1, %5, %cst {dimension_numbers = #tpu.dot_dimension_numbers<[1], [0], [0], [1], [0, 0, 1, 1], [], []>} : vector<16x16xbf16>, vector<16x16xbf16>, vector<16x16xf32> -> vector<16x16xf32>
    %c0_11 = arith.constant 0 : index
    %c0_12 = arith.constant 0 : index
    %7 = vector.load %arg6[%c0_11, %c0_12] : memref<1x16xf32, #tpu.memory_space<vmem>>, vector<1x16xf32>
    %8 = vector.broadcast %7 : vector<1x16xf32> to vector<16x16xf32>
    %9 = arith.addf %6, %8 : vector<16x16xf32>
    %10 = arith.truncf %9 : vector<16x16xf32> to vector<16x16xbf16>
    %c0_13 = arith.constant 0 : index
    %c0_14 = arith.constant 0 : index
    %c0_15 = arith.constant 0 : index
    %11 = vector.load %arg7[%c0_13, %c0_14, %c0_15] : memref<2x16x16xbf16, #tpu.memory_space<vmem>>, vector<1x16x16xbf16>
    %12 = vector.shape_cast %11 : vector<1x16x16xbf16> to vector<16x16xbf16>
    %cst_16 = arith.constant dense<0.000000e+00> : vector<16x16xf32>
    %13 = tpu.matmul %10, %12, %cst_16 {dimension_numbers = #tpu.dot_dimension_numbers<[1], [0], [0], [1], [0, 0, 1, 1], [], []>} : vector<16x16xbf16>, vector<16x16xbf16>, vector<16x16xf32> -> vector<16x16xf32>
    %c1 = arith.constant 1 : index
    %c0_17 = arith.constant 0 : index
    %c0_18 = arith.constant 0 : index
    %14 = vector.load %arg7[%c1, %c0_17, %c0_18] : memref<2x16x16xbf16, #tpu.memory_space<vmem>>, vector<1x16x16xbf16>
    %15 = vector.shape_cast %14 : vector<1x16x16xbf16> to vector<16x16xbf16>
    %cst_19 = arith.constant dense<0.000000e+00> : vector<16x16xf32>
    %16 = tpu.matmul %3, %15, %cst_19 {dimension_numbers = #tpu.dot_dimension_numbers<[1], [0], [0], [1], [0, 0, 1, 1], [], []>} : vector<16x16xbf16>, vector<16x16xbf16>, vector<16x16xf32> -> vector<16x16xf32>
    %17 = arith.addf %13, %16 : vector<16x16xf32>
    %c0_20 = arith.constant 0 : index
    %c0_21 = arith.constant 0 : index
    %18 = vector.load %arg8[%c0_20, %c0_21] : memref<1x16xf32, #tpu.memory_space<vmem>>, vector<1x16xf32>
    %19 = vector.broadcast %18 : vector<1x16xf32> to vector<16x16xf32>
    %20 = arith.addf %17, %19 : vector<16x16xf32>
    %cst_22 = arith.constant 0.000000e+00 : f32
    %21 = vector.broadcast %cst_22 : f32 to vector<16x16xf32>
    %22 = arith.maximumf %20, %21 : vector<16x16xf32>
    %23 = arith.truncf %22 : vector<16x16xf32> to vector<16x16xbf16>
    %c0_23 = arith.constant 0 : index
    %c0_24 = arith.constant 0 : index
    %24 = vector.load %arg9[%c0_23, %c0_24] : memref<16x16xbf16, #tpu.memory_space<vmem>>, vector<16x16xbf16>
    %cst_25 = arith.constant dense<0.000000e+00> : vector<16x16xf32>
    %25 = tpu.matmul %23, %24, %cst_25 {dimension_numbers = #tpu.dot_dimension_numbers<[1], [0], [0], [1], [0, 0, 1, 1], [], []>} : vector<16x16xbf16>, vector<16x16xbf16>, vector<16x16xf32> -> vector<16x16xf32>
    %c0_26 = arith.constant 0 : index
    %c0_27 = arith.constant 0 : index
    %26 = vector.load %arg10[%c0_26, %c0_27] : memref<1x16xf32, #tpu.memory_space<vmem>>, vector<1x16xf32>
    %27 = vector.broadcast %26 : vector<1x16xf32> to vector<16x16xf32>
    %28 = arith.addf %25, %27 : vector<16x16xf32>
    %29 = arith.negf %28 : vector<16x16xf32>
    %30 = math.exp %29 : vector<16x16xf32>
    %cst_28 = arith.constant 1.000000e+00 : f32
    %31 = vector.broadcast %cst_28 : f32 to vector<16x16xf32>
    %32 = arith.addf %31, %30 : vector<16x16xf32>
    %33 = arith.divf %31, %32 : vector<16x16xf32>
    %34 = arith.extf %3 : vector<16x16xbf16> to vector<16x16xf32>
    %35 = arith.mulf %34, %33 : vector<16x16xf32>
    %36 = vector.extract_strided_slice %9 {offsets = [0, 0], sizes = [16, 8], strides = [1, 1]} : vector<16x16xf32> to vector<16x8xf32>
    %37 = vector.shape_cast %36 : vector<16x8xf32> to vector<1x4x1x4x8xf32>
    %38 = arith.truncf %37 : vector<1x4x1x4x8xf32> to vector<1x4x1x4x8xbf16>
    %c0_29 = arith.constant 0 : index
    %c0_30 = arith.constant 0 : index
    %c0_31 = arith.constant 0 : index
    %c0_32 = arith.constant 0 : index
    %c0_33 = arith.constant 0 : index
    %39 = vector.load %arg11[%c0_29, %c0_30, %c0_31, %c0_32, %c0_33] : memref<1x4x1x4x32xbf16, #tpu.memory_space<vmem>>, vector<1x4x1x4x8xbf16>
    tpu.vector_store %arg11[%c0_29, %c0_30, %c0_31, %c0_32, %c0_33], %38 {strides = array<i32>} : memref<1x4x1x4x32xbf16, #tpu.memory_space<vmem>>, vector<1x4x1x4x8xbf16>,
    %40 = vector.extract_strided_slice %35 {offsets = [0, 0], sizes = [16, 8], strides = [1, 1]} : vector<16x16xf32> to vector<16x8xf32>
    %41 = vector.shape_cast %40 : vector<16x8xf32> to vector<1x4x1x4x8xf32>
    %42 = arith.truncf %41 : vector<1x4x1x4x8xf32> to vector<1x4x1x4x8xbf16>
    %c0_34 = arith.constant 0 : index
    %c0_35 = arith.constant 0 : index
    %c0_36 = arith.constant 0 : index
    %c0_37 = arith.constant 0 : index
    %c8 = arith.constant 8 : index
    %43 = vector.load %arg11[%c0_34, %c0_35, %c0_36, %c0_37, %c8] : memref<1x4x1x4x32xbf16, #tpu.memory_space<vmem>>, vector<1x4x1x4x8xbf16>
    tpu.vector_store %arg11[%c0_34, %c0_35, %c0_36, %c0_37, %c8], %42 {strides = array<i32>} : memref<1x4x1x4x32xbf16, #tpu.memory_space<vmem>>, vector<1x4x1x4x8xbf16>,
    %44 = vector.extract_strided_slice %9 {offsets = [0, 8], sizes = [16, 8], strides = [1, 1]} : vector<16x16xf32> to vector<16x8xf32>
    %45 = vector.shape_cast %44 : vector<16x8xf32> to vector<1x4x1x4x8xf32>
    %46 = arith.truncf %45 : vector<1x4x1x4x8xf32> to vector<1x4x1x4x8xbf16>
    %c0_38 = arith.constant 0 : index
    %c0_39 = arith.constant 0 : index
    %c0_40 = arith.constant 0 : index
    %c0_41 = arith.constant 0 : index
    %c16 = arith.constant 16 : index
    %47 = vector.load %arg11[%c0_38, %c0_39, %c0_40, %c0_41, %c16] : memref<1x4x1x4x32xbf16, #tpu.memory_space<vmem>>, vector<1x4x1x4x8xbf16>
    tpu.vector_store %arg11[%c0_38, %c0_39, %c0_40, %c0_41, %c16], %46 {strides = array<i32>} : memref<1x4x1x4x32xbf16, #tpu.memory_space<vmem>>, vector<1x4x1x4x8xbf16>,
    %48 = vector.extract_strided_slice %35 {offsets = [0, 8], sizes = [16, 8], strides = [1, 1]} : vector<16x16xf32> to vector<16x8xf32>
    %49 = vector.shape_cast %48 : vector<16x8xf32> to vector<1x4x1x4x8xf32>
    %50 = arith.truncf %49 : vector<1x4x1x4x8xf32> to vector<1x4x1x4x8xbf16>
    %c0_42 = arith.constant 0 : index
    %c0_43 = arith.constant 0 : index
    %c0_44 = arith.constant 0 : index
    %c0_45 = arith.constant 0 : index
    %c24 = arith.constant 24 : index
    %51 = vector.load %arg11[%c0_42, %c0_43, %c0_44, %c0_45, %c24] : memref<1x4x1x4x32xbf16, #tpu.memory_space<vmem>>, vector<1x4x1x4x8xbf16>
    tpu.vector_store %arg11[%c0_42, %c0_43, %c0_44, %c0_45, %c24], %50 {strides = array<i32>} : memref<1x4x1x4x32xbf16, #tpu.memory_space<vmem>>, vector<1x4x1x4x8xbf16>,
    return
  }
  func.func @transform_0(%arg0: i32, %arg1: i32, %arg2: i32) -> (i32, i32, i32, i32) {
    %c0_i32 = arith.constant 0 : i32
    %c0_i32_0 = arith.constant 0 : i32
    %c0_i32_1 = arith.constant 0 : i32
    return %arg0, %arg1, %c0_i32, %c0_i32_0 : i32, i32, i32, i32
  }
  func.func @transform_1(%arg0: i32, %arg1: i32, %arg2: i32) -> (i32, i32, i32, i32, i32) {
    %c0_i32 = arith.constant 0 : i32
    %c0_i32_0 = arith.constant 0 : i32
    %c0_i32_1 = arith.constant 0 : i32
    return %arg0, %arg1, %arg2, %c0_i32, %c0_i32_0 : i32, i32, i32, i32, i32
  }
  func.func @transform_2(%arg0: i32, %arg1: i32, %arg2: i32) -> (i32, i32, i32) {
    %c0_i32 = arith.constant 0 : i32
    %c0_i32_0 = arith.constant 0 : i32
    %c0_i32_1 = arith.constant 0 : i32
    return %arg2, %c0_i32, %c0_i32_0 : i32, i32, i32
  }
  func.func @transform_3(%arg0: i32, %arg1: i32, %arg2: i32) -> (i32, i32) {
    %c0_i32 = arith.constant 0 : i32
    %c0_i32_0 = arith.constant 0 : i32
    %c0_i32_1 = arith.constant 0 : i32
    return %c0_i32, %c0_i32_0 : i32, i32
  }
  func.func @transform_4(%arg0: i32, %arg1: i32, %arg2: i32) -> (i32, i32, i32) {
    %c0_i32 = arith.constant 0 : i32
    %c0_i32_0 = arith.constant 0 : i32
    %c0_i32_1 = arith.constant 0 : i32
    %c0_i32_2 = arith.constant 0 : i32
    return %c0_i32, %c0_i32_0, %c0_i32_1 : i32, i32, i32
  }
  func.func @transform_5(%arg0: i32, %arg1: i32, %arg2: i32) -> (i32, i32) {
    %c0_i32 = arith.constant 0 : i32
    %c0_i32_0 = arith.constant 0 : i32
    %c0_i32_1 = arith.constant 0 : i32
    return %c0_i32, %c0_i32_0 : i32, i32
  }
  func.func @transform_6(%arg0: i32, %arg1: i32, %arg2: i32) -> (i32, i32) {
    %c0_i32 = arith.constant 0 : i32
    %c0_i32_0 = arith.constant 0 : i32
    %c0_i32_1 = arith.constant 0 : i32
    return %c0_i32, %c0_i32_0 : i32, i32
  }
  func.func @transform_7(%arg0: i32, %arg1: i32, %arg2: i32) -> (i32, i32) {
    %c0_i32 = arith.constant 0 : i32
    %c0_i32_0 = arith.constant 0 : i32
    %c0_i32_1 = arith.constant 0 : i32
    return %c0_i32, %c0_i32_0 : i32, i32
  }
  func.func @transform_8(%arg0: i32, %arg1: i32, %arg2: i32) -> (i32, i32, i32, i32, i32) {
    %c0_i32 = arith.constant 0 : i32
    %c0_i32_0 = arith.constant 0 : i32
    %c0_i32_1 = arith.constant 0 : i32
    return %arg0, %arg1, %arg2, %c0_i32, %c0_i32_0 : i32, i32, i32, i32, i32
  }
}

module attributes {stable_mosaic.version = 11 : i64} {
  func.func @_conv3x3_relu_kernel(%arg0: i32, %arg1: i32, %arg2: memref<1x11x16x16xbf16, #tpu.memory_space<vmem>>, %arg3: memref<3x48x8xbf16, #tpu.memory_space<vmem>>, %arg4: memref<1x8xf32, #tpu.memory_space<vmem>>, %arg5: memref<1x8x8x8xbf16, #tpu.memory_space<vmem>>) attributes {dimension_semantics = [#tpu.dimension_semantics<parallel>, #tpu.dimension_semantics<parallel>], iteration_bounds = array<i64: 2, 1>, scalar_prefetch = 0 : i64, scratch_operands = 0 : i64, tpu.core_type = #tpu.core_type<tc>, window_params = [{transform_indices = @transform_0, window_bounds = array<i64: 1, 11, 16, 16>}, {pipeline_mode = #tpu.pipeline_mode<synchronous>, transform_indices = @transform_1, window_bounds = array<i64: 3, 48, 8>}, {pipeline_mode = #tpu.pipeline_mode<synchronous>, transform_indices = @transform_2, window_bounds = array<i64: 1, 8>}, {transform_indices = @transform_3, window_bounds = array<i64: 1, 8, 8, 8>}]} {
    %c8_i32 = arith.constant 8 : i32
    %0 = arith.muli %arg1, %c8_i32 : i32
    %cst = arith.constant 0.000000e+00 : f32
    %1 = vector.broadcast %cst : f32 to vector<128x8xf32>
    %c0_i32 = arith.constant 0 : i32
    %2 = arith.addi %0, %c0_i32 : i32
    %c0 = arith.constant 0 : index
    %3 = arith.index_cast %2 : i32 to index
    %c0_0 = arith.constant 0 : index
    %c0_1 = arith.constant 0 : index
    %4 = vector.load %arg2[%c0, %3, %c0_0, %c0_1] : memref<1x11x16x16xbf16, #tpu.memory_space<vmem>>, vector<1x9x16x16xbf16>
    %5 = vector.shape_cast %4 : vector<1x9x16x16xbf16> to vector<9x16x16xbf16>
    %6 = vector.shape_cast %5 : vector<9x16x16xbf16> to vector<144x16xbf16>
    %7 = vector.extract_strided_slice %6 {offsets = [0, 0], sizes = [128, 16], strides = [1, 1]} : vector<144x16xbf16> to vector<128x16xbf16>
    %8 = vector.extract_strided_slice %6 {offsets = [1, 0], sizes = [128, 16], strides = [1, 1]} : vector<144x16xbf16> to vector<128x16xbf16>
    %9 = vector.extract_strided_slice %6 {offsets = [2, 0], sizes = [128, 16], strides = [1, 1]} : vector<144x16xbf16> to vector<128x16xbf16>
    %10 = tpu.concatenate %7, %8, %9 in 1 : vector<128x16xbf16>, vector<128x16xbf16>, vector<128x16xbf16> -> vector<128x48xbf16>
    %c0_2 = arith.constant 0 : index
    %c0_3 = arith.constant 0 : index
    %c0_4 = arith.constant 0 : index
    %11 = vector.load %arg3[%c0_2, %c0_3, %c0_4] : memref<3x48x8xbf16, #tpu.memory_space<vmem>>, vector<1x48x8xbf16>
    %12 = vector.shape_cast %11 : vector<1x48x8xbf16> to vector<48x8xbf16>
    %cst_5 = arith.constant dense<0.000000e+00> : vector<128x8xf32>
    %13 = tpu.matmul %10, %12, %cst_5 {dimension_numbers = #tpu.dot_dimension_numbers<[1], [0], [0], [1], [0, 0, 1, 1], [], []>} : vector<128x48xbf16>, vector<48x8xbf16>, vector<128x8xf32> -> vector<128x8xf32>
    %14 = arith.addf %1, %13 : vector<128x8xf32>
    %c1_i32 = arith.constant 1 : i32
    %15 = arith.addi %0, %c1_i32 : i32
    %c0_6 = arith.constant 0 : index
    %16 = arith.index_cast %15 : i32 to index
    %c0_7 = arith.constant 0 : index
    %c0_8 = arith.constant 0 : index
    %17 = vector.load %arg2[%c0_6, %16, %c0_7, %c0_8] : memref<1x11x16x16xbf16, #tpu.memory_space<vmem>>, vector<1x9x16x16xbf16>
    %18 = vector.shape_cast %17 : vector<1x9x16x16xbf16> to vector<9x16x16xbf16>
    %19 = vector.shape_cast %18 : vector<9x16x16xbf16> to vector<144x16xbf16>
    %20 = vector.extract_strided_slice %19 {offsets = [0, 0], sizes = [128, 16], strides = [1, 1]} : vector<144x16xbf16> to vector<128x16xbf16>
    %21 = vector.extract_strided_slice %19 {offsets = [1, 0], sizes = [128, 16], strides = [1, 1]} : vector<144x16xbf16> to vector<128x16xbf16>
    %22 = vector.extract_strided_slice %19 {offsets = [2, 0], sizes = [128, 16], strides = [1, 1]} : vector<144x16xbf16> to vector<128x16xbf16>
    %23 = tpu.concatenate %20, %21, %22 in 1 : vector<128x16xbf16>, vector<128x16xbf16>, vector<128x16xbf16> -> vector<128x48xbf16>
    %c1 = arith.constant 1 : index
    %c0_9 = arith.constant 0 : index
    %c0_10 = arith.constant 0 : index
    %24 = vector.load %arg3[%c1, %c0_9, %c0_10] : memref<3x48x8xbf16, #tpu.memory_space<vmem>>, vector<1x48x8xbf16>
    %25 = vector.shape_cast %24 : vector<1x48x8xbf16> to vector<48x8xbf16>
    %cst_11 = arith.constant dense<0.000000e+00> : vector<128x8xf32>
    %26 = tpu.matmul %23, %25, %cst_11 {dimension_numbers = #tpu.dot_dimension_numbers<[1], [0], [0], [1], [0, 0, 1, 1], [], []>} : vector<128x48xbf16>, vector<48x8xbf16>, vector<128x8xf32> -> vector<128x8xf32>
    %27 = arith.addf %14, %26 : vector<128x8xf32>
    %c2_i32 = arith.constant 2 : i32
    %28 = arith.addi %0, %c2_i32 : i32
    %c0_12 = arith.constant 0 : index
    %29 = arith.index_cast %28 : i32 to index
    %c0_13 = arith.constant 0 : index
    %c0_14 = arith.constant 0 : index
    %30 = vector.load %arg2[%c0_12, %29, %c0_13, %c0_14] : memref<1x11x16x16xbf16, #tpu.memory_space<vmem>>, vector<1x9x16x16xbf16>
    %31 = vector.shape_cast %30 : vector<1x9x16x16xbf16> to vector<9x16x16xbf16>
    %32 = vector.shape_cast %31 : vector<9x16x16xbf16> to vector<144x16xbf16>
    %33 = vector.extract_strided_slice %32 {offsets = [0, 0], sizes = [128, 16], strides = [1, 1]} : vector<144x16xbf16> to vector<128x16xbf16>
    %34 = vector.extract_strided_slice %32 {offsets = [1, 0], sizes = [128, 16], strides = [1, 1]} : vector<144x16xbf16> to vector<128x16xbf16>
    %35 = vector.extract_strided_slice %32 {offsets = [2, 0], sizes = [128, 16], strides = [1, 1]} : vector<144x16xbf16> to vector<128x16xbf16>
    %36 = tpu.concatenate %33, %34, %35 in 1 : vector<128x16xbf16>, vector<128x16xbf16>, vector<128x16xbf16> -> vector<128x48xbf16>
    %c2 = arith.constant 2 : index
    %c0_15 = arith.constant 0 : index
    %c0_16 = arith.constant 0 : index
    %37 = vector.load %arg3[%c2, %c0_15, %c0_16] : memref<3x48x8xbf16, #tpu.memory_space<vmem>>, vector<1x48x8xbf16>
    %38 = vector.shape_cast %37 : vector<1x48x8xbf16> to vector<48x8xbf16>
    %cst_17 = arith.constant dense<0.000000e+00> : vector<128x8xf32>
    %39 = tpu.matmul %36, %38, %cst_17 {dimension_numbers = #tpu.dot_dimension_numbers<[1], [0], [0], [1], [0, 0, 1, 1], [], []>} : vector<128x48xbf16>, vector<48x8xbf16>, vector<128x8xf32> -> vector<128x8xf32>
    %40 = arith.addf %27, %39 : vector<128x8xf32>
    %c0_18 = arith.constant 0 : index
    %c0_19 = arith.constant 0 : index
    %41 = vector.load %arg4[%c0_18, %c0_19] : memref<1x8xf32, #tpu.memory_space<vmem>>, vector<1x8xf32>
    %42 = vector.broadcast %41 : vector<1x8xf32> to vector<128x8xf32>
    %43 = arith.addf %40, %42 : vector<128x8xf32>
    %cst_20 = arith.constant 0.000000e+00 : f32
    %44 = vector.broadcast %cst_20 : f32 to vector<128x8xf32>
    %45 = arith.maximumf %43, %44 : vector<128x8xf32>
    %46 = vector.shape_cast %45 : vector<128x8xf32> to vector<8x16x8xf32>
    %47 = vector.extract_strided_slice %46 {offsets = [0, 0, 0], sizes = [8, 8, 8], strides = [1, 1, 1]} : vector<8x16x8xf32> to vector<8x8x8xf32>
    %48 = vector.shape_cast %47 : vector<8x8x8xf32> to vector<1x8x8x8xf32>
    %49 = arith.truncf %48 : vector<1x8x8x8xf32> to vector<1x8x8x8xbf16>
    %c0_21 = arith.constant 0 : index
    %c0_22 = arith.constant 0 : index
    %c0_23 = arith.constant 0 : index
    %c0_24 = arith.constant 0 : index
    %50 = vector.load %arg5[%c0_21, %c0_22, %c0_23, %c0_24] : memref<1x8x8x8xbf16, #tpu.memory_space<vmem>>, vector<1x8x8x8xbf16>
    tpu.vector_store %arg5[%c0_21, %c0_22, %c0_23, %c0_24], %49 {strides = array<i32>} : memref<1x8x8x8xbf16, #tpu.memory_space<vmem>>, vector<1x8x8x8xbf16>,
    return
  }
  func.func @transform_0(%arg0: i32, %arg1: i32) -> (i32, i32, i32, i32) {
    %c0_i32 = arith.constant 0 : i32
    %c0_i32_0 = arith.constant 0 : i32
    %c0_i32_1 = arith.constant 0 : i32
    %c0_i32_2 = arith.constant 0 : i32
    return %arg0, %c0_i32, %c0_i32_0, %c0_i32_1 : i32, i32, i32, i32
  }
  func.func @transform_1(%arg0: i32, %arg1: i32) -> (i32, i32, i32) {
    %c0_i32 = arith.constant 0 : i32
    %c0_i32_0 = arith.constant 0 : i32
    %c0_i32_1 = arith.constant 0 : i32
    %c0_i32_2 = arith.constant 0 : i32
    return %c0_i32, %c0_i32_0, %c0_i32_1 : i32, i32, i32
  }
  func.func @transform_2(%arg0: i32, %arg1: i32) -> (i32, i32) {
    %c0_i32 = arith.constant 0 : i32
    %c0_i32_0 = arith.constant 0 : i32
    %c0_i32_1 = arith.constant 0 : i32
    return %c0_i32, %c0_i32_0 : i32, i32
  }
  func.func @transform_3(%arg0: i32, %arg1: i32) -> (i32, i32, i32, i32) {
    %c0_i32 = arith.constant 0 : i32
    %c0_i32_0 = arith.constant 0 : i32
    %c0_i32_1 = arith.constant 0 : i32
    return %arg0, %arg1, %c0_i32, %c0_i32_0 : i32, i32, i32, i32
  }
}

module attributes {stable_mosaic.version = 11 : i64} {
  func.func @_conv3x3_relu_kernel(%arg0: i32, %arg1: i32, %arg2: memref<1x11x16x8xbf16, #tpu.memory_space<vmem>>, %arg3: memref<3x24x8xbf16, #tpu.memory_space<vmem>>, %arg4: memref<1x8xf32, #tpu.memory_space<vmem>>, %arg5: memref<1x8x8x8xbf16, #tpu.memory_space<vmem>>) attributes {dimension_semantics = [#tpu.dimension_semantics<parallel>, #tpu.dimension_semantics<parallel>], iteration_bounds = array<i64: 2, 1>, scalar_prefetch = 0 : i64, scratch_operands = 0 : i64, tpu.core_type = #tpu.core_type<tc>, window_params = [{transform_indices = @transform_0, window_bounds = array<i64: 1, 11, 16, 8>}, {pipeline_mode = #tpu.pipeline_mode<synchronous>, transform_indices = @transform_1, window_bounds = array<i64: 3, 24, 8>}, {pipeline_mode = #tpu.pipeline_mode<synchronous>, transform_indices = @transform_2, window_bounds = array<i64: 1, 8>}, {transform_indices = @transform_3, window_bounds = array<i64: 1, 8, 8, 8>}]} {
    %c8_i32 = arith.constant 8 : i32
    %0 = arith.muli %arg1, %c8_i32 : i32
    %cst = arith.constant 0.000000e+00 : f32
    %1 = vector.broadcast %cst : f32 to vector<128x8xf32>
    %c0_i32 = arith.constant 0 : i32
    %2 = arith.addi %0, %c0_i32 : i32
    %c0 = arith.constant 0 : index
    %3 = arith.index_cast %2 : i32 to index
    %c0_0 = arith.constant 0 : index
    %c0_1 = arith.constant 0 : index
    %4 = vector.load %arg2[%c0, %3, %c0_0, %c0_1] : memref<1x11x16x8xbf16, #tpu.memory_space<vmem>>, vector<1x9x16x8xbf16>
    %5 = vector.shape_cast %4 : vector<1x9x16x8xbf16> to vector<9x16x8xbf16>
    %6 = vector.shape_cast %5 : vector<9x16x8xbf16> to vector<144x8xbf16>
    %7 = vector.extract_strided_slice %6 {offsets = [0, 0], sizes = [128, 8], strides = [1, 1]} : vector<144x8xbf16> to vector<128x8xbf16>
    %8 = vector.extract_strided_slice %6 {offsets = [1, 0], sizes = [128, 8], strides = [1, 1]} : vector<144x8xbf16> to vector<128x8xbf16>
    %9 = vector.extract_strided_slice %6 {offsets = [2, 0], sizes = [128, 8], strides = [1, 1]} : vector<144x8xbf16> to vector<128x8xbf16>
    %10 = tpu.concatenate %7, %8, %9 in 1 : vector<128x8xbf16>, vector<128x8xbf16>, vector<128x8xbf16> -> vector<128x24xbf16>
    %c0_2 = arith.constant 0 : index
    %c0_3 = arith.constant 0 : index
    %c0_4 = arith.constant 0 : index
    %11 = vector.load %arg3[%c0_2, %c0_3, %c0_4] : memref<3x24x8xbf16, #tpu.memory_space<vmem>>, vector<1x24x8xbf16>
    %12 = vector.shape_cast %11 : vector<1x24x8xbf16> to vector<24x8xbf16>
    %cst_5 = arith.constant dense<0.000000e+00> : vector<128x8xf32>
    %13 = tpu.matmul %10, %12, %cst_5 {dimension_numbers = #tpu.dot_dimension_numbers<[1], [0], [0], [1], [0, 0, 1, 1], [], []>} : vector<128x24xbf16>, vector<24x8xbf16>, vector<128x8xf32> -> vector<128x8xf32>
    %14 = arith.addf %1, %13 : vector<128x8xf32>
    %c1_i32 = arith.constant 1 : i32
    %15 = arith.addi %0, %c1_i32 : i32
    %c0_6 = arith.constant 0 : index
    %16 = arith.index_cast %15 : i32 to index
    %c0_7 = arith.constant 0 : index
    %c0_8 = arith.constant 0 : index
    %17 = vector.load %arg2[%c0_6, %16, %c0_7, %c0_8] : memref<1x11x16x8xbf16, #tpu.memory_space<vmem>>, vector<1x9x16x8xbf16>
    %18 = vector.shape_cast %17 : vector<1x9x16x8xbf16> to vector<9x16x8xbf16>
    %19 = vector.shape_cast %18 : vector<9x16x8xbf16> to vector<144x8xbf16>
    %20 = vector.extract_strided_slice %19 {offsets = [0, 0], sizes = [128, 8], strides = [1, 1]} : vector<144x8xbf16> to vector<128x8xbf16>
    %21 = vector.extract_strided_slice %19 {offsets = [1, 0], sizes = [128, 8], strides = [1, 1]} : vector<144x8xbf16> to vector<128x8xbf16>
    %22 = vector.extract_strided_slice %19 {offsets = [2, 0], sizes = [128, 8], strides = [1, 1]} : vector<144x8xbf16> to vector<128x8xbf16>
    %23 = tpu.concatenate %20, %21, %22 in 1 : vector<128x8xbf16>, vector<128x8xbf16>, vector<128x8xbf16> -> vector<128x24xbf16>
    %c1 = arith.constant 1 : index
    %c0_9 = arith.constant 0 : index
    %c0_10 = arith.constant 0 : index
    %24 = vector.load %arg3[%c1, %c0_9, %c0_10] : memref<3x24x8xbf16, #tpu.memory_space<vmem>>, vector<1x24x8xbf16>
    %25 = vector.shape_cast %24 : vector<1x24x8xbf16> to vector<24x8xbf16>
    %cst_11 = arith.constant dense<0.000000e+00> : vector<128x8xf32>
    %26 = tpu.matmul %23, %25, %cst_11 {dimension_numbers = #tpu.dot_dimension_numbers<[1], [0], [0], [1], [0, 0, 1, 1], [], []>} : vector<128x24xbf16>, vector<24x8xbf16>, vector<128x8xf32> -> vector<128x8xf32>
    %27 = arith.addf %14, %26 : vector<128x8xf32>
    %c2_i32 = arith.constant 2 : i32
    %28 = arith.addi %0, %c2_i32 : i32
    %c0_12 = arith.constant 0 : index
    %29 = arith.index_cast %28 : i32 to index
    %c0_13 = arith.constant 0 : index
    %c0_14 = arith.constant 0 : index
    %30 = vector.load %arg2[%c0_12, %29, %c0_13, %c0_14] : memref<1x11x16x8xbf16, #tpu.memory_space<vmem>>, vector<1x9x16x8xbf16>
    %31 = vector.shape_cast %30 : vector<1x9x16x8xbf16> to vector<9x16x8xbf16>
    %32 = vector.shape_cast %31 : vector<9x16x8xbf16> to vector<144x8xbf16>
    %33 = vector.extract_strided_slice %32 {offsets = [0, 0], sizes = [128, 8], strides = [1, 1]} : vector<144x8xbf16> to vector<128x8xbf16>
    %34 = vector.extract_strided_slice %32 {offsets = [1, 0], sizes = [128, 8], strides = [1, 1]} : vector<144x8xbf16> to vector<128x8xbf16>
    %35 = vector.extract_strided_slice %32 {offsets = [2, 0], sizes = [128, 8], strides = [1, 1]} : vector<144x8xbf16> to vector<128x8xbf16>
    %36 = tpu.concatenate %33, %34, %35 in 1 : vector<128x8xbf16>, vector<128x8xbf16>, vector<128x8xbf16> -> vector<128x24xbf16>
    %c2 = arith.constant 2 : index
    %c0_15 = arith.constant 0 : index
    %c0_16 = arith.constant 0 : index
    %37 = vector.load %arg3[%c2, %c0_15, %c0_16] : memref<3x24x8xbf16, #tpu.memory_space<vmem>>, vector<1x24x8xbf16>
    %38 = vector.shape_cast %37 : vector<1x24x8xbf16> to vector<24x8xbf16>
    %cst_17 = arith.constant dense<0.000000e+00> : vector<128x8xf32>
    %39 = tpu.matmul %36, %38, %cst_17 {dimension_numbers = #tpu.dot_dimension_numbers<[1], [0], [0], [1], [0, 0, 1, 1], [], []>} : vector<128x24xbf16>, vector<24x8xbf16>, vector<128x8xf32> -> vector<128x8xf32>
    %40 = arith.addf %27, %39 : vector<128x8xf32>
    %c0_18 = arith.constant 0 : index
    %c0_19 = arith.constant 0 : index
    %41 = vector.load %arg4[%c0_18, %c0_19] : memref<1x8xf32, #tpu.memory_space<vmem>>, vector<1x8xf32>
    %42 = vector.broadcast %41 : vector<1x8xf32> to vector<128x8xf32>
    %43 = arith.addf %40, %42 : vector<128x8xf32>
    %cst_20 = arith.constant 0.000000e+00 : f32
    %44 = vector.broadcast %cst_20 : f32 to vector<128x8xf32>
    %45 = arith.maximumf %43, %44 : vector<128x8xf32>
    %46 = vector.shape_cast %45 : vector<128x8xf32> to vector<8x16x8xf32>
    %47 = vector.extract_strided_slice %46 {offsets = [0, 0, 0], sizes = [8, 8, 8], strides = [1, 1, 1]} : vector<8x16x8xf32> to vector<8x8x8xf32>
    %48 = vector.shape_cast %47 : vector<8x8x8xf32> to vector<1x8x8x8xf32>
    %49 = arith.truncf %48 : vector<1x8x8x8xf32> to vector<1x8x8x8xbf16>
    %c0_21 = arith.constant 0 : index
    %c0_22 = arith.constant 0 : index
    %c0_23 = arith.constant 0 : index
    %c0_24 = arith.constant 0 : index
    %50 = vector.load %arg5[%c0_21, %c0_22, %c0_23, %c0_24] : memref<1x8x8x8xbf16, #tpu.memory_space<vmem>>, vector<1x8x8x8xbf16>
    tpu.vector_store %arg5[%c0_21, %c0_22, %c0_23, %c0_24], %49 {strides = array<i32>} : memref<1x8x8x8xbf16, #tpu.memory_space<vmem>>, vector<1x8x8x8xbf16>,
    return
  }
  func.func @transform_0(%arg0: i32, %arg1: i32) -> (i32, i32, i32, i32) {
    %c0_i32 = arith.constant 0 : i32
    %c0_i32_0 = arith.constant 0 : i32
    %c0_i32_1 = arith.constant 0 : i32
    %c0_i32_2 = arith.constant 0 : i32
    return %arg0, %c0_i32, %c0_i32_0, %c0_i32_1 : i32, i32, i32, i32
  }
  func.func @transform_1(%arg0: i32, %arg1: i32) -> (i32, i32, i32) {
    %c0_i32 = arith.constant 0 : i32
    %c0_i32_0 = arith.constant 0 : i32
    %c0_i32_1 = arith.constant 0 : i32
    %c0_i32_2 = arith.constant 0 : i32
    return %c0_i32, %c0_i32_0, %c0_i32_1 : i32, i32, i32
  }
  func.func @transform_2(%arg0: i32, %arg1: i32) -> (i32, i32) {
    %c0_i32 = arith.constant 0 : i32
    %c0_i32_0 = arith.constant 0 : i32
    %c0_i32_1 = arith.constant 0 : i32
    return %c0_i32, %c0_i32_0 : i32, i32
  }
  func.func @transform_3(%arg0: i32, %arg1: i32) -> (i32, i32, i32, i32) {
    %c0_i32 = arith.constant 0 : i32
    %c0_i32_0 = arith.constant 0 : i32
    %c0_i32_1 = arith.constant 0 : i32
    return %arg0, %arg1, %c0_i32, %c0_i32_0 : i32, i32, i32, i32
  }
}

module attributes {stable_mosaic.version = 11 : i64} {
  func.func @_up_gate_cat_kernel(%arg0: i32, %arg1: i32, %arg2: i32, %arg3: memref<1x8x8x8xbf16, #tpu.memory_space<vmem>>, %arg4: memref<1x8x1x8x8xbf16, #tpu.memory_space<vmem>>, %arg5: memref<1x8x8xbf16, #tpu.memory_space<vmem>>, %arg6: memref<1x8xf32, #tpu.memory_space<vmem>>, %arg7: memref<2x8x8xbf16, #tpu.memory_space<vmem>>, %arg8: memref<1x8xf32, #tpu.memory_space<vmem>>, %arg9: memref<8x8xbf16, #tpu.memory_space<vmem>>, %arg10: memref<1x8xf32, #tpu.memory_space<vmem>>, %arg11: memref<1x8x1x8x16xbf16, #tpu.memory_space<vmem>>) attributes {dimension_semantics = [#tpu.dimension_semantics<parallel>, #tpu.dimension_semantics<parallel>, #tpu.dimension_semantics<parallel>], iteration_bounds = array<i64: 2, 1, 2>, scalar_prefetch = 0 : i64, scratch_operands = 0 : i64, tpu.core_type = #tpu.core_type<tc>, window_params = [{transform_indices = @transform_0, window_bounds = array<i64: 1, 8, 8, 8>}, {transform_indices = @transform_1, window_bounds = array<i64: 1, 8, 1, 8, 8>}, {transform_indices = @transform_2, window_bounds = array<i64: 1, 8, 8>}, {pipeline_mode = #tpu.pipeline_mode<synchronous>, transform_indices = @transform_3, window_bounds = array<i64: 1, 8>}, {pipeline_mode = #tpu.pipeline_mode<synchronous>, transform_indices = @transform_4, window_bounds = array<i64: 2, 8, 8>}, {pipeline_mode = #tpu.pipeline_mode<synchronous>, transform_indices = @transform_5, window_bounds = array<i64: 1, 8>}, {pipeline_mode = #tpu.pipeline_mode<synchronous>, transform_indices = @transform_6, window_bounds = array<i64: 8, 8>}, {pipeline_mode = #tpu.pipeline_mode<synchronous>, transform_indices = @transform_7, window_bounds = array<i64: 1, 8>}, {transform_indices = @transform_8, window_bounds = array<i64: 1, 8, 1, 8, 16>}]} {
    %c0 = arith.constant 0 : index
    %c0_0 = arith.constant 0 : index
    %c0_1 = arith.constant 0 : index
    %c0_2 = arith.constant 0 : index
    %0 = vector.load %arg3[%c0, %c0_0, %c0_1, %c0_2] : memref<1x8x8x8xbf16, #tpu.memory_space<vmem>>, vector<1x8x8x8xbf16>
    %1 = vector.shape_cast %0 : vector<1x8x8x8xbf16> to vector<64x8xbf16>
    %c0_3 = arith.constant 0 : index
    %c0_4 = arith.constant 0 : index
    %c0_5 = arith.constant 0 : index
    %c0_6 = arith.constant 0 : index
    %c0_7 = arith.constant 0 : index
    %2 = vector.load %arg4[%c0_3, %c0_4, %c0_5, %c0_6, %c0_7] : memref<1x8x1x8x8xbf16, #tpu.memory_space<vmem>>, vector<1x8x1x8x8xbf16>
    %3 = vector.shape_cast %2 : vector<1x8x1x8x8xbf16> to vector<64x8xbf16>
    %c0_8 = arith.constant 0 : index
    %c0_9 = arith.constant 0 : index
    %c0_10 = arith.constant 0 : index
    %4 = vector.load %arg5[%c0_8, %c0_9, %c0_10] : memref<1x8x8xbf16, #tpu.memory_space<vmem>>, vector<1x8x8xbf16>
    %5 = vector.shape_cast %4 : vector<1x8x8xbf16> to vector<8x8xbf16>
    %cst = arith.constant dense<0.000000e+00> : vector<64x8xf32>
    %6 = tpu.matmul %1, %5, %cst {dimension_numbers = #tpu.dot_dimension_numbers<[1], [0], [0], [1], [0, 0, 1, 1], [], []>} : vector<64x8xbf16>, vector<8x8xbf16>, vector<64x8xf32> -> vector<64x8xf32>
    %c0_11 = arith.constant 0 : index
    %c0_12 = arith.constant 0 : index
    %7 = vector.load %arg6[%c0_11, %c0_12] : memref<1x8xf32, #tpu.memory_space<vmem>>, vector<1x8xf32>
    %8 = vector.broadcast %7 : vector<1x8xf32> to vector<64x8xf32>
    %9 = arith.addf %6, %8 : vector<64x8xf32>
    %10 = arith.truncf %9 : vector<64x8xf32> to vector<64x8xbf16>
    %c0_13 = arith.constant 0 : index
    %c0_14 = arith.constant 0 : index
    %c0_15 = arith.constant 0 : index
    %11 = vector.load %arg7[%c0_13, %c0_14, %c0_15] : memref<2x8x8xbf16, #tpu.memory_space<vmem>>, vector<1x8x8xbf16>
    %12 = vector.shape_cast %11 : vector<1x8x8xbf16> to vector<8x8xbf16>
    %cst_16 = arith.constant dense<0.000000e+00> : vector<64x8xf32>
    %13 = tpu.matmul %10, %12, %cst_16 {dimension_numbers = #tpu.dot_dimension_numbers<[1], [0], [0], [1], [0, 0, 1, 1], [], []>} : vector<64x8xbf16>, vector<8x8xbf16>, vector<64x8xf32> -> vector<64x8xf32>
    %c1 = arith.constant 1 : index
    %c0_17 = arith.constant 0 : index
    %c0_18 = arith.constant 0 : index
    %14 = vector.load %arg7[%c1, %c0_17, %c0_18] : memref<2x8x8xbf16, #tpu.memory_space<vmem>>, vector<1x8x8xbf16>
    %15 = vector.shape_cast %14 : vector<1x8x8xbf16> to vector<8x8xbf16>
    %cst_19 = arith.constant dense<0.000000e+00> : vector<64x8xf32>
    %16 = tpu.matmul %3, %15, %cst_19 {dimension_numbers = #tpu.dot_dimension_numbers<[1], [0], [0], [1], [0, 0, 1, 1], [], []>} : vector<64x8xbf16>, vector<8x8xbf16>, vector<64x8xf32> -> vector<64x8xf32>
    %17 = arith.addf %13, %16 : vector<64x8xf32>
    %c0_20 = arith.constant 0 : index
    %c0_21 = arith.constant 0 : index
    %18 = vector.load %arg8[%c0_20, %c0_21] : memref<1x8xf32, #tpu.memory_space<vmem>>, vector<1x8xf32>
    %19 = vector.broadcast %18 : vector<1x8xf32> to vector<64x8xf32>
    %20 = arith.addf %17, %19 : vector<64x8xf32>
    %cst_22 = arith.constant 0.000000e+00 : f32
    %21 = vector.broadcast %cst_22 : f32 to vector<64x8xf32>
    %22 = arith.maximumf %20, %21 : vector<64x8xf32>
    %23 = arith.truncf %22 : vector<64x8xf32> to vector<64x8xbf16>
    %c0_23 = arith.constant 0 : index
    %c0_24 = arith.constant 0 : index
    %24 = vector.load %arg9[%c0_23, %c0_24] : memref<8x8xbf16, #tpu.memory_space<vmem>>, vector<8x8xbf16>
    %cst_25 = arith.constant dense<0.000000e+00> : vector<64x8xf32>
    %25 = tpu.matmul %23, %24, %cst_25 {dimension_numbers = #tpu.dot_dimension_numbers<[1], [0], [0], [1], [0, 0, 1, 1], [], []>} : vector<64x8xbf16>, vector<8x8xbf16>, vector<64x8xf32> -> vector<64x8xf32>
    %c0_26 = arith.constant 0 : index
    %c0_27 = arith.constant 0 : index
    %26 = vector.load %arg10[%c0_26, %c0_27] : memref<1x8xf32, #tpu.memory_space<vmem>>, vector<1x8xf32>
    %27 = vector.broadcast %26 : vector<1x8xf32> to vector<64x8xf32>
    %28 = arith.addf %25, %27 : vector<64x8xf32>
    %29 = arith.negf %28 : vector<64x8xf32>
    %30 = math.exp %29 : vector<64x8xf32>
    %cst_28 = arith.constant 1.000000e+00 : f32
    %31 = vector.broadcast %cst_28 : f32 to vector<64x8xf32>
    %32 = arith.addf %31, %30 : vector<64x8xf32>
    %33 = arith.divf %31, %32 : vector<64x8xf32>
    %34 = arith.extf %3 : vector<64x8xbf16> to vector<64x8xf32>
    %35 = arith.mulf %34, %33 : vector<64x8xf32>
    %36 = vector.extract_strided_slice %9 {offsets = [0, 0], sizes = [64, 4], strides = [1, 1]} : vector<64x8xf32> to vector<64x4xf32>
    %37 = vector.shape_cast %36 : vector<64x4xf32> to vector<1x8x1x8x4xf32>
    %38 = arith.truncf %37 : vector<1x8x1x8x4xf32> to vector<1x8x1x8x4xbf16>
    %c0_29 = arith.constant 0 : index
    %c0_30 = arith.constant 0 : index
    %c0_31 = arith.constant 0 : index
    %c0_32 = arith.constant 0 : index
    %c0_33 = arith.constant 0 : index
    %39 = vector.load %arg11[%c0_29, %c0_30, %c0_31, %c0_32, %c0_33] : memref<1x8x1x8x16xbf16, #tpu.memory_space<vmem>>, vector<1x8x1x8x4xbf16>
    tpu.vector_store %arg11[%c0_29, %c0_30, %c0_31, %c0_32, %c0_33], %38 {strides = array<i32>} : memref<1x8x1x8x16xbf16, #tpu.memory_space<vmem>>, vector<1x8x1x8x4xbf16>,
    %40 = vector.extract_strided_slice %35 {offsets = [0, 0], sizes = [64, 4], strides = [1, 1]} : vector<64x8xf32> to vector<64x4xf32>
    %41 = vector.shape_cast %40 : vector<64x4xf32> to vector<1x8x1x8x4xf32>
    %42 = arith.truncf %41 : vector<1x8x1x8x4xf32> to vector<1x8x1x8x4xbf16>
    %c0_34 = arith.constant 0 : index
    %c0_35 = arith.constant 0 : index
    %c0_36 = arith.constant 0 : index
    %c0_37 = arith.constant 0 : index
    %c4 = arith.constant 4 : index
    %43 = vector.load %arg11[%c0_34, %c0_35, %c0_36, %c0_37, %c4] : memref<1x8x1x8x16xbf16, #tpu.memory_space<vmem>>, vector<1x8x1x8x4xbf16>
    tpu.vector_store %arg11[%c0_34, %c0_35, %c0_36, %c0_37, %c4], %42 {strides = array<i32>} : memref<1x8x1x8x16xbf16, #tpu.memory_space<vmem>>, vector<1x8x1x8x4xbf16>,
    %44 = vector.extract_strided_slice %9 {offsets = [0, 4], sizes = [64, 4], strides = [1, 1]} : vector<64x8xf32> to vector<64x4xf32>
    %45 = vector.shape_cast %44 : vector<64x4xf32> to vector<1x8x1x8x4xf32>
    %46 = arith.truncf %45 : vector<1x8x1x8x4xf32> to vector<1x8x1x8x4xbf16>
    %c0_38 = arith.constant 0 : index
    %c0_39 = arith.constant 0 : index
    %c0_40 = arith.constant 0 : index
    %c0_41 = arith.constant 0 : index
    %c8 = arith.constant 8 : index
    %47 = vector.load %arg11[%c0_38, %c0_39, %c0_40, %c0_41, %c8] : memref<1x8x1x8x16xbf16, #tpu.memory_space<vmem>>, vector<1x8x1x8x4xbf16>
    tpu.vector_store %arg11[%c0_38, %c0_39, %c0_40, %c0_41, %c8], %46 {strides = array<i32>} : memref<1x8x1x8x16xbf16, #tpu.memory_space<vmem>>, vector<1x8x1x8x4xbf16>,
    %48 = vector.extract_strided_slice %35 {offsets = [0, 4], sizes = [64, 4], strides = [1, 1]} : vector<64x8xf32> to vector<64x4xf32>
    %49 = vector.shape_cast %48 : vector<64x4xf32> to vector<1x8x1x8x4xf32>
    %50 = arith.truncf %49 : vector<1x8x1x8x4xf32> to vector<1x8x1x8x4xbf16>
    %c0_42 = arith.constant 0 : index
    %c0_43 = arith.constant 0 : index
    %c0_44 = arith.constant 0 : index
    %c0_45 = arith.constant 0 : index
    %c12 = arith.constant 12 : index
    %51 = vector.load %arg11[%c0_42, %c0_43, %c0_44, %c0_45, %c12] : memref<1x8x1x8x16xbf16, #tpu.memory_space<vmem>>, vector<1x8x1x8x4xbf16>
    tpu.vector_store %arg11[%c0_42, %c0_43, %c0_44, %c0_45, %c12], %50 {strides = array<i32>} : memref<1x8x1x8x16xbf16, #tpu.memory_space<vmem>>, vector<1x8x1x8x4xbf16>,
    return
  }
  func.func @transform_0(%arg0: i32, %arg1: i32, %arg2: i32) -> (i32, i32, i32, i32) {
    %c0_i32 = arith.constant 0 : i32
    %c0_i32_0 = arith.constant 0 : i32
    %c0_i32_1 = arith.constant 0 : i32
    return %arg0, %arg1, %c0_i32, %c0_i32_0 : i32, i32, i32, i32
  }
  func.func @transform_1(%arg0: i32, %arg1: i32, %arg2: i32) -> (i32, i32, i32, i32, i32) {
    %c0_i32 = arith.constant 0 : i32
    %c0_i32_0 = arith.constant 0 : i32
    %c0_i32_1 = arith.constant 0 : i32
    return %arg0, %arg1, %arg2, %c0_i32, %c0_i32_0 : i32, i32, i32, i32, i32
  }
  func.func @transform_2(%arg0: i32, %arg1: i32, %arg2: i32) -> (i32, i32, i32) {
    %c0_i32 = arith.constant 0 : i32
    %c0_i32_0 = arith.constant 0 : i32
    %c0_i32_1 = arith.constant 0 : i32
    return %arg2, %c0_i32, %c0_i32_0 : i32, i32, i32
  }
  func.func @transform_3(%arg0: i32, %arg1: i32, %arg2: i32) -> (i32, i32) {
    %c0_i32 = arith.constant 0 : i32
    %c0_i32_0 = arith.constant 0 : i32
    %c0_i32_1 = arith.constant 0 : i32
    return %c0_i32, %c0_i32_0 : i32, i32
  }
  func.func @transform_4(%arg0: i32, %arg1: i32, %arg2: i32) -> (i32, i32, i32) {
    %c0_i32 = arith.constant 0 : i32
    %c0_i32_0 = arith.constant 0 : i32
    %c0_i32_1 = arith.constant 0 : i32
    %c0_i32_2 = arith.constant 0 : i32
    return %c0_i32, %c0_i32_0, %c0_i32_1 : i32, i32, i32
  }
  func.func @transform_5(%arg0: i32, %arg1: i32, %arg2: i32) -> (i32, i32) {
    %c0_i32 = arith.constant 0 : i32
    %c0_i32_0 = arith.constant 0 : i32
    %c0_i32_1 = arith.constant 0 : i32
    return %c0_i32, %c0_i32_0 : i32, i32
  }
  func.func @transform_6(%arg0: i32, %arg1: i32, %arg2: i32) -> (i32, i32) {
    %c0_i32 = arith.constant 0 : i32
    %c0_i32_0 = arith.constant 0 : i32
    %c0_i32_1 = arith.constant 0 : i32
    return %c0_i32, %c0_i32_0 : i32, i32
  }
  func.func @transform_7(%arg0: i32, %arg1: i32, %arg2: i32) -> (i32, i32) {
    %c0_i32 = arith.constant 0 : i32
    %c0_i32_0 = arith.constant 0 : i32
    %c0_i32_1 = arith.constant 0 : i32
    return %c0_i32, %c0_i32_0 : i32, i32
  }
  func.func @transform_8(%arg0: i32, %arg1: i32, %arg2: i32) -> (i32, i32, i32, i32, i32) {
    %c0_i32 = arith.constant 0 : i32
    %c0_i32_0 = arith.constant 0 : i32
    %c0_i32_1 = arith.constant 0 : i32
    return %arg0, %arg1, %arg2, %c0_i32, %c0_i32_0 : i32, i32, i32, i32, i32
  }
}

module attributes {stable_mosaic.version = 11 : i64} {
  func.func @_conv3x3_relu_kernel(%arg0: i32, %arg1: i32, %arg2: memref<1x19x24x8xbf16, #tpu.memory_space<vmem>>, %arg3: memref<3x24x4xbf16, #tpu.memory_space<vmem>>, %arg4: memref<1x4xf32, #tpu.memory_space<vmem>>, %arg5: memref<1x16x16x4xbf16, #tpu.memory_space<vmem>>) attributes {dimension_semantics = [#tpu.dimension_semantics<parallel>, #tpu.dimension_semantics<parallel>], iteration_bounds = array<i64: 2, 1>, scalar_prefetch = 0 : i64, scratch_operands = 0 : i64, tpu.core_type = #tpu.core_type<tc>, window_params = [{transform_indices = @transform_0, window_bounds = array<i64: 1, 19, 24, 8>}, {pipeline_mode = #tpu.pipeline_mode<synchronous>, transform_indices = @transform_1, window_bounds = array<i64: 3, 24, 4>}, {pipeline_mode = #tpu.pipeline_mode<synchronous>, transform_indices = @transform_2, window_bounds = array<i64: 1, 4>}, {transform_indices = @transform_3, window_bounds = array<i64: 1, 16, 16, 4>}]} {
    %c16_i32 = arith.constant 16 : i32
    %0 = arith.muli %arg1, %c16_i32 : i32
    %cst = arith.constant 0.000000e+00 : f32
    %1 = vector.broadcast %cst : f32 to vector<384x4xf32>
    %c0_i32 = arith.constant 0 : i32
    %2 = arith.addi %0, %c0_i32 : i32
    %c0 = arith.constant 0 : index
    %3 = arith.index_cast %2 : i32 to index
    %c0_0 = arith.constant 0 : index
    %c0_1 = arith.constant 0 : index
    %4 = vector.load %arg2[%c0, %3, %c0_0, %c0_1] : memref<1x19x24x8xbf16, #tpu.memory_space<vmem>>, vector<1x17x24x8xbf16>
    %5 = vector.shape_cast %4 : vector<1x17x24x8xbf16> to vector<17x24x8xbf16>
    %6 = vector.shape_cast %5 : vector<17x24x8xbf16> to vector<408x8xbf16>
    %7 = vector.extract_strided_slice %6 {offsets = [0, 0], sizes = [384, 8], strides = [1, 1]} : vector<408x8xbf16> to vector<384x8xbf16>
    %8 = vector.extract_strided_slice %6 {offsets = [1, 0], sizes = [384, 8], strides = [1, 1]} : vector<408x8xbf16> to vector<384x8xbf16>
    %9 = vector.extract_strided_slice %6 {offsets = [2, 0], sizes = [384, 8], strides = [1, 1]} : vector<408x8xbf16> to vector<384x8xbf16>
    %10 = tpu.concatenate %7, %8, %9 in 1 : vector<384x8xbf16>, vector<384x8xbf16>, vector<384x8xbf16> -> vector<384x24xbf16>
    %c0_2 = arith.constant 0 : index
    %c0_3 = arith.constant 0 : index
    %c0_4 = arith.constant 0 : index
    %11 = vector.load %arg3[%c0_2, %c0_3, %c0_4] : memref<3x24x4xbf16, #tpu.memory_space<vmem>>, vector<1x24x4xbf16>
    %12 = vector.shape_cast %11 : vector<1x24x4xbf16> to vector<24x4xbf16>
    %cst_5 = arith.constant dense<0.000000e+00> : vector<384x4xf32>
    %13 = tpu.matmul %10, %12, %cst_5 {dimension_numbers = #tpu.dot_dimension_numbers<[1], [0], [0], [1], [0, 0, 1, 1], [], []>} : vector<384x24xbf16>, vector<24x4xbf16>, vector<384x4xf32> -> vector<384x4xf32>
    %14 = arith.addf %1, %13 : vector<384x4xf32>
    %c1_i32 = arith.constant 1 : i32
    %15 = arith.addi %0, %c1_i32 : i32
    %c0_6 = arith.constant 0 : index
    %16 = arith.index_cast %15 : i32 to index
    %c0_7 = arith.constant 0 : index
    %c0_8 = arith.constant 0 : index
    %17 = vector.load %arg2[%c0_6, %16, %c0_7, %c0_8] : memref<1x19x24x8xbf16, #tpu.memory_space<vmem>>, vector<1x17x24x8xbf16>
    %18 = vector.shape_cast %17 : vector<1x17x24x8xbf16> to vector<17x24x8xbf16>
    %19 = vector.shape_cast %18 : vector<17x24x8xbf16> to vector<408x8xbf16>
    %20 = vector.extract_strided_slice %19 {offsets = [0, 0], sizes = [384, 8], strides = [1, 1]} : vector<408x8xbf16> to vector<384x8xbf16>
    %21 = vector.extract_strided_slice %19 {offsets = [1, 0], sizes = [384, 8], strides = [1, 1]} : vector<408x8xbf16> to vector<384x8xbf16>
    %22 = vector.extract_strided_slice %19 {offsets = [2, 0], sizes = [384, 8], strides = [1, 1]} : vector<408x8xbf16> to vector<384x8xbf16>
    %23 = tpu.concatenate %20, %21, %22 in 1 : vector<384x8xbf16>, vector<384x8xbf16>, vector<384x8xbf16> -> vector<384x24xbf16>
    %c1 = arith.constant 1 : index
    %c0_9 = arith.constant 0 : index
    %c0_10 = arith.constant 0 : index
    %24 = vector.load %arg3[%c1, %c0_9, %c0_10] : memref<3x24x4xbf16, #tpu.memory_space<vmem>>, vector<1x24x4xbf16>
    %25 = vector.shape_cast %24 : vector<1x24x4xbf16> to vector<24x4xbf16>
    %cst_11 = arith.constant dense<0.000000e+00> : vector<384x4xf32>
    %26 = tpu.matmul %23, %25, %cst_11 {dimension_numbers = #tpu.dot_dimension_numbers<[1], [0], [0], [1], [0, 0, 1, 1], [], []>} : vector<384x24xbf16>, vector<24x4xbf16>, vector<384x4xf32> -> vector<384x4xf32>
    %27 = arith.addf %14, %26 : vector<384x4xf32>
    %c2_i32 = arith.constant 2 : i32
    %28 = arith.addi %0, %c2_i32 : i32
    %c0_12 = arith.constant 0 : index
    %29 = arith.index_cast %28 : i32 to index
    %c0_13 = arith.constant 0 : index
    %c0_14 = arith.constant 0 : index
    %30 = vector.load %arg2[%c0_12, %29, %c0_13, %c0_14] : memref<1x19x24x8xbf16, #tpu.memory_space<vmem>>, vector<1x17x24x8xbf16>
    %31 = vector.shape_cast %30 : vector<1x17x24x8xbf16> to vector<17x24x8xbf16>
    %32 = vector.shape_cast %31 : vector<17x24x8xbf16> to vector<408x8xbf16>
    %33 = vector.extract_strided_slice %32 {offsets = [0, 0], sizes = [384, 8], strides = [1, 1]} : vector<408x8xbf16> to vector<384x8xbf16>
    %34 = vector.extract_strided_slice %32 {offsets = [1, 0], sizes = [384, 8], strides = [1, 1]} : vector<408x8xbf16> to vector<384x8xbf16>
    %35 = vector.extract_strided_slice %32 {offsets = [2, 0], sizes = [384, 8], strides = [1, 1]} : vector<408x8xbf16> to vector<384x8xbf16>
    %36 = tpu.concatenate %33, %34, %35 in 1 : vector<384x8xbf16>, vector<384x8xbf16>, vector<384x8xbf16> -> vector<384x24xbf16>
    %c2 = arith.constant 2 : index
    %c0_15 = arith.constant 0 : index
    %c0_16 = arith.constant 0 : index
    %37 = vector.load %arg3[%c2, %c0_15, %c0_16] : memref<3x24x4xbf16, #tpu.memory_space<vmem>>, vector<1x24x4xbf16>
    %38 = vector.shape_cast %37 : vector<1x24x4xbf16> to vector<24x4xbf16>
    %cst_17 = arith.constant dense<0.000000e+00> : vector<384x4xf32>
    %39 = tpu.matmul %36, %38, %cst_17 {dimension_numbers = #tpu.dot_dimension_numbers<[1], [0], [0], [1], [0, 0, 1, 1], [], []>} : vector<384x24xbf16>, vector<24x4xbf16>, vector<384x4xf32> -> vector<384x4xf32>
    %40 = arith.addf %27, %39 : vector<384x4xf32>
    %c0_18 = arith.constant 0 : index
    %c0_19 = arith.constant 0 : index
    %41 = vector.load %arg4[%c0_18, %c0_19] : memref<1x4xf32, #tpu.memory_space<vmem>>, vector<1x4xf32>
    %42 = vector.broadcast %41 : vector<1x4xf32> to vector<384x4xf32>
    %43 = arith.addf %40, %42 : vector<384x4xf32>
    %cst_20 = arith.constant 0.000000e+00 : f32
    %44 = vector.broadcast %cst_20 : f32 to vector<384x4xf32>
    %45 = arith.maximumf %43, %44 : vector<384x4xf32>
    %46 = vector.shape_cast %45 : vector<384x4xf32> to vector<16x24x4xf32>
    %47 = vector.extract_strided_slice %46 {offsets = [0, 0, 0], sizes = [16, 16, 4], strides = [1, 1, 1]} : vector<16x24x4xf32> to vector<16x16x4xf32>
    %48 = vector.shape_cast %47 : vector<16x16x4xf32> to vector<1x16x16x4xf32>
    %49 = arith.truncf %48 : vector<1x16x16x4xf32> to vector<1x16x16x4xbf16>
    %c0_21 = arith.constant 0 : index
    %c0_22 = arith.constant 0 : index
    %c0_23 = arith.constant 0 : index
    %c0_24 = arith.constant 0 : index
    %50 = vector.load %arg5[%c0_21, %c0_22, %c0_23, %c0_24] : memref<1x16x16x4xbf16, #tpu.memory_space<vmem>>, vector<1x16x16x4xbf16>
    tpu.vector_store %arg5[%c0_21, %c0_22, %c0_23, %c0_24], %49 {strides = array<i32>} : memref<1x16x16x4xbf16, #tpu.memory_space<vmem>>, vector<1x16x16x4xbf16>,
    return
  }
  func.func @transform_0(%arg0: i32, %arg1: i32) -> (i32, i32, i32, i32) {
    %c0_i32 = arith.constant 0 : i32
    %c0_i32_0 = arith.constant 0 : i32
    %c0_i32_1 = arith.constant 0 : i32
    %c0_i32_2 = arith.constant 0 : i32
    return %arg0, %c0_i32, %c0_i32_0, %c0_i32_1 : i32, i32, i32, i32
  }
  func.func @transform_1(%arg0: i32, %arg1: i32) -> (i32, i32, i32) {
    %c0_i32 = arith.constant 0 : i32
    %c0_i32_0 = arith.constant 0 : i32
    %c0_i32_1 = arith.constant 0 : i32
    %c0_i32_2 = arith.constant 0 : i32
    return %c0_i32, %c0_i32_0, %c0_i32_1 : i32, i32, i32
  }
  func.func @transform_2(%arg0: i32, %arg1: i32) -> (i32, i32) {
    %c0_i32 = arith.constant 0 : i32
    %c0_i32_0 = arith.constant 0 : i32
    %c0_i32_1 = arith.constant 0 : i32
    return %c0_i32, %c0_i32_0 : i32, i32
  }
  func.func @transform_3(%arg0: i32, %arg1: i32) -> (i32, i32, i32, i32) {
    %c0_i32 = arith.constant 0 : i32
    %c0_i32_0 = arith.constant 0 : i32
    %c0_i32_1 = arith.constant 0 : i32
    return %arg0, %arg1, %c0_i32, %c0_i32_0 : i32, i32, i32, i32
  }
}

module attributes {stable_mosaic.version = 11 : i64} {
  func.func @_conv3x3_relu_kernel(%arg0: i32, %arg1: i32, %arg2: memref<1x19x24x4xbf16, #tpu.memory_space<vmem>>, %arg3: memref<3x12x4xbf16, #tpu.memory_space<vmem>>, %arg4: memref<1x4xf32, #tpu.memory_space<vmem>>, %arg5: memref<1x16x16x4xf32, #tpu.memory_space<vmem>>) attributes {dimension_semantics = [#tpu.dimension_semantics<parallel>, #tpu.dimension_semantics<parallel>], iteration_bounds = array<i64: 2, 1>, scalar_prefetch = 0 : i64, scratch_operands = 0 : i64, tpu.core_type = #tpu.core_type<tc>, window_params = [{transform_indices = @transform_0, window_bounds = array<i64: 1, 19, 24, 4>}, {pipeline_mode = #tpu.pipeline_mode<synchronous>, transform_indices = @transform_1, window_bounds = array<i64: 3, 12, 4>}, {pipeline_mode = #tpu.pipeline_mode<synchronous>, transform_indices = @transform_2, window_bounds = array<i64: 1, 4>}, {transform_indices = @transform_3, window_bounds = array<i64: 1, 16, 16, 4>}]} {
    %c16_i32 = arith.constant 16 : i32
    %0 = arith.muli %arg1, %c16_i32 : i32
    %cst = arith.constant 0.000000e+00 : f32
    %1 = vector.broadcast %cst : f32 to vector<384x4xf32>
    %c0_i32 = arith.constant 0 : i32
    %2 = arith.addi %0, %c0_i32 : i32
    %c0 = arith.constant 0 : index
    %3 = arith.index_cast %2 : i32 to index
    %c0_0 = arith.constant 0 : index
    %c0_1 = arith.constant 0 : index
    %4 = vector.load %arg2[%c0, %3, %c0_0, %c0_1] : memref<1x19x24x4xbf16, #tpu.memory_space<vmem>>, vector<1x17x24x4xbf16>
    %5 = vector.shape_cast %4 : vector<1x17x24x4xbf16> to vector<17x24x4xbf16>
    %6 = vector.shape_cast %5 : vector<17x24x4xbf16> to vector<408x4xbf16>
    %7 = vector.extract_strided_slice %6 {offsets = [0, 0], sizes = [384, 4], strides = [1, 1]} : vector<408x4xbf16> to vector<384x4xbf16>
    %8 = vector.extract_strided_slice %6 {offsets = [1, 0], sizes = [384, 4], strides = [1, 1]} : vector<408x4xbf16> to vector<384x4xbf16>
    %9 = vector.extract_strided_slice %6 {offsets = [2, 0], sizes = [384, 4], strides = [1, 1]} : vector<408x4xbf16> to vector<384x4xbf16>
    %10 = tpu.concatenate %7, %8, %9 in 1 : vector<384x4xbf16>, vector<384x4xbf16>, vector<384x4xbf16> -> vector<384x12xbf16>
    %c0_2 = arith.constant 0 : index
    %c0_3 = arith.constant 0 : index
    %c0_4 = arith.constant 0 : index
    %11 = vector.load %arg3[%c0_2, %c0_3, %c0_4] : memref<3x12x4xbf16, #tpu.memory_space<vmem>>, vector<1x12x4xbf16>
    %12 = vector.shape_cast %11 : vector<1x12x4xbf16> to vector<12x4xbf16>
    %cst_5 = arith.constant dense<0.000000e+00> : vector<384x4xf32>
    %13 = tpu.matmul %10, %12, %cst_5 {dimension_numbers = #tpu.dot_dimension_numbers<[1], [0], [0], [1], [0, 0, 1, 1], [], []>} : vector<384x12xbf16>, vector<12x4xbf16>, vector<384x4xf32> -> vector<384x4xf32>
    %14 = arith.addf %1, %13 : vector<384x4xf32>
    %c1_i32 = arith.constant 1 : i32
    %15 = arith.addi %0, %c1_i32 : i32
    %c0_6 = arith.constant 0 : index
    %16 = arith.index_cast %15 : i32 to index
    %c0_7 = arith.constant 0 : index
    %c0_8 = arith.constant 0 : index
    %17 = vector.load %arg2[%c0_6, %16, %c0_7, %c0_8] : memref<1x19x24x4xbf16, #tpu.memory_space<vmem>>, vector<1x17x24x4xbf16>
    %18 = vector.shape_cast %17 : vector<1x17x24x4xbf16> to vector<17x24x4xbf16>
    %19 = vector.shape_cast %18 : vector<17x24x4xbf16> to vector<408x4xbf16>
    %20 = vector.extract_strided_slice %19 {offsets = [0, 0], sizes = [384, 4], strides = [1, 1]} : vector<408x4xbf16> to vector<384x4xbf16>
    %21 = vector.extract_strided_slice %19 {offsets = [1, 0], sizes = [384, 4], strides = [1, 1]} : vector<408x4xbf16> to vector<384x4xbf16>
    %22 = vector.extract_strided_slice %19 {offsets = [2, 0], sizes = [384, 4], strides = [1, 1]} : vector<408x4xbf16> to vector<384x4xbf16>
    %23 = tpu.concatenate %20, %21, %22 in 1 : vector<384x4xbf16>, vector<384x4xbf16>, vector<384x4xbf16> -> vector<384x12xbf16>
    %c1 = arith.constant 1 : index
    %c0_9 = arith.constant 0 : index
    %c0_10 = arith.constant 0 : index
    %24 = vector.load %arg3[%c1, %c0_9, %c0_10] : memref<3x12x4xbf16, #tpu.memory_space<vmem>>, vector<1x12x4xbf16>
    %25 = vector.shape_cast %24 : vector<1x12x4xbf16> to vector<12x4xbf16>
    %cst_11 = arith.constant dense<0.000000e+00> : vector<384x4xf32>
    %26 = tpu.matmul %23, %25, %cst_11 {dimension_numbers = #tpu.dot_dimension_numbers<[1], [0], [0], [1], [0, 0, 1, 1], [], []>} : vector<384x12xbf16>, vector<12x4xbf16>, vector<384x4xf32> -> vector<384x4xf32>
    %27 = arith.addf %14, %26 : vector<384x4xf32>
    %c2_i32 = arith.constant 2 : i32
    %28 = arith.addi %0, %c2_i32 : i32
    %c0_12 = arith.constant 0 : index
    %29 = arith.index_cast %28 : i32 to index
    %c0_13 = arith.constant 0 : index
    %c0_14 = arith.constant 0 : index
    %30 = vector.load %arg2[%c0_12, %29, %c0_13, %c0_14] : memref<1x19x24x4xbf16, #tpu.memory_space<vmem>>, vector<1x17x24x4xbf16>
    %31 = vector.shape_cast %30 : vector<1x17x24x4xbf16> to vector<17x24x4xbf16>
    %32 = vector.shape_cast %31 : vector<17x24x4xbf16> to vector<408x4xbf16>
    %33 = vector.extract_strided_slice %32 {offsets = [0, 0], sizes = [384, 4], strides = [1, 1]} : vector<408x4xbf16> to vector<384x4xbf16>
    %34 = vector.extract_strided_slice %32 {offsets = [1, 0], sizes = [384, 4], strides = [1, 1]} : vector<408x4xbf16> to vector<384x4xbf16>
    %35 = vector.extract_strided_slice %32 {offsets = [2, 0], sizes = [384, 4], strides = [1, 1]} : vector<408x4xbf16> to vector<384x4xbf16>
    %36 = tpu.concatenate %33, %34, %35 in 1 : vector<384x4xbf16>, vector<384x4xbf16>, vector<384x4xbf16> -> vector<384x12xbf16>
    %c2 = arith.constant 2 : index
    %c0_15 = arith.constant 0 : index
    %c0_16 = arith.constant 0 : index
    %37 = vector.load %arg3[%c2, %c0_15, %c0_16] : memref<3x12x4xbf16, #tpu.memory_space<vmem>>, vector<1x12x4xbf16>
    %38 = vector.shape_cast %37 : vector<1x12x4xbf16> to vector<12x4xbf16>
    %cst_17 = arith.constant dense<0.000000e+00> : vector<384x4xf32>
    %39 = tpu.matmul %36, %38, %cst_17 {dimension_numbers = #tpu.dot_dimension_numbers<[1], [0], [0], [1], [0, 0, 1, 1], [], []>} : vector<384x12xbf16>, vector<12x4xbf16>, vector<384x4xf32> -> vector<384x4xf32>
    %40 = arith.addf %27, %39 : vector<384x4xf32>
    %c0_18 = arith.constant 0 : index
    %c0_19 = arith.constant 0 : index
    %41 = vector.load %arg4[%c0_18, %c0_19] : memref<1x4xf32, #tpu.memory_space<vmem>>, vector<1x4xf32>
    %42 = vector.broadcast %41 : vector<1x4xf32> to vector<384x4xf32>
    %43 = arith.addf %40, %42 : vector<384x4xf32>
    %cst_20 = arith.constant 0.000000e+00 : f32
    %44 = vector.broadcast %cst_20 : f32 to vector<384x4xf32>
    %45 = arith.maximumf %43, %44 : vector<384x4xf32>
    %46 = vector.shape_cast %45 : vector<384x4xf32> to vector<16x24x4xf32>
    %47 = vector.extract_strided_slice %46 {offsets = [0, 0, 0], sizes = [16, 16, 4], strides = [1, 1, 1]} : vector<16x24x4xf32> to vector<16x16x4xf32>
    %48 = vector.shape_cast %47 : vector<16x16x4xf32> to vector<1x16x16x4xf32>
    %c0_21 = arith.constant 0 : index
    %c0_22 = arith.constant 0 : index
    %c0_23 = arith.constant 0 : index
    %c0_24 = arith.constant 0 : index
    %49 = vector.load %arg5[%c0_21, %c0_22, %c0_23, %c0_24] : memref<1x16x16x4xf32, #tpu.memory_space<vmem>>, vector<1x16x16x4xf32>
    tpu.vector_store %arg5[%c0_21, %c0_22, %c0_23, %c0_24], %48 {strides = array<i32>} : memref<1x16x16x4xf32, #tpu.memory_space<vmem>>, vector<1x16x16x4xf32>,
    return
  }
  func.func @transform_0(%arg0: i32, %arg1: i32) -> (i32, i32, i32, i32) {
    %c0_i32 = arith.constant 0 : i32
    %c0_i32_0 = arith.constant 0 : i32
    %c0_i32_1 = arith.constant 0 : i32
    %c0_i32_2 = arith.constant 0 : i32
    return %arg0, %c0_i32, %c0_i32_0, %c0_i32_1 : i32, i32, i32, i32
  }
  func.func @transform_1(%arg0: i32, %arg1: i32) -> (i32, i32, i32) {
    %c0_i32 = arith.constant 0 : i32
    %c0_i32_0 = arith.constant 0 : i32
    %c0_i32_1 = arith.constant 0 : i32
    %c0_i32_2 = arith.constant 0 : i32
    return %c0_i32, %c0_i32_0, %c0_i32_1 : i32, i32, i32
  }
  func.func @transform_2(%arg0: i32, %arg1: i32) -> (i32, i32) {
    %c0_i32 = arith.constant 0 : i32
    %c0_i32_0 = arith.constant 0 : i32
    %c0_i32_1 = arith.constant 0 : i32
    return %c0_i32, %c0_i32_0 : i32, i32
  }
  func.func @transform_3(%arg0: i32, %arg1: i32) -> (i32, i32, i32, i32) {
    %c0_i32 = arith.constant 0 : i32
    %c0_i32_0 = arith.constant 0 : i32
    %c0_i32_1 = arith.constant 0 : i32
    return %arg0, %arg1, %c0_i32, %c0_i32_0 : i32, i32, i32, i32
  }
}

</mosaic_0001>

<bundles_post_ra>
// kernel: tile.38
= control target key start
LH: loop header
LB: loop body
LE: loop exit
PB: predicated region body
PF: predicated region fallthrough
CT: control target
= control target key end

     0   :  { %s22_s0 = inlined_call_operand.vmem [shape: f32[8], index: 0, kind: input, shape index: {}]   ;;  %s23_s1 = inlined_call_operand.vmem [shape: f32[2,8], index: 1, kind: output, shape index: {}]  }
   0x1   :  { %v4_v0 = vld [vmem:[%s22_s0] ss:$0 sm:$0xff] }
   0x2   :  { %5 = vst [vmem:[%s23_s1] sm:$0x3] %v4_v0 }

// kernel: tile.39
= control target key start
LH: loop header
LB: loop body
LE: loop exit
PB: predicated region body
PF: predicated region fallthrough
CT: control target
= control target key end

     0   :  { %vm7_vm0 = vcmask 64512   ;;  %vm13_vm1 = vcmask 130112   ;;  %s39_s0 = inlined_call_operand.vmem [shape: f32[2,8], index: 0, kind: input, shape index: {}]   ;;  %s40_s1 = inlined_call_operand.vmem [shape: f32[1,16], index: 1, kind: output, shape index: {}]  }
   0x1   :  { %v4_v0 = vld [vmem:[%s39_s0] sm:$0x3]  ;;  %s22_s0 = smov 8  }
   0x2   :  { %5 = vst [vmem:[#allocation1] sm:$0x3] %v4_v0 }
   0x9   :  { %v10_v1 = vld [vmem:[#allocation1 + $0x1] sm:$0x1]   ;;  %v6_v2 = vld [vmem:[#allocation1] sm:$0x1]  }
   0xa   :  { %11 = vrot.lane.b32.xlu0 %v10_v1, %s22_s0  ;;  %8 = vst.msk [vmem:[#allocation0] sm:$0x1] %vm7_vm0, %v6_v2  }
  0x7c   :  { %v12_v3 = vpop.permute.xlu0 %11  }
  0x7d   :  { %14 = vst.msk [vmem:[#allocation0] sm:$0x1] %vm13_vm1, %v12_v3  }
  0x84   :  { %v17_v4 = vld [vmem:[#allocation0] sm:$0x1] }
  0x85   :  { %20 = vst [vmem:[%s40_s1] sm:$0x1] %v17_v4 }

// kernel: tile.53
= control target key start
LH: loop header
LB: loop body
LE: loop exit
PB: predicated region body
PF: predicated region fallthrough
CT: control target
= control target key end

     0   :  { %s22_s0 = inlined_call_operand.vmem [shape: f32[4], index: 0, kind: input, shape index: {}]   ;;  %s23_s1 = inlined_call_operand.vmem [shape: f32[2,4], index: 1, kind: output, shape index: {}]  }
   0x1   :  { %v4_v0 = vld [vmem:[%s22_s0] ss:$0 sm:$0xff] }
   0x2   :  { %5 = vst [vmem:[%s23_s1] sm:$0x3] %v4_v0 }

// kernel: tile.54
= control target key start
LH: loop header
LB: loop body
LE: loop exit
PB: predicated region body
PF: predicated region fallthrough
CT: control target
= control target key end

     0   :  { %vm7_vm0 = vcmask 31744   ;;  %vm13_vm1 = vcmask 64544   ;;  %s39_s0 = inlined_call_operand.vmem [shape: f32[2,4], index: 0, kind: input, shape index: {}]   ;;  %s40_s1 = inlined_call_operand.vmem [shape: f32[1,8], index: 1, kind: output, shape index: {}]  }
   0x1   :  { %v4_v0 = vld [vmem:[%s39_s0] sm:$0x3]  ;;  %s22_s0 = smov 4  }
   0x2   :  { %5 = vst [vmem:[#allocation1] sm:$0x3] %v4_v0 }
   0x9   :  { %v10_v1 = vld [vmem:[#allocation1 + $0x1] sm:$0x1]   ;;  %v6_v2 = vld [vmem:[#allocation1] sm:$0x1]  }
   0xa   :  { %11 = vrot.lane.b32.xlu0 %v10_v1, %s22_s0  ;;  %8 = vst.msk [vmem:[#allocation0] sm:$0x1] %vm7_vm0, %v6_v2  }
  0x7c   :  { %v12_v3 = vpop.permute.xlu0 %11  }
  0x7d   :  { %14 = vst.msk [vmem:[#allocation0] sm:$0x1] %vm13_vm1, %v12_v3  }
  0x84   :  { %v17_v4 = vld [vmem:[#allocation0] sm:$0x1] }
  0x85   :  { %20 = vst [vmem:[%s40_s1] sm:$0x1] %v17_v4 }

// kernel: unet_decoder_attention.6
= control target key start
LH: loop header
LB: loop body
LE: loop exit
PB: predicated region body
PF: predicated region fallthrough
CT: control target
= control target key end

     0   :  { %s1164_s27 = smov 0   ;;  %s1166_s28 = smov 0   ;;  %s1362_s0 = inlined_call_operand.vmem [shape: bf16[2,4,4,16], index: 0, kind: input, shape index: {}]   ;;  %s1363_s1 = inlined_call_operand.vmem [shape: bf16[2,4,2,4,16], index: 1, kind: input, shape index: {}]   ;;  %s1364_s2 = inlined_call_operand.vmem [shape: bf16[2,16,16], index: 2, kind: input, shape index: {}]   ;;  %s1365_s3 = inlined_call_operand.vmem [shape: f32[1,16], index: 3, kind: input, shape index: {}]   ;;  %s1366_s4 = inlined_call_operand.vmem [shape: bf16[2,16,16], index: 4, kind: input, shape index: {}]   ;;  %s1367_s5 = inlined_call_operand.vmem [shape: f32[1,16], index: 5, kind: input, shape index: {}]   ;;  %s1368_s6 = inlined_call_operand.vmem [shape: bf16[16,16], index: 6, kind: input, shape index: {}]   ;;  %s1369_s7 = inlined_call_operand.vmem [shape: f32[1,16], index: 7, kind: input, shape index: {}]   ;;  %s1370_s8 = inlined_call_operand.vmem [shape: bf16[2,4,2,4,32], index: 8, kind: output, shape index: {}]  }
   0x1   :  { %s1168_s29 = smov 0   ;;  %s1170_s30 = smov 0  }
   0x2   :  { %s1172_s9 = smov 0   ;;  %s1174_s10 = smov 0  }
   0x3   :  { %s1176_s11 = smov 0  }
   0x4 LB: > { %s30_s12 = sadd.s32 1, %s1107_s9  ;;  %s37_s13 = sadd.s32 1, %s1111_s10  ;;  %s1115_s11 = sphi %s1176_s11, %s18_s11   ;;  %s1111_s10 = sphi %s1174_s10, %s1377_s10   ;;  %s1107_s9 = sphi %s1172_s9, %s1376_s9   ;;  %s1103_s30 = sphi %s1170_s30, %s1375_s30   ;;  %s1099_s29 = sphi %s1168_s29, %s1374_s29   ;;  %s1095_s28 = sphi %s1166_s28, %s1373_s28   ;;  %s1091_s27 = sphi %s1164_s27, %s1372_s27  }
   0x5   : > { %p31_p0 = scmp.ge.s32.totalorder %s30_s12, 2  ;;  %s943_s14 = sadd.s32 4294967295, %s1115_s11  }
   0x6   : > { %p83_p1 = scmp.ne.s32.totalorder %s1095_s28, %s1091_s27  ;;  %p84_p2 = scmp.eq.s32.totalorder %s1115_s11, 0 }
   0x7   : > { %s1379_s12 = smov (%p31_p0, %s30_s12), 0  ;;  %s1381_s13 = smov (!%p31_p0, %s37_s13), %s1111_s10 }
   0x8   : > { %p39_p3 = scmp.ge.s32.totalorder %s1381_s13, 2  ;;  %p248_p4 = scmp.eq.s32.totalorder %s943_s14, 3 }
   0x9   : > { %s72_s15 = ssub.s32 %s1107_s9, %s1379_s12  ;;  %p85_p5 = por %p84_p2, %p83_p1 }
   0xa   : > { %s1383_s13 = smov (%p39_p3, %s1381_s13), 0  ;;  %p1212_p6 = por %p248_p4, %p83_p1 }
   0xb   : > { %s69_s17 = ssub.s32 %s1111_s10, %s1383_s13  ;;  %s76_s19 = sadd.s32 1, %s1095_s28 }
   0xc   : > { %s73_s18 = sor.u32 %s72_s15, %s69_s17  ;;  %p946_p8 = scmp.ge.s32.totalorder %s1115_s11, 4 }
   0xd   : > { %p74_p7 = scmp.eq.s32.totalorder %s73_s18, 0 }
   0xe   : > { %285 = sbr.rel (%p946_p8) target bundleno = 29 (0x1d), region = 36 }
   0xf   : > { %s1220_s20 = scalar_select %p74_p7, %s1095_s28, %s76_s19  }
  0x13   : > { %301 = sbr.rel (!%p85_p5) target bundleno = 29 (0x1d), region = 44  ;;  %s303_s21 = sand.u32 (%p85_p5), 1, %s1095_s28  }
  0x14   : > { %s948_s22 = sshll.u32 (%p85_p5), %s1111_s10, 3  ;;  %s947_s23 = sshll.u32 (%p85_p5), %s303_s21, 3 }
  0x15   : > { %s310_s24 = sadd.s32 (%p85_p5), %s1107_s9, %s948_s22  ;;  %s305_s17 = scalar_lea.vmem (%p85_p5), [#allocation2], %s947_s23 }
  0x16   : > { %s949_s25 = sshll.u32 (%p85_p5), %s310_s24, 1 }
  0x17   : > { %s312_s15 = scalar_lea.vmem (%p85_p5), %s1363_s1, %s949_s25 }
  0x18   : > { %v329_v0 = vld [vmem:[%s312_s15] sm:$0x3]  ;;  %v331_v1 = vld [vmem:[%s312_s15 + $0x4] sm:$0x3]  ;;  %v333_v2 = vld [vmem:[%s312_s15 + $0x8] sm:$0x3] }
  0x19   : > { %330 = vst [vmem:[%s305_s17] sm:$0x3] %v329_v0  ;;  %v335_v3 = vld [vmem:[%s312_s15 + $0xc] sm:$0x3] }
  0x1a   : > { %332 = vst [vmem:[%s305_s17 + $0x2] sm:$0x3] %v331_v1 }
  0x1b   : > { %334 = vst [vmem:[%s305_s17 + $0x4] sm:$0x3] %v333_v2 }
  0x1c   : > { %336 = vst [vmem:[%s305_s17 + $0x6] sm:$0x3] %v335_v3 }
  0x1d PF: > { %p950_p9 = scmp.ge.s32.totalorder %s1115_s11, 1  ;;  %p375_p10 = scmp.lt.s32.totalorder %s1115_s11, 5 }
  0x1f   : > { %p376_p11 = pnand %p950_p9, %p375_p10 }
  0x20   : > { %p439_p12 = scmp.lt.s32.totalorder (!%p376_p11), %s1099_s29, 1  ;;  %p429_p13 = scmp.lt.s32.totalorder (!%p376_p11), %s1103_s30, 1 }
  0x21   : > { %379 = sbr.rel (%p376_p11) target bundleno = 658 (0x292), region = 89  ;;  %s382_s26 = sand.u32 (!%p376_p11), 1, %s1091_s27  }
  0x22   : > { %s1117_s14 = smov (!%p376_p11), 8   ;;  %s1118_s22 = smov (!%p376_p11), 16  }
  0x26   : > { %s440_s18 = scalar_select %p439_p12, %s1099_s29, 1  ;;  %vm478_vm0 = vcmask 130048   ;;  %v990_v14 = vld [vmem:[%s1366_s4 + $0x8] sm:$0xff]  ;;  %v989_v15 = vld [vmem:[%s1366_s4] sm:$0xff]  ;;  %vm658_vm1 = vcmask 58368   ;;  %vm675_vm2 = vcmask 1041408  }
  0x27   : > { %s430_s24 = scalar_select %p429_p13, %s1103_s30, 1  ;;  %528 = vmatpush.bf16.msra.mxu1 %v990_v14  ;;  %551 = vmatpush.bf16.msra.mxu2 %v989_v15  ;;  %v1050_v17 = vld [vmem:[%s1365_s3] ss:$0 sm:$0xff]  ;;  %vm704_vm11 = vcmask 123968   ;;  %vm745_vm12 = vcmask 189568   ;;  %vm762_vm13 = vcmask 255168  }
  0x28   : > { %s987_s19 = sshll.u32 %s440_s18, 3  ;;  %s951_s18 = sshll.u32 %s382_s26, 3  ;;  %v991_v37 = vld [vmem:[%s1368_s6] sm:$0xff] }
  0x29   : > { %s443_s23 = scalar_lea.vmem %s1364_s2, %s987_s19  ;;  %s986_s25 = sshll.u32 %s430_s24, 3  ;;  %589 = vmatpush.bf16.msra.mxu3 %v991_v37  ;;  %v1051_v41 = vld [vmem:[%s1367_s5] ss:$0 sm:$0xff] }
  0x2a   : > { %v988_v4 = vld [vmem:[%s443_s23] sm:$0xff]  ;;  %s436_s17 = scalar_lea.vmem %s1362_s0, %s986_s25  ;;  %s384_s21 = scalar_lea.vmem [#allocation2], %s951_s18 }
  0x2b   : > { %488 = vmatpush.bf16.msra.mxu0 %v988_v4  ;;  %v446_v5 = vld [vmem:[%s436_s17] sm:$0x3]  ;;  %v447_v6 = vld [vmem:[%s436_s17 + $0x2] sm:$0x3]  ;;  %v448_v7 = vld [vmem:[%s436_s17 + $0x4] sm:$0x3] }
  0x2c   : > { %v449_v8 = vld [vmem:[%s436_s17 + $0x6] sm:$0x3]  ;;  %461 = vst [vmem:[#allocation1] ss:$4 sm:$0xff] %v446_v5  ;;  %v1242_v9 = vld [vmem:[%s384_s21] sm:$0x3] }
  0x2d   : > { %464 = vst [vmem:[#allocation1 + $0x1] ss:$4 sm:$0xff] %v447_v6  ;;  %v1244_v10 = vld [vmem:[%s384_s21 + $0x2] sm:$0x3]  ;;  %v1246_v11 = vld [vmem:[%s384_s21 + $0x4] sm:$0x3]  ;;  %v634_v4 = vunpack.c.l.bf16 %v1242_v9 }
  0x2e   : > { %467 = vst [vmem:[#allocation1 + $0x2] ss:$4 sm:$0xff] %v448_v7  ;;  %v1248_v13 = vld [vmem:[%s384_s21 + $0x6] sm:$0x3]  ;;  %s1265_s26 = scalar_lea.vmem [#allocation3], %s951_s18  ;;  %s982_s23 = sshll.u32 (%p1212_p6), %s1103_s30, 3 }
  0x2f   : > { %470 = vst [vmem:[#allocation1 + $0x3] ss:$4 sm:$0xff] %v449_v8  ;;  %v1052_v50 = vld [vmem:[%s1369_s7] ss:$0 sm:$0xff]  ;;  %s778_s24 = sadd.s32 (%p1212_p6), %s1099_s29, %s982_s23 }
  0x30   : > { %s983_s25 = sshll.u32 (%p1212_p6), %s778_s24, 1 }
  0x31   : > { %s780_s17 = scalar_lea.vmem (%p1212_p6), %s1370_s8, %s983_s25 }
  0x36   : > { %v471_v12 = vld.sshfl [vmem:[#allocation1] sm:$0xff pattern:$0x73625140] }
  0x37   : > { %961 = vmatmul.msk.bf16.vlgmr.msra.gmra.mxu0 %vm478_vm0, %v471_v12  ;;  %502 = vst [vmem:[#allocation1] ss:$4 sm:$0xff] %v1242_v9  ;;  %v635_v12 = vunpack.c.l.bf16 %v1244_v10 }
  0x38   : > { %505 = vst [vmem:[#allocation1 + $0x1] ss:$4 sm:$0xff] %v1244_v10 }
  0x39   : > { %508 = vst [vmem:[#allocation1 + $0x2] ss:$4 sm:$0xff] %v1246_v11 }
  0x3a   : > { %511 = vst [vmem:[#allocation1 + $0x3] ss:$4 sm:$0xff] %v1248_v13 }
  0x41   : > { %v512_v16 = vld.sshfl [vmem:[#allocation1] sm:$0xff pattern:$0x73625140] }
  0x42   : > { %968 = vmatmul.msk.bf16.vlgmr.msra.gmra.mxu1 %vm478_vm0, %v512_v16 }
  0xb4   : > { %v490_v18 = vpop.f32.mrf.mxu0 }
  0xb5   : > { %v491_v19 = vadd.f32 %v1050_v17, %v490_v18 }
  0xb7   : > { %v650_v20 = vrot.slane %v491_v19, 4  ;;  %v654_v21 = vpack.c.bf16 %v491_v19, %v491_v19 }
  0xb9   : > { %v655_v22 = vpack.c.bf16 %v650_v20, %v650_v20  ;;  %v713_v23 = vrot.slane %v654_v21, 2  ;;  %659 = vst.msk [vmem:[%s1265_s26] sm:$0x3] %vm658_vm1, %v654_v21 }
  0xbb   : > { %v719_v24 = vsel %vm675_vm2, %v654_v21, %v713_v23  ;;  %660 = vst.msk [vmem:[%s1265_s26 + $0x2] sm:$0x3] %vm658_vm1, %v655_v22  ;;  %v714_v30 = vrot.slane %v655_v22, 2 }
  0xbc   : > { %v492_v25 = vpop.f32.mrf.mxu0  ;;  %733 = vrot.lane.b32.xlu2 %v719_v24, %s1117_s14  ;;  %v636_v24 = vunpack.c.l.bf16 %v1246_v11 }
  0xbd   : > { %v493_v26 = vadd.f32 %v1050_v17, %v492_v25  ;;  %v723_v34 = vsel %vm675_vm2, %v655_v22, %v714_v30 }
  0xbf   : > { %v651_v27 = vrot.slane %v493_v26, 4  ;;  %v495_v28 = vpack.c.bf16 %v493_v26, %v491_v19  ;;  %v656_v29 = vpack.c.bf16 %v493_v26, %v493_v26  ;;  %v530_v38 = vpop.f32.mrf.mxu1  ;;  %v637_v26 = vunpack.c.l.bf16 %v1248_v13 }
  0xc1   : > { %973 = vmatmul.msk.bf16.vlgmr.msra.gmra.mxu2 %vm478_vm0, %v495_v28  ;;  %v715_v31 = vrot.slane %v656_v29, 2  ;;  %v657_v32 = vpack.c.bf16 %v651_v27, %v651_v27  ;;  %661 = vst.msk [vmem:[%s1265_s26 + $0x4] sm:$0x3] %vm658_vm1, %v656_v29 }
  0xc3   : > { %v727_v33 = vsel %vm675_vm2, %v656_v29, %v715_v31  ;;  %v716_v35 = vrot.slane %v657_v32, 2  ;;  %662 = vst.msk [vmem:[%s1265_s26 + $0x6] sm:$0x3] %vm658_vm1, %v657_v32 }
  0xc4   : > { %737 = vrot.lane.b32.xlu0 %v727_v33, %s1117_s14  ;;  %735 = vrot.lane.b32.xlu2 %v723_v34, %s1117_s14 }
  0xc5   : > { %v731_v36 = vsel %vm675_vm2, %v657_v32, %v716_v35 }
  0xc6   : > { %739 = vrot.lane.b32.xlu1 %v731_v36, %s1117_s14 }
  0xc7   : > { %v532_v42 = vpop.f32.mrf.mxu1 }
 0x144   : > { %v553_v39 = vpop.f32.mrf.mxu2 }
 0x145   : > { %v554_v40 = vadd.f32 %v553_v39, %v530_v38  ;;  %v734_v39 = vpop.permute.xlu2 %733 }
 0x147   : > { %v562_v44 = vadd.f32 %v1051_v41, %v554_v40  ;;  %v738_v40 = vpop.permute.xlu0 %737 }
 0x149   : > { %v564_v47 = vmax.f32 %v562_v44, 0.0 }
 0x14c   : > { %v555_v43 = vpop.f32.mrf.mxu2 }
 0x14d   : > { %v556_v45 = vadd.f32 %v555_v43, %v532_v42  ;;  %v740_v42 = vpop.permute.xlu1 %739 }
 0x14f   : > { %v563_v46 = vadd.f32 %v1051_v41, %v556_v45  ;;  %v736_v41 = vpop.permute.xlu2 %735 }
 0x151   : > { %v565_v48 = vmax.f32 %v563_v46, 0.0 }
 0x153   : > { %v566_v49 = vpack.c.bf16 %v565_v48, %v564_v47 }
 0x155   : > { %978 = vmatmul.msk.bf16.vlgmr.msra.gmra.mxu3 %vm478_vm0, %v566_v49 }
 0x1d8   : > { %v591_v51 = vpop.f32.mrf.mxu3 }
 0x1d9   : > { %v592_v52 = vadd.f32 %v1052_v50, %v591_v51 }
 0x1db   : > { %v979_v53 = vmul.f32 -1.442695, %v592_v52 }
 0x1dd   : > { %1053 = vpow2.f32 %v979_v53 }
 0x1e0   : > { %v593_v54 = vpop.f32.mrf.mxu3 }
 0x1e1   : > { %v594_v55 = vadd.f32 %v1052_v50, %v593_v54 }
 0x1e3   : > { %v1054_v56 = vpop.eup %1053  ;;  %v980_v57 = vmul.f32 -1.442695, %v594_v55 }
 0x1e4   : > { %v602_v58 = vadd.f32 1.0, %v1054_v56 }
 0x1e5   : > { %1055 = vpow2.f32 %v980_v57 }
 0x1e6   : > { %1057 = vrcp.f32 %v602_v58  ;;  %v615_v0 = vand.u32 2147483648, %v602_v58  ;;  %v613_v2 = vand.u32 2147483647, %v602_v58  ;;  %vm609_vm4 = vweird.f32 %v602_v58 }
 0x1e8   : > { %v616_v6 = vor.u32 1.1754944e-38, %v615_v0  ;;  %vm614_vm6 = vcmp.eq.f32.partialorder %v613_v2, 8.507059e+37 }
 0x1eb   : > { %v1056_v59 = vpop.eup %1055 }
 0x1ec   : > { %v1058_v60 = vpop.eup %1057  ;;  %v603_v61 = vadd.f32 1.0, %v1056_v59 }
 0x1ed   : > { %v605_v62 = vmul.f32 %v1058_v60, %v602_v58  ;;  %vm610_vm3 = vweird.f32 %v1058_v60 }
 0x1ee   : > { %1059 = vrcp.f32 %v603_v61  ;;  %vm611_vm5 = vmor %vm609_vm4, %vm610_vm3  ;;  %v628_v18 = vand.u32 2147483647, %v603_v61  ;;  %v630_v19 = vand.u32 2147483648, %v603_v61  ;;  %vm624_vm8 = vweird.f32 %v603_v61 }
 0x1ef   : > { %v606_v63 = vsub.f32 1.0, %v605_v62 }
 0x1f0   : > { %v631_v25 = vor.u32 1.1754944e-38, %v630_v19  ;;  %vm629_vm10 = vcmp.eq.f32.partialorder %v628_v18, 8.507059e+37 }
 0x1f1   : > { %v607_v1 = vmul.f32 %v1058_v60, %v606_v63 }
 0x1f3   : > { %v608_v3 = vadd.f32 %v1058_v60, %v607_v1 }
 0x1f4   : > { %v1060_v5 = vpop.eup %1059 }
 0x1f5   : > { %v620_v7 = vmul.f32 %v1060_v5, %v603_v61  ;;  %v612_v8 = vsel %vm611_vm5, %v1058_v60, %v608_v3  ;;  %vm625_vm7 = vweird.f32 %v1060_v5 }
 0x1f6   : > { %v617_v14 = vsel %vm614_vm6, %v616_v6, %v612_v8  ;;  %vm626_vm9 = vmor %vm624_vm8, %vm625_vm7 }
 0x1f7   : > { %v621_v15 = vsub.f32 1.0, %v620_v7  ;;  %v644_v16 = vmul.f32 %v634_v4, %v617_v14  ;;  %v640_v17 = vrot.slane %v617_v14, 4 }
 0x1f9   : > { %v663_v20 = vpack.c.bf16 %v644_v16, %v644_v16  ;;  %v622_v21 = vmul.f32 %v1060_v5, %v621_v15  ;;  %v645_v22 = vmul.f32 %v640_v17, %v635_v12 }
 0x1fb   : > { %v671_v23 = vrot.slane %v663_v20, 2  ;;  %v623_v9 = vadd.f32 %v1060_v5, %v622_v21  ;;  %v664_v28 = vpack.c.bf16 %v645_v22, %v645_v22 }
 0x1fd   : > { %v678_v10 = vsel %vm675_vm2, %v663_v20, %v671_v23  ;;  %v627_v27 = vsel %vm626_vm9, %v1060_v5, %v623_v9  ;;  %v672_v33 = vrot.slane %v664_v28, 2 }
 0x1fe   : > { %750 = vrot.lane.b32.xlu2 %v678_v10, %s1118_s22  ;;  %692 = vrot.lane.b32.xlu0 %v678_v10, %s1117_s14  ;;  %v632_v29 = vsel %vm629_vm10, %v631_v25, %v627_v27 }
 0x1ff   : > { %v646_v30 = vmul.f32 %v636_v24, %v632_v29  ;;  %v641_v31 = vrot.slane %v632_v29, 4  ;;  %v682_v13 = vsel %vm675_vm2, %v664_v28, %v672_v33 }
 0x201   : > { %v665_v32 = vpack.c.bf16 %v646_v30, %v646_v30  ;;  %v647_v34 = vmul.f32 %v641_v31, %v637_v26 }
 0x203   : > { %v673_v11 = vrot.slane %v665_v32, 2  ;;  %v666_v35 = vpack.c.bf16 %v647_v34, %v647_v34 }
 0x205   : > { %v686_v36 = vsel %vm675_vm2, %v665_v32, %v673_v11  ;;  %v674_v37 = vrot.slane %v666_v35, 2 }
 0x206   : > { %696 = vrot.lane.b32.xlu1 %v686_v36, %s1117_s14  ;;  %694 = vrot.lane.b32.xlu0 %v682_v13, %s1117_s14 }
 0x207   : > { %v690_v38 = vsel %vm675_vm2, %v666_v35, %v674_v37 }
 0x208   : > { %756 = vrot.lane.b32.xlu2 %v690_v38, %s1118_s22 }
 0x20e   : > { %698 = vrot.lane.b32.xlu1 %v690_v38, %s1117_s14  ;;  %752 = vrot.lane.b32.xlu0 %v682_v13, %s1118_s22 }
 0x216   : > { %754 = vrot.lane.b32.xlu1 %v686_v36, %s1118_s22 }
 0x258   : > { %v751_v44 = vpop.permute.xlu2 %750 }
 0x262   : > { %v757_v49 = vpop.permute.xlu2 %756 }
 0x270   : > { %v693_v43 = vpop.permute.xlu0 %692 }
 0x271   : > { %705 = vst.msk [vmem:[%s1265_s26] sm:$0x3] %vm704_vm11, %v693_v43 }
 0x272   : > { %746 = vst.msk [vmem:[%s1265_s26] sm:$0x3] %vm745_vm12, %v734_v39 }
 0x273   : > { %763 = vst.msk [vmem:[%s1265_s26] sm:$0x3] %vm762_vm13, %v751_v44 }
 0x278   : > { %v697_v45 = vpop.permute.xlu1 %696  ;;  %v695_v46 = vpop.permute.xlu0 %694 }
 0x279   : > { %707 = vst.msk [vmem:[%s1265_s26 + $0x4] sm:$0x3] %vm704_vm11, %v697_v45 }
 0x27a   : > { %748 = vst.msk [vmem:[%s1265_s26 + $0x4] sm:$0x3] %vm745_vm12, %v738_v40  ;;  %v797_v51 = vld [vmem:[%s1265_s26] sm:$0x3] (%p1212_p6) }
 0x27b   : > { %706 = vst.msk [vmem:[%s1265_s26 + $0x2] sm:$0x3] %vm704_vm11, %v695_v46 }
 0x27c   : > { %747 = vst.msk [vmem:[%s1265_s26 + $0x2] sm:$0x3] %vm745_vm12, %v736_v41 }
 0x27d   : > { %798 = vst [vmem:[%s780_s17] sm:$0x3] (%p1212_p6), %v797_v51 }
 0x280   : > { %v699_v47 = vpop.permute.xlu1 %698  ;;  %v753_v48 = vpop.permute.xlu0 %752 }
 0x281   : > { %708 = vst.msk [vmem:[%s1265_s26 + $0x6] sm:$0x3] %vm704_vm11, %v699_v47 }
 0x282   : > { %749 = vst.msk [vmem:[%s1265_s26 + $0x6] sm:$0x3] %vm745_vm12, %v740_v42 }
 0x283   : > { %766 = vst.msk [vmem:[%s1265_s26 + $0x6] sm:$0x3] %vm762_vm13, %v757_v49 }
 0x284   : > { %764 = vst.msk [vmem:[%s1265_s26 + $0x2] sm:$0x3] %vm762_vm13, %v753_v48 }
 0x285   : > { %773 = sbr.rel (!%p1212_p6) target bundleno = 658 (0x292), region = 97 }
 0x288   : > { %v755_v50 = vpop.permute.xlu1 %754 }
 0x289   : > { %765 = vst.msk [vmem:[%s1265_s26 + $0x4] sm:$0x3] %vm762_vm13, %v755_v50 }
 0x28a   : > { %v803_v54 = vld [vmem:[%s1265_s26 + $0x6] sm:$0x3] }
 0x28b   : > { %v799_v52 = vld [vmem:[%s1265_s26 + $0x2] sm:$0x3]  ;;  %804 = vst [vmem:[%s780_s17 + $0xc] sm:$0x3] %v803_v54 }
 0x28c   : > { %800 = vst [vmem:[%s780_s17 + $0x4] sm:$0x3] %v799_v52 }
 0x290   : > { %v801_v53 = vld [vmem:[%s1265_s26 + $0x4] sm:$0x3] }
 0x291   : > { %802 = vst [vmem:[%s780_s17 + $0x8] sm:$0x3] %v801_v53 }
 0x292 PF: > { %s18_s11 = sadd.s32 1, %s1115_s11   ;;  %s1372_s27 = smov %s1095_s28 }
 0x293   : > { %p15_p0 = scmp.ge.s32.totalorder %s18_s11, 6   ;;  %s1373_s28 = smov %s1220_s20 }
 0x294   : > { %s1374_s29 = smov %s1107_s9  ;;  %s1375_s30 = smov %s1111_s10 }
 0x295   : > { %s1376_s9 = smov %s1379_s12  ;;  %s1377_s10 = smov %s1383_s13 }
 0x296   :  { %17 = sbr.rel (!%p15_p0) target bundleno = 4 (0x4), region = 182 }

// kernel: unet_decoder_attention.7
= control target key start
LH: loop header
LB: loop body
LE: loop exit
PB: predicated region body
PF: predicated region fallthrough
CT: control target
= control target key end

     0   :  { %s1549_s12 = smov 0   ;;  %s1551_s13 = smov 0   ;;  %s2052_s0 = inlined_call_operand.vmem [shape: bf16[2,11,16,16], index: 0, kind: input, shape index: {}]   ;;  %s2053_s1 = inlined_call_operand.vmem [shape: bf16[3,48,8], index: 1, kind: input, shape index: {}]   ;;  %s2054_s2 = inlined_call_operand.vmem [shape: f32[1,8], index: 2, kind: input, shape index: {}]   ;;  %s2055_s3 = inlined_call_operand.vmem [shape: bf16[2,8,8,8], index: 3, kind: output, shape index: {}]  }
   0x1   :  { %s1553_s14 = smov 0  }
   0x2 LB: > { %s25_s15 = sadd.s32 1, %s1521_s13  ;;  %p1224_p0 = scmp.ge.s32.totalorder %s1525_s14, 1  ;;  %s1525_s14 = sphi %s1553_s14, %s13_s14   ;;  %s1521_s13 = sphi %s1551_s13, %s2057_s13   ;;  %s1517_s12 = sphi %s1549_s12, %s2056_s12  }
   0x3   : > { %p27_p1 = scmp.ge.s32.totalorder %s25_s15, 2  ;;  %p151_p2 = scmp.lt.s32.totalorder %s1525_s14, 3 }
   0x5   : > { %s2059_s15 = smov (%p27_p1, %s25_s15), 0  ;;  %p152_p3 = pnand %p1224_p0, %p151_p2 }
   0x6   : > { %p179_p4 = scmp.lt.s32.totalorder (!%p152_p3), %s1517_s12, 1  ;;  %s1527_s20 = smov (!%p152_p3), 32  }
   0x7   : > { %155 = sbr.rel (%p152_p3) target bundleno = 395 (0x18b), region = 32  ;;  %s1528_s21 = smov (!%p152_p3), 16  }
   0xc   : > { %s2061_s12 = smov (!%p179_p4, %s1517_s12), 1  ;;  %vm344_vm0 = vcmask 1046528   ;;  %vm259_vm1 = vsmask.f32 7424  ;;  %vm378_vm2 = vcmask 130048   ;;  %vm395_vm3 = vcmask 261120  }
   0xd   : > { %s1475_s16 = smul.u32 88, %s2061_s12  ;;  %vm656_vm4 = vcmask 392192   ;;  %vm1120_vm5 = vcmask 60416  }
   0xf   : > { %s1573_s19 = scalar_lea.vmem %s2052_s0, %s1475_s16 }
  0x10   : > { %v1576_v0 = vld [vmem:[%s1573_s19 + $0x38] sm:$0xff]  ;;  %v1579_v1 = vld [vmem:[%s1573_s19 + $0x40] sm:$0xff]  ;;  %v1585_v3 = vld [vmem:[%s1573_s19 + $0x8] sm:$0xff] }
  0x11   : > { %v1582_v2 = vld [vmem:[%s1573_s19] sm:$0xff]  ;;  %v577_v4 = vrot.slane %v1576_v0, 1  ;;  %v579_v5 = vrot.slane %v1579_v1, 1  ;;  %v1591_v7 = vld [vmem:[%s1573_s19 + $0x10] sm:$0xff]  ;;  %v1594_v8 = vld [vmem:[%s1573_s19 + $0x18] sm:$0xff]  ;;  %v530_v9 = vshll.u32 %v1576_v0, 16 }
  0x12   : > { %v345_v6 = vrot.slane %v1582_v2, 1  ;;  %v346_v10 = vrot.slane %v1585_v3, 1  ;;  %v534_v11 = vshrl.u32 %v1576_v0, 16  ;;  %v538_v14 = vshll.u32 %v1579_v1, 16  ;;  %v1620_v24 = vld [vmem:[%s1573_s19 + $0x8] sm:$0xff]  ;;  %v1626_v28 = vld [vmem:[%s1573_s19 + $0x10] sm:$0xff] }
  0x13   : > { %v580_v12 = vsel %vm344_vm0, %v577_v4, %v579_v5  ;;  %v1604_v13 = vrot.slane %v530_v9, 1  ;;  %v937_v16 = vrot.slane %v1591_v7, 1  ;;  %v938_v17 = vrot.slane %v1594_v8, 1  ;;  %v1276_v32 = vld [vmem:[%s1573_s19 + $0x48] sm:$0xf]  ;;  %v1639_v41 = vld [vmem:[%s1573_s19 + $0x20] sm:$0xff] }
  0x14   : > { %595 = vrot.lane.b32.xlu1 %v580_v12, %s1527_s20  ;;  %v347_v15 = vsel %vm344_vm0, %v345_v6, %v346_v10  ;;  %v856_v19 = vshll.u32 %v1591_v7, 16  ;;  %v540_v20 = vrot.slane %v538_v14, 1  ;;  %v261_v21 = vshrl.u32 %v1582_v2, 16  ;;  %v1655_v57 = vld [vmem:[%s1573_s19 + $0x18] sm:$0xff]  ;;  %v1659_v60 = vld [vmem:[%s1573_s19 + $0x10] sm:$0xff] }
  0x15   : > { %362 = vrot.lane.b32.xlu0 %v347_v15, %s1527_s20  ;;  %v536_v18 = vor.u32 %v534_v11, %v1604_v13  ;;  %v263_v22 = vshll.u32 %v1582_v2, 16  ;;  %v268_v23 = vshll.u32 %v1585_v3, 16  ;;  %v939_v27 = vsel %vm344_vm0, %v937_v16, %v938_v17  ;;  %v1667_v11 = vld [vmem:[%s1573_s19 + $0x30] sm:$0xff] }
  0x16   : > { %v854_v29 = vshrl.u32 %v1591_v7, 16  ;;  %v858_v30 = vrot.slane %v856_v19, 1  ;;  %v861_v31 = vshll.u32 %v1594_v8, 16  ;;  %v480_v36 = vunpack.c.l.b16 %v1276_v32  ;;  %v1676_v19 = vld [vmem:[%s1573_s19 + $0x38] sm:$0xff] }
  0x17   : > { %v265_v25 = vrot.slane %v263_v22, 1  ;;  %v270_v26 = vrot.slane %v268_v23, 1  ;;  %v541_v33 = vsel %vm259_vm1, %v536_v18, %v540_v20  ;;  %v566_v37 = vrot.slane %v1620_v24, 1 }
  0x18   : > { %v567_v38 = vrot.slane %v1626_v28, 1  ;;  %v859_v39 = vor.u32 %v858_v30, %v854_v29  ;;  %v863_v40 = vrot.slane %v861_v31, 1  ;;  %v490_v42 = vshll.u32 %v1626_v28, 16 }
  0x19   : > { %v266_v34 = vor.u32 %v265_v25, %v261_v21  ;;  %v483_v43 = vshrl.u32 %v1620_v24, 16  ;;  %v485_v44 = vshll.u32 %v1620_v24, 16  ;;  %v481_v45 = vpack.c.b16 %v480_v36, %v480_v36 }
  0x1a   : > { %v568_v47 = vsel %vm344_vm0, %v566_v37, %v567_v38  ;;  %v864_v48 = vsel %vm259_vm1, %v859_v39, %v863_v40  ;;  %v865_v49 = vshrl.u32 %v1594_v8, 16  ;;  %v869_v50 = vshll.u32 %v1639_v41, 16  ;;  %v1698_v37 = vld [vmem:[%s1573_s19 + $0x28] sm:$0xff] }
  0x1b   : > { %v271_v35 = vsel %vm259_vm1, %v266_v34, %v270_v26  ;;  %v487_v46 = vrot.slane %v485_v44, 1  ;;  %v492_v51 = vrot.slane %v490_v42, 1  ;;  %v542_v53 = vshrl.u32 %v1579_v1, 16 }
  0x1c   : > { %954 = vrot.lane.b32.xlu1 %v939_v27, %s1527_s20  ;;  %328 = vrot.lane.b32.xlu2 %v271_v35, %s1528_s21  ;;  %v546_v54 = vshll.u32 %v481_v45, 16  ;;  %v581_v56 = vrot.slane %v481_v45, 1  ;;  %v867_v58 = vor.u32 %v865_v49, %v863_v40  ;;  %v871_v59 = vrot.slane %v869_v50, 1  ;;  %v1723_v50 = vld [vmem:[%s1573_s19 + $0x18] sm:$0xff] }
  0x1d   : > { %562 = vrot.lane.b32.xlu0 %v541_v33, %s1528_s21  ;;  %v488_v52 = vor.u32 %v487_v46, %v483_v43  ;;  %v544_v61 = vor.u32 %v542_v53, %v540_v20  ;;  %v494_v6 = vshrl.u32 %v1626_v28, 16  ;;  %v498_v9 = vshll.u32 %v1655_v57, 16  ;;  %v215_v46 = vld [vmem:[%s1573_s19 + $0x40] sm:$0xf] }
  0x1e   : > { %v548_v62 = vrot.slane %v546_v54, 1  ;;  %v582_v63 = vsel %vm344_vm0, %v579_v5, %v581_v56  ;;  %v872_v12 = vsel %vm259_vm1, %v867_v58, %v871_v59  ;;  %v272_v14 = vshrl.u32 %v1585_v3, 16 }
  0x1f   : > { %v493_v55 = vsel %vm259_vm1, %v488_v52, %v492_v51  ;;  %v276_v15 = vshll.u32 %v1659_v60, 16  ;;  %v496_v18 = vor.u32 %v494_v6, %v492_v51  ;;  %v500_v5 = vrot.slane %v498_v9, 1 }
  0x20   : > { %v549_v16 = vsel %vm259_vm1, %v544_v61, %v548_v62  ;;  %v308_v20 = vshll.u32 %v1667_v11, 16  ;;  %v274_v21 = vor.u32 %v272_v14, %v270_v26  ;;  %v940_v23 = vrot.slane %v1639_v41, 1 }
  0x21   : > { %v278_v22 = vrot.slane %v276_v15, 1  ;;  %v501_v25 = vsel %vm259_vm1, %v496_v18, %v500_v5  ;;  %v312_v29 = vshrl.u32 %v1667_v11, 16  ;;  %v316_v30 = vshll.u32 %v1676_v19, 16 }
  0x22   : > { %v1682_v27 = vrot.slane %v308_v20, 1  ;;  %v941_v32 = vsel %vm344_vm0, %v938_v17, %v940_v23  ;;  %v569_v34 = vrot.slane %v1655_v57, 1  ;;  %v348_v35 = vrot.slane %v1659_v60, 1 }
  0x23   : > { %v279_v31 = vsel %vm259_vm1, %v274_v21, %v278_v22  ;;  %v318_v33 = vrot.slane %v316_v30, 1  ;;  %v873_v40 = vshrl.u32 %v1639_v41, 16  ;;  %v877_v42 = vshll.u32 %v1698_v37, 16 }
  0x24   : > { %583 = vrot.lane.b32.xlu1 %v568_v47, %s1527_s20  ;;  %550 = vrot.lane.b32.xlu2 %v493_v55, %s1528_s21  ;;  %v314_v26 = vor.u32 %v312_v29, %v1682_v27  ;;  %v570_v17 = vsel %vm344_vm0, %v567_v38, %v569_v34  ;;  %v349_v39 = vsel %vm344_vm0, %v346_v10, %v348_v35  ;;  %v942_v43 = vrot.slane %v1698_v37, 1  ;;  %v1715_v38 = vld [vmem:[%s1573_s19 + $0x20] sm:$0xff] }
  0x25   : > { %921 = vrot.lane.b32.xlu0 %v864_v48, %s1528_s21  ;;  %v356_v44 = vrot.slane %v1667_v11, 1  ;;  %v358_v45 = vrot.slane %v1676_v19, 1  ;;  %v875_v10 = vor.u32 %v873_v40, %v871_v59  ;;  %v879_v47 = vrot.slane %v877_v42, 1  ;;  %v1734_v59 = vld [vmem:[%s1573_s19 + $0x30] sm:$0xff] }
  0x26   : > { %v319_v36 = vsel %vm259_vm1, %v314_v26, %v318_v33  ;;  %v943_v48 = vsel %vm344_vm0, %v940_v23, %v942_v43  ;;  %v502_v51 = vshrl.u32 %v1655_v57, 16  ;;  %v506_v52 = vshll.u32 %v1715_v38, 16  ;;  %v1746_v23 = vld [vmem:[%s1573_s19 + $0x20] sm:$0xff] }
  0x27   : > { %v359_v49 = vsel %vm344_vm0, %v356_v44, %v358_v45  ;;  %v257_v53 = vunpack.c.l.b16 %v215_v46  ;;  %v880_v54 = vsel %vm259_vm1, %v875_v10, %v879_v47  ;;  %v280_v55 = vshrl.u32 %v1659_v60, 16  ;;  %v1764_v10 = vld [vmem:[%s1573_s19 + $0x28] sm:$0xff]  ;;  %v1767_v46 = vld [vmem:[%s1573_s19 + $0x40] sm:$0xff] }
  0x28   : > { %v284_v56 = vshll.u32 %v1723_v50, 16  ;;  %v350_v58 = vrot.slane %v1723_v50, 1  ;;  %v504_v61 = vor.u32 %v502_v51, %v500_v5  ;;  %v508_v62 = vrot.slane %v506_v52, 1  ;;  %v1443_v51 = vld [vmem:[%s2053_s1 + $0x10] sm:$0xff] }
  0x29   : > { %v282_v6 = vor.u32 %v280_v55, %v278_v22  ;;  %v881_v14 = vshrl.u32 %v1698_v37, 16  ;;  %v885_v15 = vshll.u32 %v1734_v59, 16  ;;  %v320_v18 = vshrl.u32 %v1676_v19, 16  ;;  %753 = vmatpush.bf16.msra.mxu1 %v1443_v51  ;;  %v1442_v55 = vld [vmem:[%s2053_s1 + $0x8] sm:$0xff] }
  0x2a   : > { %v286_v9 = vrot.slane %v284_v56, 1  ;;  %v571_v30 = vrot.slane %v1715_v38, 1  ;;  %v292_v26 = vshll.u32 %v1746_v23, 16  ;;  %v573_v52 = vrot.slane %v1764_v10, 1 }
  0x2b   : > { %v883_v5 = vor.u32 %v881_v14, %v879_v47  ;;  %v887_v22 = vrot.slane %v885_v15, 1  ;;  %v889_v15 = vshrl.u32 %v1734_v59, 16 }
  0x2c   : > { %597 = vrot.lane.b32.xlu1 %v582_v63, %s1527_s20  ;;  %564 = vrot.lane.b32.xlu2 %v549_v16, %s1528_s21  ;;  %v258_v63 = vpack.c.b16 %v257_v53, %v257_v53  ;;  %v509_v16 = vsel %vm259_vm1, %v504_v61, %v508_v62  ;;  %v287_v21 = vsel %vm259_vm1, %v282_v6, %v286_v9  ;;  %v352_v53 = vrot.slane %v1746_v23, 1  ;;  %v1795_v6 = vld [vmem:[%s1573_s19 + $0x38] sm:$0xff] }
  0x2d   : > { %923 = vrot.lane.b32.xlu0 %v872_v12, %s1528_s21  ;;  %v351_v12 = vsel %vm344_vm0, %v348_v35, %v350_v58  ;;  %v574_v61 = vsel %vm344_vm0, %v571_v30, %v573_v52  ;;  %754 = vmatpush.bf16.msra.mxu1 %v1442_v55 }
  0x2e   : > { %v324_v20 = vshll.u32 %v258_v63, 16  ;;  %v360_v40 = vrot.slane %v258_v63, 1  ;;  %v353_v63 = vsel %vm344_vm0, %v350_v58, %v352_v53  ;;  %v1441_v58 = vld [vmem:[%s2053_s1] sm:$0xff] }
  0x30   : > { %v326_v29 = vrot.slane %v324_v20, 1  ;;  %v361_v47 = vsel %vm344_vm0, %v358_v45, %v360_v40  ;;  %v1783_v45 = vld [vmem:[%s1573_s19 + $0x48] sm:$0xff]  ;;  %v1811_v20 = vld [vmem:[%s1573_s19 + $0x30] sm:$0xff] }
  0x31   : > { %755 = vmatpush.bf16.msra.mxu1 %v1441_v58 }
  0x34   : > { %552 = vrot.lane.b32.xlu1 %v501_v25, %s1528_s21  ;;  %956 = vrot.lane.b32.xlu2 %v941_v32, %s1527_s20  ;;  %v322_v25 = vor.u32 %v320_v18, %v318_v33  ;;  %v288_v32 = vshrl.u32 %v1723_v50, 16  ;;  %v946_v18 = vrot.slane %v1795_v6, 1 }
  0x35   : > { %330 = vrot.lane.b32.xlu0 %v279_v31, %s1528_s21  ;;  %v888_v31 = vsel %vm259_vm1, %v883_v5, %v887_v22 }
  0x36   : > { %v327_v35 = vsel %vm259_vm1, %v322_v25, %v326_v29  ;;  %v290_v33 = vor.u32 %v288_v32, %v286_v9  ;;  %v1819_v29 = vld [vmem:[%s1573_s19 + $0x28] sm:$0xff] }
  0x37   : > { %v300_v40 = vshll.u32 %v1819_v29, 16 }
  0x3c   : > { %340 = vrot.lane.b32.xlu1 %v319_v36, %s1528_s21  ;;  %364 = vrot.lane.b32.xlu2 %v349_v39, %s1527_s20  ;;  %v572_v36 = vsel %vm344_vm0, %v569_v34, %v571_v30  ;;  %v944_v39 = vrot.slane %v1734_v59, 1  ;;  %v891_v30 = vor.u32 %v889_v15, %v887_v22  ;;  %v296_v22 = vshrl.u32 %v1746_v23, 16 }
  0x3d   : > { %585 = vrot.lane.b32.xlu0 %v570_v17, %s1527_s20  ;;  %v1757_v17 = vrot.slane %v292_v26, 1  ;;  %v518_v26 = vshrl.u32 %v1764_v10, 16 }
  0x3e   : > { %v945_v34 = vsel %vm344_vm0, %v942_v43, %v944_v39  ;;  %v901_v43 = vshll.u32 %v1767_v46, 16  ;;  %v947_v32 = vsel %vm344_vm0, %v944_v39, %v946_v18 }
  0x3f   : > { %v295_v42 = vsel %vm259_vm1, %v290_v33, %v1757_v17 }
  0x40   : > { %v1797_v9 = vrot.slane %v901_v43, 1  ;;  %v302_v43 = vrot.slane %v300_v40, 1 }
  0x44   : > { %958 = vrot.lane.b32.xlu1 %v943_v48, %s1527_s20  ;;  %925 = vrot.lane.b32.xlu2 %v880_v54, %s1528_s21  ;;  %v510_v48 = vshrl.u32 %v1715_v38, 16 }
  0x45   : > { %374 = vrot.lane.b32.xlu0 %v359_v49, %s1527_s20  ;;  %v514_v49 = vshll.u32 %v1764_v10, 16 }
  0x46   : > { %v512_v54 = vor.u32 %v510_v48, %v508_v62  ;;  %v905_v62 = vshrl.u32 %v1767_v46, 16  ;;  %v1842_v48 = vld [vmem:[%s2053_s1 + $0x40] sm:$0xff] }
  0x47   : > { %v516_v56 = vrot.slane %v514_v49, 1  ;;  %v298_v49 = vor.u32 %v296_v22, %v1757_v17  ;;  %1048 = vmatpush.bf16.msra.mxu2 %v1842_v48 }
  0x48   : > { %v907_v5 = vor.u32 %v905_v62, %v1797_v9  ;;  %v1371_v62 = vld [vmem:[%s1573_s19 + $0x50] sm:$0xf]  ;;  %s1432_s19 = sshll.u32 %s2061_s12, 5 }
  0x49   : > { %v517_v14 = vsel %vm259_vm1, %v512_v54, %v516_v56  ;;  %v520_v39 = vor.u32 %v518_v26, %v516_v56  ;;  %v950_v54 = vrot.slane %v1783_v45, 1  ;;  %v303_v17 = vsel %vm259_vm1, %v298_v49, %v302_v43  ;;  %s2015_s22 = scalar_lea.vmem %s2055_s3, %s1432_s19 }
  0x4a   : > { %v851_v15 = vunpack.c.l.b16 %v1371_v62 }
  0x4c   : > { %366 = vrot.lane.b32.xlu1 %v351_v12, %s1527_s20  ;;  %332 = vrot.lane.b32.xlu2 %v287_v21, %s1528_s21  ;;  %v909_v12 = vshll.u32 %v1783_v45, 16  ;;  %v1454_v21 = vld [vmem:[%s2053_s1 + $0x28] sm:$0xff] }
  0x4d   : > { %554 = vrot.lane.b32.xlu0 %v509_v16, %s1528_s21  ;;  %v893_v16 = vshll.u32 %v1795_v6, 16  ;;  %1466 = vmatpush.bf16.msra.mxu3 %v1454_v21 }
  0x4e   : > { %v911_v25 = vrot.slane %v909_v12, 1  ;;  %678 = vmatpush.bf16.msra.mxu0 %v1454_v21  ;;  %v1854_v12 = vld [vmem:[%s2053_s1 + $0x38] sm:$0xff]  ;;  %v575_v21 = vrot.slane %v1811_v20, 1 }
  0x4f   : > { %1049 = vmatpush.bf16.msra.mxu2 %v1854_v12 }
  0x50   : > { %v912_v33 = vsel %vm259_vm1, %v907_v5, %v911_v25  ;;  %v354_v5 = vrot.slane %v1819_v29, 1 }
  0x54   : > { %927 = vrot.lane.b32.xlu1 %v888_v31, %s1528_s21  ;;  %587 = vrot.lane.b32.xlu2 %v572_v36, %s1527_s20  ;;  %v895_v31 = vrot.slane %v893_v16, 1  ;;  %v1453_v36 = vld [vmem:[%s2053_s1 + $0x20] sm:$0xff] }
  0x55   : > { %342 = vrot.lane.b32.xlu0 %v327_v35, %s1528_s21  ;;  %v522_v35 = vshll.u32 %v1811_v20, 16  ;;  %1467 = vmatpush.bf16.msra.mxu3 %v1453_v36 }
  0x56   : > { %679 = vmatpush.bf16.msra.mxu0 %v1453_v36 }
  0x5c   : > { %334 = vrot.lane.b32.xlu1 %v295_v42, %s1528_s21  ;;  %376 = vrot.lane.b32.xlu2 %v361_v47, %s1527_s20  ;;  %v896_v42 = vsel %vm259_vm1, %v891_v30, %v895_v31  ;;  %v1452_v47 = vld [vmem:[%s2053_s1 + $0x18] sm:$0xff] }
  0x5d   : > { %960 = vrot.lane.b32.xlu0 %v945_v34, %s1527_s20  ;;  %v524_v34 = vrot.slane %v522_v35, 1  ;;  %1468 = vmatpush.bf16.msra.mxu3 %v1452_v47  ;;  %v913_v35 = vshrl.u32 %v1783_v45, 16 }
  0x5e   : > { %680 = vmatpush.bf16.msra.mxu0 %v1452_v47 }
  0x5f   : > { %v525_v56 = vsel %vm259_vm1, %v520_v39, %v524_v34  ;;  %v304_v39 = vshrl.u32 %v1819_v29, 16 }
  0x61   : > { %1469 = vmatpush.bf16.msrb.mxu3 %v1443_v51  ;;  %v1862_v51 = vld [vmem:[%s2053_s1 + $0x30] sm:$0xff]  ;;  %v306_v49 = vor.u32 %v304_v39, %v302_v43 }
  0x62   : > { %1050 = vmatpush.bf16.msra.mxu2 %v1862_v51 }
  0x63   : > { %v311_v62 = vsel %vm259_vm1, %v306_v49, %v1682_v27 }
  0x64   : > { %589 = vrot.lane.b32.xlu1 %v574_v61, %s1527_s20  ;;  %556 = vrot.lane.b32.xlu2 %v517_v14, %s1528_s21  ;;  %v948_v61 = vrot.slane %v1767_v46, 1 }
  0x65   : > { %368 = vrot.lane.b32.xlu0 %v353_v63, %s1527_s20  ;;  %v897_v63 = vshrl.u32 %v1795_v6, 16  ;;  %1470 = vmatpush.bf16.msrb.mxu3 %v1442_v55  ;;  %v576_v55 = vsel %vm344_vm0, %v573_v52, %v575_v21 }
  0x66   : > { %v951_v14 = vsel %vm344_vm0, %v948_v61, %v950_v54  ;;  %v949_v52 = vsel %vm344_vm0, %v946_v18, %v948_v61 }
  0x67   : > { %v899_v16 = vor.u32 %v897_v63, %v895_v31  ;;  %v355_v31 = vsel %vm344_vm0, %v352_v53, %v354_v5  ;;  %v526_v53 = vshrl.u32 %v1811_v20, 16  ;;  %v357_v63 = vsel %vm344_vm0, %v354_v5, %v356_v44 }
  0x69   : > { %1471 = vmatpush.bf16.msrb.mxu3 %v1441_v58  ;;  %v904_v26 = vsel %vm259_vm1, %v899_v16, %v1797_v9  ;;  %v915_v58 = vor.u32 %v913_v35, %v911_v25  ;;  %v528_v18 = vor.u32 %v526_v53, %v524_v34 }
  0x6c   : > { %962 = vrot.lane.b32.xlu1 %v947_v32, %s1527_s20  ;;  %929 = vrot.lane.b32.xlu2 %v896_v42, %s1528_s21  ;;  %v852_v32 = vpack.c.b16 %v851_v15, %v851_v15 }
  0x6d   : > { %933 = vrot.lane.b32.xlu0 %v912_v33, %s1528_s21 }
  0x6e   : > { %v917_v36 = vshll.u32 %v852_v32, 16  ;;  %v952_v33 = vrot.slane %v852_v32, 1 }
  0x70   : > { %v919_v9 = vrot.slane %v917_v36, 1  ;;  %v953_v40 = vsel %vm344_vm0, %v950_v54, %v952_v33 }
  0x72   : > { %v920_v42 = vsel %vm259_vm1, %v915_v58, %v919_v9 }
  0x74   : > { %558 = vrot.lane.b32.xlu1 %v525_v56, %s1528_s21  ;;  %966 = vrot.lane.b32.xlu2 %v951_v14, %s1527_s20 }
  0x75   : > { %336 = vrot.lane.b32.xlu0 %v303_v17, %s1528_s21 }
  0x76   : > { %v329_v30 = vpop.permute.xlu2 %328 }
  0x77   : > { %v380_v25 = vsel %vm378_vm2, %v1582_v2, %v329_v30  ;;  %v533_v2 = vsel %vm259_vm1, %v528_v18, %v1604_v13  ;;  %v578_v13 = vsel %vm344_vm0, %v575_v21, %v577_v4 }
  0x7c   : > { %931 = vrot.lane.b32.xlu1 %v904_v26, %s1528_s21  ;;  %370 = vrot.lane.b32.xlu2 %v355_v31, %s1527_s20 }
  0x7d   : > { %591 = vrot.lane.b32.xlu0 %v576_v55, %s1527_s20 }
  0x7e   : > { %v551_v22 = vpop.permute.xlu2 %550 }
  0x7f   : > { %v600_v27 = vsel %vm378_vm2, %v1620_v24, %v551_v22 }
  0x84   : > { %968 = vrot.lane.b32.xlu1 %v953_v40, %s1527_s20  ;;  %935 = vrot.lane.b32.xlu2 %v920_v42, %s1528_s21 }
  0x85   : > { %964 = vrot.lane.b32.xlu0 %v949_v52, %s1527_s20 }
  0x86   : > { %v596_v47 = vpop.permute.xlu1 %595  ;;  %v565_v61 = vpop.permute.xlu2 %564 }
  0x87   : > { %v363_v54 = vpop.permute.xlu0 %362  ;;  %v614_v4 = vsel %vm378_vm2, %v1579_v1, %v565_v61 }
  0x88   : > { %v397_v56 = vsel %vm395_vm3, %v380_v25, %v363_v54 }
  0x89   : > { %1347 = vmatmul.msk.bf16.vlgmr.msra.gmra.mxu1 %vm656_vm4, %v397_v56 }
  0x8c   : > { %372 = vrot.lane.b32.xlu1 %v357_v63, %s1527_s20  ;;  %338 = vrot.lane.b32.xlu2 %v311_v62, %s1528_s21 }
  0x8d   : > { %560 = vrot.lane.b32.xlu0 %v533_v2, %s1528_s21 }
  0x8e   : > { %v955_v34 = vpop.permute.xlu1 %954  ;;  %v957_v17 = vpop.permute.xlu2 %956 }
  0x8f   : > { %v563_v43 = vpop.permute.xlu0 %562 }
  0x90   : > { %v612_v14 = vsel %vm378_vm2, %v1576_v0, %v563_v43 }
  0x91   : > { %v628_v44 = vsel %vm395_vm3, %v612_v14, %v596_v47 }
  0x92   : > { %1333 = vmatmul.msk.bf16.vlgmr.msra.gmra.mxu3 %vm656_vm4, %v628_v44 }
  0x93   : > { %1472 = vmatpush.bf16.msra.mxu3 %v1842_v48 }
  0x94   : > { %593 = vrot.lane.b32.xlu2 %v578_v13, %s1527_s20 }
  0x96   : > { %v584_v15 = vpop.permute.xlu1 %583  ;;  %v365_v30 = vpop.permute.xlu2 %364 }
  0x97   : > { %v922_v16 = vpop.permute.xlu0 %921  ;;  %v616_v5 = vsel %vm395_vm3, %v600_v27, %v584_v15  ;;  %1473 = vmatpush.bf16.msra.mxu3 %v1854_v12 }
  0x98   : > { %v971_v32 = vsel %vm378_vm2, %v1591_v7, %v922_v16  ;;  %1327 = vmatmul.msk.bf16.vlgmr.msra.gmra.mxu0 %vm656_vm4, %v616_v5 }
  0x99   : > { %v987_v0 = vsel %vm395_vm3, %v971_v32, %v955_v34 }
  0x9a   : > { %1422 = vmatmul.msk.bf16.vlgmr.msra.gmra.mxu2 %vm656_vm4, %v987_v0 }
  0x9b   : > { %1474 = vmatpush.bf16.msra.mxu3 %v1862_v51 }
  0x9e   : > { %v598_v24 = vpop.permute.xlu1 %597  ;;  %v926_v26 = vpop.permute.xlu2 %925 }
  0x9f   : > { %v924_v48 = vpop.permute.xlu0 %923  ;;  %v630_v21 = vsel %vm395_vm3, %v614_v4, %v598_v24 }
  0xa0   : > { %v973_v7 = vsel %vm378_vm2, %v1594_v8, %v924_v48 }
  0xa1   : > { %v989_v1 = vsel %vm395_vm3, %v973_v7, %v957_v17 }
  0xa2   : > { %1334 = vmatmul.msk.bf16.gmra.mxu3 %vm656_vm4, %v630_v21 }
  0xa6   : > { %v553_v12 = vpop.permute.xlu1 %552  ;;  %v333_v31 = vpop.permute.xlu2 %332 }
  0xa7   : > { %v331_v55 = vpop.permute.xlu0 %330  ;;  %v602_v33 = vsel %vm378_vm2, %v1626_v28, %v553_v12  ;;  %v384_v28 = vsel %vm378_vm2, %v1659_v60, %v333_v31 }
  0xa8   : > { %v382_v35 = vsel %vm378_vm2, %v1585_v3, %v331_v55  ;;  %v975_v3 = vsel %vm378_vm2, %v1639_v41, %v926_v26 }
  0xa9   : > { %v399_v51 = vsel %vm395_vm3, %v382_v35, %v365_v30 }
  0xaa   : > { %1348 = vmatmul.msk.bf16.gmra.mxu1 %vm656_vm4, %v399_v51  ;;  %1423 = vmatmul.msk.bf16.gmra.mxu2 %vm656_vm4, %v989_v1 }
  0xae   : > { %v341_v36 = vpop.permute.xlu1 %340  ;;  %v588_v8 = vpop.permute.xlu2 %587 }
  0xaf   : > { %v586_v58 = vpop.permute.xlu0 %585  ;;  %v392_v40 = vsel %vm378_vm2, %v1667_v11, %v341_v36 }
  0xb0   : > { %v618_v9 = vsel %vm395_vm3, %v602_v33, %v586_v58 }
  0xb1   : > { %1328 = vmatmul.msk.bf16.gmra.mxu0 %vm656_vm4, %v618_v9 }
  0xb6   : > { %v959_v22 = vpop.permute.xlu1 %958  ;;  %v377_v39 = vpop.permute.xlu2 %376 }
  0xb7   : > { %v375_v52 = vpop.permute.xlu0 %374  ;;  %v991_v53 = vsel %vm395_vm3, %v975_v3, %v959_v22 }
  0xb8   : > { %v409_v42 = vsel %vm395_vm3, %v392_v40, %v375_v52  ;;  %v2008_v40 = vld [vmem:[%s2054_s2] ss:$0 sm:$0xff] }
  0xb9   : > { %1353 = vmatmul.msk.bf16.vlgmr.msrb.gmra.mxu3 %vm656_vm4, %v409_v42 }
  0xba   : > { %1424 = vmatmul.msk.bf16.gmra.mxu2 %vm656_vm4, %v991_v53 }
  0xbe   : > { %v367_v25 = vpop.permute.xlu1 %366  ;;  %v557_v49 = vpop.permute.xlu2 %556 }
  0xbf   : > { %v555_v47 = vpop.permute.xlu0 %554  ;;  %v401_v41 = vsel %vm395_vm3, %v384_v28, %v367_v25  ;;  %v606_v43 = vsel %vm378_vm2, %v1715_v38, %v557_v49 }
  0xc0   : > { %v604_v11 = vsel %vm378_vm2, %v1655_v57, %v555_v47  ;;  %1349 = vmatmul.msk.bf16.gmra.mxu1 %vm656_vm4, %v401_v41 }
  0xc1   : > { %v620_v18 = vsel %vm395_vm3, %v604_v11, %v588_v8 }
  0xc2   : > { %1329 = vmatmul.msk.bf16.gmra.mxu0 %vm656_vm4, %v620_v18 }
  0xc6   : > { %v928_v54 = vpop.permute.xlu1 %927  ;;  %v930_v63 = vpop.permute.xlu2 %929 }
  0xc7   : > { %v343_v61 = vpop.permute.xlu0 %342  ;;  %v977_v57 = vsel %vm378_vm2, %v1698_v37, %v928_v54  ;;  %v979_v27 = vsel %vm378_vm2, %v1734_v59, %v930_v63 }
  0xc8   : > { %v394_v56 = vsel %vm378_vm2, %v1676_v19, %v343_v61 }
  0xc9   : > { %v411_v60 = vsel %vm395_vm3, %v394_v56, %v377_v39 }
  0xca   : > { %1354 = vmatmul.msk.bf16.gmra.mxu3 %vm656_vm4, %v411_v60 }
  0xce   : > { %v335_v2 = vpop.permute.xlu1 %334  ;;  %v967_v14 = vpop.permute.xlu2 %966 }
  0xcf   : > { %v961_v62 = vpop.permute.xlu0 %960  ;;  %v386_v19 = vsel %vm378_vm2, %v1723_v50, %v335_v2 }
  0xd0   : > { %v993_v34 = vsel %vm395_vm3, %v977_v57, %v961_v62 }
  0xd1   : > { %1425 = vmatmul.msk.bf16.gmra.mxu2 %vm656_vm4, %v993_v34 }
  0xd6   : > { %v590_v17 = vpop.permute.xlu1 %589  ;;  %v371_v50 = vpop.permute.xlu2 %370 }
  0xd7   : > { %v369_v44 = vpop.permute.xlu0 %368  ;;  %v622_v13 = vsel %vm395_vm3, %v606_v43, %v590_v17 }
  0xd8   : > { %1330 = vmatmul.msk.bf16.gmra.mxu0 %vm656_vm4, %v622_v13  ;;  %v403_v37 = vsel %vm395_vm3, %v386_v19, %v369_v44 }
  0xd9   : > { %1350 = vmatmul.msk.bf16.gmra.mxu1 %vm656_vm4, %v403_v37 }
  0xde   : > { %v963_v15 = vpop.permute.xlu1 %962  ;;  %v936_v24 = vpop.permute.xlu2 %935 }
  0xdf   : > { %v934_v16 = vpop.permute.xlu0 %933  ;;  %v995_v38 = vsel %vm395_vm3, %v979_v27, %v963_v15  ;;  %v985_v12 = vsel %vm378_vm2, %v1783_v45, %v936_v24 }
  0xe0   : > { %v983_v5 = vsel %vm378_vm2, %v1767_v46, %v934_v16 }
  0xe1   : > { %v999_v30 = vsel %vm395_vm3, %v983_v5, %v967_v14  ;;  %1426 = vmatmul.msk.bf16.gmra.mxu2 %vm656_vm4, %v995_v38 }
  0xe2   : > { %1428 = vmatmul.msk.bf16.vlgmr.msra.gmra.mxu3 %vm656_vm4, %v999_v30 }
  0xe6   : > { %v559_v32 = vpop.permute.xlu1 %558  ;;  %v339_v7 = vpop.permute.xlu2 %338 }
  0xe7   : > { %v337_v0 = vpop.permute.xlu0 %336  ;;  %v608_v46 = vsel %vm378_vm2, %v1764_v10, %v559_v32  ;;  %v390_v10 = vsel %vm378_vm2, %v1819_v29, %v339_v7 }
  0xe8   : > { %v388_v4 = vsel %vm378_vm2, %v1746_v23, %v337_v0 }
  0xe9   : > { %v405_v59 = vsel %vm395_vm3, %v388_v4, %v371_v50 }
  0xea   : > { %1351 = vmatmul.msk.bf16.gmra.mxu1 %vm656_vm4, %v405_v59 }
  0xee   : > { %v932_v48 = vpop.permute.xlu1 %931  ;;  %v594_v36 = vpop.permute.xlu2 %593 }
  0xef   : > { %v592_v21 = vpop.permute.xlu0 %591  ;;  %v981_v23 = vsel %vm378_vm2, %v1795_v6, %v932_v48 }
  0xf0   : > { %v624_v26 = vsel %vm395_vm3, %v608_v46, %v592_v21 }
  0xf1   : > { %1331 = vmatmul.msk.bf16.gmra.mxu0 %vm656_vm4, %v624_v26 }
  0xf6   : > { %v969_v55 = vpop.permute.xlu1 %968 }
  0xf7   : > { %v965_v31 = vpop.permute.xlu0 %964  ;;  %v1001_v35 = vsel %vm395_vm3, %v985_v12, %v969_v55 }
  0xf8   : > { %v997_v51 = vsel %vm395_vm3, %v981_v23, %v965_v31  ;;  %1429 = vmatmul.msk.bf16.gmra.mxu3 %vm656_vm4, %v1001_v35 }
  0xf9   : > { %1427 = vmatmul.msk.bf16.gmra.mxu2 %vm656_vm4, %v997_v51 }
  0xfe   : > { %v373_v1 = vpop.permute.xlu1 %372 }
  0xff   : > { %v561_v33 = vpop.permute.xlu0 %560  ;;  %v407_v45 = vsel %vm395_vm3, %v390_v10, %v373_v1 }
 0x100   : > { %v610_v6 = vsel %vm378_vm2, %v1811_v20, %v561_v33  ;;  %1352 = vmatmul.msk.bf16.gmra.mxu1 %vm656_vm4, %v407_v45 }
 0x101   : > { %v626_v58 = vsel %vm395_vm3, %v610_v6, %v594_v36 }
 0x102   : > { %1332 = vmatmul.msk.bf16.gmra.mxu0 %vm656_vm4, %v626_v58 }
 0x106   : > { %v757_v8 = vpop.f32.mrf.mxu1 }
 0x10e   : > { %v759_v9 = vpop.f32.mrf.mxu1 }
 0x115   : > { %v706_v3 = vpop.f32.mrf.mxu3  ;;  %v682_v22 = vpop.f32.mrf.mxu0 }
 0x116   : > { %v758_v29 = vadd.f32 %v757_v8, %v682_v22 }
 0x11d   : > { %v708_v52 = vpop.f32.mrf.mxu3  ;;  %v1052_v53 = vpop.f32.mrf.mxu2 }
 0x11e   : > { %v1084_v42 = vadd.f32 %v1052_v53, %v758_v29  ;;  %v684_v20 = vpop.f32.mrf.mxu0 }
 0x120   : > { %v1096_v39 = vadd.f32 %v2008_v40, %v1084_v42 }
 0x122   : > { %v1104_v28 = vmax.f32 %v1096_v39, 0.0 }
 0x124   : > { %v1112_v25 = vpack.c.bf16 %v1104_v28, %v1104_v28 }
 0x125   : > { %v2017_v47 = vpop.f32.mrf.mxu3  ;;  %v1054_v41 = vpop.f32.mrf.mxu2 }
 0x126   : > { %1121 = vst.msk [vmem:[%s2015_s22] sm:$0xf] %vm1120_vm5, %v1112_v25 }
 0x127   : > { %v761_v11 = vpop.f32.mrf.mxu1 }
 0x12d   : > { %v712_v18 = vpop.f32.mrf.mxu3  ;;  %v1056_v49 = vpop.f32.mrf.mxu2 }
 0x12e   : > { %v686_v54 = vpop.f32.mrf.mxu0 }
 0x12f   : > { %v762_v61 = vadd.f32 %v761_v11, %v686_v54  ;;  %v763_v56 = vpop.f32.mrf.mxu1 }
 0x131   : > { %v1085_v60 = vadd.f32 %v1056_v49, %v762_v61 }
 0x133   : > { %v1097_v63 = vadd.f32 %v2008_v40, %v1085_v60 }
 0x135   : > { %v1105_v2 = vmax.f32 %v1097_v63, 0.0  ;;  %v1058_v57 = vpop.f32.mrf.mxu2 }
 0x136   : > { %v688_v62 = vpop.f32.mrf.mxu0 }
 0x137   : > { %v1113_v34 = vpack.c.bf16 %v1105_v2, %v1105_v2 }
 0x139   : > { %1122 = vst.msk [vmem:[%s2015_s22 + $0x4] sm:$0xf] %vm1120_vm5, %v1113_v34 }
 0x13c   : > { %v781_v43 = vpop.f32.mrf.mxu3 }
 0x13d   : > { %v1060_v17 = vpop.f32.mrf.mxu2  ;;  %v765_v14 = vpop.f32.mrf.mxu1  ;;  %v782_v23 = vadd.f32 %v781_v43, %v706_v3 }
 0x13f   : > { %v690_v19 = vpop.f32.mrf.mxu0 }
 0x140   : > { %v766_v44 = vadd.f32 %v765_v14, %v690_v19 }
 0x142   : > { %v1086_v13 = vadd.f32 %v1060_v17, %v766_v44 }
 0x144   : > { %v1098_v37 = vadd.f32 %v2008_v40, %v1086_v13  ;;  %v783_v27 = vpop.f32.mrf.mxu3 }
 0x145   : > { %v1062_v15 = vpop.f32.mrf.mxu2  ;;  %v767_v16 = vpop.f32.mrf.mxu1 }
 0x146   : > { %v1106_v38 = vmax.f32 %v1098_v37, 0.0 }
 0x147   : > { %v692_v5 = vpop.f32.mrf.mxu0 }
 0x148   : > { %v1114_v50 = vpack.c.bf16 %v1106_v38, %v1106_v38 }
 0x14a   : > { %1123 = vst.msk [vmem:[%s2015_s22 + $0x8] sm:$0xf] %vm1120_vm5, %v1114_v50 }
 0x14d   : > { %v785_v30 = vpop.f32.mrf.mxu3 }
 0x14e   : > { %v786_v42 = vadd.f32 %v785_v30, %v2017_v47 }
 0x154   : > { %v1064_v32 = vpop.f32.mrf.mxu2 }
 0x155   : > { %v787_v0 = vpop.f32.mrf.mxu3  ;;  %v694_v4 = vpop.f32.mrf.mxu0 }
 0x156   : > { %v769_v59 = vpop.f32.mrf.mxu1 }
 0x157   : > { %v770_v24 = vadd.f32 %v769_v59, %v694_v4 }
 0x159   : > { %v1087_v48 = vadd.f32 %v1064_v32, %v770_v24 }
 0x15b   : > { %v1099_v46 = vadd.f32 %v2008_v40, %v1087_v48 }
 0x15c   : > { %v1066_v21 = vpop.f32.mrf.mxu2 }
 0x15d   : > { %v1107_v26 = vmax.f32 %v1099_v46, 0.0  ;;  %v696_v7 = vpop.f32.mrf.mxu0 }
 0x15e   : > { %v771_v12 = vpop.f32.mrf.mxu1 }
 0x15f   : > { %v1115_v55 = vpack.c.bf16 %v1107_v26, %v1107_v26 }
 0x161   : > { %1124 = vst.msk [vmem:[%s2015_s22 + $0xc] sm:$0xf] %vm1120_vm5, %v1115_v55 }
 0x164   : > { %v1068_v31 = vpop.f32.mrf.mxu2 }
 0x165   : > { %v1076_v35 = vpop.f32.mrf.mxu3 }
 0x166   : > { %v1090_v51 = vadd.f32 %v1076_v35, %v782_v23 }
 0x167   : > { %v773_v10 = vpop.f32.mrf.mxu1 }
 0x168   : > { %v1102_v1 = vadd.f32 %v2008_v40, %v1090_v51 }
 0x16a   : > { %v1110_v36 = vmax.f32 %v1102_v1, 0.0 }
 0x16c   : > { %v1118_v33 = vpack.c.bf16 %v1110_v36, %v1110_v36  ;;  %v1070_v45 = vpop.f32.mrf.mxu2 }
 0x16d   : > { %v1078_v6 = vpop.f32.mrf.mxu3 }
 0x16e   : > { %1127 = vst.msk [vmem:[%s2015_s22 + $0x18] sm:$0xf] %vm1120_vm5, %v1118_v33  ;;  %v698_v58 = vpop.f32.mrf.mxu0 }
 0x16f   : > { %v774_v8 = vadd.f32 %v773_v10, %v698_v58  ;;  %v775_v9 = vpop.f32.mrf.mxu1 }
 0x171   : > { %v1088_v22 = vadd.f32 %v1068_v31, %v774_v8 }
 0x173   : > { %v1100_v29 = vadd.f32 %v2008_v40, %v1088_v22 }
 0x175   : > { %v1108_v3 = vmax.f32 %v1100_v29, 0.0 }
 0x176   : > { %v700_v52 = vpop.f32.mrf.mxu0 }
 0x177   : > { %v1116_v53 = vpack.c.bf16 %v1108_v3, %v1108_v3 }
 0x179   : > { %1125 = vst.msk [vmem:[%s2015_s22 + $0x10] sm:$0xf] %vm1120_vm5, %v1116_v53 }
 0x17b   : > { %v1080_v20 = vpop.f32.mrf.mxu3 }
 0x17c   : > { %v1072_v39 = vpop.f32.mrf.mxu2  ;;  %v1091_v28 = vadd.f32 %v1080_v20, %v786_v42 }
 0x17d   : > { %v777_v25 = vpop.f32.mrf.mxu1 }
 0x17e   : > { %v1103_v41 = vadd.f32 %v2008_v40, %v1091_v28 }
 0x17f   : > { %v702_v11 = vpop.f32.mrf.mxu0 }
 0x180   : > { %v1111_v18 = vmax.f32 %v1103_v41, 0.0  ;;  %v778_v49 = vadd.f32 %v777_v25, %v702_v11 }
 0x182   : > { %v1119_v54 = vpack.c.bf16 %v1111_v18, %v1111_v18  ;;  %v1089_v61 = vadd.f32 %v1072_v39, %v778_v49 }
 0x183   : > { %v1082_v56 = vpop.f32.mrf.mxu3 }
 0x184   : > { %1128 = vst.msk [vmem:[%s2015_s22 + $0x1c] sm:$0xf] %vm1120_vm5, %v1119_v54  ;;  %v1101_v60 = vadd.f32 %v2008_v40, %v1089_v61  ;;  %v1074_v63 = vpop.f32.mrf.mxu2 }
 0x185   : > { %v779_v2 = vpop.f32.mrf.mxu1 }
 0x186   : > { %v1109_v47 = vmax.f32 %v1101_v60, 0.0 }
 0x187   : > { %v704_v57 = vpop.f32.mrf.mxu0 }
 0x188   : > { %v1117_v62 = vpack.c.bf16 %v1109_v47, %v1109_v47 }
 0x18a   : > { %1126 = vst.msk [vmem:[%s2015_s22 + $0x14] sm:$0xf] %vm1120_vm5, %v1117_v62 }
 0x18b PF: > { %s13_s14 = sadd.s32 1, %s1525_s14   ;;  %s2056_s12 = smov %s1521_s13 }
 0x18c   : > { %p10_p5 = scmp.ge.s32.totalorder %s13_s14, 4   ;;  %s2057_s13 = smov %s2059_s15 }
 0x18e   :  { %12 = sbr.rel (!%p10_p5) target bundleno = 2 (0x2), region = 67 }

// kernel: unet_decoder_attention.8
= control target key start
LH: loop header
LB: loop body
LE: loop exit
PB: predicated region body
PF: predicated region fallthrough
CT: control target
= control target key end

     0   :  { %s1484_s12 = smov 0   ;;  %s1486_s13 = smov 0   ;;  %s1973_s0 = inlined_call_operand.vmem [shape: bf16[2,11,16,8], index: 0, kind: input, shape index: {}]   ;;  %s1974_s1 = inlined_call_operand.vmem [shape: bf16[3,24,8], index: 1, kind: input, shape index: {}]   ;;  %s1975_s2 = inlined_call_operand.vmem [shape: f32[1,8], index: 2, kind: input, shape index: {}]   ;;  %s1976_s3 = inlined_call_operand.vmem [shape: bf16[2,8,8,8], index: 3, kind: output, shape index: {}]  }
   0x1   :  { %s1488_s14 = smov 0  }
   0x2 LB: > { %s25_s15 = sadd.s32 1, %s1456_s13  ;;  %p1198_p0 = scmp.ge.s32.totalorder %s1460_s14, 1  ;;  %s1460_s14 = sphi %s1488_s14, %s13_s14   ;;  %s1456_s13 = sphi %s1486_s13, %s1978_s13   ;;  %s1452_s12 = sphi %s1484_s12, %s1977_s12  }
   0x3   : > { %p27_p1 = scmp.ge.s32.totalorder %s25_s15, 2  ;;  %p151_p2 = scmp.lt.s32.totalorder %s1460_s14, 3 }
   0x5   : > { %s1980_s15 = smov (%p27_p1, %s25_s15), 0  ;;  %p152_p3 = pnand %p1198_p0, %p151_p2 }
   0x6   : > { %p179_p4 = scmp.lt.s32.totalorder (!%p152_p3), %s1452_s12, 1  ;;  %s1462_s20 = smov (!%p152_p3), 16  }
   0x7   : > { %155 = sbr.rel (%p152_p3) target bundleno = 395 (0x18b), region = 32  ;;  %s1463_s21 = smov (!%p152_p3), 8  }
   0xc   : > { %s1982_s12 = smov (!%p179_p4, %s1452_s12), 1  ;;  %vm344_vm0 = vcmask 1046528   ;;  %vm259_vm1 = vsmask.f32 7424  ;;  %vm658_vm2 = vcmask 1043456   ;;  %vm378_vm3 = vcmask 64512  }
   0xd   : > { %s1410_s16 = smul.u32 88, %s1982_s12  ;;  %vm395_vm4 = vcmask 130048   ;;  %vm641_vm5 = vcmask 195584   ;;  %s1376_s9 = sshll.u32 %s1982_s12, 5  ;;  %vm1094_vm6 = vcmask 60416  }
   0xf   : > { %s1508_s19 = scalar_lea.vmem %s1973_s0, %s1410_s16  ;;  %s1936_s16 = scalar_lea.vmem %s1976_s3, %s1376_s9 }
  0x10   : > { %v1511_v0 = vld [vmem:[%s1508_s19 + $0x38] sm:$0xff]  ;;  %v1514_v1 = vld [vmem:[%s1508_s19 + $0x40] sm:$0xff]  ;;  %v1520_v3 = vld [vmem:[%s1508_s19 + $0x8] sm:$0xff] }
  0x11   : > { %v1517_v2 = vld [vmem:[%s1508_s19] sm:$0xff]  ;;  %v574_v4 = vrot.slane %v1511_v0, 1  ;;  %v576_v5 = vrot.slane %v1514_v1, 1  ;;  %v1526_v7 = vld [vmem:[%s1508_s19 + $0x10] sm:$0xff]  ;;  %v1529_v8 = vld [vmem:[%s1508_s19 + $0x18] sm:$0xff]  ;;  %v527_v9 = vshll.u32 %v1511_v0, 16 }
  0x12   : > { %v345_v6 = vrot.slane %v1517_v2, 1  ;;  %v346_v10 = vrot.slane %v1520_v3, 1  ;;  %v531_v11 = vshrl.u32 %v1511_v0, 16  ;;  %v535_v14 = vshll.u32 %v1514_v1, 16  ;;  %v1555_v24 = vld [vmem:[%s1508_s19 + $0x8] sm:$0xff]  ;;  %v1561_v28 = vld [vmem:[%s1508_s19 + $0x10] sm:$0xff] }
  0x13   : > { %v577_v12 = vsel %vm344_vm0, %v574_v4, %v576_v5  ;;  %v1539_v13 = vrot.slane %v527_v9, 1  ;;  %v920_v16 = vrot.slane %v1526_v7, 1  ;;  %v921_v17 = vrot.slane %v1529_v8, 1  ;;  %v1250_v32 = vld [vmem:[%s1508_s19 + $0x48] sm:$0xf]  ;;  %v1574_v41 = vld [vmem:[%s1508_s19 + $0x20] sm:$0xff] }
  0x14   : > { %592 = vrot.lane.b32.xlu1 %v577_v12, %s1462_s20  ;;  %v347_v15 = vsel %vm344_vm0, %v345_v6, %v346_v10  ;;  %v839_v19 = vshll.u32 %v1526_v7, 16  ;;  %v537_v20 = vrot.slane %v535_v14, 1  ;;  %v261_v21 = vshrl.u32 %v1517_v2, 16  ;;  %v1590_v57 = vld [vmem:[%s1508_s19 + $0x18] sm:$0xff]  ;;  %v1594_v60 = vld [vmem:[%s1508_s19 + $0x10] sm:$0xff] }
  0x15   : > { %362 = vrot.lane.b32.xlu0 %v347_v15, %s1462_s20  ;;  %v533_v18 = vor.u32 %v531_v11, %v1539_v13  ;;  %v263_v22 = vshll.u32 %v1517_v2, 16  ;;  %v268_v23 = vshll.u32 %v1520_v3, 16  ;;  %v922_v27 = vsel %vm344_vm0, %v920_v16, %v921_v17  ;;  %v1602_v11 = vld [vmem:[%s1508_s19 + $0x30] sm:$0xff] }
  0x16   : > { %v837_v29 = vshrl.u32 %v1526_v7, 16  ;;  %v841_v30 = vrot.slane %v839_v19, 1  ;;  %v844_v31 = vshll.u32 %v1529_v8, 16  ;;  %v477_v36 = vunpack.c.l.b16 %v1250_v32  ;;  %v1611_v19 = vld [vmem:[%s1508_s19 + $0x38] sm:$0xff] }
  0x17   : > { %v265_v25 = vrot.slane %v263_v22, 1  ;;  %v270_v26 = vrot.slane %v268_v23, 1  ;;  %v538_v33 = vsel %vm259_vm1, %v533_v18, %v537_v20  ;;  %v563_v37 = vrot.slane %v1555_v24, 1 }
  0x18   : > { %v564_v38 = vrot.slane %v1561_v28, 1  ;;  %v842_v39 = vor.u32 %v841_v30, %v837_v29  ;;  %v846_v40 = vrot.slane %v844_v31, 1  ;;  %v487_v42 = vshll.u32 %v1561_v28, 16 }
  0x19   : > { %v266_v34 = vor.u32 %v265_v25, %v261_v21  ;;  %v480_v43 = vshrl.u32 %v1555_v24, 16  ;;  %v482_v44 = vshll.u32 %v1555_v24, 16  ;;  %v478_v45 = vpack.c.b16 %v477_v36, %v477_v36 }
  0x1a   : > { %v565_v47 = vsel %vm344_vm0, %v563_v37, %v564_v38  ;;  %v847_v48 = vsel %vm259_vm1, %v842_v39, %v846_v40  ;;  %v848_v49 = vshrl.u32 %v1529_v8, 16  ;;  %v852_v50 = vshll.u32 %v1574_v41, 16  ;;  %v1633_v37 = vld [vmem:[%s1508_s19 + $0x28] sm:$0xff] }
  0x1b   : > { %v271_v35 = vsel %vm259_vm1, %v266_v34, %v270_v26  ;;  %v484_v46 = vrot.slane %v482_v44, 1  ;;  %v489_v51 = vrot.slane %v487_v42, 1  ;;  %v539_v53 = vshrl.u32 %v1514_v1, 16 }
  0x1c   : > { %937 = vrot.lane.b32.xlu1 %v922_v27, %s1462_s20  ;;  %328 = vrot.lane.b32.xlu2 %v271_v35, %s1463_s21  ;;  %v543_v54 = vshll.u32 %v478_v45, 16  ;;  %v578_v56 = vrot.slane %v478_v45, 1  ;;  %v850_v58 = vor.u32 %v848_v49, %v846_v40  ;;  %v854_v59 = vrot.slane %v852_v50, 1  ;;  %v1658_v50 = vld [vmem:[%s1508_s19 + $0x18] sm:$0xff] }
  0x1d   : > { %559 = vrot.lane.b32.xlu0 %v538_v33, %s1463_s21  ;;  %v485_v52 = vor.u32 %v484_v46, %v480_v43  ;;  %v541_v61 = vor.u32 %v539_v53, %v537_v20  ;;  %v491_v6 = vshrl.u32 %v1561_v28, 16  ;;  %v495_v9 = vshll.u32 %v1590_v57, 16  ;;  %v215_v46 = vld [vmem:[%s1508_s19 + $0x40] sm:$0xf] }
  0x1e   : > { %v545_v62 = vrot.slane %v543_v54, 1  ;;  %v579_v63 = vsel %vm344_vm0, %v576_v5, %v578_v56  ;;  %v855_v12 = vsel %vm259_vm1, %v850_v58, %v854_v59  ;;  %v272_v14 = vshrl.u32 %v1520_v3, 16 }
  0x1f   : > { %v490_v55 = vsel %vm259_vm1, %v485_v52, %v489_v51  ;;  %v276_v15 = vshll.u32 %v1594_v60, 16  ;;  %v493_v18 = vor.u32 %v491_v6, %v489_v51  ;;  %v497_v5 = vrot.slane %v495_v9, 1 }
  0x20   : > { %v546_v16 = vsel %vm259_vm1, %v541_v61, %v545_v62  ;;  %v308_v20 = vshll.u32 %v1602_v11, 16  ;;  %v274_v21 = vor.u32 %v272_v14, %v270_v26  ;;  %v923_v23 = vrot.slane %v1574_v41, 1 }
  0x21   : > { %v278_v22 = vrot.slane %v276_v15, 1  ;;  %v498_v25 = vsel %vm259_vm1, %v493_v18, %v497_v5  ;;  %v312_v29 = vshrl.u32 %v1602_v11, 16  ;;  %v316_v30 = vshll.u32 %v1611_v19, 16 }
  0x22   : > { %v1617_v27 = vrot.slane %v308_v20, 1  ;;  %v924_v32 = vsel %vm344_vm0, %v921_v17, %v923_v23  ;;  %v566_v34 = vrot.slane %v1590_v57, 1  ;;  %v348_v35 = vrot.slane %v1594_v60, 1 }
  0x23   : > { %v279_v31 = vsel %vm259_vm1, %v274_v21, %v278_v22  ;;  %v318_v33 = vrot.slane %v316_v30, 1  ;;  %v856_v40 = vshrl.u32 %v1574_v41, 16  ;;  %v860_v42 = vshll.u32 %v1633_v37, 16 }
  0x24   : > { %580 = vrot.lane.b32.xlu1 %v565_v47, %s1462_s20  ;;  %547 = vrot.lane.b32.xlu2 %v490_v55, %s1463_s21  ;;  %v314_v26 = vor.u32 %v312_v29, %v1617_v27  ;;  %v567_v17 = vsel %vm344_vm0, %v564_v38, %v566_v34  ;;  %v349_v39 = vsel %vm344_vm0, %v346_v10, %v348_v35  ;;  %v925_v43 = vrot.slane %v1633_v37, 1  ;;  %v1650_v38 = vld [vmem:[%s1508_s19 + $0x20] sm:$0xff] }
  0x25   : > { %904 = vrot.lane.b32.xlu0 %v847_v48, %s1463_s21  ;;  %v356_v44 = vrot.slane %v1602_v11, 1  ;;  %v358_v45 = vrot.slane %v1611_v19, 1  ;;  %v858_v10 = vor.u32 %v856_v40, %v854_v59  ;;  %v862_v47 = vrot.slane %v860_v42, 1  ;;  %v1669_v59 = vld [vmem:[%s1508_s19 + $0x30] sm:$0xff] }
  0x26   : > { %v319_v36 = vsel %vm259_vm1, %v314_v26, %v318_v33  ;;  %v926_v48 = vsel %vm344_vm0, %v923_v23, %v925_v43  ;;  %v499_v51 = vshrl.u32 %v1590_v57, 16  ;;  %v503_v52 = vshll.u32 %v1650_v38, 16  ;;  %v1681_v23 = vld [vmem:[%s1508_s19 + $0x20] sm:$0xff] }
  0x27   : > { %v359_v49 = vsel %vm344_vm0, %v356_v44, %v358_v45  ;;  %v257_v53 = vunpack.c.l.b16 %v215_v46  ;;  %v863_v54 = vsel %vm259_vm1, %v858_v10, %v862_v47  ;;  %v280_v55 = vshrl.u32 %v1594_v60, 16  ;;  %v1699_v10 = vld [vmem:[%s1508_s19 + $0x28] sm:$0xff]  ;;  %v1702_v46 = vld [vmem:[%s1508_s19 + $0x40] sm:$0xff] }
  0x28   : > { %v284_v56 = vshll.u32 %v1658_v50, 16  ;;  %v350_v58 = vrot.slane %v1658_v50, 1  ;;  %v501_v61 = vor.u32 %v499_v51, %v497_v5  ;;  %v505_v62 = vrot.slane %v503_v52, 1  ;;  %v414_v51 = vld [vmem:[%s1974_s1 + $0x8] sm:$0xf] }
  0x29   : > { %v282_v6 = vor.u32 %v280_v55, %v278_v22  ;;  %v864_v14 = vshrl.u32 %v1633_v37, 16  ;;  %v868_v15 = vshll.u32 %v1669_v59, 16  ;;  %v320_v18 = vshrl.u32 %v1611_v19, 16 }
  0x2a   : > { %v286_v9 = vrot.slane %v284_v56, 1  ;;  %v568_v30 = vrot.slane %v1650_v38, 1  ;;  %v292_v26 = vshll.u32 %v1681_v23, 16  ;;  %v570_v52 = vrot.slane %v1699_v10, 1 }
  0x2b   : > { %v866_v5 = vor.u32 %v864_v14, %v862_v47  ;;  %v870_v22 = vrot.slane %v868_v15, 1 }
  0x2c   : > { %594 = vrot.lane.b32.xlu1 %v579_v63, %s1462_s20  ;;  %561 = vrot.lane.b32.xlu2 %v546_v16, %s1463_s21  ;;  %v258_v63 = vpack.c.b16 %v257_v53, %v257_v53  ;;  %v506_v16 = vsel %vm259_vm1, %v501_v61, %v505_v62  ;;  %v287_v21 = vsel %vm259_vm1, %v282_v6, %v286_v9  ;;  %v352_v53 = vrot.slane %v1681_v23, 1 }
  0x2d   : > { %906 = vrot.lane.b32.xlu0 %v855_v12, %s1463_s21  ;;  %v351_v12 = vsel %vm344_vm0, %v348_v35, %v350_v58 }
  0x2e   : > { %v324_v20 = vshll.u32 %v258_v63, 16  ;;  %v360_v40 = vrot.slane %v258_v63, 1  ;;  %v571_v63 = vsel %vm344_vm0, %v568_v30, %v570_v52  ;;  %v353_v6 = vsel %vm344_vm0, %v350_v58, %v352_v53 }
  0x30   : > { %v326_v29 = vrot.slane %v324_v20, 1  ;;  %v361_v47 = vsel %vm344_vm0, %v358_v45, %v360_v40  ;;  %v708_v45 = vunpack.c.l.b16 %v414_v51  ;;  %v1385_v20 = vld [vmem:[%s1974_s1] sm:$0xff]  ;;  %v515_v40 = vshrl.u32 %v1699_v10, 16 }
  0x32   : > { %v710_v56 = vpack.c.b16 %v708_v45, %v708_v45  ;;  %v1394_v45 = vld [vmem:[%s1974_s1 + $0xc] sm:$0xff] }
  0x34   : > { %549 = vrot.lane.b32.xlu1 %v498_v25, %s1463_s21  ;;  %939 = vrot.lane.b32.xlu2 %v924_v32, %s1462_s20  ;;  %v322_v25 = vor.u32 %v320_v18, %v318_v33  ;;  %v288_v32 = vshrl.u32 %v1658_v50, 16  ;;  %v729_v14 = vsel %vm658_vm2, %v710_v56, 0  ;;  %v872_v18 = vshrl.u32 %v1669_v59, 16 }
  0x35   : > { %330 = vrot.lane.b32.xlu0 %v279_v31, %s1463_s21  ;;  %v871_v31 = vsel %vm259_vm1, %v866_v5, %v870_v22  ;;  %737 = vmatpush.bf16.msra.mxu1 %v729_v14  ;;  %v1744_v5 = vld [vmem:[%s1508_s19 + $0x30] sm:$0xff] }
  0x36   : > { %v327_v35 = vsel %vm259_vm1, %v322_v25, %v326_v29  ;;  %v290_v33 = vor.u32 %v288_v32, %v286_v9  ;;  %v1727_v9 = vld [vmem:[%s1508_s19 + $0x38] sm:$0xff]  ;;  %v1285_v25 = vld [vmem:[%s1974_s1 + $0x14] sm:$0xf]  ;;  %v874_v32 = vor.u32 %v872_v18, %v870_v22 }
  0x37   : > { %v876_v58 = vshll.u32 %v1727_v9, 16 }
  0x39   : > { %738 = vmatpush.bf16.msra.mxu1 %v1385_v20 }
  0x3c   : > { %340 = vrot.lane.b32.xlu1 %v319_v36, %s1463_s21  ;;  %364 = vrot.lane.b32.xlu2 %v349_v39, %s1462_s20  ;;  %v569_v36 = vsel %vm344_vm0, %v566_v34, %v568_v30  ;;  %v927_v39 = vrot.slane %v1669_v59, 1 }
  0x3d   : > { %582 = vrot.lane.b32.xlu0 %v567_v17, %s1462_s20  ;;  %v1692_v17 = vrot.slane %v292_v26, 1  ;;  %v637_v26 = vunpack.c.l.b16 %v1285_v25 }
  0x3e   : > { %v928_v34 = vsel %vm344_vm0, %v925_v43, %v927_v39  ;;  %v884_v43 = vshll.u32 %v1702_v46, 16 }
  0x3f   : > { %v295_v42 = vsel %vm259_vm1, %v290_v33, %v1692_v17 }
  0x44   : > { %941 = vrot.lane.b32.xlu1 %v926_v48, %s1462_s20  ;;  %908 = vrot.lane.b32.xlu2 %v863_v54, %s1463_s21  ;;  %v507_v48 = vshrl.u32 %v1650_v38, 16  ;;  %v1718_v54 = vld [vmem:[%s1508_s19 + $0x48] sm:$0xff] }
  0x45   : > { %374 = vrot.lane.b32.xlu0 %v359_v49, %s1462_s20  ;;  %v511_v49 = vshll.u32 %v1699_v10, 16  ;;  %v892_v15 = vshll.u32 %v1718_v54, 16 }
  0x46   : > { %v509_v55 = vor.u32 %v507_v48, %v505_v62  ;;  %v888_v62 = vshrl.u32 %v1702_v46, 16 }
  0x47   : > { %v513_v61 = vrot.slane %v511_v49, 1  ;;  %v894_v30 = vrot.slane %v892_v15, 1  ;;  %v880_v15 = vshrl.u32 %v1727_v9, 16 }
  0x4c   : > { %366 = vrot.lane.b32.xlu1 %v351_v12, %s1462_s20  ;;  %332 = vrot.lane.b32.xlu2 %v287_v21, %s1463_s21  ;;  %v1729_v12 = vrot.slane %v884_v43, 1  ;;  %v929_v21 = vrot.slane %v1727_v9, 1 }
  0x4d   : > { %551 = vrot.lane.b32.xlu0 %v506_v16, %s1463_s21  ;;  %v514_v16 = vsel %vm259_vm1, %v509_v55, %v513_v61  ;;  %v1361_v55 = vld [vmem:[%s1974_s1 + $0x20] sm:$0xf] }
  0x4e   : > { %v890_v29 = vor.u32 %v888_v62, %v1729_v12  ;;  %v930_v33 = vsel %vm344_vm0, %v927_v39, %v929_v21  ;;  %v517_v39 = vor.u32 %v515_v40, %v513_v61  ;;  %v994_v61 = vunpack.c.l.b16 %v1361_v55 }
  0x50   : > { %v996_v62 = vpack.c.b16 %v994_v61, %v994_v61 }
  0x52   : > { %v1015_v25 = vsel %vm658_vm2, %v996_v62, 0 }
  0x53   : > { %1023 = vmatpush.bf16.msra.mxu2 %v1015_v25 }
  0x54   : > { %910 = vrot.lane.b32.xlu1 %v871_v31, %s1463_s21  ;;  %584 = vrot.lane.b32.xlu2 %v569_v36, %s1462_s20  ;;  %v1752_v31 = vld [vmem:[%s1508_s19 + $0x28] sm:$0xff]  ;;  %v639_v36 = vpack.c.b16 %v637_v26, %v637_v26  ;;  %v572_v26 = vrot.slane %v1744_v5, 1 }
  0x55   : > { %342 = vrot.lane.b32.xlu0 %v327_v35, %s1463_s21  ;;  %v878_v35 = vrot.slane %v876_v58, 1  ;;  %v300_v48 = vshll.u32 %v1752_v31, 16 }
  0x56   : > { %v660_v49 = vsel %vm658_vm2, %v639_v36, 0  ;;  %v354_v36 = vrot.slane %v1752_v31, 1 }
  0x57   : > { %v879_v22 = vsel %vm259_vm1, %v874_v32, %v878_v35  ;;  %1404 = vmatpush.bf16.msra.mxu3 %v660_v49  ;;  %668 = vmatpush.bf16.msra.mxu0 %v660_v49  ;;  %v302_v56 = vrot.slane %v300_v48, 1  ;;  %v882_v32 = vor.u32 %v880_v15, %v878_v35 }
  0x58   : > { %v355_v35 = vsel %vm344_vm0, %v352_v53, %v354_v36  ;;  %v523_v53 = vshrl.u32 %v1744_v5, 16 }
  0x5b   : > { %1405 = vmatpush.bf16.msra.mxu3 %v1394_v45  ;;  %669 = vmatpush.bf16.msra.mxu0 %v1394_v45  ;;  %v304_v45 = vshrl.u32 %v1752_v31, 16 }
  0x5c   : > { %334 = vrot.lane.b32.xlu1 %v295_v42, %s1463_s21  ;;  %376 = vrot.lane.b32.xlu2 %v361_v47, %s1462_s20  ;;  %v519_v42 = vshll.u32 %v1744_v5, 16  ;;  %v895_v47 = vsel %vm259_vm1, %v890_v29, %v894_v30  ;;  %v1785_v29 = vld [vmem:[%s1974_s1 + $0x18] sm:$0xff] }
  0x5d   : > { %943 = vrot.lane.b32.xlu0 %v928_v34, %s1462_s20  ;;  %v296_v34 = vshrl.u32 %v1681_v23, 16  ;;  %1024 = vmatpush.bf16.msra.mxu2 %v1785_v29 }
  0x5e   : > { %v521_v51 = vrot.slane %v519_v42, 1  ;;  %v887_v42 = vsel %vm259_vm1, %v882_v32, %v1729_v12 }
  0x5f   : > { %v298_v43 = vor.u32 %v296_v34, %v1692_v17  ;;  %1406 = vmatpush.bf16.msrb.mxu3 %v729_v14  ;;  %v896_v34 = vshrl.u32 %v1718_v54, 16 }
  0x60   : > { %v522_v17 = vsel %vm259_vm1, %v517_v39, %v521_v51 }
  0x61   : > { %v303_v18 = vsel %vm259_vm1, %v298_v43, %v302_v56 }
  0x63   : > { %1407 = vmatpush.bf16.msrb.mxu3 %v1385_v20  ;;  %v573_v20 = vsel %vm344_vm0, %v570_v52, %v572_v26 }
  0x64   : > { %586 = vrot.lane.b32.xlu1 %v571_v63, %s1462_s20  ;;  %553 = vrot.lane.b32.xlu2 %v514_v16, %s1463_s21  ;;  %v933_v63 = vrot.slane %v1718_v54, 1  ;;  %v1326_v16 = vld [vmem:[%s1508_s19 + $0x50] sm:$0xf] }
  0x65   : > { %368 = vrot.lane.b32.xlu0 %v353_v6, %s1462_s20  ;;  %v931_v6 = vrot.slane %v1702_v46, 1  ;;  %v834_v14 = vunpack.c.l.b16 %v1326_v16 }
  0x67   : > { %v934_v58 = vsel %vm344_vm0, %v931_v6, %v933_v63  ;;  %v835_v40 = vpack.c.b16 %v834_v14, %v834_v14  ;;  %v932_v52 = vsel %vm344_vm0, %v929_v21, %v931_v6  ;;  %v525_v21 = vor.u32 %v523_v53, %v521_v51 }
  0x69   : > { %v935_v48 = vrot.slane %v835_v40, 1 }
  0x6b   : > { %v936_v39 = vsel %vm344_vm0, %v933_v63, %v935_v48  ;;  %v306_v63 = vor.u32 %v304_v45, %v302_v56 }
  0x6c   : > { %945 = vrot.lane.b32.xlu1 %v930_v33, %s1462_s20  ;;  %912 = vrot.lane.b32.xlu2 %v879_v22, %s1463_s21  ;;  %v898_v22 = vor.u32 %v896_v34, %v894_v30 }
  0x6d   : > { %916 = vrot.lane.b32.xlu0 %v895_v47, %s1463_s21  ;;  %v900_v47 = vshll.u32 %v835_v40, 16  ;;  %v311_v15 = vsel %vm259_vm1, %v306_v63, %v1617_v27 }
  0x6f   : > { %v902_v12 = vrot.slane %v900_v47, 1 }
  0x71   : > { %v903_v43 = vsel %vm259_vm1, %v898_v22, %v902_v12 }
  0x74   : > { %555 = vrot.lane.b32.xlu1 %v522_v17, %s1463_s21  ;;  %949 = vrot.lane.b32.xlu2 %v934_v58, %s1462_s20  ;;  %v357_v17 = vsel %vm344_vm0, %v354_v36, %v356_v44 }
  0x75   : > { %336 = vrot.lane.b32.xlu0 %v303_v18, %s1463_s21 }
  0x76   : > { %v329_v33 = vpop.permute.xlu2 %328 }
  0x77   : > { %v380_v30 = vsel %vm378_vm3, %v1517_v2, %v329_v33  ;;  %v530_v2 = vsel %vm259_vm1, %v525_v21, %v1539_v13  ;;  %v575_v13 = vsel %vm344_vm0, %v572_v26, %v574_v4 }
  0x7c   : > { %914 = vrot.lane.b32.xlu1 %v887_v42, %s1463_s21  ;;  %370 = vrot.lane.b32.xlu2 %v355_v35, %s1462_s20 }
  0x7d   : > { %588 = vrot.lane.b32.xlu0 %v573_v20, %s1462_s20 }
  0x7e   : > { %v548_v49 = vpop.permute.xlu2 %547 }
  0x7f   : > { %v597_v27 = vsel %vm378_vm3, %v1555_v24, %v548_v49 }
  0x84   : > { %951 = vrot.lane.b32.xlu1 %v936_v39, %s1462_s20  ;;  %918 = vrot.lane.b32.xlu2 %v903_v43, %s1463_s21 }
  0x85   : > { %947 = vrot.lane.b32.xlu0 %v932_v52, %s1462_s20 }
  0x86   : > { %v593_v55 = vpop.permute.xlu1 %592  ;;  %v562_v61 = vpop.permute.xlu2 %561 }
  0x87   : > { %v363_v6 = vpop.permute.xlu0 %362  ;;  %v611_v4 = vsel %vm378_vm3, %v1514_v1, %v562_v61 }
  0x88   : > { %v397_v62 = vsel %vm395_vm4, %v380_v30, %v363_v6 }
  0x89   : > { %1302 = vmatmul.msk.bf16.vlgmr.msra.gmra.mxu1 %vm641_vm5, %v397_v62 }
  0x8c   : > { %372 = vrot.lane.b32.xlu1 %v357_v17, %s1462_s20  ;;  %338 = vrot.lane.b32.xlu2 %v311_v15, %s1463_s21 }
  0x8d   : > { %557 = vrot.lane.b32.xlu0 %v530_v2, %s1463_s21 }
  0x8e   : > { %v938_v51 = vpop.permute.xlu1 %937  ;;  %v940_v16 = vpop.permute.xlu2 %939 }
  0x8f   : > { %v560_v56 = vpop.permute.xlu0 %559 }
  0x90   : > { %v609_v18 = vsel %vm378_vm3, %v1511_v0, %v560_v56 }
  0x91   : > { %v625_v44 = vsel %vm395_vm4, %v609_v18, %v593_v55 }
  0x92   : > { %1296 = vmatmul.msk.bf16.vlgmr.msra.gmra.mxu3 %vm641_vm5, %v625_v44 }
  0x93   : > { %1408 = vmatpush.bf16.msra.mxu3 %v1015_v25 }
  0x94   : > { %590 = vrot.lane.b32.xlu2 %v575_v13, %s1462_s20 }
  0x96   : > { %v581_v58 = vpop.permute.xlu1 %580  ;;  %v365_v36 = vpop.permute.xlu2 %364 }
  0x97   : > { %v905_v14 = vpop.permute.xlu0 %904  ;;  %v613_v32 = vsel %vm395_vm4, %v597_v27, %v581_v58  ;;  %1409 = vmatpush.bf16.msra.mxu3 %v1785_v29 }
  0x98   : > { %v954_v33 = vsel %vm378_vm3, %v1526_v7, %v905_v14  ;;  %1290 = vmatmul.msk.bf16.vlgmr.msra.gmra.mxu0 %vm641_vm5, %v613_v32 }
  0x99   : > { %v970_v0 = vsel %vm395_vm4, %v954_v33, %v938_v51 }
  0x9a   : > { %1366 = vmatmul.msk.bf16.vlgmr.msra.gmra.mxu2 %vm641_vm5, %v970_v0 }
  0x9e   : > { %v595_v24 = vpop.permute.xlu1 %594  ;;  %v909_v40 = vpop.permute.xlu2 %908 }
  0x9f   : > { %v907_v25 = vpop.permute.xlu0 %906  ;;  %v627_v26 = vsel %vm395_vm4, %v611_v4, %v595_v24 }
  0xa0   : > { %v956_v29 = vsel %vm378_vm3, %v1529_v8, %v907_v25 }
  0xa1   : > { %v972_v1 = vsel %vm395_vm4, %v956_v29, %v940_v16 }
  0xa2   : > { %1297 = vmatmul.msk.bf16.gmra.mxu3 %vm641_vm5, %v627_v26 }
  0xa6   : > { %v550_v7 = vpop.permute.xlu1 %549  ;;  %v333_v20 = vpop.permute.xlu2 %332 }
  0xa7   : > { %v331_v42 = vpop.permute.xlu0 %330  ;;  %v599_v48 = vsel %vm378_vm3, %v1561_v28, %v550_v7  ;;  %v384_v28 = vsel %vm378_vm3, %v1594_v60, %v333_v20 }
  0xa8   : > { %v382_v35 = vsel %vm378_vm3, %v1520_v3, %v331_v42  ;;  %v958_v3 = vsel %vm378_vm3, %v1574_v41, %v909_v40 }
  0xa9   : > { %v399_v34 = vsel %vm395_vm4, %v382_v35, %v365_v36 }
  0xaa   : > { %1303 = vmatmul.msk.bf16.gmra.mxu1 %vm641_vm5, %v399_v34  ;;  %1367 = vmatmul.msk.bf16.gmra.mxu2 %vm641_vm5, %v972_v1 }
  0xae   : > { %v341_v47 = vpop.permute.xlu1 %340  ;;  %v585_v8 = vpop.permute.xlu2 %584 }
  0xaf   : > { %v583_v22 = vpop.permute.xlu0 %582  ;;  %v392_v39 = vsel %vm378_vm3, %v1602_v11, %v341_v47 }
  0xb0   : > { %v615_v12 = vsel %vm395_vm4, %v599_v48, %v583_v22 }
  0xb1   : > { %1291 = vmatmul.msk.bf16.gmra.mxu0 %vm641_vm5, %v615_v12 }
  0xb6   : > { %v942_v49 = vpop.permute.xlu1 %941  ;;  %v377_v45 = vpop.permute.xlu2 %376 }
  0xb7   : > { %v375_v52 = vpop.permute.xlu0 %374  ;;  %v974_v53 = vsel %vm395_vm4, %v958_v3, %v942_v49 }
  0xb8   : > { %v409_v43 = vsel %vm395_vm4, %v392_v39, %v375_v52  ;;  %v1929_v39 = vld [vmem:[%s1975_s2] ss:$0 sm:$0xff] }
  0xb9   : > { %1308 = vmatmul.msk.bf16.vlgmr.msrb.gmra.mxu3 %vm641_vm5, %v409_v43 }
  0xba   : > { %1368 = vmatmul.msk.bf16.gmra.mxu2 %vm641_vm5, %v974_v53 }
  0xbe   : > { %v367_v30 = vpop.permute.xlu1 %366  ;;  %v554_v63 = vpop.permute.xlu2 %553 }
  0xbf   : > { %v552_v55 = vpop.permute.xlu0 %551  ;;  %v401_v41 = vsel %vm395_vm4, %v384_v28, %v367_v30  ;;  %v603_v56 = vsel %vm378_vm3, %v1650_v38, %v554_v63 }
  0xc0   : > { %v601_v11 = vsel %vm378_vm3, %v1590_v57, %v552_v55  ;;  %1304 = vmatmul.msk.bf16.gmra.mxu1 %vm641_vm5, %v401_v41 }
  0xc1   : > { %v617_v21 = vsel %vm395_vm4, %v601_v11, %v585_v8 }
  0xc2   : > { %1292 = vmatmul.msk.bf16.gmra.mxu0 %vm641_vm5, %v617_v21 }
  0xc6   : > { %v911_v6 = vpop.permute.xlu1 %910  ;;  %v913_v17 = vpop.permute.xlu2 %912 }
  0xc7   : > { %v343_v61 = vpop.permute.xlu0 %342  ;;  %v960_v57 = vsel %vm378_vm3, %v1633_v37, %v911_v6  ;;  %v962_v27 = vsel %vm378_vm3, %v1669_v59, %v913_v17 }
  0xc8   : > { %v394_v62 = vsel %vm378_vm3, %v1611_v19, %v343_v61 }
  0xc9   : > { %v411_v60 = vsel %vm395_vm4, %v394_v62, %v377_v45 }
  0xca   : > { %1309 = vmatmul.msk.bf16.gmra.mxu3 %vm641_vm5, %v411_v60 }
  0xce   : > { %v335_v2 = vpop.permute.xlu1 %334  ;;  %v950_v18 = vpop.permute.xlu2 %949 }
  0xcf   : > { %v944_v15 = vpop.permute.xlu0 %943  ;;  %v386_v19 = vsel %vm378_vm3, %v1658_v50, %v335_v2 }
  0xd0   : > { %v976_v51 = vsel %vm395_vm4, %v960_v57, %v944_v15 }
  0xd1   : > { %1369 = vmatmul.msk.bf16.gmra.mxu2 %vm641_vm5, %v976_v51 }
  0xd6   : > { %v587_v16 = vpop.permute.xlu1 %586  ;;  %v371_v50 = vpop.permute.xlu2 %370 }
  0xd7   : > { %v369_v44 = vpop.permute.xlu0 %368  ;;  %v619_v13 = vsel %vm395_vm4, %v603_v56, %v587_v16 }
  0xd8   : > { %1293 = vmatmul.msk.bf16.gmra.mxu0 %vm641_vm5, %v619_v13  ;;  %v403_v37 = vsel %vm395_vm4, %v386_v19, %v369_v44 }
  0xd9   : > { %1305 = vmatmul.msk.bf16.gmra.mxu1 %vm641_vm5, %v403_v37 }
  0xde   : > { %v946_v58 = vpop.permute.xlu1 %945  ;;  %v919_v24 = vpop.permute.xlu2 %918 }
  0xdf   : > { %v917_v14 = vpop.permute.xlu0 %916  ;;  %v978_v38 = vsel %vm395_vm4, %v962_v27, %v946_v58  ;;  %v968_v7 = vsel %vm378_vm3, %v1718_v54, %v919_v24 }
  0xe0   : > { %v966_v32 = vsel %vm378_vm3, %v1702_v46, %v917_v14 }
  0xe1   : > { %v982_v36 = vsel %vm395_vm4, %v966_v32, %v950_v18  ;;  %1370 = vmatmul.msk.bf16.gmra.mxu2 %vm641_vm5, %v978_v38 }
  0xe2   : > { %1372 = vmatmul.msk.bf16.vlgmr.msra.gmra.mxu3 %vm641_vm5, %v982_v36 }
  0xe6   : > { %v556_v33 = vpop.permute.xlu1 %555  ;;  %v339_v29 = vpop.permute.xlu2 %338 }
  0xe7   : > { %v337_v0 = vpop.permute.xlu0 %336  ;;  %v605_v46 = vsel %vm378_vm3, %v1699_v10, %v556_v33  ;;  %v390_v10 = vsel %vm378_vm3, %v1752_v31, %v339_v29 }
  0xe8   : > { %v388_v4 = vsel %vm378_vm3, %v1681_v23, %v337_v0 }
  0xe9   : > { %v405_v59 = vsel %vm395_vm4, %v388_v4, %v371_v50 }
  0xea   : > { %1306 = vmatmul.msk.bf16.gmra.mxu1 %vm641_vm5, %v405_v59 }
  0xee   : > { %v915_v25 = vpop.permute.xlu1 %914  ;;  %v591_v47 = vpop.permute.xlu2 %590 }
  0xef   : > { %v589_v26 = vpop.permute.xlu0 %588  ;;  %v964_v23 = vsel %vm378_vm3, %v1727_v9, %v915_v25 }
  0xf0   : > { %v621_v40 = vsel %vm395_vm4, %v605_v46, %v589_v26 }
  0xf1   : > { %1294 = vmatmul.msk.bf16.gmra.mxu0 %vm641_vm5, %v621_v40 }
  0xf6   : > { %v952_v42 = vpop.permute.xlu1 %951 }
  0xf7   : > { %v948_v20 = vpop.permute.xlu0 %947  ;;  %v984_v35 = vsel %vm395_vm4, %v968_v7, %v952_v42 }
  0xf8   : > { %v980_v34 = vsel %vm395_vm4, %v964_v23, %v948_v20  ;;  %1373 = vmatmul.msk.bf16.gmra.mxu3 %vm641_vm5, %v984_v35 }
  0xf9   : > { %1371 = vmatmul.msk.bf16.gmra.mxu2 %vm641_vm5, %v980_v34 }
  0xfe   : > { %v373_v1 = vpop.permute.xlu1 %372 }
  0xff   : > { %v558_v48 = vpop.permute.xlu0 %557  ;;  %v407_v54 = vsel %vm395_vm4, %v390_v10, %v373_v1 }
 0x100   : > { %v607_v9 = vsel %vm378_vm3, %v1744_v5, %v558_v48  ;;  %1307 = vmatmul.msk.bf16.gmra.mxu1 %vm641_vm5, %v407_v54 }
 0x101   : > { %v623_v22 = vsel %vm395_vm4, %v607_v9, %v591_v47 }
 0x102   : > { %1295 = vmatmul.msk.bf16.gmra.mxu0 %vm641_vm5, %v623_v22 }
 0x106   : > { %v740_v8 = vpop.f32.mrf.mxu1 }
 0x10e   : > { %v742_v12 = vpop.f32.mrf.mxu1 }
 0x115   : > { %v695_v3 = vpop.f32.mrf.mxu3  ;;  %v671_v49 = vpop.f32.mrf.mxu0 }
 0x116   : > { %v741_v31 = vadd.f32 %v740_v8, %v671_v49 }
 0x11d   : > { %v697_v52 = vpop.f32.mrf.mxu3  ;;  %v1026_v53 = vpop.f32.mrf.mxu2 }
 0x11e   : > { %v1058_v43 = vadd.f32 %v1026_v53, %v741_v31  ;;  %v673_v5 = vpop.f32.mrf.mxu0 }
 0x120   : > { %v1070_v45 = vadd.f32 %v1929_v39, %v1058_v43 }
 0x122   : > { %v1078_v28 = vmax.f32 %v1070_v45, 0.0 }
 0x124   : > { %v1086_v30 = vpack.c.bf16 %v1078_v28, %v1078_v28 }
 0x125   : > { %v1938_v55 = vpop.f32.mrf.mxu3  ;;  %v1028_v41 = vpop.f32.mrf.mxu2 }
 0x126   : > { %1095 = vst.msk [vmem:[%s1936_s16] sm:$0xf] %vm1094_vm6, %v1086_v30 }
 0x127   : > { %v744_v11 = vpop.f32.mrf.mxu1 }
 0x12d   : > { %v701_v21 = vpop.f32.mrf.mxu3  ;;  %v1030_v63 = vpop.f32.mrf.mxu2 }
 0x12e   : > { %v675_v6 = vpop.f32.mrf.mxu0 }
 0x12f   : > { %v745_v61 = vadd.f32 %v744_v11, %v675_v6  ;;  %v746_v62 = vpop.f32.mrf.mxu1 }
 0x131   : > { %v1059_v60 = vadd.f32 %v1030_v63, %v745_v61 }
 0x133   : > { %v1071_v17 = vadd.f32 %v1929_v39, %v1059_v60 }
 0x135   : > { %v1079_v2 = vmax.f32 %v1071_v17, 0.0  ;;  %v1032_v57 = vpop.f32.mrf.mxu2 }
 0x136   : > { %v677_v15 = vpop.f32.mrf.mxu0 }
 0x137   : > { %v1087_v51 = vpack.c.bf16 %v1079_v2, %v1079_v2 }
 0x139   : > { %1096 = vst.msk [vmem:[%s1936_s16 + $0x4] sm:$0xf] %vm1094_vm6, %v1087_v51 }
 0x13c   : > { %v764_v56 = vpop.f32.mrf.mxu3 }
 0x13d   : > { %v1034_v16 = vpop.f32.mrf.mxu2  ;;  %v748_v18 = vpop.f32.mrf.mxu1  ;;  %v765_v23 = vadd.f32 %v764_v56, %v695_v3 }
 0x13f   : > { %v679_v19 = vpop.f32.mrf.mxu0 }
 0x140   : > { %v749_v44 = vadd.f32 %v748_v18, %v679_v19 }
 0x142   : > { %v1060_v13 = vadd.f32 %v1034_v16, %v749_v44 }
 0x144   : > { %v1072_v37 = vadd.f32 %v1929_v39, %v1060_v13  ;;  %v766_v27 = vpop.f32.mrf.mxu3 }
 0x145   : > { %v1036_v58 = vpop.f32.mrf.mxu2  ;;  %v750_v14 = vpop.f32.mrf.mxu1 }
 0x146   : > { %v1080_v38 = vmax.f32 %v1072_v37, 0.0 }
 0x147   : > { %v681_v32 = vpop.f32.mrf.mxu0 }
 0x148   : > { %v1088_v50 = vpack.c.bf16 %v1080_v38, %v1080_v38 }
 0x14a   : > { %1097 = vst.msk [vmem:[%s1936_s16 + $0x8] sm:$0xf] %vm1094_vm6, %v1088_v50 }
 0x14d   : > { %v768_v36 = vpop.f32.mrf.mxu3 }
 0x14e   : > { %v769_v43 = vadd.f32 %v768_v36, %v1938_v55 }
 0x154   : > { %v1038_v33 = vpop.f32.mrf.mxu2 }
 0x155   : > { %v770_v0 = vpop.f32.mrf.mxu3  ;;  %v683_v4 = vpop.f32.mrf.mxu0 }
 0x156   : > { %v752_v59 = vpop.f32.mrf.mxu1 }
 0x157   : > { %v753_v24 = vadd.f32 %v752_v59, %v683_v4 }
 0x159   : > { %v1061_v25 = vadd.f32 %v1038_v33, %v753_v24 }
 0x15b   : > { %v1073_v46 = vadd.f32 %v1929_v39, %v1061_v25 }
 0x15c   : > { %v1040_v26 = vpop.f32.mrf.mxu2 }
 0x15d   : > { %v1081_v40 = vmax.f32 %v1073_v46, 0.0  ;;  %v685_v29 = vpop.f32.mrf.mxu0 }
 0x15e   : > { %v754_v7 = vpop.f32.mrf.mxu1 }
 0x15f   : > { %v1089_v42 = vpack.c.bf16 %v1081_v40, %v1081_v40 }
 0x161   : > { %1098 = vst.msk [vmem:[%s1936_s16 + $0xc] sm:$0xf] %vm1094_vm6, %v1089_v42 }
 0x164   : > { %v1042_v20 = vpop.f32.mrf.mxu2 }
 0x165   : > { %v1050_v35 = vpop.f32.mrf.mxu3 }
 0x166   : > { %v1064_v34 = vadd.f32 %v1050_v35, %v765_v23 }
 0x167   : > { %v756_v10 = vpop.f32.mrf.mxu1 }
 0x168   : > { %v1076_v1 = vadd.f32 %v1929_v39, %v1064_v34 }
 0x16a   : > { %v1084_v47 = vmax.f32 %v1076_v1, 0.0 }
 0x16c   : > { %v1092_v48 = vpack.c.bf16 %v1084_v47, %v1084_v47  ;;  %v1044_v54 = vpop.f32.mrf.mxu2 }
 0x16d   : > { %v1052_v9 = vpop.f32.mrf.mxu3 }
 0x16e   : > { %1101 = vst.msk [vmem:[%s1936_s16 + $0x18] sm:$0xf] %vm1094_vm6, %v1092_v48  ;;  %v687_v22 = vpop.f32.mrf.mxu0 }
 0x16f   : > { %v757_v8 = vadd.f32 %v756_v10, %v687_v22  ;;  %v758_v12 = vpop.f32.mrf.mxu1 }
 0x171   : > { %v1062_v49 = vadd.f32 %v1042_v20, %v757_v8 }
 0x173   : > { %v1074_v31 = vadd.f32 %v1929_v39, %v1062_v49 }
 0x175   : > { %v1082_v3 = vmax.f32 %v1074_v31, 0.0 }
 0x176   : > { %v689_v52 = vpop.f32.mrf.mxu0 }
 0x177   : > { %v1090_v53 = vpack.c.bf16 %v1082_v3, %v1082_v3 }
 0x179   : > { %1099 = vst.msk [vmem:[%s1936_s16 + $0x10] sm:$0xf] %vm1094_vm6, %v1090_v53 }
 0x17b   : > { %v1054_v5 = vpop.f32.mrf.mxu3 }
 0x17c   : > { %v1046_v45 = vpop.f32.mrf.mxu2  ;;  %v1065_v28 = vadd.f32 %v1054_v5, %v769_v43 }
 0x17d   : > { %v760_v30 = vpop.f32.mrf.mxu1 }
 0x17e   : > { %v1077_v41 = vadd.f32 %v1929_v39, %v1065_v28 }
 0x17f   : > { %v691_v11 = vpop.f32.mrf.mxu0 }
 0x180   : > { %v1085_v21 = vmax.f32 %v1077_v41, 0.0  ;;  %v761_v63 = vadd.f32 %v760_v30, %v691_v11 }
 0x182   : > { %v1093_v6 = vpack.c.bf16 %v1085_v21, %v1085_v21  ;;  %v1063_v61 = vadd.f32 %v1046_v45, %v761_v63 }
 0x183   : > { %v1056_v62 = vpop.f32.mrf.mxu3 }
 0x184   : > { %1102 = vst.msk [vmem:[%s1936_s16 + $0x1c] sm:$0xf] %vm1094_vm6, %v1093_v6  ;;  %v1075_v60 = vadd.f32 %v1929_v39, %v1063_v61  ;;  %v1048_v17 = vpop.f32.mrf.mxu2 }
 0x185   : > { %v762_v2 = vpop.f32.mrf.mxu1 }
 0x186   : > { %v1083_v55 = vmax.f32 %v1075_v60, 0.0 }
 0x187   : > { %v693_v57 = vpop.f32.mrf.mxu0 }
 0x188   : > { %v1091_v15 = vpack.c.bf16 %v1083_v55, %v1083_v55 }
 0x18a   : > { %1100 = vst.msk [vmem:[%s1936_s16 + $0x14] sm:$0xf] %vm1094_vm6, %v1091_v15 }
 0x18b PF: > { %s13_s14 = sadd.s32 1, %s1460_s14   ;;  %s1977_s12 = smov %s1456_s13 }
 0x18c   : > { %p10_p5 = scmp.ge.s32.totalorder %s13_s14, 4   ;;  %s1978_s13 = smov %s1980_s15 }
 0x18e   :  { %12 = sbr.rel (!%p10_p5) target bundleno = 2 (0x2), region = 67 }

// kernel: unet_decoder_attention.9
= control target key start
LH: loop header
LB: loop body
LE: loop exit
PB: predicated region body
PF: predicated region fallthrough
CT: control target
= control target key end

     0   :  { %s1514_s27 = smov 0   ;;  %s1516_s28 = smov 0   ;;  %s1776_s0 = inlined_call_operand.vmem [shape: bf16[2,8,8,8], index: 0, kind: input, shape index: {}]   ;;  %s1777_s1 = inlined_call_operand.vmem [shape: bf16[2,8,2,8,8], index: 1, kind: input, shape index: {}]   ;;  %s1778_s2 = inlined_call_operand.vmem [shape: bf16[2,8,8], index: 2, kind: input, shape index: {}]   ;;  %s1779_s3 = inlined_call_operand.vmem [shape: f32[1,8], index: 3, kind: input, shape index: {}]   ;;  %s1780_s4 = inlined_call_operand.vmem [shape: bf16[2,8,8], index: 4, kind: input, shape index: {}]   ;;  %s1781_s5 = inlined_call_operand.vmem [shape: f32[1,8], index: 5, kind: input, shape index: {}]   ;;  %s1782_s6 = inlined_call_operand.vmem [shape: bf16[8,8], index: 6, kind: input, shape index: {}]   ;;  %s1783_s7 = inlined_call_operand.vmem [shape: f32[1,8], index: 7, kind: input, shape index: {}]   ;;  %s1784_s8 = inlined_call_operand.vmem [shape: bf16[2,8,2,8,16], index: 8, kind: output, shape index: {}]  }
   0x1   :  { %s1518_s29 = smov 0   ;;  %s1520_s30 = smov 0  }
   0x2   :  { %s1522_s9 = smov 0   ;;  %s1524_s10 = smov 0  }
   0x3   :  { %s1526_s11 = smov 0  }
   0x4 LB: > { %s30_s12 = sadd.s32 1, %s1457_s9  ;;  %s37_s13 = sadd.s32 1, %s1461_s10  ;;  %s1465_s11 = sphi %s1526_s11, %s18_s11   ;;  %s1461_s10 = sphi %s1524_s10, %s1791_s10   ;;  %s1457_s9 = sphi %s1522_s9, %s1790_s9   ;;  %s1453_s30 = sphi %s1520_s30, %s1789_s30   ;;  %s1449_s29 = sphi %s1518_s29, %s1788_s29   ;;  %s1445_s28 = sphi %s1516_s28, %s1787_s28   ;;  %s1441_s27 = sphi %s1514_s27, %s1786_s27  }
   0x5   : > { %p31_p0 = scmp.ge.s32.totalorder %s30_s12, 2  ;;  %s1234_s14 = sadd.s32 4294967295, %s1465_s11  }
   0x6   : > { %p83_p1 = scmp.ne.s32.totalorder %s1445_s28, %s1441_s27  ;;  %p84_p2 = scmp.eq.s32.totalorder %s1465_s11, 0 }
   0x7   : > { %s1793_s12 = smov (%p31_p0, %s30_s12), 0  ;;  %s1795_s13 = smov (!%p31_p0, %s37_s13), %s1461_s10 }
   0x8   : > { %p39_p3 = scmp.ge.s32.totalorder %s1795_s13, 2  ;;  %p248_p4 = scmp.eq.s32.totalorder %s1234_s14, 3 }
   0x9   : > { %s72_s15 = ssub.s32 %s1457_s9, %s1793_s12  ;;  %p85_p5 = por %p84_p2, %p83_p1 }
   0xa   : > { %s1797_s13 = smov (%p39_p3, %s1795_s13), 0  ;;  %p1562_p6 = por %p248_p4, %p83_p1 }
   0xb   : > { %s69_s17 = ssub.s32 %s1461_s10, %s1797_s13  ;;  %s76_s19 = sadd.s32 1, %s1445_s28 }
   0xc   : > { %s73_s18 = sor.u32 %s72_s15, %s69_s17  ;;  %p1237_p8 = scmp.ge.s32.totalorder %s1465_s11, 4 }
   0xd   : > { %p74_p7 = scmp.eq.s32.totalorder %s73_s18, 0 }
   0xe   : > { %285 = sbr.rel (%p1237_p8) target bundleno = 33 (0x21), region = 36 }
   0xf   : > { %s1570_s20 = scalar_select %p74_p7, %s1445_s28, %s76_s19  }
  0x13   : > { %301 = sbr.rel (!%p85_p5) target bundleno = 33 (0x21), region = 44  ;;  %s303_s21 = sand.u32 (%p85_p5), 1, %s1445_s28  }
  0x14   : > { %s1239_s22 = sshll.u32 (%p85_p5), %s1461_s10, 4  ;;  %s1238_s23 = sshll.u32 (%p85_p5), %s303_s21, 5 }
  0x15   : > { %s310_s24 = sadd.s32 (%p85_p5), %s1457_s9, %s1239_s22  ;;  %s305_s17 = scalar_lea.vmem (%p85_p5), [#allocation2], %s1238_s23 }
  0x16   : > { %s1240_s25 = sshll.u32 (%p85_p5), %s310_s24, 2 }
  0x17   : > { %s312_s15 = scalar_lea.vmem (%p85_p5), %s1777_s1, %s1240_s25 }
  0x18   : > { %v329_v0 = vld [vmem:[%s312_s15] sm:$0xf]  ;;  %v331_v1 = vld [vmem:[%s312_s15 + $0x8] sm:$0xf]  ;;  %v333_v2 = vld [vmem:[%s312_s15 + $0x10] sm:$0xf] }
  0x19   : > { %330 = vst [vmem:[%s305_s17] sm:$0xf] %v329_v0  ;;  %v335_v3 = vld [vmem:[%s312_s15 + $0x18] sm:$0xf]  ;;  %v337_v4 = vld [vmem:[%s312_s15 + $0x20] sm:$0xf] }
  0x1a   : > { %332 = vst [vmem:[%s305_s17 + $0x4] sm:$0xf] %v331_v1  ;;  %v339_v5 = vld [vmem:[%s312_s15 + $0x28] sm:$0xf]  ;;  %v341_v6 = vld [vmem:[%s312_s15 + $0x30] sm:$0xf] }
  0x1b   : > { %334 = vst [vmem:[%s305_s17 + $0x8] sm:$0xf] %v333_v2  ;;  %v343_v7 = vld [vmem:[%s312_s15 + $0x38] sm:$0xf] }
  0x1c   : > { %336 = vst [vmem:[%s305_s17 + $0xc] sm:$0xf] %v335_v3 }
  0x1d   : > { %338 = vst [vmem:[%s305_s17 + $0x10] sm:$0xf] %v337_v4 }
  0x1e   : > { %340 = vst [vmem:[%s305_s17 + $0x14] sm:$0xf] %v339_v5 }
  0x1f   : > { %342 = vst [vmem:[%s305_s17 + $0x18] sm:$0xf] %v341_v6 }
  0x20   : > { %344 = vst [vmem:[%s305_s17 + $0x1c] sm:$0xf] %v343_v7 }
  0x21 PF: > { %p1241_p9 = scmp.ge.s32.totalorder %s1465_s11, 1  ;;  %p390_p10 = scmp.lt.s32.totalorder %s1465_s11, 5 }
  0x23   : > { %p391_p11 = pnand %p1241_p9, %p390_p10 }
  0x24   : > { %p453_p12 = scmp.lt.s32.totalorder (!%p391_p11), %s1449_s29, 1  ;;  %p443_p13 = scmp.lt.s32.totalorder (!%p391_p11), %s1453_s30, 1 }
  0x25   : > { %394 = sbr.rel (%p391_p11) target bundleno = 691 (0x2b3), region = 89  ;;  %s397_s17 = sand.u32 (!%p391_p11), 1, %s1441_s27  }
  0x26   : > { %s1467_s26 = smov (!%p391_p11), 4   ;;  %s1468_s23 = smov (!%p391_p11), 8  }
  0x2a   : > { %s454_s18 = scalar_select %p453_p12, %s1449_s29, 1  ;;  %vm513_vm0 = vcmask 1043456   ;;  %vm500_vm1 = vcmask 64512   ;;  %v1267_v14 = vld [vmem:[%s1780_s4 + $0x4] sm:$0xf]  ;;  %vm910_vm2 = vcmask 27648  }
  0x2b   : > { %s444_s19 = scalar_select %p443_p13, %s1453_s30, 1  ;;  %v586_v15 = vsel %vm513_vm0, %v1267_v14, 0  ;;  %v550_v16 = vld [vmem:[%s1780_s4] sm:$0xf] }
  0x2c   : > { %s1246_s21 = sshll.u32 %s454_s18, 2  ;;  %s1242_s18 = sshll.u32 %s397_s17, 5  ;;  %595 = vmatpush.bf16.msra.mxu1 %v586_v15  ;;  %v630_v17 = vsel %vm513_vm0, %v550_v16, 0  ;;  %v1376_v20 = vld [vmem:[%s1779_s3] ss:$0 sm:$0xff] }
  0x2d   : > { %s456_s24 = scalar_lea.vmem %s1778_s2, %s1246_s21  ;;  %s1309_s25 = sshll.u32 %s444_s19, 5  ;;  %639 = vmatpush.bf16.msra.mxu2 %v630_v17  ;;  %v685_v51 = vld [vmem:[%s1782_s6] sm:$0xf] }
  0x2e   : > { %v475_v8 = vld [vmem:[%s456_s24] sm:$0xf]  ;;  %s450_s15 = scalar_lea.vmem %s1776_s0, %s1309_s25  ;;  %s1605_s24 = scalar_lea.vmem [#allocation2], %s1242_s18  ;;  %v703_v52 = vsel %vm513_vm0, %v685_v51, 0 }
  0x2f   : > { %v515_v9 = vsel %vm513_vm0, %v475_v8, 0  ;;  %v1310_v10 = vld [vmem:[%s450_s15] sm:$0xff]  ;;  %v1311_v11 = vld [vmem:[%s450_s15 + $0x8] sm:$0xff]  ;;  %v1312_v12 = vld [vmem:[%s450_s15 + $0x10] sm:$0xff]  ;;  %s1615_s14 = scalar_lea.vmem [#allocation3], %s1242_s18  ;;  %712 = vmatpush.bf16.msra.mxu3 %v703_v52 }
  0x30   : > { %524 = vmatpush.bf16.msra.mxu0 %v515_v9  ;;  %v1313_v13 = vld [vmem:[%s450_s15 + $0x18] sm:$0xff]  ;;  %v1314_v18 = vld [vmem:[%s1605_s24] sm:$0xff]  ;;  %v1315_v19 = vld [vmem:[%s1605_s24 + $0x8] sm:$0xff] }
  0x31   : > { %1284 = vmatmul.msk.bf16.vlgmr.msra.gmra.mxu1 %vm500_vm1, %v1314_v18  ;;  %v1316_v26 = vld [vmem:[%s1605_s24 + $0x10] sm:$0xff]  ;;  %v1317_v34 = vld [vmem:[%s1605_s24 + $0x18] sm:$0xff]  ;;  %v1377_v57 = vld [vmem:[%s1781_s5] ss:$0 sm:$0xff] }
  0x32   : > { %v467_v52 = vld [vmem:[%s1605_s24] sm:$0xff]  }
  0x33   : > { %1263 = vmatmul.msk.bf16.vlgmr.msra.gmra.mxu0 %vm500_vm1, %v1310_v10 }
  0x41   : > { %1285 = vmatmul.msk.bf16.gmra.mxu1 %vm500_vm1, %v1315_v19 }
  0x43   : > { %1264 = vmatmul.msk.bf16.gmra.mxu0 %vm500_vm1, %v1311_v11 }
  0x51   : > { %1286 = vmatmul.msk.bf16.gmra.mxu1 %vm500_vm1, %v1316_v26 }
  0x53   : > { %1265 = vmatmul.msk.bf16.gmra.mxu0 %vm500_vm1, %v1312_v12 }
  0x61   : > { %1287 = vmatmul.msk.bf16.gmra.mxu1 %vm500_vm1, %v1317_v34  ;;  %v1662_v34 = vld [vmem:[%s1783_s7] ss:$0 sm:$0xff] }
  0x63   : > { %1266 = vmatmul.msk.bf16.gmra.mxu0 %vm500_vm1, %v1313_v13 }
  0xae   : > { %v597_v53 = vpop.f32.mrf.mxu1 }
  0xb0   : > { %v526_v21 = vpop.f32.mrf.mxu0 }
  0xb1   : > { %v527_v22 = vadd.f32 %v1376_v20, %v526_v21 }
  0xb3   : > { %v902_v23 = vpack.c.bf16 %v527_v22, %v527_v22 }
  0xb5   : > { %976 = vrot.lane.b32.xlu2 %v902_v23, %s1467_s26  ;;  %911 = vst.msk [vmem:[%s1615_s14] sm:$0xf] %vm910_vm2, %v902_v23 }
  0xb6   : > { %v599_v54 = vpop.f32.mrf.mxu1 }
  0xb8   : > { %v528_v24 = vpop.f32.mrf.mxu0 }
  0xb9   : > { %v529_v25 = vadd.f32 %v1376_v20, %v528_v24 }
  0xbb   : > { %v546_v27 = vpack.c.bf16 %v529_v25, %v527_v22  ;;  %v903_v28 = vpack.c.bf16 %v529_v25, %v529_v25 }
  0xbd   : > { %978 = vrot.lane.b32.xlu0 %v903_v28, %s1467_s26  ;;  %912 = vst.msk [vmem:[%s1615_s14 + $0x4] sm:$0xf] %vm910_vm2, %v903_v28  ;;  %1288 = vmatmul.msk.bf16.vlgmr.msra.gmra.mxu2 %vm500_vm1, %v546_v27 }
  0xbe   : > { %v602_v58 = vpop.f32.mrf.mxu1 }
  0xc0   : > { %v531_v29 = vpop.f32.mrf.mxu0 }
  0xc1   : > { %v532_v30 = vadd.f32 %v1376_v20, %v531_v29 }
  0xc3   : > { %v904_v31 = vpack.c.bf16 %v532_v30, %v532_v30 }
  0xc5   : > { %980 = vrot.lane.b32.xlu1 %v904_v31, %s1467_s26  ;;  %913 = vst.msk [vmem:[%s1615_s14 + $0x8] sm:$0xf] %vm910_vm2, %v904_v31 }
  0xc6   : > { %v604_v2 = vpop.f32.mrf.mxu1 }
  0xc8   : > { %v533_v32 = vpop.f32.mrf.mxu0 }
  0xc9   : > { %v534_v33 = vadd.f32 %v1376_v20, %v533_v32 }
  0xcb   : > { %v547_v35 = vpack.c.bf16 %v534_v33, %v532_v30  ;;  %v905_v36 = vpack.c.bf16 %v534_v33, %v534_v33 }
  0xcd   : > { %914 = vst.msk [vmem:[%s1615_s14 + $0xc] sm:$0xf] %vm910_vm2, %v905_v36  ;;  %982 = vrot.lane.b32.xlu2 %v905_v36, %s1467_s26  ;;  %1289 = vmatmul.msk.bf16.gmra.mxu2 %vm500_vm1, %v547_v35 }
  0xce   : > { %v607_v8 = vpop.f32.mrf.mxu1 }
  0xd0   : > { %v536_v37 = vpop.f32.mrf.mxu0 }
  0xd1   : > { %v537_v38 = vadd.f32 %v1376_v20, %v536_v37 }
  0xd3   : > { %v906_v39 = vpack.c.bf16 %v537_v38, %v537_v38 }
  0xd5   : > { %915 = vst.msk [vmem:[%s1615_s14 + $0x10] sm:$0xf] %vm910_vm2, %v906_v39  ;;  %984 = vrot.lane.b32.xlu0 %v906_v39, %s1467_s26 }
  0xd6   : > { %v609_v14 = vpop.f32.mrf.mxu1 }
  0xd8   : > { %v538_v40 = vpop.f32.mrf.mxu0 }
  0xd9   : > { %v539_v41 = vadd.f32 %v1376_v20, %v538_v40 }
  0xdb   : > { %v548_v42 = vpack.c.bf16 %v539_v41, %v537_v38  ;;  %v907_v43 = vpack.c.bf16 %v539_v41, %v539_v41 }
  0xdd   : > { %916 = vst.msk [vmem:[%s1615_s14 + $0x14] sm:$0xf] %vm910_vm2, %v907_v43  ;;  %986 = vrot.lane.b32.xlu1 %v907_v43, %s1467_s26  ;;  %1290 = vmatmul.msk.bf16.gmra.mxu2 %vm500_vm1, %v548_v42 }
  0xde   : > { %v612_v22 = vpop.f32.mrf.mxu1 }
  0xe0   : > { %v541_v44 = vpop.f32.mrf.mxu0 }
  0xe1   : > { %v542_v45 = vadd.f32 %v1376_v20, %v541_v44 }
  0xe3   : > { %v908_v46 = vpack.c.bf16 %v542_v45, %v542_v45 }
  0xe5   : > { %917 = vst.msk [vmem:[%s1615_s14 + $0x18] sm:$0xf] %vm910_vm2, %v908_v46  ;;  %988 = vrot.lane.b32.xlu2 %v908_v46, %s1467_s26 }
  0xe6   : > { %v614_v26 = vpop.f32.mrf.mxu1 }
  0xe8   : > { %v543_v47 = vpop.f32.mrf.mxu0 }
  0xe9   : > { %v544_v48 = vadd.f32 %v1376_v20, %v543_v47 }
  0xeb   : > { %v549_v49 = vpack.c.bf16 %v544_v48, %v542_v45  ;;  %v909_v50 = vpack.c.bf16 %v544_v48, %v544_v48 }
  0xed   : > { %918 = vst.msk [vmem:[%s1615_s14 + $0x1c] sm:$0xf] %vm910_vm2, %v909_v50  ;;  %990 = vrot.lane.b32.xlu0 %v909_v50, %s1467_s26  ;;  %1291 = vmatmul.msk.bf16.gmra.mxu2 %vm500_vm1, %v549_v49 }
 0x140   : > { %v641_v55 = vpop.f32.mrf.mxu2 }
 0x141   : > { %v642_v56 = vadd.f32 %v641_v55, %v597_v53 }
 0x143   : > { %v665_v60 = vadd.f32 %v1377_v57, %v642_v56 }
 0x145   : > { %v673_v63 = vmax.f32 %v665_v60, 0.0  ;;  %v886_v60 = vunpack.c.l.bf16 %v467_v52 }
 0x148   : > { %v643_v59 = vpop.f32.mrf.mxu2 }
 0x149   : > { %v644_v61 = vadd.f32 %v643_v59, %v599_v54 }
 0x14b   : > { %v666_v62 = vadd.f32 %v1377_v57, %v644_v61 }
 0x14d   : > { %v674_v0 = vmax.f32 %v666_v62, 0.0 }
 0x14f   : > { %v681_v1 = vpack.c.bf16 %v674_v0, %v673_v63 }
 0x150   : > { %v646_v3 = vpop.f32.mrf.mxu2 }
 0x151   : > { %1292 = vmatmul.msk.bf16.vlgmr.msra.gmra.mxu3 %vm500_vm1, %v681_v1  ;;  %v647_v4 = vadd.f32 %v646_v3, %v602_v58 }
 0x153   : > { %v667_v6 = vadd.f32 %v1377_v57, %v647_v4 }
 0x155   : > { %v675_v10 = vmax.f32 %v667_v6, 0.0 }
 0x158   : > { %v648_v5 = vpop.f32.mrf.mxu2 }
 0x159   : > { %v649_v7 = vadd.f32 %v648_v5, %v604_v2 }
 0x15b   : > { %v668_v9 = vadd.f32 %v1377_v57, %v649_v7 }
 0x15d   : > { %v676_v11 = vmax.f32 %v668_v9, 0.0 }
 0x15f   : > { %v682_v12 = vpack.c.bf16 %v676_v11, %v675_v10 }
 0x160   : > { %v651_v13 = vpop.f32.mrf.mxu2 }
 0x161   : > { %1293 = vmatmul.msk.bf16.gmra.mxu3 %vm500_vm1, %v682_v12  ;;  %v652_v15 = vadd.f32 %v651_v13, %v607_v8 }
 0x163   : > { %v669_v17 = vadd.f32 %v1377_v57, %v652_v15 }
 0x165   : > { %v677_v20 = vmax.f32 %v669_v17, 0.0 }
 0x168   : > { %v653_v16 = vpop.f32.mrf.mxu2 }
 0x169   : > { %v654_v18 = vadd.f32 %v653_v16, %v609_v14  ;;  %v887_v14 = vunpack.c.h.bf16 %v467_v52 }
 0x16b   : > { %v670_v19 = vadd.f32 %v1377_v57, %v654_v18 }
 0x16d   : > { %v678_v21 = vmax.f32 %v670_v19, 0.0 }
 0x16f   : > { %v683_v23 = vpack.c.bf16 %v678_v21, %v677_v20 }
 0x170   : > { %v656_v24 = vpop.f32.mrf.mxu2 }
 0x171   : > { %1294 = vmatmul.msk.bf16.gmra.mxu3 %vm500_vm1, %v683_v23  ;;  %v657_v25 = vadd.f32 %v656_v24, %v612_v22  ;;  %v469_v24 = vld [vmem:[%s1605_s24 + $0x8] sm:$0xff]  }
 0x172   : > { %v889_v52 = vunpack.c.h.bf16 %v469_v24 }
 0x173   : > { %v671_v28 = vadd.f32 %v1377_v57, %v657_v25 }
 0x175   : > { %v679_v31 = vmax.f32 %v671_v28, 0.0 }
 0x178   : > { %v658_v27 = vpop.f32.mrf.mxu2 }
 0x179   : > { %v659_v29 = vadd.f32 %v658_v27, %v614_v26 }
 0x17b   : > { %v672_v30 = vadd.f32 %v1377_v57, %v659_v29 }
 0x17d   : > { %v680_v32 = vmax.f32 %v672_v30, 0.0 }
 0x17f   : > { %v684_v33 = vpack.c.bf16 %v680_v32, %v679_v31 }
 0x181   : > { %1295 = vmatmul.msk.bf16.gmra.mxu3 %vm500_vm1, %v684_v33  ;;  %v888_v33 = vunpack.c.l.bf16 %v469_v24 }
 0x1d4   : > { %v714_v35 = vpop.f32.mrf.mxu3 }
 0x1d5   : > { %v715_v36 = vadd.f32 %v1662_v34, %v714_v35 }
 0x1d7   : > { %v1296_v37 = vmul.f32 -1.442695, %v715_v36 }
 0x1d9   : > { %1379 = vpow2.f32 %v1296_v37 }
 0x1dc   : > { %v716_v38 = vpop.f32.mrf.mxu3 }
 0x1dd   : > { %v717_v39 = vadd.f32 %v1662_v34, %v716_v38 }
 0x1df   : > { %v1380_v40 = vpop.eup %1379  ;;  %v1297_v41 = vmul.f32 -1.442695, %v717_v39 }
 0x1e0   : > { %v758_v42 = vadd.f32 1.0, %v1380_v40 }
 0x1e1   : > { %1381 = vpow2.f32 %v1297_v41 }
 0x1e2   : > { %1383 = vrcp.f32 %v758_v42  ;;  %v777_v53 = vand.u32 2147483648, %v758_v42  ;;  %v775_v56 = vand.u32 2147483647, %v758_v42  ;;  %vm771_vm4 = vweird.f32 %v758_v42 }
 0x1e4   : > { %v719_v43 = vpop.f32.mrf.mxu3  ;;  %v778_v63 = vor.u32 1.1754944e-38, %v777_v53  ;;  %vm776_vm6 = vcmp.eq.f32.partialorder %v775_v56, 8.507059e+37 }
 0x1e5   : > { %v720_v44 = vadd.f32 %v1662_v34, %v719_v43 }
 0x1e7   : > { %v1382_v45 = vpop.eup %1381  ;;  %v1298_v46 = vmul.f32 -1.442695, %v720_v44 }
 0x1e8   : > { %v1384_v47 = vpop.eup %1383  ;;  %v759_v48 = vadd.f32 1.0, %v1382_v45 }
 0x1e9   : > { %v767_v49 = vmul.f32 %v1384_v47, %v758_v42  ;;  %1385 = vpow2.f32 %v1298_v46  ;;  %vm772_vm3 = vweird.f32 %v1384_v47 }
 0x1ea   : > { %1387 = vrcp.f32 %v759_v48  ;;  %vm773_vm5 = vmor %vm771_vm4, %vm772_vm3  ;;  %v790_v6 = vand.u32 2147483647, %v759_v48  ;;  %v792_v7 = vand.u32 2147483648, %v759_v48  ;;  %vm786_vm8 = vweird.f32 %v759_v48 }
 0x1eb   : > { %v768_v50 = vsub.f32 1.0, %v767_v49 }
 0x1ec   : > { %v721_v51 = vpop.f32.mrf.mxu3  ;;  %v793_v17 = vor.u32 1.1754944e-38, %v792_v7  ;;  %vm791_vm10 = vcmp.eq.f32.partialorder %v790_v6, 8.507059e+37 }
 0x1ed   : > { %v722_v54 = vadd.f32 %v1662_v34, %v721_v51  ;;  %v769_v55 = vmul.f32 %v1384_v47, %v768_v50 }
 0x1ef   : > { %v1386_v57 = vpop.eup %1385  ;;  %v1299_v58 = vmul.f32 -1.442695, %v722_v54  ;;  %v770_v59 = vadd.f32 %v1384_v47, %v769_v55 }
 0x1f0   : > { %v1388_v61 = vpop.eup %1387  ;;  %v760_v62 = vadd.f32 1.0, %v1386_v57 }
 0x1f1   : > { %v782_v0 = vmul.f32 %v1388_v61, %v759_v48  ;;  %1389 = vpow2.f32 %v1299_v58  ;;  %v774_v1 = vsel %vm773_vm5, %v1384_v47, %v770_v59  ;;  %vm787_vm7 = vweird.f32 %v1388_v61 }
 0x1f2   : > { %1391 = vrcp.f32 %v760_v62  ;;  %v779_v2 = vsel %vm776_vm6, %v778_v63, %v774_v1  ;;  %vm788_vm9 = vmor %vm786_vm8, %vm787_vm7  ;;  %v805_v25 = vand.u32 2147483647, %v760_v62  ;;  %v807_v26 = vand.u32 2147483648, %v760_v62 }
 0x1f3   : > { %v894_v3 = vmul.f32 %v886_v60, %v779_v2  ;;  %v783_v4 = vsub.f32 1.0, %v782_v0  ;;  %vm801_vm12 = vweird.f32 %v760_v62 }
 0x1f4   : > { %v724_v5 = vpop.f32.mrf.mxu3  ;;  %v808_v37 = vor.u32 1.1754944e-38, %v807_v26  ;;  %vm806_vm14 = vcmp.eq.f32.partialorder %v805_v25, 8.507059e+37 }
 0x1f5   : > { %v725_v8 = vadd.f32 %v1662_v34, %v724_v5  ;;  %v919_v9 = vpack.c.bf16 %v894_v3, %v894_v3  ;;  %v784_v10 = vmul.f32 %v1388_v61, %v783_v4 }
 0x1f7   : > { %v1390_v11 = vpop.eup %1389  ;;  %v1300_v12 = vmul.f32 -1.442695, %v725_v8  ;;  %1009 = vrot.lane.b32.xlu1 %v919_v9, %s1468_s23  ;;  %935 = vrot.lane.b32.xlu0 %v919_v9, %s1467_s26  ;;  %v785_v13 = vadd.f32 %v1388_v61, %v784_v10 }
 0x1f8   : > { %v1392_v15 = vpop.eup %1391  ;;  %v761_v16 = vadd.f32 1.0, %v1390_v11 }
 0x1f9   : > { %v797_v18 = vmul.f32 %v1392_v15, %v760_v62  ;;  %1393 = vpow2.f32 %v1300_v12  ;;  %v789_v19 = vsel %vm788_vm9, %v1388_v61, %v785_v13  ;;  %vm802_vm11 = vweird.f32 %v1392_v15  ;;  %v471_v62 = vld [vmem:[%s1605_s24 + $0x10] sm:$0xff]  }
 0x1fa   : > { %1395 = vrcp.f32 %v761_v16  ;;  %v794_v20 = vsel %vm791_vm10, %v793_v17, %v789_v19  ;;  %vm803_vm13 = vmor %vm801_vm12, %vm802_vm11  ;;  %v820_v44 = vand.u32 2147483647, %v761_v16  ;;  %v822_v45 = vand.u32 2147483648, %v761_v16 }
 0x1fb   : > { %v895_v21 = vmul.f32 %v887_v14, %v794_v20  ;;  %v798_v22 = vsub.f32 1.0, %v797_v18  ;;  %vm816_vm0 = vweird.f32 %v761_v16  ;;  %v890_v7 = vunpack.c.l.bf16 %v471_v62 }
 0x1fc   : > { %v726_v23 = vpop.f32.mrf.mxu3  ;;  %v823_v55 = vor.u32 1.1754944e-38, %v822_v45  ;;  %vm821_vm2 = vcmp.eq.f32.partialorder %v820_v44, 8.507059e+37 }
 0x1fd   : > { %v727_v27 = vadd.f32 %v1662_v34, %v726_v23  ;;  %v920_v28 = vpack.c.bf16 %v895_v21, %v895_v21  ;;  %v799_v29 = vmul.f32 %v1392_v15, %v798_v22 }
 0x1ff   : > { %v1394_v30 = vpop.eup %1393  ;;  %v1301_v31 = vmul.f32 -1.442695, %v727_v27  ;;  %1011 = vrot.lane.b32.xlu2 %v920_v28, %s1468_s23  ;;  %937 = vrot.lane.b32.xlu0 %v920_v28, %s1467_s26  ;;  %v800_v32 = vadd.f32 %v1392_v15, %v799_v29  ;;  %v891_v27 = vunpack.c.h.bf16 %v471_v62  ;;  %v473_v28 = vld [vmem:[%s1605_s24 + $0x18] sm:$0xff]   ;;  %s1305_s24 = sshll.u32 (%p1562_p6), %s1453_s30, 4 }
 0x200   : > { %v1396_v35 = vpop.eup %1395  ;;  %v762_v36 = vadd.f32 1.0, %v1394_v30  ;;  %s1053_s27 = sadd.s32 (%p1562_p6), %s1449_s29, %s1305_s24 }
 0x201   : > { %v812_v38 = vmul.f32 %v1396_v35, %v761_v16  ;;  %1397 = vpow2.f32 %v1301_v31  ;;  %v804_v39 = vsel %vm803_vm13, %v1392_v15, %v800_v32  ;;  %vm817_vm15 = vweird.f32 %v1396_v35  ;;  %s1306_s25 = sshll.u32 (%p1562_p6), %s1053_s27, 2 }
 0x202   : > { %1399 = vrcp.f32 %v762_v36  ;;  %v809_v40 = vsel %vm806_vm14, %v808_v37, %v804_v39  ;;  %vm818_vm1 = vmor %vm816_vm0, %vm817_vm15  ;;  %v835_v63 = vand.u32 2147483647, %v762_v36  ;;  %v837_v0 = vand.u32 2147483648, %v762_v36  ;;  %s1055_s16 = scalar_lea.vmem (%p1562_p6), %s1784_s8, %s1306_s25 }
 0x203   : > { %v896_v41 = vmul.f32 %v888_v33, %v809_v40  ;;  %v813_v42 = vsub.f32 1.0, %v812_v38  ;;  %vm831_vm4 = vweird.f32 %v762_v36 }
 0x204   : > { %v729_v43 = vpop.f32.mrf.mxu3  ;;  %v838_v10 = vor.u32 1.1754944e-38, %v837_v0  ;;  %vm836_vm6 = vcmp.eq.f32.partialorder %v835_v63, 8.507059e+37 }
 0x205   : > { %v730_v46 = vadd.f32 %v1662_v34, %v729_v43  ;;  %v921_v47 = vpack.c.bf16 %v896_v41, %v896_v41  ;;  %v814_v48 = vmul.f32 %v1396_v35, %v813_v42 }
 0x207   : > { %v1398_v49 = vpop.eup %1397  ;;  %v1302_v50 = vmul.f32 -1.442695, %v730_v46  ;;  %939 = vrot.lane.b32.xlu1 %v921_v47, %s1467_s26  ;;  %1013 = vrot.lane.b32.xlu0 %v921_v47, %s1468_s23  ;;  %v815_v51 = vadd.f32 %v1396_v35, %v814_v48 }
 0x208   : > { %v1400_v53 = vpop.eup %1399  ;;  %v763_v54 = vadd.f32 1.0, %v1398_v49 }
 0x209   : > { %v827_v56 = vmul.f32 %v1400_v53, %v762_v36  ;;  %1401 = vpow2.f32 %v1302_v50  ;;  %v819_v57 = vsel %vm818_vm1, %v1396_v35, %v815_v51  ;;  %vm832_vm3 = vweird.f32 %v1400_v53 }
 0x20a   : > { %1403 = vrcp.f32 %v763_v54  ;;  %v824_v58 = vsel %vm821_vm2, %v823_v55, %v819_v57  ;;  %vm833_vm5 = vmor %vm831_vm4, %vm832_vm3  ;;  %v852_v21 = vand.u32 2147483648, %v763_v54  ;;  %vm846_vm8 = vweird.f32 %v763_v54  ;;  %v979_v57 = vpop.permute.xlu0 %978 }
 0x20b   : > { %v897_v59 = vmul.f32 %v889_v52, %v824_v58  ;;  %v828_v60 = vsub.f32 1.0, %v827_v56  ;;  %v850_v23 = vand.u32 2147483647, %v763_v54  ;;  %v892_v35 = vunpack.c.l.bf16 %v473_v28  ;;  %v977_v56 = vpop.permute.xlu2 %976 }
 0x20c   : > { %v731_v61 = vpop.f32.mrf.mxu3  ;;  %v853_v26 = vor.u32 1.1754944e-38, %v852_v21  ;;  %v893_v50 = vunpack.c.h.bf16 %v473_v28  ;;  %vm959_vm3 = vcmask 60448   ;;  %vm1000_vm4 = vcmask 93248  }
 0x20d   : > { %v732_v1 = vadd.f32 %v1662_v34, %v731_v61  ;;  %v922_v2 = vpack.c.bf16 %v897_v59, %v897_v59  ;;  %v829_v3 = vmul.f32 %v1400_v53, %v828_v60  ;;  %vm851_vm10 = vcmp.eq.f32.partialorder %v850_v23, 8.507059e+37  ;;  %v981_v60 = vpop.permute.xlu1 %980 }
 0x20f   : > { %v1402_v4 = vpop.eup %1401  ;;  %v1303_v5 = vmul.f32 -1.442695, %v732_v1  ;;  %941 = vrot.lane.b32.xlu1 %v922_v2, %s1467_s26  ;;  %v830_v6 = vadd.f32 %v1400_v53, %v829_v3 }
 0x210   : > { %v1404_v8 = vpop.eup %1403  ;;  %v764_v9 = vadd.f32 1.0, %v1402_v4 }
 0x211   : > { %v842_v11 = vmul.f32 %v1404_v8, %v763_v54  ;;  %1405 = vpow2.f32 %v1303_v5  ;;  %v834_v12 = vsel %vm833_vm5, %v1400_v53, %v830_v6  ;;  %vm847_vm7 = vweird.f32 %v1404_v8 }
 0x212   : > { %1407 = vrcp.f32 %v764_v9  ;;  %v839_v34 = vsel %vm836_vm6, %v838_v10, %v834_v12  ;;  %vm848_vm9 = vmor %vm846_vm8, %vm847_vm7  ;;  %v867_v29 = vand.u32 2147483648, %v764_v9  ;;  %v865_v31 = vand.u32 2147483647, %v764_v9  ;;  %v985_v59 = vpop.permute.xlu0 %984 }
 0x213   : > { %v898_v13 = vmul.f32 %v890_v7, %v839_v34  ;;  %v843_v14 = vsub.f32 1.0, %v842_v11  ;;  %vm861_vm12 = vweird.f32 %v764_v9  ;;  %v983_v58 = vpop.permute.xlu2 %982  ;;  %vm1033_vm5 = vcmask 126048  }
 0x214   : > { %v868_v37 = vor.u32 1.1754944e-38, %v867_v29  ;;  %vm866_vm14 = vcmp.eq.f32.partialorder %v865_v31, 8.507059e+37 }
 0x215   : > { %v923_v15 = vpack.c.bf16 %v898_v13, %v898_v13  ;;  %v844_v16 = vmul.f32 %v1404_v8, %v843_v14  ;;  %v987_v63 = vpop.permute.xlu1 %986 }
 0x217   : > { %v1406_v17 = vpop.eup %1405  ;;  %943 = vrot.lane.b32.xlu2 %v923_v15, %s1467_s26  ;;  %1015 = vrot.lane.b32.xlu1 %v922_v2, %s1468_s23  ;;  %v845_v18 = vadd.f32 %v1404_v8, %v844_v16 }
 0x218   : > { %v1408_v19 = vpop.eup %1407  ;;  %v765_v20 = vadd.f32 1.0, %v1406_v17 }
 0x219   : > { %v857_v22 = vmul.f32 %v1408_v19, %v764_v9  ;;  %v849_v24 = vsel %vm848_vm9, %v1404_v8, %v845_v18  ;;  %vm862_vm11 = vweird.f32 %v1408_v19 }
 0x21a   : > { %1409 = vrcp.f32 %v765_v20  ;;  %v854_v32 = vsel %vm851_vm10, %v853_v26, %v849_v24  ;;  %vm863_vm13 = vmor %vm861_vm12, %vm862_vm11  ;;  %v880_v44 = vand.u32 2147483647, %v765_v20  ;;  %v882_v45 = vand.u32 2147483648, %v765_v20  ;;  %v991_v62 = vpop.permute.xlu0 %990 }
 0x21b   : > { %v858_v25 = vsub.f32 1.0, %v857_v22  ;;  %v899_v39 = vmul.f32 %v891_v27, %v854_v32  ;;  %vm876_vm0 = vweird.f32 %v765_v20  ;;  %v989_v61 = vpop.permute.xlu2 %988 }
 0x21c   : > { %v883_v51 = vor.u32 1.1754944e-38, %v882_v45  ;;  %vm881_vm2 = vcmp.eq.f32.partialorder %v880_v44, 8.507059e+37 }
 0x21d   : > { %v859_v30 = vmul.f32 %v1408_v19, %v858_v25  ;;  %v924_v46 = vpack.c.bf16 %v899_v39, %v899_v39 }
 0x21f   : > { %1017 = vrot.lane.b32.xlu2 %v923_v15, %s1468_s23  ;;  %v860_v33 = vadd.f32 %v1408_v19, %v859_v30 }
 0x220   : > { %v1410_v36 = vpop.eup %1409 }
 0x221   : > { %v872_v38 = vmul.f32 %v1410_v36, %v765_v20  ;;  %v864_v40 = vsel %vm863_vm13, %v1408_v19, %v860_v33  ;;  %vm877_vm15 = vweird.f32 %v1410_v36 }
 0x222   : > { %v869_v41 = vsel %vm866_vm14, %v868_v37, %v864_v40  ;;  %vm878_vm1 = vmor %vm876_vm0, %vm877_vm15 }
 0x223   : > { %v900_v42 = vmul.f32 %v892_v35, %v869_v41  ;;  %v873_v43 = vsub.f32 1.0, %v872_v38 }
 0x225   : > { %v925_v47 = vpack.c.bf16 %v900_v42, %v900_v42  ;;  %v874_v48 = vmul.f32 %v1410_v36, %v873_v43 }
 0x227   : > { %945 = vrot.lane.b32.xlu2 %v924_v46, %s1467_s26  ;;  %947 = vrot.lane.b32.xlu0 %v925_v47, %s1467_s26  ;;  %v875_v49 = vadd.f32 %v1410_v36, %v874_v48 }
 0x229   : > { %v879_v52 = vsel %vm878_vm1, %v1410_v36, %v875_v49 }
 0x22a   : > { %v884_v53 = vsel %vm881_vm2, %v883_v51, %v879_v52 }
 0x22b   : > { %v901_v54 = vmul.f32 %v893_v50, %v884_v53 }
 0x22d   : > { %v926_v55 = vpack.c.bf16 %v901_v54, %v901_v54 }
 0x22f   : > { %1023 = vrot.lane.b32.xlu2 %v926_v55, %s1468_s23  ;;  %949 = vrot.lane.b32.xlu1 %v926_v55, %s1467_s26 }
 0x230   : > { %1019 = vrot.lane.b32.xlu0 %v924_v46, %s1468_s23 }
 0x237   : > { %1021 = vrot.lane.b32.xlu1 %v925_v47, %s1468_s23 }
 0x259   : > { %v1012_v0 = vpop.permute.xlu2 %1011 }
 0x269   : > { %v936_v1 = vpop.permute.xlu0 %935  ;;  %v1010_v2 = vpop.permute.xlu1 %1009 }
 0x26a   : > { %960 = vst.msk [vmem:[%s1615_s14] sm:$0xf] %vm959_vm3, %v936_v1 }
 0x26b   : > { %1001 = vst.msk [vmem:[%s1615_s14] sm:$0xf] %vm1000_vm4, %v977_v56 }
 0x26c   : > { %1034 = vst.msk [vmem:[%s1615_s14] sm:$0xf] %vm1033_vm5, %v1010_v2 }
 0x271   : > { %v944_v3 = vpop.permute.xlu2 %943  ;;  %v938_v4 = vpop.permute.xlu0 %937 }
 0x272   : > { %964 = vst.msk [vmem:[%s1615_s14 + $0x10] sm:$0xf] %vm959_vm3, %v944_v3 }
 0x273   : > { %1005 = vst.msk [vmem:[%s1615_s14 + $0x10] sm:$0xf] %vm1000_vm4, %v985_v59  ;;  %v1072_v15 = vld [vmem:[%s1615_s14] sm:$0xf] (%p1562_p6) }
 0x274   : > { %961 = vst.msk [vmem:[%s1615_s14 + $0x4] sm:$0xf] %vm959_vm3, %v938_v4 }
 0x275   : > { %1002 = vst.msk [vmem:[%s1615_s14 + $0x4] sm:$0xf] %vm1000_vm4, %v979_v57 }
 0x276   : > { %1035 = vst.msk [vmem:[%s1615_s14 + $0x4] sm:$0xf] %vm1033_vm5, %v1012_v0 }
 0x277   : > { %1073 = vst [vmem:[%s1055_s16] sm:$0xf] (%p1562_p6), %v1072_v15 }
 0x279   : > { %v1018_v5 = vpop.permute.xlu2 %1017  ;;  %v940_v6 = vpop.permute.xlu1 %939 }
 0x27a   : > { %1038 = vst.msk [vmem:[%s1615_s14 + $0x10] sm:$0xf] %vm1033_vm5, %v1018_v5  ;;  %v1014_v7 = vpop.permute.xlu0 %1013 }
 0x27b   : > { %962 = vst.msk [vmem:[%s1615_s14 + $0x8] sm:$0xf] %vm959_vm3, %v940_v6 }
 0x27c   : > { %1003 = vst.msk [vmem:[%s1615_s14 + $0x8] sm:$0xf] %vm1000_vm4, %v981_v60 }
 0x27d   : > { %1036 = vst.msk [vmem:[%s1615_s14 + $0x8] sm:$0xf] %vm1033_vm5, %v1014_v7  ;;  %v1074_v16 = vld [vmem:[%s1615_s14 + $0x4] sm:$0xf] (%p1562_p6) }
 0x27e   : > { %1075 = vst [vmem:[%s1055_s16 + $0x8] sm:$0xf] (%p1562_p6), %v1074_v16 }
 0x281   : > { %v946_v8 = vpop.permute.xlu2 %945  ;;  %v942_v9 = vpop.permute.xlu1 %941  ;;  %v1080_v19 = vld [vmem:[%s1615_s14 + $0x10] sm:$0xf] (%p1562_p6) }
 0x282   : > { %965 = vst.msk [vmem:[%s1615_s14 + $0x14] sm:$0xf] %vm959_vm3, %v946_v8 }
 0x283   : > { %1006 = vst.msk [vmem:[%s1615_s14 + $0x14] sm:$0xf] %vm1000_vm4, %v987_v63 }
 0x284   : > { %963 = vst.msk [vmem:[%s1615_s14 + $0xc] sm:$0xf] %vm959_vm3, %v942_v9  ;;  %v1076_v17 = vld [vmem:[%s1615_s14 + $0x8] sm:$0xf] (%p1562_p6) }
 0x285   : > { %1004 = vst.msk [vmem:[%s1615_s14 + $0xc] sm:$0xf] %vm1000_vm4, %v983_v58 }
 0x286   : > { %1077 = vst [vmem:[%s1055_s16 + $0x10] sm:$0xf] (%p1562_p6), %v1076_v17 }
 0x287   : > { %1081 = vst [vmem:[%s1055_s16 + $0x20] sm:$0xf] (%p1562_p6), %v1080_v19 }
 0x289   : > { %v1016_v10 = vpop.permute.xlu1 %1015  ;;  %v1024_v13 = vpop.permute.xlu2 %1023 }
 0x28a   : > { %1037 = vst.msk [vmem:[%s1615_s14 + $0xc] sm:$0xf] %vm1033_vm5, %v1016_v10 }
 0x291   : > { %v1078_v18 = vld [vmem:[%s1615_s14 + $0xc] sm:$0xf] (%p1562_p6) }
 0x292   : > { %1079 = vst [vmem:[%s1055_s16 + $0x18] sm:$0xf] (%p1562_p6), %v1078_v18 }
 0x299   : > { %v948_v11 = vpop.permute.xlu0 %947 }
 0x29a   : > { %966 = vst.msk [vmem:[%s1615_s14 + $0x18] sm:$0xf] %vm959_vm3, %v948_v11 }
 0x29b   : > { %1007 = vst.msk [vmem:[%s1615_s14 + $0x18] sm:$0xf] %vm1000_vm4, %v989_v61 }
 0x2a1   : > { %v950_v12 = vpop.permute.xlu1 %949 }
 0x2a2   : > { %967 = vst.msk [vmem:[%s1615_s14 + $0x1c] sm:$0xf] %vm959_vm3, %v950_v12  ;;  %v1020_v34 = vpop.permute.xlu0 %1019 }
 0x2a3   : > { %1008 = vst.msk [vmem:[%s1615_s14 + $0x1c] sm:$0xf] %vm1000_vm4, %v991_v62 }
 0x2a4   : > { %1041 = vst.msk [vmem:[%s1615_s14 + $0x1c] sm:$0xf] %vm1033_vm5, %v1024_v13 }
 0x2a5   : > { %1039 = vst.msk [vmem:[%s1615_s14 + $0x14] sm:$0xf] %vm1033_vm5, %v1020_v34 }
 0x2a6   : > { %1048 = sbr.rel (!%p1562_p6) target bundleno = 691 (0x2b3), region = 97 }
 0x2a9   : > { %v1022_v14 = vpop.permute.xlu1 %1021 }
 0x2aa   : > { %1040 = vst.msk [vmem:[%s1615_s14 + $0x18] sm:$0xf] %vm1033_vm5, %v1022_v14 }
 0x2ab   : > { %v1086_v22 = vld [vmem:[%s1615_s14 + $0x1c] sm:$0xf] }
 0x2ac   : > { %v1082_v20 = vld [vmem:[%s1615_s14 + $0x14] sm:$0xf]  ;;  %1087 = vst [vmem:[%s1055_s16 + $0x38] sm:$0xf] %v1086_v22 }
 0x2ad   : > { %1083 = vst [vmem:[%s1055_s16 + $0x28] sm:$0xf] %v1082_v20 }
 0x2b1   : > { %v1084_v21 = vld [vmem:[%s1615_s14 + $0x18] sm:$0xf] }
 0x2b2   : > { %1085 = vst [vmem:[%s1055_s16 + $0x30] sm:$0xf] %v1084_v21 }
 0x2b3 PF: > { %s18_s11 = sadd.s32 1, %s1465_s11   ;;  %s1786_s27 = smov %s1445_s28 }
 0x2b4   : > { %p15_p0 = scmp.ge.s32.totalorder %s18_s11, 6   ;;  %s1787_s28 = smov %s1570_s20 }
 0x2b5   : > { %s1788_s29 = smov %s1457_s9  ;;  %s1789_s30 = smov %s1461_s10 }
 0x2b6   : > { %s1790_s9 = smov %s1793_s12  ;;  %s1791_s10 = smov %s1797_s13 }
 0x2b7   :  { %17 = sbr.rel (!%p15_p0) target bundleno = 4 (0x4), region = 176 }

// kernel: unet_decoder_attention.10
= control target key start
LH: loop header
LB: loop body
LE: loop exit
PB: predicated region body
PF: predicated region fallthrough
CT: control target
= control target key end

     0   :  { %s3480_s12 = smov 0   ;;  %s3482_s13 = smov 0   ;;  %s5106_s0 = inlined_call_operand.vmem [shape: bf16[2,19,24,8], index: 0, kind: input, shape index: {}]   ;;  %s5107_s1 = inlined_call_operand.vmem [shape: bf16[3,24,4], index: 1, kind: input, shape index: {}]   ;;  %s5108_s2 = inlined_call_operand.vmem [shape: f32[1,4], index: 2, kind: input, shape index: {}]   ;;  %s5109_s3 = inlined_call_operand.vmem [shape: bf16[2,16,16,4], index: 3, kind: output, shape index: {}]  }
   0x1   :  { %s3484_s14 = smov 0  }
   0x2 LB: > { %s25_s15 = sadd.s32 1, %s3452_s13  ;;  %p2838_p0 = scmp.ge.s32.totalorder %s3456_s14, 1  ;;  %s3456_s14 = sphi %s3484_s14, %s13_s14   ;;  %s3452_s13 = sphi %s3482_s13, %s5129_s13   ;;  %s3448_s12 = sphi %s3480_s12, %s5128_s12  }
   0x3   : > { %p27_p1 = scmp.ge.s32.totalorder %s25_s15, 2  ;;  %p151_p2 = scmp.lt.s32.totalorder %s3456_s14, 3 }
   0x5   : > { %s5131_s15 = smov (%p27_p1, %s25_s15), 0  ;;  %p152_p3 = pnand %p2838_p0, %p151_p2 }
   0x6   : > { %p180_p4 = scmp.lt.s32.totalorder (!%p152_p3), %s3448_s12, 1  ;;  %s3458_s20 = smov (!%p152_p3), 16  }
   0x7   : > { %155 = sbr.rel (%p152_p3) target bundleno = 651 (0x28b), region = 32  ;;  %s3459_s21 = smov (!%p152_p3), 8  }
   0xc   : > { %s5133_s12 = smov (!%p180_p4, %s3448_s12), 1  ;;  %vm618_vm0 = vcmask 1046528   ;;  %vm373_vm1 = vsmask.f32 7424  ;;  %vm1492_vm2 = vcmask 1043456   ;;  %vm716_vm3 = vcmask 64512  }
   0xd   : > { %s3402_s16 = smul.u32 228, %s5133_s12  ;;  %vm765_vm4 = vcmask 130048   ;;  %vm1443_vm5 = vcmask 195584   ;;  %s3320_s9 = sshll.u32 %s5133_s12, 7  ;;  %vm2704_vm6 = vcmask 27648  }
   0xe   : > { %s4457_s12 = scalar_lea.vmem %s5109_s3, %s3320_s9 }
   0xf   : > { %s3504_s19 = scalar_lea.vmem %s5106_s0, %s3402_s16 }
  0x10   : > { %v3507_v0 = vld [vmem:[%s3504_s19 + $0x9c] sm:$0xff]  ;;  %v3510_v1 = vld [vmem:[%s3504_s19 + $0xa4] sm:$0xff]  ;;  %v3551_v24 = vld [vmem:[%s3504_s19 + $0xc] sm:$0xff] }
  0x11   : > { %v3513_v2 = vld [vmem:[%s3504_s19] sm:$0xff]  ;;  %v3516_v3 = vld [vmem:[%s3504_s19 + $0x8] sm:$0xff]  ;;  %v5110_v4 = vrot.slane %v3507_v0, 1  ;;  %v1274_v5 = vrot.slane %v3510_v1, 1  ;;  %v3522_v7 = vld [vmem:[%s3504_s19 + $0x18] sm:$0xff]  ;;  %v1137_v9 = vshll.u32 %v3507_v0, 16 }
  0x12   : > { %v619_v6 = vrot.slane %v3513_v2, 1  ;;  %v3525_v8 = vld [vmem:[%s3504_s19 + $0x20] sm:$0xff]  ;;  %v620_v10 = vrot.slane %v3516_v3, 1  ;;  %v1141_v11 = vshrl.u32 %v3507_v0, 16  ;;  %v1145_v14 = vshll.u32 %v3510_v1, 16  ;;  %v3557_v28 = vld [vmem:[%s3504_s19 + $0x14] sm:$0xff] }
  0x13   : > { %v1275_v12 = vsel %vm618_vm0, %v5110_v4, %v1274_v5  ;;  %v3535_v13 = vrot.slane %v1137_v9, 1  ;;  %v2202_v16 = vrot.slane %v3522_v7, 1  ;;  %v2203_v17 = vrot.slane %v3525_v8, 1  ;;  %v3572_v42 = vld [vmem:[%s3504_s19 + $0x28] sm:$0xff]  ;;  %v3588_v55 = vld [vmem:[%s3504_s19 + $0x1c] sm:$0xff]  ;;  %v3592_v58 = vld [vmem:[%s3504_s19 + $0x10] sm:$0xff] }
  0x14   : > { %1322 = vrot.lane.b32.xlu1 %v1275_v12, %s3458_s20  ;;  %v621_v15 = vsel %vm618_vm0, %v619_v6, %v620_v10  ;;  %v1147_v19 = vrot.slane %v1145_v14, 1  ;;  %v1961_v20 = vshll.u32 %v3522_v7, 16  ;;  %v375_v21 = vshrl.u32 %v3513_v2, 16  ;;  %v3576_v45 = vld [vmem:[%s3504_s19 + $0xac] sm:$0xff] }
  0x15   : > { %668 = vrot.lane.b32.xlu0 %v621_v15, %s3458_s20  ;;  %v1143_v18 = vor.u32 %v1141_v11, %v3535_v13  ;;  %v377_v22 = vshll.u32 %v3513_v2, 16  ;;  %v382_v23 = vshll.u32 %v3516_v3, 16  ;;  %v2204_v27 = vsel %vm618_vm0, %v2202_v16, %v2203_v17  ;;  %v3606_v16 = vld [vmem:[%s3504_s19 + $0xb4] sm:$0xff] }
  0x16   : > { %v1959_v29 = vshrl.u32 %v3522_v7, 16  ;;  %v1963_v31 = vrot.slane %v1961_v20, 1  ;;  %v1966_v32 = vshll.u32 %v3525_v8, 16  ;;  %v1237_v34 = vrot.slane %v3551_v24, 1 }
  0x17   : > { %v379_v25 = vrot.slane %v377_v22, 1  ;;  %v384_v26 = vrot.slane %v382_v23, 1  ;;  %v1148_v30 = vsel %vm373_vm1, %v1143_v18, %v1147_v19  ;;  %v1238_v36 = vrot.slane %v3557_v28, 1 }
  0x18   : > { %v1001_v37 = vshll.u32 %v3557_v28, 16  ;;  %v994_v38 = vshrl.u32 %v3551_v24, 16  ;;  %v996_v39 = vshll.u32 %v3551_v24, 16  ;;  %v1964_v40 = vor.u32 %v1963_v31, %v1959_v29 }
  0x19   : > { %v380_v33 = vor.u32 %v379_v25, %v375_v21  ;;  %v1968_v41 = vrot.slane %v1966_v32, 1  ;;  %v1239_v44 = vsel %vm618_vm0, %v1237_v34, %v1238_v36  ;;  %v1970_v49 = vshrl.u32 %v3525_v8, 16  ;;  %v3624_v32 = vld [vmem:[%s3504_s19 + $0x30] sm:$0xff] }
  0x1a   : > { %v998_v43 = vrot.slane %v996_v39, 1  ;;  %v1003_v46 = vrot.slane %v1001_v37, 1  ;;  %v1974_v50 = vshll.u32 %v3572_v42, 16  ;;  %v1149_v51 = vshrl.u32 %v3510_v1, 16 }
  0x1b   : > { %v385_v35 = vsel %vm373_vm1, %v380_v33, %v384_v26  ;;  %v1969_v48 = vsel %vm373_vm1, %v1964_v40, %v1968_v41  ;;  %v1153_v53 = vshll.u32 %v3576_v45, 16  ;;  %v1276_v54 = vrot.slane %v3576_v45, 1 }
  0x1c   : > { %2251 = vrot.lane.b32.xlu1 %v2204_v27, %s3458_s20  ;;  %570 = vrot.lane.b32.xlu2 %v385_v35, %s3459_s21  ;;  %v999_v47 = vor.u32 %v998_v43, %v994_v38  ;;  %v1972_v56 = vor.u32 %v1970_v49, %v1968_v41  ;;  %v1976_v57 = vrot.slane %v1974_v50, 1  ;;  %v1151_v59 = vor.u32 %v1149_v51, %v1147_v19  ;;  %v3643_v43 = vld [vmem:[%s3504_s19 + $0x18] sm:$0xff] }
  0x1d   : > { %1225 = vrot.lane.b32.xlu0 %v1148_v30, %s3459_s21  ;;  %v1155_v60 = vrot.slane %v1153_v53, 1  ;;  %v1277_v61 = vsel %vm618_vm0, %v1274_v5, %v1276_v54  ;;  %v1005_v62 = vshrl.u32 %v3557_v28, 16  ;;  %v1009_v63 = vshll.u32 %v3588_v55, 16  ;;  %v3654_v51 = vld [vmem:[%s3504_s19 + $0x38] sm:$0xff] }
  0x1e   : > { %v1004_v52 = vsel %vm373_vm1, %v999_v47, %v1003_v46  ;;  %v1977_v6 = vsel %vm373_vm1, %v1972_v56, %v1976_v57  ;;  %v386_v9 = vshrl.u32 %v3516_v3, 16  ;;  %v390_v11 = vshll.u32 %v3592_v58, 16 }
  0x1f   : > { %v1156_v12 = vsel %vm373_vm1, %v1151_v59, %v1155_v60  ;;  %v1007_v14 = vor.u32 %v1005_v62, %v1003_v46  ;;  %v1011_v15 = vrot.slane %v1009_v63, 1  ;;  %v2205_v19 = vrot.slane %v3572_v42, 1 }
  0x20   : > { %v388_v5 = vor.u32 %v386_v9, %v384_v26  ;;  %v392_v18 = vrot.slane %v390_v11, 1  ;;  %v1157_v21 = vshrl.u32 %v3576_v45, 16  ;;  %v1161_v22 = vshll.u32 %v3606_v16, 16 }
  0x21   : > { %v1012_v20 = vsel %vm373_vm1, %v1007_v14, %v1011_v15  ;;  %v2206_v25 = vsel %vm618_vm0, %v2203_v17, %v2205_v19  ;;  %v1240_v29 = vrot.slane %v3588_v55, 1  ;;  %v622_v30 = vrot.slane %v3592_v58, 1  ;;  %v3670_v14 = vld [vmem:[%s3504_s19 + $0x20] sm:$0xff] }
  0x22   : > { %v393_v23 = vsel %vm373_vm1, %v388_v5, %v392_v18  ;;  %v1159_v26 = vor.u32 %v1157_v21, %v1155_v60  ;;  %v1163_v27 = vrot.slane %v1161_v22, 1  ;;  %v1978_v34 = vshrl.u32 %v3572_v42, 16 }
  0x23   : > { %v1241_v17 = vsel %vm618_vm0, %v1238_v36, %v1240_v29  ;;  %v623_v33 = vsel %vm618_vm0, %v620_v10, %v622_v30  ;;  %v1982_v35 = vshll.u32 %v3624_v32, 16  ;;  %v2207_v37 = vrot.slane %v3624_v32, 1  ;;  %v3638_v36 = vld [vmem:[%s3504_s19 + $0x24] sm:$0xff] }
  0x24   : > { %1286 = vrot.lane.b32.xlu1 %v1239_v44, %s3458_s20  ;;  %1189 = vrot.lane.b32.xlu2 %v1004_v52, %s3459_s21  ;;  %v1164_v31 = vsel %vm373_vm1, %v1159_v26, %v1163_v27  ;;  %v1278_v38 = vrot.slane %v3606_v16, 1  ;;  %v1980_v39 = vor.u32 %v1978_v34, %v1976_v57  ;;  %v1013_v44 = vshrl.u32 %v3588_v55, 16 }
  0x25   : > { %2154 = vrot.lane.b32.xlu0 %v1969_v48, %s3459_s21  ;;  %v1984_v40 = vrot.slane %v1982_v35, 1  ;;  %v2208_v10 = vsel %vm618_vm0, %v2205_v19, %v2207_v37  ;;  %v1017_v46 = vshll.u32 %v3638_v36, 16  ;;  %v394_v48 = vshrl.u32 %v3592_v58, 16 }
  0x26   : > { %v1279_v41 = vsel %vm618_vm0, %v1276_v54, %v1278_v38  ;;  %v398_v49 = vshll.u32 %v3643_v43, 16  ;;  %v624_v50 = vrot.slane %v3643_v43, 1  ;;  %v1015_v52 = vor.u32 %v1013_v44, %v1011_v15  ;;  %v3658_v54 = vld [vmem:[%s3504_s19 + $0xbc] sm:$0xff] }
  0x27   : > { %v1985_v47 = vsel %vm373_vm1, %v1980_v39, %v1984_v40  ;;  %v1019_v53 = vrot.slane %v1017_v46, 1  ;;  %v396_v56 = vor.u32 %v394_v48, %v392_v18  ;;  %v1986_v60 = vshrl.u32 %v3624_v32, 16  ;;  %v816_v39 = vld [vmem:[%s5107_s1 + $0x8] sm:$0xf] }
  0x28   : > { %v400_v57 = vrot.slane %v398_v49, 1  ;;  %v625_v59 = vsel %vm618_vm0, %v622_v30, %v624_v50  ;;  %v1165_v63 = vshrl.u32 %v3606_v16, 16  ;;  %v1242_v18 = vrot.slane %v3638_v36, 1  ;;  %v3709_v46 = vld [vmem:[%s3504_s19 + $0xc4] sm:$0xff] }
  0x29   : > { %v1020_v62 = vsel %vm373_vm1, %v1015_v52, %v1019_v53  ;;  %v1988_v11 = vor.u32 %v1986_v60, %v1984_v40  ;;  %v406_v21 = vshll.u32 %v3670_v14, 16  ;;  %v1280_v30 = vrot.slane %v3658_v54, 1 }
  0x2a   : > { %v401_v9 = vsel %vm373_vm1, %v396_v56, %v400_v57  ;;  %v1167_v15 = vor.u32 %v1165_v63, %v1163_v27  ;;  %v2209_v27 = vrot.slane %v3654_v51, 1  ;;  %v1021_v34 = vshrl.u32 %v3638_v36, 16 }
  0x2b   : > { %v3681_v26 = vrot.slane %v406_v21, 1  ;;  %v1994_v49 = vshrl.u32 %v3654_v51, 16  ;;  %v1282_v60 = vrot.slane %v3709_v46, 1 }
  0x2c   : > { %1324 = vrot.lane.b32.xlu1 %v1277_v61, %s3458_s20  ;;  %1227 = vrot.lane.b32.xlu2 %v1156_v12, %s3459_s21  ;;  %v1990_v61 = vshll.u32 %v3654_v51, 16 }
  0x2d   : > { %2156 = vrot.lane.b32.xlu0 %v1977_v6, %s3459_s21  ;;  %v1169_v6 = vshll.u32 %v3658_v54, 16 }
  0x2e   : > { %v1992_v12 = vrot.slane %v1990_v61, 1  ;;  %v1177_v61 = vshll.u32 %v3709_v46, 16 }
  0x2f   : > { %v1171_v5 = vrot.slane %v1169_v6, 1 }
  0x30   : > { %v1993_v19 = vsel %vm373_vm1, %v1988_v11, %v1992_v12  ;;  %v1996_v63 = vor.u32 %v1994_v49, %v1992_v12  ;;  %v3739_v11 = vld [vmem:[%s3504_s19 + $0x28] sm:$0xff]  ;;  %v1283_v12 = vsel %vm618_vm0, %v1280_v30, %v1282_v60 }
  0x31   : > { %v1172_v22 = vsel %vm373_vm1, %v1167_v15, %v1171_v5  ;;  %v2986_v15 = vld [vmem:[%s3504_s19 + $0xcc] sm:$0xf] }
  0x34   : > { %1191 = vrot.lane.b32.xlu1 %v1012_v20, %s3459_s21  ;;  %2253 = vrot.lane.b32.xlu2 %v2206_v25, %s3458_s20  ;;  %v402_v20 = vshrl.u32 %v3643_v43, 16 }
  0x35   : > { %572 = vrot.lane.b32.xlu0 %v393_v23, %s3459_s21  ;;  %v1243_v23 = vsel %vm618_vm0, %v1240_v29, %v1242_v18  ;;  %v2210_v29 = vsel %vm618_vm0, %v2207_v37, %v2209_v27  ;;  %v1614_v37 = vunpack.c.l.b16 %v816_v39 }
  0x36   : > { %v404_v25 = vor.u32 %v402_v20, %v400_v57  ;;  %v1179_v20 = vrot.slane %v1177_v61, 1 }
  0x37   : > { %v1616_v44 = vpack.c.b16 %v1614_v37, %v1614_v37  ;;  %v3370_v37 = vld [vmem:[%s5107_s1 + $0xc] sm:$0xff] }
  0x39   : > { %v1667_v56 = vsel %vm1492_vm2, %v1616_v44, 0 }
  0x3a   : > { %1675 = vmatpush.bf16.msra.mxu1 %v1667_v56 }
  0x3c   : > { %1229 = vrot.lane.b32.xlu1 %v1164_v31, %s3459_s21  ;;  %670 = vrot.lane.b32.xlu2 %v623_v33, %s3458_s20  ;;  %v409_v31 = vsel %vm373_vm1, %v404_v25, %v3681_v26  ;;  %v1281_v33 = vsel %vm618_vm0, %v1278_v38, %v1280_v30  ;;  %v626_v38 = vrot.slane %v3670_v14, 1 }
  0x3d   : > { %1288 = vrot.lane.b32.xlu0 %v1241_v17, %s3458_s20  ;;  %v3689_v17 = vld [vmem:[%s3504_s19 + $0x2c] sm:$0xff] }
  0x3e   : > { %v1025_v35 = vshll.u32 %v3689_v17, 16  ;;  %v1244_v40 = vrot.slane %v3689_v17, 1 }
  0x40   : > { %v1245_v48 = vsel %vm618_vm0, %v1242_v18, %v1244_v40 }
  0x44   : > { %2255 = vrot.lane.b32.xlu1 %v2208_v10, %s3458_s20  ;;  %2158 = vrot.lane.b32.xlu2 %v1985_v47, %s3459_s21  ;;  %v3704_v10 = vld [vmem:[%s3504_s19 + $0x40] sm:$0xff]  ;;  %v1027_v47 = vrot.slane %v1025_v35, 1 }
  0x45   : > { %1326 = vrot.lane.b32.xlu0 %v1279_v41, %s3458_s20  ;;  %v1023_v41 = vor.u32 %v1021_v34, %v1019_v53  ;;  %v1998_v52 = vshll.u32 %v3704_v10, 16  ;;  %v627_v53 = vsel %vm618_vm0, %v624_v50, %v626_v38  ;;  %v3732_v50 = vld [vmem:[%s3504_s19 + $0x34] sm:$0xff]  ;;  %v2211_v49 = vrot.slane %v3704_v10, 1 }
  0x46   : > { %v1033_v25 = vshll.u32 %v3732_v50, 16 }
  0x47   : > { %v1028_v57 = vsel %vm373_vm1, %v1023_v41, %v1027_v47  ;;  %v3729_v6 = vrot.slane %v1998_v52, 1  ;;  %v3289_v41 = vld [vmem:[%s5107_s1 + $0x20] sm:$0xf] }
  0x48   : > { %v1035_v35 = vrot.slane %v1033_v25, 1  ;;  %v2404_v52 = vunpack.c.l.b16 %v3289_v41 }
  0x4c   : > { %672 = vrot.lane.b32.xlu1 %v625_v59, %s3458_s20  ;;  %574 = vrot.lane.b32.xlu2 %v401_v9, %s3459_s21  ;;  %v1173_v59 = vshrl.u32 %v3658_v54, 16  ;;  %v3085_v9 = vld [vmem:[%s5107_s1 + $0x14] sm:$0xf] }
  0x4d   : > { %1193 = vrot.lane.b32.xlu0 %v1020_v62, %s3459_s21  ;;  %v3345_v62 = vld [vmem:[%s5107_s1] sm:$0xff] }
  0x4e   : > { %v1175_v18 = vor.u32 %v1173_v59, %v1171_v5  ;;  %1676 = vmatpush.bf16.msra.mxu1 %v3345_v62  ;;  %v414_v5 = vshll.u32 %v3739_v11, 16 }
  0x54   : > { %2160 = vrot.lane.b32.xlu1 %v1993_v19, %s3459_s21  ;;  %1290 = vrot.lane.b32.xlu2 %v1243_v23, %s3458_s20  ;;  %v1439_v19 = vunpack.c.l.b16 %v3085_v9  ;;  %v1029_v23 = vshrl.u32 %v3689_v17, 16 }
  0x55   : > { %1231 = vrot.lane.b32.xlu0 %v1172_v22, %s3459_s21  ;;  %v2001_v22 = vsel %vm373_vm1, %v1996_v63, %v3729_v6 }
  0x56   : > { %v1441_v21 = vpack.c.b16 %v1439_v19, %v1439_v19  ;;  %v1031_v30 = vor.u32 %v1029_v23, %v1027_v47  ;;  %v2406_v47 = vpack.c.b16 %v2404_v52, %v2404_v52 }
  0x58   : > { %v1494_v34 = vsel %vm1492_vm2, %v1441_v21, 0  ;;  %v3774_v63 = vsel %vm1492_vm2, %v2406_v47, 0 }
  0x59   : > { %3396 = vmatpush.bf16.msra.mxu3 %v1494_v34  ;;  %1502 = vmatpush.bf16.msra.mxu0 %v1494_v34  ;;  %v3816_v34 = vld [vmem:[%s3504_s19 + $0x30] sm:$0xff] }
  0x5a   : > { %2465 = vmatpush.bf16.msra.mxu2 %v3774_v63 }
  0x5c   : > { %576 = vrot.lane.b32.xlu1 %v409_v31, %s3459_s21  ;;  %1328 = vrot.lane.b32.xlu2 %v1281_v33, %s3458_s20  ;;  %v991_v31 = vunpack.c.l.b16 %v2986_v15  ;;  %v1180_v33 = vsel %vm373_vm1, %v1175_v18, %v1179_v20  ;;  %v3783_v15 = vld [vmem:[%s5107_s1 + $0x18] sm:$0xff]  ;;  %v628_v18 = vrot.slane %v3739_v11, 1 }
  0x5d   : > { %2257 = vrot.lane.b32.xlu0 %v2210_v29, %s3458_s20  ;;  %v410_v29 = vshrl.u32 %v3670_v14, 16  ;;  %3397 = vmatpush.bf16.msra.mxu3 %v3370_v37 }
  0x5e   : > { %v992_v39 = vpack.c.b16 %v991_v31, %v991_v31  ;;  %1503 = vmatpush.bf16.msra.mxu0 %v3370_v37  ;;  %2466 = vmatpush.bf16.msra.mxu2 %v3783_v15  ;;  %v629_v21 = vsel %vm618_vm0, %v626_v38, %v628_v18  ;;  %v3806_v31 = vld [vmem:[%s3504_s19 + $0x3c] sm:$0xff] }
  0x5f   : > { %v412_v44 = vor.u32 %v410_v29, %v3681_v26  ;;  %v2212_v26 = vsel %vm618_vm0, %v2209_v27, %v2211_v49  ;;  %v1246_v27 = vrot.slane %v3732_v50, 1  ;;  %v1041_v37 = vshll.u32 %v3806_v31, 16 }
  0x60   : > { %v1185_v59 = vshll.u32 %v992_v39, 16 }
  0x61   : > { %3398 = vmatpush.bf16.msrb.mxu3 %v1667_v56 }
  0x62   : > { %v1187_v9 = vrot.slane %v1185_v59, 1 }
  0x64   : > { %1292 = vrot.lane.b32.xlu1 %v1245_v48, %s3458_s20  ;;  %1195 = vrot.lane.b32.xlu2 %v1028_v57, %s3459_s21  ;;  %v3763_v48 = vrot.slane %v414_v5, 1  ;;  %v1181_v57 = vshrl.u32 %v3709_v46, 16 }
  0x65   : > { %674 = vrot.lane.b32.xlu0 %v627_v53, %s3458_s20  ;;  %v1036_v53 = vsel %vm373_vm1, %v1031_v30, %v1035_v35  ;;  %3399 = vmatpush.bf16.msrb.mxu3 %v3345_v62  ;;  %v1037_v30 = vshrl.u32 %v3732_v50, 16 }
  0x66   : > { %v417_v61 = vsel %vm373_vm1, %v412_v44, %v3763_v48  ;;  %v1183_v56 = vor.u32 %v1181_v57, %v1179_v20  ;;  %v1247_v20 = vsel %vm618_vm0, %v1244_v40, %v1246_v27  ;;  %v1284_v40 = vrot.slane %v992_v39, 1  ;;  %v3837_v57 = vld [vmem:[%s3504_s19 + $0x50] sm:$0xff] }
  0x67   : > { %v418_v44 = vshrl.u32 %v3739_v11, 16  ;;  %v1039_v47 = vor.u32 %v1037_v30, %v1035_v35  ;;  %v3866_v30 = vld [vmem:[%s3504_s19 + $0x38] sm:$0xff] }
  0x68   : > { %v1188_v62 = vsel %vm373_vm1, %v1183_v56, %v1187_v9  ;;  %v1285_v39 = vsel %vm618_vm0, %v1282_v60, %v1284_v40  ;;  %v630_v60 = vrot.slane %v3816_v34, 1 }
  0x69   : > { %v420_v56 = vor.u32 %v418_v44, %v3763_v48  ;;  %v2014_v48 = vshll.u32 %v3837_v57, 16  ;;  %v1248_v44 = vrot.slane %v3806_v31, 1 }
  0x6c   : > { %1330 = vrot.lane.b32.xlu1 %v1283_v12, %s3458_s20  ;;  %1233 = vrot.lane.b32.xlu2 %v1180_v33, %s3459_s21  ;;  %v3790_v12 = vld [vmem:[%s3504_s19 + $0x48] sm:$0xff] }
  0x6d   : > { %2162 = vrot.lane.b32.xlu0 %v2001_v22, %s3459_s21  ;;  %v2002_v22 = vshrl.u32 %v3704_v10, 16  ;;  %v2006_v23 = vshll.u32 %v3790_v12, 16  ;;  %v2213_v25 = vrot.slane %v3790_v12, 1 }
  0x6f   : > { %v2004_v29 = vor.u32 %v2002_v22, %v3729_v6  ;;  %v2008_v38 = vrot.slane %v2006_v23, 1  ;;  %v2214_v33 = vsel %vm618_vm0, %v2211_v49, %v2213_v25  ;;  %v3824_v6 = vld [vmem:[%s3504_s19 + $0x90] sm:$0xff]  ;;  %v422_v49 = vshll.u32 %v3816_v34, 16 }
  0x70   : > { %v522_v23 = vshrl.u32 %v3824_v6, 16 }
  0x71   : > { %v2009_v41 = vsel %vm373_vm1, %v2004_v29, %v2008_v38  ;;  %v424_v35 = vrot.slane %v422_v49, 1 }
  0x73   : > { %v425_v29 = vsel %vm373_vm1, %v420_v56, %v424_v35  ;;  %v426_v56 = vshrl.u32 %v3816_v34, 16 }
  0x74   : > { %1197 = vrot.lane.b32.xlu1 %v1036_v53, %s3459_s21  ;;  %2259 = vrot.lane.b32.xlu2 %v2212_v26, %s3458_s20  ;;  %v3834_v53 = vrot.slane %v1041_v37, 1  ;;  %v518_v26 = vshll.u32 %v3824_v6, 16 }
  0x75   : > { %578 = vrot.lane.b32.xlu0 %v417_v61, %s3459_s21  ;;  %v3841_v61 = vld [vmem:[%s3504_s19 + $0x98] sm:$0xff] }
  0x76   : > { %v571_v19 = vpop.permute.xlu2 %570  ;;  %v3856_v22 = vrot.slane %v518_v26, 1  ;;  %v526_v40 = vshll.u32 %v3841_v61, 16 }
  0x77   : > { %v718_v52 = vsel %vm716_vm3, %v3513_v2, %v571_v19  ;;  %v631_v19 = vsel %vm618_vm0, %v628_v18, %v630_v60 }
  0x7c   : > { %1235 = vrot.lane.b32.xlu1 %v1188_v62, %s3459_s21  ;;  %676 = vrot.lane.b32.xlu2 %v629_v21, %s3458_s20  ;;  %v2010_v21 = vshrl.u32 %v3790_v12, 16 }
  0x7d   : > { %1294 = vrot.lane.b32.xlu0 %v1247_v20, %s3458_s20  ;;  %v1044_v20 = vsel %vm373_vm1, %v1039_v47, %v3834_v53 }
  0x7e   : > { %v3810_v5 = vpop.permute.xlu2 %1189  ;;  %v2012_v18 = vor.u32 %v2010_v21, %v2008_v38 }
  0x7f   : > { %v1335_v21 = vsel %vm716_vm3, %v3551_v24, %v3810_v5 }
  0x84   : > { %2261 = vrot.lane.b32.xlu1 %v2214_v33, %s3458_s20  ;;  %2164 = vrot.lane.b32.xlu2 %v2009_v41, %s3459_s21  ;;  %v3863_v33 = vrot.slane %v2014_v48, 1  ;;  %v3870_v41 = vrot.slane %v526_v40, 1 }
  0x85   : > { %1332 = vrot.lane.b32.xlu0 %v1285_v39, %s3458_s20  ;;  %v524_v39 = vor.u32 %v522_v23, %v3856_v22  ;;  %v2215_v23 = vrot.slane %v3837_v57, 1 }
  0x86   : > { %v1323_v59 = vpop.permute.xlu1 %1322  ;;  %v3845_v62 = vpop.permute.xlu2 %1227  ;;  %v2017_v26 = vsel %vm373_vm1, %v2012_v18, %v3863_v33 }
  0x87   : > { %v669_v9 = vpop.permute.xlu0 %668 }
  0x88   : > { %v767_v2 = vsel %vm765_vm4, %v718_v52, %v669_v9  ;;  %v430_v9 = vshll.u32 %v3866_v30, 16 }
  0x89   : > { %3118 = vmatmul.msk.bf16.vlgmr.msra.gmra.mxu1 %vm1443_vm5, %v767_v2  ;;  %v529_v2 = vsel %vm373_vm1, %v524_v39, %v3870_v41  ;;  %v3909_v39 = vld [vmem:[%s3504_s19 + $0x44] sm:$0xff] }
  0x8c   : > { %678 = vrot.lane.b32.xlu1 %v631_v19, %s3458_s20  ;;  %580 = vrot.lane.b32.xlu2 %v425_v29, %s3459_s21  ;;  %v1249_v19 = vsel %vm618_vm0, %v1246_v27, %v1248_v44  ;;  %v656_v27 = vrot.slane %v3841_v61, 1 }
  0x8d   : > { %1199 = vrot.lane.b32.xlu0 %v1044_v20, %s3459_s21  ;;  %v3891_v20 = vrot.slane %v430_v9, 1 }
  0x8e   : > { %v2252_v37 = vpop.permute.xlu1 %2251  ;;  %v3873_v52 = vpop.permute.xlu2 %2253 }
  0x8f   : > { %v1226_v49 = vpop.permute.xlu0 %1225 }
  0x90   : > { %v1371_v47 = vsel %vm716_vm3, %v3507_v0, %v1226_v49  ;;  %v1049_v49 = vshll.u32 %v3909_v39, 16 }
  0x91   : > { %v1419_v38 = vsel %vm765_vm4, %v1371_v47, %v1323_v59  ;;  %v428_v59 = vor.u32 %v426_v56, %v424_v35  ;;  %v1250_v47 = vrot.slane %v3909_v39, 1  ;;  %v3931_v56 = vld [vmem:[%s3504_s19 + $0x58] sm:$0xff] }
  0x92   : > { %3108 = vmatmul.msk.bf16.vlgmr.msra.gmra.mxu3 %vm1443_vm5, %v1419_v38  ;;  %v632_v38 = vrot.slane %v3866_v30, 1 }
  0x93   : > { %3400 = vmatpush.bf16.msra.mxu3 %v3774_v63  ;;  %v5111_v63 = vrot.slane %v3824_v6, 1  ;;  %v433_v5 = vsel %vm373_vm1, %v428_v59, %v3891_v20 }
  0x94   : > { %2166 = vrot.lane.b32.xlu1 %v2017_v26, %s3459_s21  ;;  %1296 = vrot.lane.b32.xlu2 %v1249_v19, %s3458_s20 }
  0x95   : > { %606 = vrot.lane.b32.xlu0 %v529_v2, %s3459_s21 }
  0x96   : > { %v1287_v48 = vpop.permute.xlu1 %1286  ;;  %v671_v35 = vpop.permute.xlu2 %670 }
  0x97   : > { %v2155_v40 = vpop.permute.xlu0 %2154  ;;  %v1383_v29 = vsel %vm765_vm4, %v1335_v21, %v1287_v48  ;;  %3401 = vmatpush.bf16.msra.mxu3 %v3783_v15  ;;  %v2216_v15 = vsel %vm618_vm0, %v2213_v25, %v2215_v23  ;;  %v1373_v25 = vsel %vm716_vm3, %v3510_v1, %v3845_v62  ;;  %v3938_v21 = vld [vmem:[%s3504_s19 + $0xa0] sm:$0xff]  ;;  %v1051_v48 = vrot.slane %v1049_v49, 1 }
  0x98   : > { %v2300_v18 = vsel %vm716_vm3, %v3522_v7, %v2155_v40  ;;  %3090 = vmatmul.msk.bf16.vlgmr.msra.gmra.mxu0 %vm1443_vm5, %v1383_v29  ;;  %v657_v7 = vsel %vm618_vm0, %v5111_v63, %v656_v27  ;;  %v1251_v40 = vsel %vm618_vm0, %v1248_v44, %v1250_v47  ;;  %v633_v1 = vsel %vm618_vm0, %v630_v60, %v632_v38  ;;  %v3958_v60 = vld [vmem:[%s3504_s19 + $0x4c] sm:$0xff]  ;;  %v3967_v49 = vld [vmem:[%s3504_s19 + $0x40] sm:$0xff] }
  0x99   : > { %v2348_v24 = vsel %vm765_vm4, %v2300_v18, %v2252_v37  ;;  %v1045_v37 = vshrl.u32 %v3806_v31, 16  ;;  %v2022_v62 = vshll.u32 %v3931_v56, 16  ;;  %v530_v18 = vshrl.u32 %v3841_v61, 16 }
  0x9a   : > { %3294 = vmatmul.msk.bf16.vlgmr.msra.gmra.mxu2 %vm1443_vm5, %v2348_v24  ;;  %v658_v44 = vrot.slane %v3938_v21, 1  ;;  %v534_v24 = vshll.u32 %v3938_v21, 16 }
  0x9b   : > { %v1047_v9 = vor.u32 %v1045_v37, %v3834_v53  ;;  %v2018_v53 = vshrl.u32 %v3837_v57, 16  ;;  %v3964_v37 = vrot.slane %v2022_v62, 1 }
  0x9c   : > { %582 = vrot.lane.b32.xlu1 %v433_v5, %s3459_s21  ;;  %704 = vrot.lane.b32.xlu2 %v657_v7, %s3458_s20 }
  0x9d   : > { %2263 = vrot.lane.b32.xlu0 %v2216_v15, %s3458_s20  ;;  %v1052_v29 = vsel %vm373_vm1, %v1047_v9, %v1051_v48  ;;  %v2020_v7 = vor.u32 %v2018_v53, %v3863_v33  ;;  %v438_v53 = vshll.u32 %v3967_v49, 16 }
  0x9e   : > { %v1325_v26 = vpop.permute.xlu1 %1324  ;;  %v3935_v59 = vpop.permute.xlu2 %2158 }
  0x9f   : > { %v2157_v2 = vpop.permute.xlu0 %2156  ;;  %v1421_v19 = vsel %vm765_vm4, %v1373_v25, %v1325_v26  ;;  %v532_v25 = vor.u32 %v530_v18, %v3870_v41  ;;  %v1057_v41 = vshll.u32 %v3958_v60, 16 }
  0xa0   : > { %v2302_v5 = vsel %vm716_vm3, %v3525_v8, %v2157_v2  ;;  %v536_v8 = vrot.slane %v534_v24, 1 }
  0xa1   : > { %v2350_v33 = vsel %vm765_vm4, %v2302_v5, %v3873_v52  ;;  %v3989_v62 = vrot.slane %v1057_v41, 1  ;;  %v3996_v5 = vrot.slane %v438_v53, 1  ;;  %v2304_v41 = vsel %vm716_vm3, %v3572_v42, %v3935_v59  ;;  %v4030_v59 = vld [vmem:[%s3504_s19 + $0x60] sm:$0xff] }
  0xa2   : > { %3109 = vmatmul.msk.bf16.gmra.mxu3 %vm1443_vm5, %v1421_v19  ;;  %v634_v53 = vrot.slane %v3967_v49, 1 }
  0xa4   : > { %1298 = vrot.lane.b32.xlu1 %v1251_v40, %s3458_s20  ;;  %1201 = vrot.lane.b32.xlu2 %v1052_v29, %s3459_s21  ;;  %v659_v40 = vsel %vm618_vm0, %v656_v27, %v658_v44  ;;  %v434_v27 = vshrl.u32 %v3866_v30, 16  ;;  %v3992_v29 = vld [vmem:[%s3504_s19 + $0xa8] sm:$0xff] }
  0xa5   : > { %680 = vrot.lane.b32.xlu0 %v633_v1, %s3458_s20  ;;  %v1053_v1 = vshrl.u32 %v3909_v39, 16 }
  0xa6   : > { %v1192_v15 = vpop.permute.xlu1 %1191  ;;  %v575_v9 = vpop.permute.xlu2 %574  ;;  %v436_v24 = vor.u32 %v434_v27, %v3891_v20  ;;  %v542_v20 = vshll.u32 %v3992_v29, 16  ;;  %v1252_v27 = vrot.slane %v3958_v60, 1 }
  0xa7   : > { %v573_v26 = vpop.permute.xlu0 %572  ;;  %v1055_v52 = vor.u32 %v1053_v1, %v1051_v48 }
  0xa8   : > { %v720_v19 = vsel %vm716_vm3, %v3516_v3, %v573_v26  ;;  %v2025_v3 = vsel %vm373_vm1, %v2020_v7, %v3964_v37  ;;  %v2217_v7 = vrot.slane %v3931_v56, 1  ;;  %v4014_v1 = vrot.slane %v542_v20, 1 }
  0xa9   : > { %v769_v2 = vsel %vm765_vm4, %v720_v19, %v671_v35  ;;  %v537_v35 = vsel %vm373_vm1, %v532_v25, %v536_v8  ;;  %v1337_v25 = vsel %vm716_vm3, %v3557_v28, %v1192_v15 }
  0xaa   : > { %3119 = vmatmul.msk.bf16.gmra.mxu1 %vm1443_vm5, %v769_v2  ;;  %3295 = vmatmul.msk.bf16.gmra.mxu2 %vm1443_vm5, %v2350_v33  ;;  %v538_v2 = vshrl.u32 %v3938_v21, 16  ;;  %v441_v33 = vsel %vm373_vm1, %v436_v24, %v3996_v5  ;;  %v2218_v28 = vsel %vm618_vm0, %v2215_v23, %v2217_v7 }
  0xac   : > { %706 = vrot.lane.b32.xlu1 %v659_v40, %s3458_s20  ;;  %608 = vrot.lane.b32.xlu2 %v537_v35, %s3459_s21  ;;  %v1060_v40 = vsel %vm373_vm1, %v1055_v52, %v3989_v62  ;;  %v540_v15 = vor.u32 %v538_v2, %v536_v8 }
  0xad   : > { %2168 = vrot.lane.b32.xlu0 %v2025_v3, %s3459_s21 }
  0xae   : > { %v1230_v18 = vpop.permute.xlu1 %1229  ;;  %v1291_v19 = vpop.permute.xlu2 %1290  ;;  %v545_v42 = vsel %vm373_vm1, %v540_v15, %v4014_v1 }
  0xaf   : > { %v1289_v26 = vpop.permute.xlu0 %1288  ;;  %v1375_v23 = vsel %vm716_vm3, %v3576_v45, %v1230_v18  ;;  %v1253_v45 = vsel %vm618_vm0, %v1250_v47, %v1252_v27  ;;  %v635_v18 = vsel %vm618_vm0, %v632_v38, %v634_v53  ;;  %v722_v47 = vsel %vm716_vm3, %v3592_v58, %v575_v9  ;;  %v4051_v38 = vld [vmem:[%s3504_s19 + $0x54] sm:$0xff]  ;;  %v4070_v9 = vld [vmem:[%s3504_s19 + $0x48] sm:$0xff] }
  0xb0   : > { %v1385_v48 = vsel %vm765_vm4, %v1337_v25, %v1289_v26  ;;  %v2026_v25 = vshrl.u32 %v3931_v56, 16  ;;  %v2030_v26 = vshll.u32 %v4030_v59, 16 }
  0xb1   : > { %3091 = vmatmul.msk.bf16.gmra.mxu0 %vm1443_vm5, %v1385_v48  ;;  %v2219_v48 = vrot.slane %v4030_v59, 1 }
  0xb2   : > { %v2028_v20 = vor.u32 %v2026_v25, %v3964_v37  ;;  %v4089_v25 = vld [vmem:[%s3504_s19 + $0xb0] sm:$0xff] }
  0xb3   : > { %v2220_v58 = vsel %vm618_vm0, %v2217_v7, %v2219_v48  ;;  %v446_v7 = vshll.u32 %v4070_v9, 16 }
  0xb4   : > { %1203 = vrot.lane.b32.xlu1 %v1060_v40, %s3459_s21  ;;  %2265 = vrot.lane.b32.xlu2 %v2218_v28, %s3458_s20  ;;  %v660_v40 = vrot.slane %v3992_v29, 1 }
  0xb5   : > { %584 = vrot.lane.b32.xlu0 %v441_v33, %s3459_s21 }
  0xb6   : > { %v2256_v3 = vpop.permute.xlu1 %2255  ;;  %v1329_v8 = vpop.permute.xlu2 %1328  ;;  %v661_v37 = vsel %vm618_vm0, %v658_v44, %v660_v40  ;;  %v636_v44 = vrot.slane %v4070_v9, 1 }
  0xb7   : > { %v1327_v35 = vpop.permute.xlu0 %1326  ;;  %v2352_v52 = vsel %vm765_vm4, %v2304_v41, %v2256_v3  ;;  %v2032_v3 = vrot.slane %v2030_v26, 1 }
  0xb8   : > { %v1423_v24 = vsel %vm765_vm4, %v1375_v23, %v1327_v35  ;;  %v1065_v35 = vshll.u32 %v4051_v38, 16 }
  0xb9   : > { %3110 = vmatmul.msk.bf16.gmra.mxu3 %vm1443_vm5, %v1423_v24  ;;  %v4082_v24 = vld [vmem:[%s3504_s19 + $0x68] sm:$0xff] }
  0xba   : > { %3296 = vmatmul.msk.bf16.gmra.mxu2 %vm1443_vm5, %v2352_v52  ;;  %v442_v52 = vshrl.u32 %v3967_v49, 16 }
  0xbc   : > { %610 = vrot.lane.b32.xlu1 %v545_v42, %s3459_s21  ;;  %682 = vrot.lane.b32.xlu2 %v635_v18, %s3458_s20  ;;  %v4086_v18 = vrot.slane %v1065_v35, 1  ;;  %v444_v26 = vor.u32 %v442_v52, %v3996_v5 }
  0xbd   : > { %1300 = vrot.lane.b32.xlu0 %v1253_v45, %s3458_s20 }
  0xbe   : > { %v673_v2 = vpop.permute.xlu1 %672  ;;  %v4055_v15 = vpop.permute.xlu2 %1195 }
  0xbf   : > { %v1194_v33 = vpop.permute.xlu0 %1193  ;;  %v771_v28 = vsel %vm765_vm4, %v722_v47, %v673_v2 }
  0xc0   : > { %v1339_v41 = vsel %vm716_vm3, %v3588_v55, %v1194_v33  ;;  %3120 = vmatmul.msk.bf16.gmra.mxu1 %vm1443_vm5, %v771_v28  ;;  %v1061_v55 = vshrl.u32 %v3958_v60, 16  ;;  %v448_v33 = vrot.slane %v446_v7, 1  ;;  %v1254_v7 = vrot.slane %v4051_v38, 1 }
  0xc1   : > { %v1387_v23 = vsel %vm765_vm4, %v1339_v41, %v1291_v19  ;;  %v2033_v19 = vsel %vm373_vm1, %v2028_v20, %v2032_v3  ;;  %v637_v41 = vsel %vm618_vm0, %v634_v53, %v636_v44 }
  0xc2   : > { %3092 = vmatmul.msk.bf16.gmra.mxu0 %vm1443_vm5, %v1387_v23  ;;  %v1063_v45 = vor.u32 %v1061_v55, %v3989_v62  ;;  %v2034_v62 = vshrl.u32 %v4030_v59, 16  ;;  %v2038_v23 = vshll.u32 %v4082_v24, 16  ;;  %v4111_v55 = vld [vmem:[%s3504_s19 + $0x50] sm:$0xff] }
  0xc4   : > { %2267 = vrot.lane.b32.xlu1 %v2220_v58, %s3458_s20  ;;  %2170 = vrot.lane.b32.xlu2 %v2033_v19, %s3459_s21  ;;  %v1068_v5 = vsel %vm373_vm1, %v1063_v45, %v4086_v18  ;;  %v546_v58 = vshrl.u32 %v3992_v29, 16  ;;  %v2036_v53 = vor.u32 %v2034_v62, %v2032_v3 }
  0xc5   : > { %708 = vrot.lane.b32.xlu0 %v661_v37, %s3458_s20  ;;  %v449_v37 = vsel %vm373_vm1, %v444_v26, %v448_v33 }
  0xc6   : > { %v2161_v42 = vpop.permute.xlu1 %2160  ;;  %v1234_v2 = vpop.permute.xlu2 %1233  ;;  %v548_v19 = vor.u32 %v546_v58, %v4014_v1  ;;  %v454_v1 = vshll.u32 %v4111_v55, 16  ;;  %v2221_v58 = vrot.slane %v4082_v24, 1 }
  0xc7   : > { %v1232_v47 = vpop.permute.xlu0 %1231  ;;  %v2306_v45 = vsel %vm716_vm3, %v3624_v32, %v2161_v42  ;;  %v1255_v32 = vsel %vm618_vm0, %v1252_v27, %v1254_v7 }
  0xc8   : > { %v1377_v20 = vsel %vm716_vm3, %v3606_v16, %v1232_v47  ;;  %v550_v16 = vshll.u32 %v4089_v25, 16  ;;  %v4133_v62 = vrot.slane %v454_v1, 1 }
  0xc9   : > { %v1425_v28 = vsel %vm765_vm4, %v1377_v20, %v1329_v8  ;;  %v4108_v8 = vrot.slane %v2038_v23, 1  ;;  %v1341_v23 = vsel %vm716_vm3, %v3638_v36, %v4055_v15  ;;  %v4150_v15 = vld [vmem:[%s3504_s19 + $0x5c] sm:$0xff] }
  0xca   : > { %3111 = vmatmul.msk.bf16.gmra.mxu3 %vm1443_vm5, %v1425_v28  ;;  %v4115_v52 = vrot.slane %v550_v16, 1  ;;  %v450_v28 = vshrl.u32 %v4070_v9, 16  ;;  %v662_v16 = vrot.slane %v4089_v25, 1 }
  0xcb   : > { %v2041_v20 = vsel %vm373_vm1, %v2036_v53, %v4108_v8 }
  0xcc   : > { %684 = vrot.lane.b32.xlu1 %v637_v41, %s3458_s20  ;;  %586 = vrot.lane.b32.xlu2 %v449_v37, %s3459_s21  ;;  %v553_v41 = vsel %vm373_vm1, %v548_v19, %v4115_v52  ;;  %v452_v42 = vor.u32 %v450_v28, %v448_v33 }
  0xcd   : > { %1205 = vrot.lane.b32.xlu0 %v1068_v5, %s3459_s21 }
  0xce   : > { %v577_v35 = vpop.permute.xlu1 %576  ;;  %v2260_v47 = vpop.permute.xlu2 %2259  ;;  %v457_v36 = vsel %vm373_vm1, %v452_v42, %v4133_v62 }
  0xcf   : > { %v2258_v26 = vpop.permute.xlu0 %2257  ;;  %v724_v27 = vsel %vm716_vm3, %v3643_v43, %v577_v35  ;;  %v2222_v43 = vsel %vm618_vm0, %v2219_v48, %v2221_v58  ;;  %v663_v35 = vsel %vm618_vm0, %v660_v40, %v662_v16  ;;  %v1379_v48 = vsel %vm716_vm3, %v3658_v54, %v1234_v2  ;;  %v4170_v40 = vld [vmem:[%s3504_s19 + $0x70] sm:$0xff] }
  0xd0   : > { %v2354_v3 = vsel %vm765_vm4, %v2306_v45, %v2258_v26  ;;  %v1069_v45 = vshrl.u32 %v4051_v38, 16  ;;  %v1073_v26 = vshll.u32 %v4150_v15, 16 }
  0xd1   : > { %3297 = vmatmul.msk.bf16.gmra.mxu2 %vm1443_vm5, %v2354_v3  ;;  %v1256_v3 = vrot.slane %v4150_v15, 1 }
  0xd2   : > { %v1071_v1 = vor.u32 %v1069_v45, %v4086_v18  ;;  %v4208_v45 = vld [vmem:[%s3504_s19 + $0x58] sm:$0xff] }
  0xd3   : > { %v1257_v18 = vsel %vm618_vm0, %v1254_v7, %v1256_v3 }
  0xd4   : > { %2172 = vrot.lane.b32.xlu1 %v2041_v20, %s3459_s21  ;;  %1302 = vrot.lane.b32.xlu2 %v1255_v32, %s3458_s20  ;;  %v638_v20 = vrot.slane %v4111_v55, 1 }
  0xd5   : > { %612 = vrot.lane.b32.xlu0 %v553_v41, %s3459_s21 }
  0xd6   : > { %v1293_v5 = vpop.permute.xlu1 %1292  ;;  %v677_v33 = vpop.permute.xlu2 %676  ;;  %v639_v2 = vsel %vm618_vm0, %v636_v44, %v638_v20  ;;  %v4201_v44 = vld [vmem:[%s3504_s19 + $0x64] sm:$0xff] }
  0xd7   : > { %v675_v37 = vpop.permute.xlu0 %674  ;;  %v1389_v53 = vsel %vm765_vm4, %v1341_v23, %v1293_v5  ;;  %v4180_v5 = vld [vmem:[%s3504_s19 + $0xb8] sm:$0xff] }
  0xd8   : > { %3093 = vmatmul.msk.bf16.gmra.mxu0 %vm1443_vm5, %v1389_v53  ;;  %v773_v19 = vsel %vm765_vm4, %v724_v27, %v675_v37  ;;  %v1075_v27 = vrot.slane %v1073_v26, 1  ;;  %v2046_v37 = vshll.u32 %v4170_v40, 16  ;;  %v554_v53 = vshrl.u32 %v4089_v25, 16  ;;  %v249_v26 = vld [vmem:[%s3504_s19 + $0xc0] sm:$0xf] }
  0xd9   : > { %3121 = vmatmul.msk.bf16.gmra.mxu1 %vm1443_vm5, %v773_v19  ;;  %v664_v7 = vrot.slane %v4180_v5, 1  ;;  %v558_v19 = vshll.u32 %v4180_v5, 16 }
  0xdc   : > { %588 = vrot.lane.b32.xlu1 %v457_v36, %s3459_s21  ;;  %710 = vrot.lane.b32.xlu2 %v663_v35, %s3458_s20  ;;  %v4205_v35 = vrot.slane %v2046_v37, 1 }
  0xdd   : > { %2269 = vrot.lane.b32.xlu0 %v2222_v43, %s3458_s20 }
  0xde   : > { %v1331_v28 = vpop.permute.xlu1 %1330  ;;  %v4174_v42 = vpop.permute.xlu2 %2164 }
  0xdf   : > { %v2163_v41 = vpop.permute.xlu0 %2162  ;;  %v1427_v32 = vsel %vm765_vm4, %v1379_v48, %v1331_v28  ;;  %v556_v48 = vor.u32 %v554_v53, %v4115_v52 }
  0xe0   : > { %v2308_v23 = vsel %vm716_vm3, %v3654_v51, %v2163_v41  ;;  %3112 = vmatmul.msk.bf16.gmra.mxu3 %vm1443_vm5, %v1427_v32  ;;  %v2042_v51 = vshrl.u32 %v4082_v24, 16  ;;  %v665_v32 = vsel %vm618_vm0, %v662_v16, %v664_v7 }
  0xe1   : > { %v2356_v54 = vsel %vm765_vm4, %v2308_v23, %v2260_v47  ;;  %v1076_v47 = vsel %vm373_vm1, %v1071_v1, %v1075_v27  ;;  %v560_v23 = vrot.slane %v558_v19, 1 }
  0xe2   : > { %3298 = vmatmul.msk.bf16.gmra.mxu2 %vm1443_vm5, %v2356_v54  ;;  %v2044_v43 = vor.u32 %v2042_v51, %v4108_v8  ;;  %v1077_v8 = vshrl.u32 %v4150_v15, 16  ;;  %v458_v51 = vshrl.u32 %v4111_v55, 16 }
  0xe3   : > { %v561_v37 = vsel %vm373_vm1, %v556_v48, %v560_v23 }
  0xe4   : > { %1304 = vrot.lane.b32.xlu1 %v1257_v18, %s3458_s20  ;;  %1207 = vrot.lane.b32.xlu2 %v1076_v47, %s3459_s21  ;;  %v1081_v18 = vshll.u32 %v4201_v44, 16  ;;  %v2049_v52 = vsel %vm373_vm1, %v2044_v43, %v4205_v35  ;;  %v1079_v16 = vor.u32 %v1077_v8, %v1075_v27  ;;  %v460_v19 = vor.u32 %v458_v51, %v4133_v62 }
  0xe5   : > { %686 = vrot.lane.b32.xlu0 %v639_v2, %s3458_s20  ;;  %v371_v2 = vunpack.c.l.b16 %v249_v26  ;;  %v2223_v26 = vrot.slane %v4170_v40, 1  ;;  %v1258_v51 = vrot.slane %v4201_v44, 1 }
  0xe6   : > { %v1198_v36 = vpop.permute.xlu1 %1197  ;;  %v581_v1 = vpop.permute.xlu2 %580 }
  0xe7   : > { %v579_v28 = vpop.permute.xlu0 %578  ;;  %v372_v47 = vpack.c.b16 %v371_v2, %v371_v2  ;;  %v1343_v48 = vsel %vm716_vm3, %v3689_v17, %v1198_v36  ;;  %v2310_v2 = vsel %vm716_vm3, %v3704_v10, %v4174_v42  ;;  %v4263_v42 = vld [vmem:[%s3504_s19 + $0x78] sm:$0xff]  ;;  %v728_v55 = vsel %vm716_vm3, %v3739_v11, %v581_v1 }
  0xe8   : > { %v726_v41 = vsel %vm716_vm3, %v3670_v14, %v579_v28  ;;  %v462_v14 = vshll.u32 %v4208_v45, 16 }
  0xe9   : > { %v775_v54 = vsel %vm765_vm4, %v726_v41, %v677_v33  ;;  %v4228_v33 = vrot.slane %v1081_v18, 1  ;;  %v566_v8 = vshll.u32 %v372_v47, 16  ;;  %v2224_v18 = vsel %vm618_vm0, %v2221_v58, %v2223_v26 }
  0xea   : > { %3122 = vmatmul.msk.bf16.gmra.mxu1 %vm1443_vm5, %v775_v54  ;;  %v4232_v43 = vrot.slane %v462_v14, 1  ;;  %v562_v54 = vshrl.u32 %v4180_v5, 16  ;;  %v640_v14 = vrot.slane %v4208_v45, 1 }
  0xeb   : > { %v1084_v27 = vsel %vm373_vm1, %v1079_v16, %v4228_v33  ;;  %v568_v36 = vrot.slane %v566_v8, 1 }
  0xec   : > { %712 = vrot.lane.b32.xlu1 %v665_v32, %s3458_s20  ;;  %614 = vrot.lane.b32.xlu2 %v561_v37, %s3459_s21  ;;  %v465_v62 = vsel %vm373_vm1, %v460_v19, %v4232_v43  ;;  %v564_v17 = vor.u32 %v562_v54, %v560_v23 }
  0xed   : > { %2174 = vrot.lane.b32.xlu0 %v2049_v52, %s3459_s21 }
  0xee   : > { %v1236_v53 = vpop.permute.xlu1 %1235  ;;  %v1297_v41 = vpop.permute.xlu2 %1296  ;;  %v569_v10 = vsel %vm373_vm1, %v564_v17, %v568_v36 }
  0xef   : > { %v1295_v28 = vpop.permute.xlu0 %1294  ;;  %v1381_v58 = vsel %vm716_vm3, %v3709_v46, %v1236_v53  ;;  %v1259_v46 = vsel %vm618_vm0, %v1256_v3, %v1258_v51  ;;  %v641_v53 = vsel %vm618_vm0, %v638_v20, %v640_v14  ;;  %v4282_v20 = vld [vmem:[%s3504_s19 + $0x6c] sm:$0xff] }
  0xf0   : > { %v1391_v32 = vsel %vm765_vm4, %v1343_v48, %v1295_v28  ;;  %v2050_v48 = vshrl.u32 %v4170_v40, 16  ;;  %v2054_v28 = vshll.u32 %v4263_v42, 16 }
  0xf1   : > { %3094 = vmatmul.msk.bf16.gmra.mxu0 %vm1443_vm5, %v1391_v32  ;;  %v2225_v32 = vrot.slane %v4263_v42, 1 }
  0xf2   : > { %v2052_v54 = vor.u32 %v2050_v48, %v4205_v35  ;;  %v2056_v36 = vrot.slane %v2054_v28, 1 }
  0xf3   : > { %v2226_v35 = vsel %vm618_vm0, %v2223_v26, %v2225_v32 }
  0xf4   : > { %1209 = vrot.lane.b32.xlu1 %v1084_v27, %s3459_s21  ;;  %2271 = vrot.lane.b32.xlu2 %v2224_v18, %s3458_s20  ;;  %v666_v27 = vrot.slane %v372_v47, 1  ;;  %v4292_v47 = vld [vmem:[%s3504_s19 + $0x60] sm:$0xff] }
  0xf5   : > { %590 = vrot.lane.b32.xlu0 %v465_v62, %s3459_s21  ;;  %v642_v26 = vrot.slane %v4292_v47, 1 }
  0xf6   : > { %v2262_v52 = vpop.permute.xlu1 %2261  ;;  %v705_v19 = vpop.permute.xlu2 %704  ;;  %v667_v1 = vsel %vm618_vm0, %v664_v7, %v666_v27  ;;  %v4314_v7 = vld [vmem:[%s3504_s19 + $0xb0] sm:$0xff] }
  0xf7   : > { %v1333_v37 = vpop.permute.xlu0 %1332  ;;  %v2358_v16 = vsel %vm765_vm4, %v2310_v2, %v2262_v52  ;;  %v4302_v2 = vld [vmem:[%s3504_s19 + $0xa8] sm:$0xff]  ;;  %v1089_v52 = vshll.u32 %v4282_v20, 16 }
  0xf8   : > { %v1429_v23 = vsel %vm765_vm4, %v1381_v58, %v1333_v37  ;;  %3299 = vmatmul.msk.bf16.gmra.mxu2 %vm1443_vm5, %v2358_v16  ;;  %v2057_v58 = vsel %vm373_vm1, %v2052_v54, %v2056_v36  ;;  %v470_v37 = vshll.u32 %v4292_v47, 16  ;;  %v2102_v16 = vshll.u32 %v4302_v2, 16 }
  0xf9   : > { %3113 = vmatmul.msk.bf16.gmra.mxu3 %vm1443_vm5, %v1429_v23 }
  0xfa   : > { %v4333_v54 = vrot.slane %v2102_v16, 1 }
  0xfc   : > { %616 = vrot.lane.b32.xlu1 %v569_v10, %s3459_s21  ;;  %688 = vrot.lane.b32.xlu2 %v641_v53, %s3458_s20 }
  0xfd   : > { %1306 = vrot.lane.b32.xlu0 %v1259_v46, %s3458_s20  ;;  %v4319_v46 = vrot.slane %v1089_v52, 1 }
  0xfe   : > { %v679_v3 = vpop.permute.xlu1 %678  ;;  %v4286_v18 = vpop.permute.xlu2 %1201 }
  0xff   : > { %v1200_v8 = vpop.permute.xlu0 %1199  ;;  %v777_v62 = vsel %vm765_vm4, %v728_v55, %v679_v3  ;;  %v643_v55 = vsel %vm618_vm0, %v640_v14, %v642_v26  ;;  %v472_v3 = vrot.slane %v470_v37, 1 }
 0x100   : > { %v1345_v17 = vsel %vm716_vm3, %v3732_v50, %v1200_v8  ;;  %3123 = vmatmul.msk.bf16.gmra.mxu1 %vm1443_vm5, %v777_v62  ;;  %v1085_v50 = vshrl.u32 %v4201_v44, 16  ;;  %v2106_v8 = vshrl.u32 %v4302_v2, 16 }
 0x101   : > { %v1393_v11 = vsel %vm765_vm4, %v1345_v17, %v1297_v41  ;;  %v466_v41 = vshrl.u32 %v4208_v45, 16  ;;  %v4322_v45 = vld [vmem:[%s3504_s19 + $0x80] sm:$0xff]  ;;  %v2058_v17 = vshrl.u32 %v4263_v42, 16 }
 0x102   : > { %3095 = vmatmul.msk.bf16.gmra.mxu0 %vm1443_vm5, %v1393_v11  ;;  %v1087_v10 = vor.u32 %v1085_v50, %v4228_v33  ;;  %v2062_v11 = vshll.u32 %v4322_v45, 16 }
 0x103   : > { %v468_v53 = vor.u32 %v466_v41, %v4232_v43  ;;  %v2110_v43 = vshll.u32 %v4314_v7, 16  ;;  %v2060_v52 = vor.u32 %v2058_v17, %v2056_v36  ;;  %v1260_v41 = vrot.slane %v4282_v20, 1 }
 0x104   : > { %2273 = vrot.lane.b32.xlu1 %v2226_v35, %s3458_s20  ;;  %2176 = vrot.lane.b32.xlu2 %v2057_v58, %s3459_s21  ;;  %v1092_v62 = vsel %vm373_vm1, %v1087_v10, %v4319_v46  ;;  %v4352_v58 = vrot.slane %v2062_v11, 1  ;;  %v2239_v11 = vrot.slane %v4314_v7, 1 }
 0x105   : > { %714 = vrot.lane.b32.xlu0 %v667_v1, %s3458_s20  ;;  %v473_v14 = vsel %vm373_vm1, %v468_v53, %v472_v3  ;;  %v4346_v35 = vrot.slane %v2110_v43, 1  ;;  %v4349_v1 = vld [vmem:[%s3504_s19 + $0x68] sm:$0xff] }
 0x106   : > { %v2167_v23 = vpop.permute.xlu1 %2166  ;;  %v4325_v28 = vpop.permute.xlu2 %608  ;;  %v478_v36 = vshll.u32 %v4349_v1, 16 }
 0x107   : > { %v607_v48 = vpop.permute.xlu0 %606  ;;  %v2312_v37 = vsel %vm716_vm3, %v3790_v12, %v2167_v23  ;;  %v1261_v12 = vsel %vm618_vm0, %v1258_v51, %v1260_v41  ;;  %v1678_v23 = vpop.f32.mrf.mxu1  ;;  %v5112_v51 = vrot.slane %v4302_v2, 1 }
 0x108   : > { %v754_v27 = vsel %vm716_vm3, %v3824_v6, %v607_v48  ;;  %v4374_v43 = vrot.slane %v478_v36, 1 }
 0x109   : > { %v803_v33 = vsel %vm765_vm4, %v754_v27, %v705_v19  ;;  %v2108_v19 = vor.u32 %v2106_v8, %v4333_v54  ;;  %v474_v27 = vshrl.u32 %v4292_v47, 16 }
 0x10a   : > { %3136 = vmatmul.msk.bf16.vlgmr.msrb.gmra.mxu3 %vm1443_vm5, %v803_v33 }
 0x10b   : > { %v2113_v48 = vsel %vm373_vm1, %v2108_v19, %v4346_v35  ;;  %v476_v8 = vor.u32 %v474_v27, %v472_v3  ;;  %v4411_v27 = vld [vmem:[%s5108_s2] ss:$0 sm:$0xff] }
 0x10c   : > { %690 = vrot.lane.b32.xlu1 %v643_v55, %s3458_s20  ;;  %592 = vrot.lane.b32.xlu2 %v473_v14, %s3459_s21  ;;  %v2065_v55 = vsel %vm373_vm1, %v2060_v52, %v4352_v58  ;;  %v2227_v14 = vrot.slane %v4322_v45, 1 }
 0x10d   : > { %1211 = vrot.lane.b32.xlu0 %v1092_v62, %s3459_s21  ;;  %v1347_v62 = vsel %vm716_vm3, %v3806_v31, %v4286_v18  ;;  %v481_v18 = vsel %vm373_vm1, %v476_v8, %v4374_v43  ;;  %v4419_v8 = vld [vmem:[%s3504_s19 + $0xb8] sm:$0xff] }
 0x10e   : > { %v583_v50 = vpop.permute.xlu1 %582  ;;  %v2266_v10 = vpop.permute.xlu2 %2265 }
 0x10f   : > { %v2264_v16 = vpop.permute.xlu0 %2263  ;;  %v730_v3 = vsel %vm716_vm3, %v3816_v34, %v583_v50  ;;  %v2240_v34 = vsel %vm618_vm0, %v5112_v51, %v2239_v11  ;;  %v2228_v50 = vsel %vm618_vm0, %v2225_v32, %v2227_v14 }
 0x110   : > { %v2360_v53 = vsel %vm765_vm4, %v2312_v37, %v2264_v16  ;;  %v4394_v16 = vld [vmem:[%s3504_s19 + $0x74] sm:$0xff] }
 0x111   : > { %3300 = vmatmul.msk.bf16.gmra.mxu2 %vm1443_vm5, %v2360_v53  ;;  %v1093_v53 = vshrl.u32 %v4282_v20, 16  ;;  %v1097_v36 = vshll.u32 %v4394_v16, 16  ;;  %v1262_v32 = vrot.slane %v4394_v16, 1 }
 0x114   : > { %2190 = vrot.lane.b32.xlu1 %v2113_v48, %s3459_s21  ;;  %1308 = vrot.lane.b32.xlu2 %v1261_v12, %s3458_s20 }
 0x115   : > { %2178 = vrot.lane.b32.xlu0 %v2065_v55, %s3459_s21  ;;  %v4372_v33 = vpop.f32.mrf.mxu3  ;;  %v1505_v44 = vpop.f32.mrf.mxu0 }
 0x116   : > { %v1299_v17 = vpop.permute.xlu1 %1298  ;;  %v4386_v37 = vpop.permute.xlu2 %682  ;;  %v1679_v48 = vadd.f32 %v1678_v23, %v1505_v44 }
 0x117   : > { %v681_v19 = vpop.permute.xlu0 %680  ;;  %v1395_v52 = vsel %vm765_vm4, %v1347_v62, %v1299_v17  ;;  %v1680_v23 = vpop.f32.mrf.mxu1  ;;  %v756_v62 = vsel %vm716_vm3, %v3841_v61, %v4325_v28  ;;  %v4436_v61 = vld [vmem:[%s3504_s19 + $0x88] sm:$0xff]  ;;  %v1099_v28 = vrot.slane %v1097_v36, 1  ;;  %v2066_v36 = vshrl.u32 %v4322_v45, 16 }
 0x118   : > { %3096 = vmatmul.msk.bf16.gmra.mxu0 %vm1443_vm5, %v1395_v52  ;;  %v779_v31 = vsel %vm765_vm4, %v730_v3, %v681_v19  ;;  %v644_v3 = vrot.slane %v4349_v1, 1  ;;  %v1095_v19 = vor.u32 %v1093_v53, %v4319_v46  ;;  %v1263_v46 = vsel %vm618_vm0, %v1260_v41, %v1262_v32 }
 0x119   : > { %3124 = vmatmul.msk.bf16.gmra.mxu1 %vm1443_vm5, %v779_v31  ;;  %v2114_v53 = vshrl.u32 %v4314_v7, 16 }
 0x11c   : > { %594 = vrot.lane.b32.xlu1 %v481_v18, %s3459_s21  ;;  %2275 = vrot.lane.b32.xlu2 %v2228_v50, %s3458_s20 }
 0x11d   : > { %2287 = vrot.lane.b32.xlu0 %v2240_v34, %s3458_s20  ;;  %v4415_v55 = vpop.f32.mrf.mxu3  ;;  %v2468_v12 = vpop.f32.mrf.mxu2 }
 0x11e   : > { %v2572_v44 = vadd.f32 %v2468_v12, %v1679_v48  ;;  %v707_v17 = vpop.permute.xlu1 %706  ;;  %v4428_v18 = vpop.permute.xlu2 %2170 }
 0x11f   : > { %v2169_v52 = vpop.permute.xlu0 %2168  ;;  %v805_v31 = vsel %vm765_vm4, %v756_v62, %v707_v17  ;;  %v1507_v48 = vpop.f32.mrf.mxu0  ;;  %v2118_v62 = vshll.u32 %v4419_v8, 16 }
 0x120   : > { %v2608_v34 = vadd.f32 %v4411_v27, %v2572_v44  ;;  %v2314_v50 = vsel %vm716_vm3, %v3837_v57, %v2169_v52  ;;  %3137 = vmatmul.msk.bf16.gmra.mxu3 %vm1443_vm5, %v805_v31  ;;  %v645_v57 = vsel %vm618_vm0, %v642_v26, %v644_v3  ;;  %v1681_v17 = vadd.f32 %v1680_v23, %v1507_v48 }
 0x121   : > { %v2362_v12 = vsel %vm765_vm4, %v2314_v50, %v2266_v10  ;;  %v1100_v10 = vsel %vm373_vm1, %v1095_v19, %v1099_v28  ;;  %v2229_v52 = vrot.slane %v4436_v61, 1  ;;  %v2070_v26 = vshll.u32 %v4436_v61, 16 }
 0x122   : > { %v2640_v44 = vmax.f32 %v2608_v34, 0.0  ;;  %3301 = vmatmul.msk.bf16.gmra.mxu2 %vm1443_vm5, %v2362_v12  ;;  %v2116_v34 = vor.u32 %v2114_v53, %v4346_v35  ;;  %v4464_v50 = vrot.slane %v2118_v62, 1  ;;  %v4467_v12 = vld [vmem:[%s3504_s19 + $0x7c] sm:$0xff] }
 0x123   : > { %v2230_v53 = vsel %vm618_vm0, %v2227_v14, %v2229_v52  ;;  %v482_v14 = vshrl.u32 %v4349_v1, 16 }
 0x124   : > { %v2672_v41 = vpack.c.bf16 %v2640_v44, %v2640_v44  ;;  %1310 = vrot.lane.b32.xlu1 %v1263_v46, %s3458_s20  ;;  %1213 = vrot.lane.b32.xlu2 %v1100_v10, %s3459_s21  ;;  %v4473_v46 = vld [vmem:[%s3504_s19 + $0x70] sm:$0xff]  ;;  %v2068_v44 = vor.u32 %v2066_v36, %v4352_v58  ;;  %v2072_v10 = vrot.slane %v2070_v26, 1  ;;  %v2121_v36 = vsel %vm373_vm1, %v2116_v34, %v4464_v50 }
 0x125   : > { %692 = vrot.lane.b32.xlu0 %v645_v57, %s3458_s20  ;;  %v1588_v19 = vpop.f32.mrf.mxu3  ;;  %v2470_v31 = vpop.f32.mrf.mxu2 }
 0x126   : > { %2705 = vst.msk [vmem:[%s4457_s12] sm:$0xf] %vm2704_vm6, %v2672_v41  ;;  %v2573_v23 = vadd.f32 %v2470_v31, %v1681_v17  ;;  %v1204_v48 = vpop.permute.xlu1 %1203  ;;  %v4484_v62 = vpop.permute.xlu2 %586  ;;  %v1101_v41 = vshrl.u32 %v4394_v16, 16  ;;  %v486_v17 = vshll.u32 %v4473_v46, 16  ;;  %v2073_v26 = vsel %vm373_vm1, %v2068_v44, %v2072_v10 }
 0x127   : > { %v585_v4 = vpop.permute.xlu0 %584  ;;  %v1683_v57 = vpop.f32.mrf.mxu1 }
 0x128   : > { %v2609_v19 = vadd.f32 %v4411_v27, %v2573_v23  ;;  %v732_v35 = vsel %vm716_vm3, %v3866_v30, %v585_v4  ;;  %v1105_v4 = vshll.u32 %v4467_v12, 16  ;;  %v1103_v34 = vor.u32 %v1101_v41, %v1099_v28  ;;  %v4501_v57 = vld [vmem:[%s3504_s19 + $0x90] sm:$0xff] }
 0x129   : > { %v781_v58 = vsel %vm765_vm4, %v732_v35, %v4386_v37  ;;  %v4507_v44 = vrot.slane %v486_v17, 1 }
 0x12a   : > { %v2641_v30 = vmax.f32 %v2609_v19, 0.0  ;;  %3125 = vmatmul.msk.bf16.gmra.mxu1 %vm1443_vm5, %v781_v58  ;;  %v4498_v23 = vrot.slane %v1105_v4, 1  ;;  %v484_v58 = vor.u32 %v482_v14, %v4374_v43  ;;  %v2078_v43 = vshll.u32 %v4501_v57, 16 }
 0x12c   : > { %v2673_v31 = vpack.c.bf16 %v2641_v30, %v2641_v30  ;;  %2277 = vrot.lane.b32.xlu1 %v2230_v53, %s3458_s20  ;;  %2180 = vrot.lane.b32.xlu2 %v2073_v26, %s3459_s21  ;;  %v2241_v53 = vrot.slane %v4419_v8, 1  ;;  %v1108_v30 = vsel %vm373_vm1, %v1103_v34, %v4498_v23  ;;  %v2074_v26 = vshrl.u32 %v4436_v61, 16 }
 0x12d   : > { %2192 = vrot.lane.b32.xlu0 %v2121_v36, %s3459_s21  ;;  %v2473_v37 = vpop.f32.mrf.mxu2  ;;  %v1349_v36 = vsel %vm716_vm3, %v3909_v39, %v1204_v48  ;;  %v489_v14 = vsel %vm373_vm1, %v484_v58, %v4507_v44  ;;  %v4525_v48 = vpop.f32.mrf.mxu3  ;;  %v4529_v34 = vrot.slane %v2078_v43, 1 }
 0x12e   : > { %2706 = vst.msk [vmem:[%s4457_s12 + $0x4] sm:$0xf] %vm2704_vm6, %v2673_v31  ;;  %v1510_v19 = vpop.f32.mrf.mxu0  ;;  %v611_v35 = vpop.permute.xlu1 %610  ;;  %v2242_v39 = vsel %vm618_vm0, %v2239_v11, %v2241_v53  ;;  %v2076_v37 = vor.u32 %v2074_v26, %v2072_v10 }
 0x12f   : > { %v1301_v28 = vpop.permute.xlu0 %1300  ;;  %v1303_v4 = vpop.permute.xlu2 %1302  ;;  %v2316_v19 = vsel %vm716_vm3, %v3931_v56, %v4428_v18 }
 0x130   : > { %v1397_v41 = vsel %vm765_vm4, %v1349_v36, %v1301_v28  ;;  %v1684_v17 = vpop.f32.mrf.mxu1  ;;  %v1264_v36 = vrot.slane %v4467_v12, 1  ;;  %v646_v28 = vrot.slane %v4473_v46, 1  ;;  %v2081_v18 = vsel %vm373_vm1, %v2076_v37, %v4529_v34 }
 0x131   : > { %3097 = vmatmul.msk.bf16.gmra.mxu0 %vm1443_vm5, %v1397_v41  ;;  %v758_v41 = vsel %vm716_vm3, %v3938_v21, %v611_v35 }
 0x132   : > { %v1265_v21 = vsel %vm618_vm0, %v1262_v32, %v1264_v36  ;;  %v647_v35 = vsel %vm618_vm0, %v644_v3, %v646_v28  ;;  %v2231_v3 = vrot.slane %v4501_v57, 1 }
 0x134   : > { %1215 = vrot.lane.b32.xlu1 %v1108_v30, %s3459_s21  ;;  %2289 = vrot.lane.b32.xlu2 %v2242_v39, %s3458_s20  ;;  %v4548_v39 = vld [vmem:[%s3504_s19 + $0xc0] sm:$0xff] }
 0x135   : > { %596 = vrot.lane.b32.xlu0 %v489_v14, %s3459_s21  ;;  %v2474_v31 = vpop.f32.mrf.mxu2 }
 0x136   : > { %v1511_v58 = vpop.f32.mrf.mxu0  ;;  %v2268_v11 = vpop.permute.xlu1 %2267 }
 0x137   : > { %v1685_v30 = vadd.f32 %v1684_v17, %v1511_v58  ;;  %v709_v10 = vpop.permute.xlu0 %708  ;;  %v2364_v26 = vsel %vm765_vm4, %v2316_v19, %v2268_v11  ;;  %v4542_v14 = vpop.permute.xlu2 %710  ;;  %v2122_v17 = vshrl.u32 %v4419_v8, 16  ;;  %v2126_v19 = vshll.u32 %v4548_v39, 16 }
 0x138   : > { %v807_v43 = vsel %vm765_vm4, %v758_v41, %v709_v10  ;;  %3302 = vmatmul.msk.bf16.gmra.mxu2 %vm1443_vm5, %v2364_v26  ;;  %v2243_v41 = vrot.slane %v4548_v39, 1  ;;  %v4574_v26 = vld [vmem:[%s3504_s19 + $0x84] sm:$0xff] }
 0x139   : > { %v2574_v56 = vadd.f32 %v2474_v31, %v1685_v30  ;;  %3138 = vmatmul.msk.bf16.gmra.mxu3 %vm1443_vm5, %v807_v43  ;;  %v734_v30 = vsel %vm716_vm3, %v3967_v49, %v4484_v62  ;;  %v2124_v43 = vor.u32 %v2122_v17, %v4464_v50  ;;  %v2128_v49 = vrot.slane %v2126_v19, 1  ;;  %v4597_v17 = vld [vmem:[%s3504_s19 + $0x78] sm:$0xff] }
 0x13a   : > { %v2244_v50 = vsel %vm618_vm0, %v2241_v53, %v2243_v41  ;;  %v1109_v19 = vshrl.u32 %v4467_v12, 16  ;;  %v490_v53 = vshrl.u32 %v4473_v46, 16 }
 0x13b   : > { %v2610_v31 = vadd.f32 %v4411_v27, %v2574_v56 }
 0x13c   : > { %v4562_v37 = vpop.f32.mrf.mxu3  ;;  %2182 = vrot.lane.b32.xlu1 %v2081_v18, %s3459_s21  ;;  %694 = vrot.lane.b32.xlu2 %v647_v35, %s3458_s20 }
 0x13d   : > { %v2642_v58 = vmax.f32 %v2610_v31, 0.0  ;;  %1312 = vrot.lane.b32.xlu0 %v1265_v21, %s3458_s20  ;;  %v2477_v32 = vpop.f32.mrf.mxu2  ;;  %v1687_v11 = vpop.f32.mrf.mxu1 }
 0x13e   : > { %v685_v10 = vpop.permute.xlu1 %684 }
 0x13f   : > { %v2674_v56 = vpack.c.bf16 %v2642_v58, %v2642_v58  ;;  %v1206_v18 = vpop.permute.xlu0 %1205  ;;  %v1514_v21 = vpop.f32.mrf.mxu0  ;;  %v783_v31 = vsel %vm765_vm4, %v734_v30, %v685_v10 }
 0x140   : > { %v1351_v63 = vsel %vm716_vm3, %v3958_v60, %v1206_v18  ;;  %v1688_v51 = vadd.f32 %v1687_v11, %v1514_v21  ;;  %3126 = vmatmul.msk.bf16.gmra.mxu1 %vm1443_vm5, %v783_v31  ;;  %v4581_v35 = vpop.permute.xlu2 %1207  ;;  %v2232_v60 = vsel %vm618_vm0, %v2229_v52, %v2231_v3  ;;  %v494_v52 = vshll.u32 %v4597_v17, 16 }
 0x141   : > { %2707 = vst.msk [vmem:[%s4457_s12 + $0x8] sm:$0xf] %vm2704_vm6, %v2674_v56  ;;  %v1399_v62 = vsel %vm765_vm4, %v1351_v63, %v1303_v4  ;;  %v1113_v63 = vshll.u32 %v4574_v26, 16  ;;  %v2129_v4 = vsel %vm373_vm1, %v2124_v43, %v2128_v49  ;;  %v4610_v56 = vld [vmem:[%s3504_s19 + $0xc8] sm:$0xff]  ;;  %v1111_v21 = vor.u32 %v1109_v19, %v4498_v23 }
 0x142   : > { %v2575_v58 = vadd.f32 %v2477_v32, %v1688_v51  ;;  %3098 = vmatmul.msk.bf16.gmra.mxu0 %vm1443_vm5, %v1399_v62  ;;  %v5115_v32 = vrot.slane %v4597_v17, 1  ;;  %v4617_v62 = vld [vmem:[%s3504_s19 + $0x98] sm:$0xff]  ;;  %v2134_v19 = vshll.u32 %v4610_v56, 16 }
 0x143   : > { %v4614_v31 = vrot.slane %v1113_v63, 1  ;;  %v2082_v63 = vshrl.u32 %v4501_v57, 16 }
 0x144   : > { %v2611_v11 = vadd.f32 %v4411_v27, %v2575_v58  ;;  %v1594_v30 = vpop.f32.mrf.mxu3  ;;  %2291 = vrot.lane.b32.xlu1 %v2244_v50, %s3458_s20  ;;  %2194 = vrot.lane.b32.xlu2 %v2129_v4, %s3459_s21  ;;  %v492_v50 = vor.u32 %v490_v53, %v4507_v44  ;;  %v496_v4 = vrot.slane %v494_v52, 1  ;;  %v649_v23 = vsel %vm618_vm0, %v646_v28, %v5115_v32 }
 0x145   : > { %2279 = vrot.lane.b32.xlu0 %v2232_v60, %s3458_s20  ;;  %v2479_v10 = vpop.f32.mrf.mxu2  ;;  %v1689_v51 = vpop.f32.mrf.mxu1  ;;  %v2130_v44 = vshrl.u32 %v4548_v39, 16  ;;  %v4643_v52 = vrot.slane %v2134_v19, 1 }
 0x146   : > { %v2643_v43 = vmax.f32 %v2611_v11, 0.0  ;;  %v2173_v18 = vpop.permute.xlu1 %2172  ;;  %v497_v53 = vsel %vm373_vm1, %v492_v50, %v496_v4 }
 0x147   : > { %v613_v60 = vpop.permute.xlu0 %612  ;;  %v1516_v58 = vpop.f32.mrf.mxu0  ;;  %v2132_v28 = vor.u32 %v2130_v44, %v2128_v49  ;;  %v2318_v50 = vsel %vm716_vm3, %v4030_v59, %v2173_v18 }
 0x148   : > { %v2675_v30 = vpack.c.bf16 %v2643_v43, %v2643_v43  ;;  %v760_v10 = vsel %vm716_vm3, %v3992_v29, %v613_v60  ;;  %v4622_v51 = vpop.permute.xlu2 %614  ;;  %v1116_v29 = vsel %vm373_vm1, %v1111_v21, %v4614_v31  ;;  %v4646_v43 = vld [vmem:[%s3504_s19 + $0x80] sm:$0xff]  ;;  %v2084_v21 = vor.u32 %v2082_v63, %v4529_v34 }
 0x149   : > { %v809_v11 = vsel %vm765_vm4, %v760_v10, %v4542_v14  ;;  %v2086_v14 = vshll.u32 %v4617_v62, 16  ;;  %v2137_v44 = vsel %vm373_vm1, %v2132_v28, %v4643_v52  ;;  %v498_v34 = vshrl.u32 %v4597_v17, 16 }
 0x14a   : > { %2708 = vst.msk [vmem:[%s4457_s12 + $0xc] sm:$0xf] %vm2704_vm6, %v2675_v30  ;;  %3139 = vmatmul.msk.bf16.gmra.mxu3 %vm1443_vm5, %v809_v11  ;;  %v1266_v30 = vrot.slane %v4574_v26, 1  ;;  %v502_v19 = vshll.u32 %v4646_v43, 16  ;;  %v1353_v28 = vsel %vm716_vm3, %v4051_v38, %v4581_v35 }
 0x14b   : > { %v4650_v58 = vrot.slane %v2086_v14, 1  ;;  %v500_v14 = vor.u32 %v498_v34, %v496_v4 }
 0x14c   : > { %696 = vrot.lane.b32.xlu1 %v649_v23, %s3458_s20  ;;  %598 = vrot.lane.b32.xlu2 %v497_v53, %s3459_s21  ;;  %v1267_v59 = vsel %vm618_vm0, %v1264_v36, %v1266_v30  ;;  %v4672_v53 = vrot.slane %v502_v19, 1  ;;  %v5113_v36 = vrot.slane %v4610_v56, 1 }
 0x14d   : > { %1217 = vrot.lane.b32.xlu0 %v1116_v29, %s3459_s21  ;;  %v4656_v23 = vpop.f32.mrf.mxu3  ;;  %v2089_v29 = vsel %vm373_vm1, %v2084_v21, %v4650_v58 }
 0x14e   : > { %v589_v60 = vpop.permute.xlu1 %588  ;;  %v505_v35 = vsel %vm373_vm1, %v500_v14, %v4672_v53 }
 0x14f   : > { %v2270_v10 = vpop.permute.xlu0 %2269 }
 0x150   : > { %v2366_v11 = vsel %vm765_vm4, %v2318_v50, %v2270_v10  ;;  %v2272_v49 = vpop.permute.xlu2 %2271  ;;  %v5114_v10 = vrot.slane %v4617_v62, 1 }
 0x151   : > { %3303 = vmatmul.msk.bf16.gmra.mxu2 %vm1443_vm5, %v2366_v11  ;;  %v736_v11 = vsel %vm716_vm3, %v4070_v9, %v589_v60  ;;  %v2246_v9 = vsel %vm618_vm0, %v2243_v41, %v5113_v36 }
 0x152   : > { %v2234_v60 = vsel %vm618_vm0, %v2231_v3, %v5114_v10  ;;  %v5116_v3 = vrot.slane %v4646_v43, 1 }
 0x154   : > { %v2481_v18 = vpop.f32.mrf.mxu2  ;;  %2196 = vrot.lane.b32.xlu1 %v2137_v44, %s3459_s21  ;;  %1314 = vrot.lane.b32.xlu2 %v1267_v59, %s3458_s20  ;;  %v4691_v59 = vld [vmem:[%s3504_s19 + $0x8c] sm:$0xff] }
 0x155   : > { %2184 = vrot.lane.b32.xlu0 %v2089_v29, %s3459_s21  ;;  %v1518_v63 = vpop.f32.mrf.mxu0 }
 0x156   : > { %v1691_v21 = vpop.f32.mrf.mxu1  ;;  %v1305_v50 = vpop.permute.xlu1 %1304 }
 0x157   : > { %v1692_v44 = vadd.f32 %v1691_v21, %v1518_v63  ;;  %v687_v4 = vpop.permute.xlu0 %686  ;;  %v1401_v34 = vsel %vm765_vm4, %v1353_v28, %v1305_v50  ;;  %v4704_v63 = vpop.f32.mrf.mxu3  ;;  %v1121_v21 = vshll.u32 %v4691_v59, 16 }
 0x158   : > { %3099 = vmatmul.msk.bf16.gmra.mxu0 %vm1443_vm5, %v1401_v34  ;;  %v785_v19 = vsel %vm765_vm4, %v736_v11, %v687_v4  ;;  %v4685_v29 = vpop.permute.xlu2 %688  ;;  %v1268_v11 = vrot.slane %v4691_v59, 1 }
 0x159   : > { %v2576_v38 = vadd.f32 %v2481_v18, %v1692_v44  ;;  %3127 = vmatmul.msk.bf16.gmra.mxu1 %vm1443_vm5, %v785_v19  ;;  %v1117_v18 = vshrl.u32 %v4574_v26, 16  ;;  %v762_v44 = vsel %vm716_vm3, %v4089_v25, %v4622_v51  ;;  %v4717_v19 = vld [vmem:[%s3504_s19 + $0xd0] sm:$0xff]  ;;  %v1123_v25 = vrot.slane %v1121_v21, 1 }
 0x15b   : > { %v2612_v14 = vadd.f32 %v4411_v27, %v2576_v38  ;;  %v1119_v38 = vor.u32 %v1117_v18, %v4614_v31  ;;  %v1269_v31 = vsel %vm618_vm0, %v1266_v30, %v1268_v11  ;;  %v4740_v18 = vld [vmem:[%s3504_s19 + $0xa0] sm:$0xff]  ;;  %v2090_v30 = vshrl.u32 %v4617_v62, 16 }
 0x15c   : > { %v2483_v28 = vpop.f32.mrf.mxu2  ;;  %600 = vrot.lane.b32.xlu1 %v505_v35, %s3459_s21  ;;  %2281 = vrot.lane.b32.xlu2 %v2234_v60, %s3458_s20 }
 0x15d   : > { %v2644_v50 = vmax.f32 %v2612_v14, 0.0  ;;  %2293 = vrot.lane.b32.xlu0 %v2246_v9, %s3458_s20  ;;  %v1520_v41 = vpop.f32.mrf.mxu0 }
 0x15e   : > { %v1693_v4 = vpop.f32.mrf.mxu1  ;;  %v713_v34 = vpop.permute.xlu1 %712 }
 0x15f   : > { %v2676_v35 = vpack.c.bf16 %v2644_v50, %v2644_v50  ;;  %v1694_v9 = vadd.f32 %v1693_v4, %v1520_v41  ;;  %v2175_v14 = vpop.permute.xlu0 %2174  ;;  %v811_v36 = vsel %vm765_vm4, %v762_v44, %v713_v34  ;;  %v2094_v41 = vshll.u32 %v4740_v18, 16  ;;  %v4753_v34 = vld [vmem:[%s3504_s19 + $0x94] sm:$0xff] }
 0x160   : > { %v2320_v10 = vsel %vm716_vm3, %v4082_v24, %v2175_v14  ;;  %3140 = vmatmul.msk.bf16.gmra.mxu3 %vm1443_vm5, %v811_v36  ;;  %v4724_v60 = vpop.permute.xlu2 %2176  ;;  %v5119_v24 = vrot.slane %v4597_v17, 1  ;;  %v5117_v4 = vrot.slane %v4740_v18, 1  ;;  %v4760_v14 = vld [vmem:[%s3504_s19 + $0x88] sm:$0xff] }
 0x161   : > { %2709 = vst.msk [vmem:[%s4457_s12 + $0x10] sm:$0xf] %vm2704_vm6, %v2676_v35  ;;  %v2577_v51 = vadd.f32 %v2483_v28, %v1694_v9  ;;  %v2368_v32 = vsel %vm765_vm4, %v2320_v10, %v2272_v49  ;;  %v2138_v28 = vshrl.u32 %v4610_v56, 16  ;;  %v2142_v49 = vshll.u32 %v4717_v19, 16 }
 0x162   : > { %v651_v36 = vsel %vm618_vm0, %v5119_v24, %v5116_v3  ;;  %3304 = vmatmul.msk.bf16.gmra.mxu2 %vm1443_vm5, %v2368_v32  ;;  %v1124_v10 = vsel %vm373_vm1, %v1119_v38, %v1123_v25  ;;  %v2096_v3 = vrot.slane %v2094_v41, 1  ;;  %v506_v41 = vshrl.u32 %v4646_v43, 16 }
 0x163   : > { %v2613_v21 = vadd.f32 %v4411_v27, %v2577_v51  ;;  %v1601_v50 = vpop.f32.mrf.mxu3  ;;  %v2140_v35 = vor.u32 %v2138_v28, %v4643_v52  ;;  %v4757_v9 = vrot.slane %v2142_v49, 1  ;;  %v2092_v51 = vor.u32 %v2090_v30, %v4650_v58 }
 0x164   : > { %1316 = vrot.lane.b32.xlu1 %v1269_v31, %s3458_s20  ;;  %1219 = vrot.lane.b32.xlu2 %v1124_v10, %s3459_s21  ;;  %v5120_v28 = vrot.slane %v4617_v62, 1  ;;  %v1125_v49 = vshrl.u32 %v4691_v59, 16  ;;  %v1129_v10 = vshll.u32 %v4753_v34, 16 }
 0x165   : > { %v2645_v44 = vmax.f32 %v2613_v21, 0.0  ;;  %698 = vrot.lane.b32.xlu0 %v651_v36, %s3458_s20  ;;  %v2486_v32 = vpop.f32.mrf.mxu2  ;;  %v3430_v21 = vld [vmem:[%s3504_s19 + $0x50] sm:$0xff]  ;;  %v2145_v30 = vsel %vm373_vm1, %v2140_v35, %v4757_v9  ;;  %v508_v35 = vor.u32 %v506_v41, %v4672_v53  ;;  %v5121_v41 = vrot.slane %v4610_v56, 1 }
 0x166   : > { %v1210_v38 = vpop.permute.xlu1 %1209  ;;  %v2236_v58 = vsel %vm618_vm0, %v5120_v28, %v5117_v4 }
 0x167   : > { %v2677_v31 = vpack.c.bf16 %v2645_v44, %v2645_v44  ;;  %v591_v24 = vpop.permute.xlu0 %590  ;;  %v1696_v36 = vpop.f32.mrf.mxu1  ;;  %v510_v44 = vshll.u32 %v4760_v14, 16 }
 0x168   : > { %v738_v50 = vsel %vm716_vm3, %v3430_v21, %v591_v24  ;;  %v4765_v32 = vpop.permute.xlu2 %592  ;;  %v4786_v24 = vrot.slane %v1129_v10, 1  ;;  %v3190_v10 = vld [vmem:[%s3504_s19 + $0xd8] sm:$0xf] }
 0x169   : > { %2710 = vst.msk [vmem:[%s4457_s12 + $0x14] sm:$0xf] %vm2704_vm6, %v2677_v31  ;;  %v787_v52 = vsel %vm765_vm4, %v738_v50, %v4685_v29  ;;  %v2097_v29 = vsel %vm373_vm1, %v2092_v51, %v2096_v3  ;;  %v1127_v31 = vor.u32 %v1125_v49, %v1123_v25  ;;  %v4790_v50 = vrot.slane %v510_v44, 1 }
 0x16a   : > { %3128 = vmatmul.msk.bf16.gmra.mxu1 %vm1443_vm5, %v787_v52  ;;  %v2247_v52 = vrot.slane %v4717_v19, 1  ;;  %v1355_v51 = vsel %vm716_vm3, %v4150_v15, %v1210_v38  ;;  %v2098_v49 = vshrl.u32 %v4740_v18, 16 }
 0x16b   : > { %v1132_v25 = vsel %vm373_vm1, %v1127_v31, %v4786_v24  ;;  %v513_v53 = vsel %vm373_vm1, %v508_v35, %v4790_v50  ;;  %v4808_v44 = vpop.f32.mrf.mxu3  ;;  %v2322_v35 = vsel %vm716_vm3, %v4170_v40, %v4724_v60 }
 0x16c   : > { %2283 = vrot.lane.b32.xlu1 %v2236_v58, %s3458_s20  ;;  %2186 = vrot.lane.b32.xlu2 %v2097_v29, %s3459_s21  ;;  %v2248_v15 = vsel %vm618_vm0, %v5121_v41, %v2247_v52  ;;  %v1956_v29 = vunpack.c.l.b16 %v3190_v10  ;;  %v2100_v31 = vor.u32 %v2098_v49, %v2096_v3  ;;  %v652_v41 = vrot.slane %v4760_v14, 1 }
 0x16d   : > { %2198 = vrot.lane.b32.xlu0 %v2145_v30, %s3459_s21  ;;  %v2487_v38 = vpop.f32.mrf.mxu2 }
 0x16e   : > { %v1523_v36 = vpop.f32.mrf.mxu0  ;;  %v617_v21 = vpop.permute.xlu1 %616  ;;  %v1957_v49 = vpack.c.b16 %v1956_v29, %v1956_v29  ;;  %v2105_v60 = vsel %vm373_vm1, %v2100_v31, %v4333_v54 }
 0x16f   : > { %v1307_v28 = vpop.permute.xlu0 %1306  ;;  %v1697_v36 = vpop.f32.mrf.mxu1 }
 0x170   : > { %v1403_v58 = vsel %vm765_vm4, %v1355_v51, %v1307_v28  ;;  %v1309_v30 = vpop.permute.xlu2 %1308  ;;  %v2150_v29 = vshll.u32 %v1957_v49, 16  ;;  %v2249_v31 = vrot.slane %v1957_v49, 1 }
 0x171   : > { %3100 = vmatmul.msk.bf16.gmra.mxu0 %vm1443_vm5, %v1403_v58  ;;  %v5118_v58 = vrot.slane %v4753_v34, 1 }
 0x174   : > { %1221 = vrot.lane.b32.xlu1 %v1132_v25, %s3459_s21  ;;  %2295 = vrot.lane.b32.xlu2 %v2248_v15, %s3458_s20  ;;  %v764_v25 = vsel %vm716_vm3, %v4180_v5, %v617_v21  ;;  %v1271_v5 = vsel %vm618_vm0, %v1268_v11, %v5118_v58 }
 0x175   : > { %602 = vrot.lane.b32.xlu0 %v513_v53, %s3459_s21 }
 0x176   : > { %v1524_v51 = vpop.f32.mrf.mxu0  ;;  %v2274_v28 = vpop.permute.xlu1 %2273 }
 0x177   : > { %v1698_v10 = vadd.f32 %v1697_v36, %v1524_v51  ;;  %v715_v4 = vpop.permute.xlu0 %714  ;;  %v2370_v53 = vsel %vm765_vm4, %v2322_v35, %v2274_v28  ;;  %v3431_v28 = vld [vmem:[%s3504_s19 + $0x58] sm:$0xff] }
 0x178   : > { %v813_v3 = vsel %vm765_vm4, %v764_v25, %v715_v4  ;;  %3305 = vmatmul.msk.bf16.gmra.mxu2 %vm1443_vm5, %v2370_v53  ;;  %v2276_v15 = vpop.permute.xlu2 %2275  ;;  %v5122_v4 = vrot.slane %v4646_v43, 1  ;;  %v740_v25 = vsel %vm716_vm3, %v3431_v28, %v4765_v32 }
 0x179   : > { %v2578_v40 = vadd.f32 %v2487_v38, %v1698_v10  ;;  %3141 = vmatmul.msk.bf16.gmra.mxu3 %vm1443_vm5, %v813_v3  ;;  %v2146_v38 = vshrl.u32 %v4717_v19, 16  ;;  %v2152_v3 = vrot.slane %v2150_v29, 1  ;;  %v5124_v29 = vrot.slane %v4740_v18, 1 }
 0x17a   : > { %v653_v21 = vsel %vm618_vm0, %v5122_v4, %v652_v41 }
 0x17b   : > { %v2614_v36 = vadd.f32 %v4411_v27, %v2578_v40  ;;  %v2490_v35 = vpop.f32.mrf.mxu2  ;;  %v2148_v53 = vor.u32 %v2146_v38, %v4757_v9  ;;  %v2250_v9 = vsel %vm618_vm0, %v2247_v52, %v2249_v31  ;;  %v5123_v38 = vrot.slane %v4302_v2, 1 }
 0x17c   : > { %v4838_v51 = vpop.f32.mrf.mxu3  ;;  %2188 = vrot.lane.b32.xlu1 %v2105_v60, %s3459_s21  ;;  %700 = vrot.lane.b32.xlu2 %v653_v21, %s3458_s20 }
 0x17d   : > { %v2646_v54 = vmax.f32 %v2614_v36, 0.0  ;;  %1318 = vrot.lane.b32.xlu0 %v1271_v5, %s3458_s20  ;;  %v1700_v11 = vpop.f32.mrf.mxu1  ;;  %v3432_v36 = vld [vmem:[%s3504_s19 + $0x64] sm:$0xff] }
 0x17e   : > { %v691_v10 = vpop.permute.xlu1 %690 }
 0x17f   : > { %v2678_v40 = vpack.c.bf16 %v2646_v54, %v2646_v54  ;;  %v1212_v4 = vpop.permute.xlu0 %1211  ;;  %v1527_v58 = vpop.f32.mrf.mxu0  ;;  %v789_v60 = vsel %vm765_vm4, %v740_v25, %v691_v10  ;;  %v2238_v54 = vsel %vm618_vm0, %v5124_v29, %v5123_v38  ;;  %v514_v25 = vshrl.u32 %v4760_v14, 16 }
 0x180   : > { %v1357_v5 = vsel %vm716_vm3, %v3432_v36, %v1212_v4  ;;  %v1701_v49 = vadd.f32 %v1700_v11, %v1527_v58  ;;  %3129 = vmatmul.msk.bf16.gmra.mxu1 %vm1443_vm5, %v789_v60  ;;  %v1214_v21 = vpop.permute.xlu2 %1213  ;;  %v1133_v58 = vshrl.u32 %v4753_v34, 16  ;;  %v2153_v11 = vsel %vm373_vm1, %v2148_v53, %v2152_v3 }
 0x181   : > { %2711 = vst.msk [vmem:[%s4457_s12 + $0x18] sm:$0xf] %vm2704_vm6, %v2678_v40  ;;  %v1405_v32 = vsel %vm765_vm4, %v1357_v5, %v1309_v30  ;;  %v516_v53 = vor.u32 %v514_v25, %v4790_v50 }
 0x182   : > { %v2579_v28 = vadd.f32 %v2490_v35, %v1701_v49  ;;  %3101 = vmatmul.msk.bf16.gmra.mxu0 %vm1443_vm5, %v1405_v32  ;;  %v1135_v4 = vor.u32 %v1133_v58, %v4786_v24 }
 0x183   : > { %v2492_v30 = vpop.f32.mrf.mxu2  ;;  %v521_v50 = vsel %vm373_vm1, %v516_v53, %v3856_v22  ;;  %v5127_v22 = vrot.slane %v4753_v34, 1 }
 0x184   : > { %v2615_v10 = vadd.f32 %v4411_v27, %v2579_v28  ;;  %v1607_v40 = vpop.f32.mrf.mxu3  ;;  %2297 = vrot.lane.b32.xlu1 %v2250_v9, %s3458_s20  ;;  %2200 = vrot.lane.b32.xlu2 %v2153_v11, %s3459_s21  ;;  %v5125_v9 = vrot.slane %v3824_v6, 1  ;;  %v1140_v24 = vsel %vm373_vm1, %v1135_v4, %v3535_v13  ;;  %v5126_v13 = vrot.slane %v3507_v0, 1 }
 0x185   : > { %2285 = vrot.lane.b32.xlu0 %v2238_v54, %s3458_s20  ;;  %v1702_v52 = vpop.f32.mrf.mxu1 }
 0x186   : > { %v2647_v35 = vmax.f32 %v2615_v10, 0.0  ;;  %v2191_v31 = vpop.permute.xlu1 %2190  ;;  %v655_v38 = vsel %vm618_vm0, %v652_v41, %v5125_v9  ;;  %v1273_v28 = vsel %vm618_vm0, %v5127_v22, %v5126_v13 }
 0x187   : > { %v2179_v3 = vpop.permute.xlu0 %2178  ;;  %v1529_v60 = vpop.f32.mrf.mxu0 }
 0x188   : > { %v2679_v36 = vpack.c.bf16 %v2647_v35, %v2647_v35  ;;  %v2324_v5 = vsel %vm716_vm3, %v4263_v42, %v2179_v3  ;;  %v2181_v49 = vpop.permute.xlu2 %2180  ;;  %v2336_v42 = vsel %vm716_vm3, %v4302_v2, %v2191_v31  ;;  %v1359_v2 = vsel %vm716_vm3, %v4282_v20, %v1214_v21 }
 0x189   : > { %v2372_v32 = vsel %vm765_vm4, %v2324_v5, %v2276_v15  ;;  %v2326_v60 = vsel %vm716_vm3, %v4322_v45, %v2181_v49 }
 0x18a   : > { %2712 = vst.msk [vmem:[%s4457_s12 + $0x1c] sm:$0xf] %vm2704_vm6, %v2679_v36  ;;  %3306 = vmatmul.msk.bf16.gmra.mxu2 %vm1443_vm5, %v2372_v32 }
 0x18c   : > { %702 = vrot.lane.b32.xlu1 %v655_v38, %s3458_s20  ;;  %604 = vrot.lane.b32.xlu2 %v521_v50, %s3459_s21 }
 0x18d   : > { %1223 = vrot.lane.b32.xlu0 %v1140_v24, %s3459_s21  ;;  %v4893_v54 = vpop.f32.mrf.mxu3 }
 0x18e   : > { %v595_v6 = vpop.permute.xlu1 %594 }
 0x18f   : > { %v2288_v41 = vpop.permute.xlu0 %2287  ;;  %v742_v10 = vsel %vm716_vm3, %v4292_v47, %v595_v6 }
 0x190   : > { %v2384_v15 = vsel %vm765_vm4, %v2336_v42, %v2288_v41  ;;  %v2290_v29 = vpop.permute.xlu2 %2289 }
 0x191   : > { %3312 = vmatmul.msk.bf16.vlgmr.msra.gmra.mxu3 %vm1443_vm5, %v2384_v15 }
 0x194   : > { %v2494_v58 = vpop.f32.mrf.mxu2  ;;  %1320 = vrot.lane.b32.xlu2 %v1273_v28, %s3458_s20 }
 0x195   : > { %v1531_v11 = vpop.f32.mrf.mxu0  ;;  %v4910_v53 = vpop.f32.mrf.mxu3 }
 0x196   : > { %v1704_v25 = vpop.f32.mrf.mxu1  ;;  %v1311_v30 = vpop.permute.xlu1 %1310 }
 0x197   : > { %v1705_v40 = vadd.f32 %v1704_v25, %v1531_v11  ;;  %v1407_v52 = vsel %vm765_vm4, %v1359_v2, %v1311_v30  ;;  %v693_v0 = vpop.permute.xlu0 %692 }
 0x198   : > { %v791_v35 = vsel %vm765_vm4, %v742_v10, %v693_v0  ;;  %3102 = vmatmul.msk.bf16.gmra.mxu0 %vm1443_vm5, %v1407_v52  ;;  %v695_v31 = vpop.permute.xlu2 %694 }
 0x199   : > { %v2580_v4 = vadd.f32 %v2494_v58, %v1705_v40  ;;  %3130 = vmatmul.msk.bf16.gmra.mxu1 %vm1443_vm5, %v791_v35 }
 0x19b   : > { %v2616_v20 = vadd.f32 %v4411_v27, %v2580_v4 }
 0x19c   : > { %v2496_v21 = vpop.f32.mrf.mxu2 }
 0x19d   : > { %v2648_v3 = vmax.f32 %v2616_v20, 0.0  ;;  %v1533_v47 = vpop.f32.mrf.mxu0 }
 0x19e   : > { %v1706_v36 = vpop.f32.mrf.mxu1  ;;  %v2278_v5 = vpop.permute.xlu1 %2277 }
 0x19f   : > { %v2680_v32 = vpack.c.bf16 %v2648_v3, %v2648_v3  ;;  %v1707_v9 = vadd.f32 %v1706_v36, %v1533_v47  ;;  %v2374_v38 = vsel %vm765_vm4, %v2326_v60, %v2278_v5  ;;  %v2193_v24 = vpop.permute.xlu0 %2192 }
 0x1a0   : > { %v2338_v50 = vsel %vm716_vm3, %v4314_v7, %v2193_v24  ;;  %3307 = vmatmul.msk.bf16.gmra.mxu2 %vm1443_vm5, %v2374_v38  ;;  %v2195_v6 = vpop.permute.xlu2 %2194 }
 0x1a1   : > { %2713 = vst.msk [vmem:[%s4457_s12 + $0x20] sm:$0xf] %vm2704_vm6, %v2680_v32  ;;  %v2581_v42 = vadd.f32 %v2496_v21, %v1707_v9  ;;  %v2386_v41 = vsel %vm765_vm4, %v2338_v50, %v2290_v29 }
 0x1a2   : > { %3313 = vmatmul.msk.bf16.gmra.mxu3 %vm1443_vm5, %v2386_v41 }
 0x1a3   : > { %v2617_v45 = vadd.f32 %v4411_v27, %v2581_v42  ;;  %v1761_v49 = vpop.f32.mrf.mxu3 }
 0x1a5   : > { %v2649_v15 = vmax.f32 %v2617_v45, 0.0  ;;  %v2499_v13 = vpop.f32.mrf.mxu2 }
 0x1a6   : > { %v1216_v22 = vpop.permute.xlu1 %1215 }
 0x1a7   : > { %v2681_v28 = vpack.c.bf16 %v2649_v15, %v2649_v15  ;;  %v597_v58 = vpop.permute.xlu0 %596  ;;  %v1709_v7 = vpop.f32.mrf.mxu1  ;;  %v1361_v10 = vsel %vm716_vm3, %v4394_v16, %v1216_v22 }
 0x1a8   : > { %v744_v11 = vsel %vm716_vm3, %v4349_v1, %v597_v58  ;;  %v599_v2 = vpop.permute.xlu2 %598 }
 0x1a9   : > { %2714 = vst.msk [vmem:[%s4457_s12 + $0x24] sm:$0xf] %vm2704_vm6, %v2681_v28  ;;  %v793_v25 = vsel %vm765_vm4, %v744_v11, %v695_v31  ;;  %v2340_v31 = vsel %vm716_vm3, %v4419_v8, %v2195_v6  ;;  %v746_v50 = vsel %vm716_vm3, %v4473_v46, %v599_v2 }
 0x1aa   : > { %3131 = vmatmul.msk.bf16.gmra.mxu1 %vm1443_vm5, %v793_v25 }
 0x1ab   : > { %v4934_v1 = vpop.f32.mrf.mxu3 }
 0x1ad   : > { %v2500_v35 = vpop.f32.mrf.mxu2 }
 0x1ae   : > { %v1536_v29 = vpop.f32.mrf.mxu0  ;;  %v2183_v30 = vpop.permute.xlu1 %2182 }
 0x1af   : > { %v1313_v40 = vpop.permute.xlu0 %1312  ;;  %v1710_v4 = vpop.f32.mrf.mxu1  ;;  %v2328_v3 = vsel %vm716_vm3, %v4436_v61, %v2183_v30 }
 0x1b0   : > { %v1409_v52 = vsel %vm765_vm4, %v1361_v10, %v1313_v40  ;;  %v1315_v0 = vpop.permute.xlu2 %1314 }
 0x1b1   : > { %3103 = vmatmul.msk.bf16.gmra.mxu0 %vm1443_vm5, %v1409_v52 }
 0x1b6   : > { %v1537_v20 = vpop.f32.mrf.mxu0  ;;  %v2292_v21 = vpop.permute.xlu1 %2291 }
 0x1b7   : > { %v1711_v47 = vadd.f32 %v1710_v4, %v1537_v20  ;;  %v2388_v16 = vsel %vm765_vm4, %v2340_v31, %v2292_v21  ;;  %v2280_v60 = vpop.permute.xlu0 %2279 }
 0x1b8   : > { %v2376_v36 = vsel %vm765_vm4, %v2328_v3, %v2280_v60  ;;  %3314 = vmatmul.msk.bf16.gmra.mxu3 %vm1443_vm5, %v2388_v16  ;;  %v2282_v5 = vpop.permute.xlu2 %2281 }
 0x1b9   : > { %v2582_v32 = vadd.f32 %v2500_v35, %v1711_v47  ;;  %3308 = vmatmul.msk.bf16.gmra.mxu2 %vm1443_vm5, %v2376_v36 }
 0x1bb   : > { %v2618_v8 = vadd.f32 %v4411_v27, %v2582_v32  ;;  %v2503_v9 = vpop.f32.mrf.mxu2 }
 0x1bc   : > { %v4945_v38 = vpop.f32.mrf.mxu3 }
 0x1bd   : > { %v2650_v24 = vmax.f32 %v2618_v8, 0.0  ;;  %v1713_v61 = vpop.f32.mrf.mxu1 }
 0x1be   : > { %v697_v6 = vpop.permute.xlu1 %696 }
 0x1bf   : > { %v2682_v42 = vpack.c.bf16 %v2650_v24, %v2650_v24  ;;  %v795_v41 = vsel %vm765_vm4, %v746_v50, %v697_v6  ;;  %v1218_v45 = vpop.permute.xlu0 %1217  ;;  %v1540_v49 = vpop.f32.mrf.mxu0 }
 0x1c0   : > { %v1363_v15 = vsel %vm716_vm3, %v4467_v12, %v1218_v45  ;;  %v1714_v13 = vadd.f32 %v1713_v61, %v1540_v49  ;;  %3132 = vmatmul.msk.bf16.gmra.mxu1 %vm1443_vm5, %v795_v41  ;;  %v1220_v28 = vpop.permute.xlu2 %1219 }
 0x1c1   : > { %2715 = vst.msk [vmem:[%s4457_s12 + $0x28] sm:$0xf] %vm2704_vm6, %v2682_v42  ;;  %v1411_v22 = vsel %vm765_vm4, %v1363_v15, %v1315_v0  ;;  %v1365_v47 = vsel %vm716_vm3, %v4574_v26, %v1220_v28  ;;  %v4983_v26 = vld [vmem:[%s5108_s2] ss:$0 sm:$0xff] }
 0x1c2   : > { %v2583_v58 = vadd.f32 %v2503_v9, %v1714_v13  ;;  %3104 = vmatmul.msk.bf16.gmra.mxu0 %vm1443_vm5, %v1411_v22 }
 0x1c3   : > { %v2505_v46 = vpop.f32.mrf.mxu2 }
 0x1c4   : > { %v2619_v7 = vadd.f32 %v4411_v27, %v2583_v58  ;;  %v1767_v11 = vpop.f32.mrf.mxu3 }
 0x1c5   : > { %v1715_v2 = vpop.f32.mrf.mxu1 }
 0x1c6   : > { %v2651_v25 = vmax.f32 %v2619_v7, 0.0  ;;  %v2197_v29 = vpop.permute.xlu1 %2196 }
 0x1c7   : > { %v2185_v12 = vpop.permute.xlu0 %2184  ;;  %v1542_v30 = vpop.f32.mrf.mxu0  ;;  %v2342_v27 = vsel %vm716_vm3, %v4548_v39, %v2197_v29 }
 0x1c8   : > { %v2683_v10 = vpack.c.bf16 %v2651_v25, %v2651_v25  ;;  %v2330_v40 = vsel %vm716_vm3, %v4501_v57, %v2185_v12  ;;  %v2187_v0 = vpop.permute.xlu2 %2186 }
 0x1c9   : > { %v2378_v52 = vsel %vm765_vm4, %v2330_v40, %v2282_v5  ;;  %v2332_v42 = vsel %vm716_vm3, %v4617_v62, %v2187_v0 }
 0x1ca   : > { %2716 = vst.msk [vmem:[%s4457_s12 + $0x2c] sm:$0xf] %vm2704_vm6, %v2683_v10  ;;  %3309 = vmatmul.msk.bf16.gmra.mxu2 %vm1443_vm5, %v2378_v52 }
 0x1cd   : > { %v4967_v20 = vpop.f32.mrf.mxu3 }
 0x1ce   : > { %v601_v35 = vpop.permute.xlu1 %600 }
 0x1cf   : > { %v2294_v4 = vpop.permute.xlu0 %2293  ;;  %v748_v36 = vsel %vm716_vm3, %v4597_v17, %v601_v35 }
 0x1d0   : > { %v2390_v31 = vsel %vm765_vm4, %v2342_v27, %v2294_v4  ;;  %v2296_v3 = vpop.permute.xlu2 %2295 }
 0x1d1   : > { %3315 = vmatmul.msk.bf16.gmra.mxu3 %vm1443_vm5, %v2390_v31 }
 0x1d4   : > { %v2507_v21 = vpop.f32.mrf.mxu2 }
 0x1d5   : > { %v1544_v57 = vpop.f32.mrf.mxu0  ;;  %v4978_v24 = vpop.f32.mrf.mxu3 }
 0x1d6   : > { %v1717_v16 = vpop.f32.mrf.mxu1  ;;  %v1317_v60 = vpop.permute.xlu1 %1316 }
 0x1d7   : > { %v1718_v5 = vadd.f32 %v1717_v16, %v1544_v57  ;;  %v1413_v39 = vsel %vm765_vm4, %v1365_v47, %v1317_v60  ;;  %v699_v32 = vpop.permute.xlu0 %698 }
 0x1d8   : > { %v797_v8 = vsel %vm765_vm4, %v748_v36, %v699_v32  ;;  %3105 = vmatmul.msk.bf16.gmra.mxu0 %vm1443_vm5, %v1413_v39  ;;  %v701_v58 = vpop.permute.xlu2 %700 }
 0x1d9   : > { %v2584_v9 = vadd.f32 %v2507_v21, %v1718_v5  ;;  %3133 = vmatmul.msk.bf16.gmra.mxu1 %vm1443_vm5, %v797_v8 }
 0x1db   : > { %v2620_v17 = vadd.f32 %v4983_v26, %v2584_v9 }
 0x1dc   : > { %v2509_v61 = vpop.f32.mrf.mxu2 }
 0x1dd   : > { %v2652_v50 = vmax.f32 %v2620_v17, 0.0  ;;  %v1546_v6 = vpop.f32.mrf.mxu0 }
 0x1de   : > { %v1719_v41 = vpop.f32.mrf.mxu1  ;;  %v2284_v45 = vpop.permute.xlu1 %2283 }
 0x1df   : > { %v2684_v49 = vpack.c.bf16 %v2652_v50, %v2652_v50  ;;  %v1720_v15 = vadd.f32 %v1719_v41, %v1546_v6  ;;  %v2380_v13 = vsel %vm765_vm4, %v2332_v42, %v2284_v45  ;;  %v2199_v22 = vpop.permute.xlu0 %2198 }
 0x1e0   : > { %v2344_v28 = vsel %vm716_vm3, %v4610_v56, %v2199_v22  ;;  %3310 = vmatmul.msk.bf16.gmra.mxu2 %vm1443_vm5, %v2380_v13  ;;  %v2201_v52 = vpop.permute.xlu2 %2200 }
 0x1e1   : > { %2717 = vst.msk [vmem:[%s4457_s12 + $0x30] sm:$0xf] %vm2704_vm6, %v2684_v49  ;;  %v2585_v46 = vadd.f32 %v2509_v61, %v1720_v15  ;;  %v2392_v7 = vsel %vm765_vm4, %v2344_v28, %v2296_v3  ;;  %v2346_v47 = vsel %vm716_vm3, %v4717_v19, %v2201_v52 }
 0x1e2   : > { %3316 = vmatmul.msk.bf16.gmra.mxu3 %vm1443_vm5, %v2392_v7 }
 0x1e3   : > { %v2621_v62 = vadd.f32 %v4983_v26, %v2585_v46  ;;  %v1774_v11 = vpop.f32.mrf.mxu3 }
 0x1e5   : > { %v2653_v2 = vmax.f32 %v2621_v62, 0.0  ;;  %v2512_v25 = vpop.f32.mrf.mxu2 }
 0x1e6   : > { %v1222_v29 = vpop.permute.xlu1 %1221 }
 0x1e7   : > { %v2685_v12 = vpack.c.bf16 %v2653_v2, %v2653_v2  ;;  %v603_v30 = vpop.permute.xlu0 %602  ;;  %v1722_v56 = vpop.f32.mrf.mxu1  ;;  %v1367_v27 = vsel %vm716_vm3, %v4691_v59, %v1222_v29  ;;  %v1757_v29 = vadd.f32 %v4893_v54, %v4372_v33 }
 0x1e8   : > { %v750_v10 = vsel %vm716_vm3, %v4646_v43, %v603_v30  ;;  %v605_v43 = vpop.permute.xlu2 %604 }
 0x1e9   : > { %2718 = vst.msk [vmem:[%s4457_s12 + $0x34] sm:$0xf] %vm2704_vm6, %v2685_v12  ;;  %v799_v40 = vsel %vm765_vm4, %v750_v10, %v701_v58 }
 0x1ea   : > { %3134 = vmatmul.msk.bf16.gmra.mxu1 %vm1443_vm5, %v799_v40 }
 0x1eb   : > { %v5007_v57 = vpop.f32.mrf.mxu3 }
 0x1ed   : > { %v2513_v21 = vpop.f32.mrf.mxu2 }
 0x1ee   : > { %v1549_v0 = vpop.f32.mrf.mxu0  ;;  %v2189_v35 = vpop.permute.xlu1 %2188 }
 0x1ef   : > { %v1319_v4 = vpop.permute.xlu0 %1318  ;;  %v1723_v3 = vpop.f32.mrf.mxu1  ;;  %v2334_v36 = vsel %vm716_vm3, %v4740_v18, %v2189_v35  ;;  %v752_v18 = vsel %vm716_vm3, %v4760_v14, %v605_v43 }
 0x1f0   : > { %v1415_v31 = vsel %vm765_vm4, %v1367_v27, %v1319_v4  ;;  %v1321_v42 = vpop.permute.xlu2 %1320  ;;  %v1759_v27 = vadd.f32 %v4910_v53, %v4415_v55 }
 0x1f1   : > { %3106 = vmatmul.msk.bf16.gmra.mxu0 %vm1443_vm5, %v1415_v31 }
 0x1f6   : > { %v1550_v16 = vpop.f32.mrf.mxu0  ;;  %v2298_v60 = vpop.permute.xlu1 %2297 }
 0x1f7   : > { %v1724_v5 = vadd.f32 %v1723_v3, %v1550_v16  ;;  %v2394_v59 = vsel %vm765_vm4, %v2346_v47, %v2298_v60  ;;  %v2286_v39 = vpop.permute.xlu0 %2285 }
 0x1f8   : > { %v2382_v32 = vsel %vm765_vm4, %v2334_v36, %v2286_v39  ;;  %3317 = vmatmul.msk.bf16.gmra.mxu3 %vm1443_vm5, %v2394_v59 }
 0x1f9   : > { %v2586_v8 = vadd.f32 %v2513_v21, %v1724_v5  ;;  %3311 = vmatmul.msk.bf16.gmra.mxu2 %vm1443_vm5, %v2382_v32 }
 0x1fb   : > { %v2622_v9 = vadd.f32 %v4983_v26, %v2586_v8  ;;  %v2516_v19 = vpop.f32.mrf.mxu2 }
 0x1fc   : > { %v5018_v17 = vpop.f32.mrf.mxu3 }
 0x1fd   : > { %v2654_v61 = vmax.f32 %v2622_v9, 0.0  ;;  %v1726_v50 = vpop.f32.mrf.mxu1 }
 0x1fe   : > { %v703_v6 = vpop.permute.xlu1 %702 }
 0x1ff   : > { %v2686_v41 = vpack.c.bf16 %v2654_v61, %v2654_v61  ;;  %v801_v45 = vsel %vm765_vm4, %v752_v18, %v703_v6  ;;  %v1224_v49 = vpop.permute.xlu0 %1223  ;;  %v1553_v15 = vpop.f32.mrf.mxu0  ;;  %v1763_v61 = vadd.f32 %v4934_v1, %v4525_v48 }
 0x200   : > { %v1369_v13 = vsel %vm716_vm3, %v4753_v34, %v1224_v49  ;;  %v1727_v22 = vadd.f32 %v1726_v50, %v1553_v15  ;;  %3135 = vmatmul.msk.bf16.gmra.mxu1 %vm1443_vm5, %v801_v45 }
 0x201   : > { %2719 = vst.msk [vmem:[%s4457_s12 + $0x38] sm:$0xf] %vm2704_vm6, %v2686_v41  ;;  %v1417_v28 = vsel %vm765_vm4, %v1369_v13, %v1321_v42 }
 0x202   : > { %v2587_v58 = vadd.f32 %v2516_v19, %v1727_v22  ;;  %3107 = vmatmul.msk.bf16.gmra.mxu0 %vm1443_vm5, %v1417_v28 }
 0x203   : > { %v2518_v14 = vpop.f32.mrf.mxu2 }
 0x204   : > { %v2623_v46 = vadd.f32 %v4983_v26, %v2587_v58  ;;  %v1780_v7 = vpop.f32.mrf.mxu3  ;;  %v1766_v58 = vadd.f32 %v4945_v38, %v4562_v37 }
 0x205   : > { %v1728_v62 = vpop.f32.mrf.mxu1 }
 0x206   : > { %v2655_v11 = vmax.f32 %v2623_v46, 0.0 }
 0x207   : > { %v1555_v2 = vpop.f32.mrf.mxu0 }
 0x208   : > { %v2687_v25 = vpack.c.bf16 %v2655_v11, %v2655_v11 }
 0x20a   : > { %2720 = vst.msk [vmem:[%s4457_s12 + $0x3c] sm:$0xf] %vm2704_vm6, %v2687_v25 }
 0x20d   : > { %v2520_v34 = vpop.f32.mrf.mxu2 }
 0x214   : > { %v2546_v12 = vpop.f32.mrf.mxu3 }
 0x215   : > { %v2596_v30 = vadd.f32 %v2546_v12, %v1757_v29  ;;  %v1557_v56 = vpop.f32.mrf.mxu0  ;;  %v2522_v31 = vpop.f32.mrf.mxu2 }
 0x216   : > { %v1730_v10 = vpop.f32.mrf.mxu1 }
 0x217   : > { %v2632_v40 = vadd.f32 %v4983_v26, %v2596_v30  ;;  %v1731_v52 = vadd.f32 %v1730_v10, %v1557_v56 }
 0x219   : > { %v2664_v0 = vmax.f32 %v2632_v40, 0.0  ;;  %v2588_v35 = vadd.f32 %v2520_v34, %v1731_v52 }
 0x21b   : > { %v2696_v4 = vpack.c.bf16 %v2664_v0, %v2664_v0  ;;  %v2624_v21 = vadd.f32 %v4983_v26, %v2588_v35 }
 0x21c   : > { %v2548_v43 = vpop.f32.mrf.mxu3 }
 0x21d   : > { %2729 = vst.msk [vmem:[%s4457_s12 + $0x60] sm:$0xf] %vm2704_vm6, %v2696_v4  ;;  %v2656_v33 = vmax.f32 %v2624_v21, 0.0  ;;  %v2597_v54 = vadd.f32 %v2548_v43, %v1759_v27  ;;  %v1559_v3 = vpop.f32.mrf.mxu0  ;;  %v1770_v27 = vadd.f32 %v4967_v20, %v4656_v23 }
 0x21e   : > { %v1732_v47 = vpop.f32.mrf.mxu1 }
 0x21f   : > { %v2688_v16 = vpack.c.bf16 %v2656_v33, %v2656_v33  ;;  %v2633_v60 = vadd.f32 %v4983_v26, %v2597_v54  ;;  %v1733_v36 = vadd.f32 %v1732_v47, %v1559_v3 }
 0x221   : > { %2721 = vst.msk [vmem:[%s4457_s12 + $0x40] sm:$0xf] %vm2704_vm6, %v2688_v16  ;;  %v2665_v55 = vmax.f32 %v2633_v60, 0.0  ;;  %v2589_v53 = vadd.f32 %v2522_v31, %v1733_v36  ;;  %v1772_v16 = vadd.f32 %v4978_v24, %v4704_v63 }
 0x223   : > { %v2697_v5 = vpack.c.bf16 %v2665_v55, %v2665_v55  ;;  %v2625_v59 = vadd.f32 %v4983_v26, %v2589_v53  ;;  %v2525_v39 = vpop.f32.mrf.mxu2 }
 0x225   : > { %2730 = vst.msk [vmem:[%s4457_s12 + $0x64] sm:$0xf] %vm2704_vm6, %v2697_v5  ;;  %v2657_v32 = vmax.f32 %v2625_v59, 0.0  ;;  %v2551_v8 = vpop.f32.mrf.mxu3 }
 0x227   : > { %v2689_v9 = vpack.c.bf16 %v2657_v32, %v2657_v32  ;;  %v1735_v19 = vpop.f32.mrf.mxu1 }
 0x229   : > { %2722 = vst.msk [vmem:[%s4457_s12 + $0x44] sm:$0xf] %vm2704_vm6, %v2689_v9 }
 0x22b   : > { %v2526_v45 = vpop.f32.mrf.mxu2 }
 0x22d   : > { %v2552_v50 = vpop.f32.mrf.mxu3 }
 0x22e   : > { %v2598_v18 = vadd.f32 %v2552_v50, %v1763_v61  ;;  %v1562_v6 = vpop.f32.mrf.mxu0 }
 0x22f   : > { %v1736_v15 = vpop.f32.mrf.mxu1 }
 0x230   : > { %v2634_v42 = vadd.f32 %v4983_v26, %v2598_v18 }
 0x232   : > { %v2666_v41 = vmax.f32 %v2634_v42, 0.0 }
 0x234   : > { %v2698_v49 = vpack.c.bf16 %v2666_v41, %v2666_v41  ;;  %v1776_v41 = vadd.f32 %v5007_v57, %v4808_v44 }
 0x236   : > { %2731 = vst.msk [vmem:[%s4457_s12 + $0x68] sm:$0xf] %vm2704_vm6, %v2698_v49  ;;  %v1563_v13 = vpop.f32.mrf.mxu0 }
 0x237   : > { %v1737_v22 = vadd.f32 %v1736_v15, %v1563_v13 }
 0x239   : > { %v2590_v28 = vadd.f32 %v2526_v45, %v1737_v22 }
 0x23b   : > { %v2626_v48 = vadd.f32 %v4983_v26, %v2590_v28  ;;  %v2555_v1 = vpop.f32.mrf.mxu3 }
 0x23c   : > { %v2529_v14 = vpop.f32.mrf.mxu2  ;;  %v2599_v46 = vadd.f32 %v2555_v1, %v1766_v58 }
 0x23d   : > { %v2658_v7 = vmax.f32 %v2626_v48, 0.0  ;;  %v1739_v62 = vpop.f32.mrf.mxu1 }
 0x23e   : > { %v2635_v11 = vadd.f32 %v4983_v26, %v2599_v46 }
 0x23f   : > { %v2690_v2 = vpack.c.bf16 %v2658_v7, %v2658_v7  ;;  %v1566_v25 = vpop.f32.mrf.mxu0  ;;  %v1779_v7 = vadd.f32 %v5018_v17, %v4838_v51 }
 0x240   : > { %v2667_v34 = vmax.f32 %v2635_v11, 0.0  ;;  %v1740_v29 = vadd.f32 %v1739_v62, %v1566_v25 }
 0x241   : > { %2723 = vst.msk [vmem:[%s4457_s12 + $0x48] sm:$0xf] %vm2704_vm6, %v2690_v2 }
 0x242   : > { %v2699_v12 = vpack.c.bf16 %v2667_v34, %v2667_v34  ;;  %v2591_v30 = vadd.f32 %v2529_v14, %v1740_v29 }
 0x243   : > { %v2557_v37 = vpop.f32.mrf.mxu3 }
 0x244   : > { %2732 = vst.msk [vmem:[%s4457_s12 + $0x6c] sm:$0xf] %vm2704_vm6, %v2699_v12  ;;  %v2627_v38 = vadd.f32 %v4983_v26, %v2591_v30  ;;  %v2531_v56 = vpop.f32.mrf.mxu2 }
 0x245   : > { %v1741_v10 = vpop.f32.mrf.mxu1 }
 0x246   : > { %v2659_v40 = vmax.f32 %v2627_v38, 0.0 }
 0x247   : > { %v1568_v52 = vpop.f32.mrf.mxu0 }
 0x248   : > { %v2691_v0 = vpack.c.bf16 %v2659_v40, %v2659_v40 }
 0x24a   : > { %2724 = vst.msk [vmem:[%s4457_s12 + $0x4c] sm:$0xf] %vm2704_vm6, %v2691_v0 }
 0x24d   : > { %v2533_v35 = vpop.f32.mrf.mxu2 }
 0x254   : > { %v2559_v4 = vpop.f32.mrf.mxu3 }
 0x255   : > { %v2600_v31 = vadd.f32 %v2559_v4, %v1770_v27  ;;  %v1570_v21 = vpop.f32.mrf.mxu0  ;;  %v2535_v36 = vpop.f32.mrf.mxu2 }
 0x256   : > { %v1743_v43 = vpop.f32.mrf.mxu1 }
 0x257   : > { %v2636_v33 = vadd.f32 %v4983_v26, %v2600_v31  ;;  %v1744_v54 = vadd.f32 %v1743_v43, %v1570_v21 }
 0x259   : > { %v2668_v3 = vmax.f32 %v2636_v33, 0.0  ;;  %v2592_v47 = vadd.f32 %v2533_v35, %v1744_v54 }
 0x25b   : > { %v2700_v60 = vpack.c.bf16 %v2668_v3, %v2668_v3  ;;  %v2628_v55 = vadd.f32 %v4983_v26, %v2592_v47 }
 0x25c   : > { %v2561_v53 = vpop.f32.mrf.mxu3 }
 0x25d   : > { %2733 = vst.msk [vmem:[%s4457_s12 + $0x70] sm:$0xf] %vm2704_vm6, %v2700_v60  ;;  %v2660_v23 = vmax.f32 %v2628_v55, 0.0  ;;  %v2601_v20 = vadd.f32 %v2561_v53, %v1772_v16  ;;  %v1572_v5 = vpop.f32.mrf.mxu0 }
 0x25e   : > { %v1745_v59 = vpop.f32.mrf.mxu1 }
 0x25f   : > { %v2692_v39 = vpack.c.bf16 %v2660_v23, %v2660_v23  ;;  %v2637_v32 = vadd.f32 %v4983_v26, %v2601_v20  ;;  %v1746_v8 = vadd.f32 %v1745_v59, %v1572_v5 }
 0x261   : > { %2725 = vst.msk [vmem:[%s4457_s12 + $0x50] sm:$0xf] %vm2704_vm6, %v2692_v39  ;;  %v2669_v63 = vmax.f32 %v2637_v32, 0.0  ;;  %v2593_v24 = vadd.f32 %v2535_v36, %v1746_v8 }
 0x263   : > { %v2701_v9 = vpack.c.bf16 %v2669_v63, %v2669_v63  ;;  %v2629_v19 = vadd.f32 %v4983_v26, %v2593_v24  ;;  %v2538_v61 = vpop.f32.mrf.mxu2 }
 0x265   : > { %2734 = vst.msk [vmem:[%s4457_s12 + $0x74] sm:$0xf] %vm2704_vm6, %v2701_v9  ;;  %v2661_v50 = vmax.f32 %v2629_v19, 0.0  ;;  %v2564_v18 = vpop.f32.mrf.mxu3 }
 0x267   : > { %v2693_v6 = vpack.c.bf16 %v2661_v50, %v2661_v50  ;;  %v1748_v42 = vpop.f32.mrf.mxu1 }
 0x269   : > { %2726 = vst.msk [vmem:[%s4457_s12 + $0x54] sm:$0xf] %vm2704_vm6, %v2693_v6 }
 0x26b   : > { %v2539_v28 = vpop.f32.mrf.mxu2 }
 0x26d   : > { %v2565_v45 = vpop.f32.mrf.mxu3 }
 0x26e   : > { %v2602_v49 = vadd.f32 %v2565_v45, %v1776_v41  ;;  %v1575_v15 = vpop.f32.mrf.mxu0 }
 0x26f   : > { %v1749_v48 = vpop.f32.mrf.mxu1 }
 0x270   : > { %v2638_v13 = vadd.f32 %v4983_v26, %v2602_v49 }
 0x272   : > { %v2670_v22 = vmax.f32 %v2638_v13, 0.0 }
 0x274   : > { %v2702_v58 = vpack.c.bf16 %v2670_v22, %v2670_v22 }
 0x276   : > { %2735 = vst.msk [vmem:[%s4457_s12 + $0x78] sm:$0xf] %vm2704_vm6, %v2702_v58  ;;  %v1576_v1 = vpop.f32.mrf.mxu0 }
 0x277   : > { %v1750_v14 = vadd.f32 %v1749_v48, %v1576_v1 }
 0x279   : > { %v2594_v46 = vadd.f32 %v2539_v28, %v1750_v14 }
 0x27b   : > { %v2630_v44 = vadd.f32 %v4983_v26, %v2594_v46  ;;  %v2568_v57 = vpop.f32.mrf.mxu3 }
 0x27c   : > { %v2542_v62 = vpop.f32.mrf.mxu2  ;;  %v2603_v11 = vadd.f32 %v2568_v57, %v1779_v7 }
 0x27d   : > { %v2662_v2 = vmax.f32 %v2630_v44, 0.0  ;;  %v1752_v25 = vpop.f32.mrf.mxu1 }
 0x27e   : > { %v2639_v34 = vadd.f32 %v4983_v26, %v2603_v11 }
 0x27f   : > { %v2694_v29 = vpack.c.bf16 %v2662_v2, %v2662_v2  ;;  %v1579_v12 = vpop.f32.mrf.mxu0 }
 0x280   : > { %v2671_v30 = vmax.f32 %v2639_v34, 0.0  ;;  %v1753_v37 = vadd.f32 %v1752_v25, %v1579_v12 }
 0x281   : > { %2727 = vst.msk [vmem:[%s4457_s12 + $0x58] sm:$0xf] %vm2704_vm6, %v2694_v29 }
 0x282   : > { %v2703_v38 = vpack.c.bf16 %v2671_v30, %v2671_v30  ;;  %v2595_v56 = vadd.f32 %v2542_v62, %v1753_v37 }
 0x283   : > { %v2570_v51 = vpop.f32.mrf.mxu3 }
 0x284   : > { %2736 = vst.msk [vmem:[%s4457_s12 + $0x7c] sm:$0xf] %vm2704_vm6, %v2703_v38  ;;  %v2631_v17 = vadd.f32 %v4983_v26, %v2595_v56  ;;  %v2544_v10 = vpop.f32.mrf.mxu2 }
 0x285   : > { %v1754_v40 = vpop.f32.mrf.mxu1 }
 0x286   : > { %v2663_v52 = vmax.f32 %v2631_v17, 0.0 }
 0x287   : > { %v1581_v0 = vpop.f32.mrf.mxu0 }
 0x288   : > { %v2695_v35 = vpack.c.bf16 %v2663_v52, %v2663_v52 }
 0x28a   : > { %2728 = vst.msk [vmem:[%s4457_s12 + $0x5c] sm:$0xf] %vm2704_vm6, %v2695_v35 }
 0x28b PF: > { %s13_s14 = sadd.s32 1, %s3456_s14   ;;  %s5128_s12 = smov %s3452_s13 }
 0x28c   : > { %p10_p5 = scmp.ge.s32.totalorder %s13_s14, 4   ;;  %s5129_s13 = smov %s5131_s15 }
 0x28e   :  { %12 = sbr.rel (!%p10_p5) target bundleno = 2 (0x2), region = 67 }

// kernel: unet_decoder_attention.11
= control target key start
LH: loop header
LB: loop body
LE: loop exit
PB: predicated region body
PF: predicated region fallthrough
CT: control target
= control target key end

     0   :  { %s3425_s12 = smov 0   ;;  %s3427_s13 = smov 0   ;;  %s5032_s0 = inlined_call_operand.vmem [shape: bf16[2,19,24,4], index: 0, kind: input, shape index: {}]   ;;  %s5033_s1 = inlined_call_operand.vmem [shape: bf16[3,12,4], index: 1, kind: input, shape index: {}]   ;;  %s5034_s2 = inlined_call_operand.vmem [shape: f32[1,4], index: 2, kind: input, shape index: {}]   ;;  %s5035_s3 = inlined_call_operand.vmem [shape: f32[2,16,16,4], index: 3, kind: output, shape index: {}]  }
   0x1   :  { %s3429_s14 = smov 0  }
   0x2 LB: > { %s25_s15 = sadd.s32 1, %s3397_s13  ;;  %p2790_p0 = scmp.ge.s32.totalorder %s3401_s14, 1  ;;  %s3401_s14 = sphi %s3429_s14, %s13_s14   ;;  %s3397_s13 = sphi %s3427_s13, %s5059_s13   ;;  %s3393_s12 = sphi %s3425_s12, %s5058_s12  }
   0x3   : > { %p27_p1 = scmp.ge.s32.totalorder %s25_s15, 2  ;;  %p151_p2 = scmp.lt.s32.totalorder %s3401_s14, 3 }
   0x5   : > { %s5061_s15 = smov (%p27_p1, %s25_s15), 0  ;;  %p152_p3 = pnand %p2790_p0, %p151_p2 }
   0x6   : > { %p180_p4 = scmp.lt.s32.totalorder (!%p152_p3), %s3393_s12, 1  ;;  %s3403_s20 = smov (!%p152_p3), 8  }
   0x7   : > { %155 = sbr.rel (%p152_p3) target bundleno = 649 (0x289), region = 32  ;;  %s3404_s21 = smov (!%p152_p3), 4  }
   0xc   : > { %s5063_s12 = smov (!%p180_p4, %s3393_s12), 1  ;;  %vm618_vm0 = vcmask 1046528   ;;  %vm373_vm1 = vsmask.f32 7424  ;;  %vm1486_vm2 = vcmask 1045504   ;;  %vm716_vm3 = vcmask 31744  }
   0xd   : > { %s3349_s16 = smul.u32 228, %s5063_s12  ;;  %vm765_vm4 = vcmask 64512   ;;  %vm1437_vm5 = vcmask 97280   ;;  %s3270_s9 = sshll.u32 %s5063_s12, 8 }
   0xe   : > { %s4367_s12 = scalar_lea.vmem %s5035_s3, %s3270_s9 }
   0xf   : > { %s3449_s19 = scalar_lea.vmem %s5032_s0, %s3349_s16 }
  0x10   : > { %v3452_v0 = vld [vmem:[%s3449_s19 + $0x9c] sm:$0xff]  ;;  %v3455_v1 = vld [vmem:[%s3449_s19 + $0xa4] sm:$0xff]  ;;  %v3496_v24 = vld [vmem:[%s3449_s19 + $0xc] sm:$0xff] }
  0x11   : > { %v3458_v2 = vld [vmem:[%s3449_s19] sm:$0xff]  ;;  %v3461_v3 = vld [vmem:[%s3449_s19 + $0x8] sm:$0xff]  ;;  %v5036_v4 = vrot.slane %v3452_v0, 1  ;;  %v1273_v5 = vrot.slane %v3455_v1, 1  ;;  %v3467_v7 = vld [vmem:[%s3449_s19 + $0x18] sm:$0xff]  ;;  %v1136_v9 = vshll.u32 %v3452_v0, 16 }
  0x12   : > { %v619_v6 = vrot.slane %v3458_v2, 1  ;;  %v3470_v8 = vld [vmem:[%s3449_s19 + $0x20] sm:$0xff]  ;;  %v620_v10 = vrot.slane %v3461_v3, 1  ;;  %v1140_v11 = vshrl.u32 %v3452_v0, 16  ;;  %v1144_v14 = vshll.u32 %v3455_v1, 16  ;;  %v3502_v28 = vld [vmem:[%s3449_s19 + $0x14] sm:$0xff] }
  0x13   : > { %v1274_v12 = vsel %vm618_vm0, %v5036_v4, %v1273_v5  ;;  %v3480_v13 = vrot.slane %v1136_v9, 1  ;;  %v2192_v16 = vrot.slane %v3467_v7, 1  ;;  %v2193_v17 = vrot.slane %v3470_v8, 1  ;;  %v3517_v42 = vld [vmem:[%s3449_s19 + $0x28] sm:$0xff]  ;;  %v3533_v55 = vld [vmem:[%s3449_s19 + $0x1c] sm:$0xff]  ;;  %v3537_v58 = vld [vmem:[%s3449_s19 + $0x10] sm:$0xff] }
  0x14   : > { %1321 = vrot.lane.b32.xlu1 %v1274_v12, %s3403_s20  ;;  %v621_v15 = vsel %vm618_vm0, %v619_v6, %v620_v10  ;;  %v1146_v19 = vrot.slane %v1144_v14, 1  ;;  %v1951_v20 = vshll.u32 %v3467_v7, 16  ;;  %v375_v21 = vshrl.u32 %v3458_v2, 16  ;;  %v3521_v45 = vld [vmem:[%s3449_s19 + $0xac] sm:$0xff] }
  0x15   : > { %668 = vrot.lane.b32.xlu0 %v621_v15, %s3403_s20  ;;  %v1142_v18 = vor.u32 %v1140_v11, %v3480_v13  ;;  %v377_v22 = vshll.u32 %v3458_v2, 16  ;;  %v382_v23 = vshll.u32 %v3461_v3, 16  ;;  %v2194_v27 = vsel %vm618_vm0, %v2192_v16, %v2193_v17  ;;  %v3551_v16 = vld [vmem:[%s3449_s19 + $0xb4] sm:$0xff] }
  0x16   : > { %v1949_v29 = vshrl.u32 %v3467_v7, 16  ;;  %v1953_v31 = vrot.slane %v1951_v20, 1  ;;  %v1956_v32 = vshll.u32 %v3470_v8, 16  ;;  %v1236_v34 = vrot.slane %v3496_v24, 1 }
  0x17   : > { %v379_v25 = vrot.slane %v377_v22, 1  ;;  %v384_v26 = vrot.slane %v382_v23, 1  ;;  %v1147_v30 = vsel %vm373_vm1, %v1142_v18, %v1146_v19  ;;  %v1237_v36 = vrot.slane %v3502_v28, 1 }
  0x18   : > { %v1000_v37 = vshll.u32 %v3502_v28, 16  ;;  %v993_v38 = vshrl.u32 %v3496_v24, 16  ;;  %v995_v39 = vshll.u32 %v3496_v24, 16  ;;  %v1954_v40 = vor.u32 %v1953_v31, %v1949_v29 }
  0x19   : > { %v380_v33 = vor.u32 %v379_v25, %v375_v21  ;;  %v1958_v41 = vrot.slane %v1956_v32, 1  ;;  %v1238_v44 = vsel %vm618_vm0, %v1236_v34, %v1237_v36  ;;  %v1960_v49 = vshrl.u32 %v3470_v8, 16  ;;  %v3569_v32 = vld [vmem:[%s3449_s19 + $0x30] sm:$0xff] }
  0x1a   : > { %v997_v43 = vrot.slane %v995_v39, 1  ;;  %v1002_v46 = vrot.slane %v1000_v37, 1  ;;  %v1964_v50 = vshll.u32 %v3517_v42, 16  ;;  %v1148_v51 = vshrl.u32 %v3455_v1, 16 }
  0x1b   : > { %v385_v35 = vsel %vm373_vm1, %v380_v33, %v384_v26  ;;  %v1959_v48 = vsel %vm373_vm1, %v1954_v40, %v1958_v41  ;;  %v1152_v53 = vshll.u32 %v3521_v45, 16  ;;  %v1275_v54 = vrot.slane %v3521_v45, 1 }
  0x1c   : > { %2241 = vrot.lane.b32.xlu1 %v2194_v27, %s3403_s20  ;;  %570 = vrot.lane.b32.xlu2 %v385_v35, %s3404_s21  ;;  %v998_v47 = vor.u32 %v997_v43, %v993_v38  ;;  %v1962_v56 = vor.u32 %v1960_v49, %v1958_v41  ;;  %v1966_v57 = vrot.slane %v1964_v50, 1  ;;  %v1150_v59 = vor.u32 %v1148_v51, %v1146_v19  ;;  %v3588_v43 = vld [vmem:[%s3449_s19 + $0x18] sm:$0xff] }
  0x1d   : > { %1224 = vrot.lane.b32.xlu0 %v1147_v30, %s3404_s21  ;;  %v1154_v60 = vrot.slane %v1152_v53, 1  ;;  %v1276_v61 = vsel %vm618_vm0, %v1273_v5, %v1275_v54  ;;  %v1004_v62 = vshrl.u32 %v3502_v28, 16  ;;  %v1008_v63 = vshll.u32 %v3533_v55, 16  ;;  %v3599_v51 = vld [vmem:[%s3449_s19 + $0x38] sm:$0xff] }
  0x1e   : > { %v1003_v52 = vsel %vm373_vm1, %v998_v47, %v1002_v46  ;;  %v1967_v6 = vsel %vm373_vm1, %v1962_v56, %v1966_v57  ;;  %v386_v9 = vshrl.u32 %v3461_v3, 16  ;;  %v390_v11 = vshll.u32 %v3537_v58, 16 }
  0x1f   : > { %v1155_v12 = vsel %vm373_vm1, %v1150_v59, %v1154_v60  ;;  %v1006_v14 = vor.u32 %v1004_v62, %v1002_v46  ;;  %v1010_v15 = vrot.slane %v1008_v63, 1  ;;  %v2195_v19 = vrot.slane %v3517_v42, 1 }
  0x20   : > { %v388_v5 = vor.u32 %v386_v9, %v384_v26  ;;  %v392_v18 = vrot.slane %v390_v11, 1  ;;  %v1156_v21 = vshrl.u32 %v3521_v45, 16  ;;  %v1160_v22 = vshll.u32 %v3551_v16, 16 }
  0x21   : > { %v1011_v20 = vsel %vm373_vm1, %v1006_v14, %v1010_v15  ;;  %v2196_v25 = vsel %vm618_vm0, %v2193_v17, %v2195_v19  ;;  %v1239_v29 = vrot.slane %v3533_v55, 1  ;;  %v622_v30 = vrot.slane %v3537_v58, 1  ;;  %v3615_v14 = vld [vmem:[%s3449_s19 + $0x20] sm:$0xff] }
  0x22   : > { %v393_v23 = vsel %vm373_vm1, %v388_v5, %v392_v18  ;;  %v1158_v26 = vor.u32 %v1156_v21, %v1154_v60  ;;  %v1162_v27 = vrot.slane %v1160_v22, 1  ;;  %v1968_v34 = vshrl.u32 %v3517_v42, 16 }
  0x23   : > { %v1240_v17 = vsel %vm618_vm0, %v1237_v36, %v1239_v29  ;;  %v623_v33 = vsel %vm618_vm0, %v620_v10, %v622_v30  ;;  %v1972_v35 = vshll.u32 %v3569_v32, 16  ;;  %v2197_v37 = vrot.slane %v3569_v32, 1  ;;  %v3583_v36 = vld [vmem:[%s3449_s19 + $0x24] sm:$0xff] }
  0x24   : > { %1285 = vrot.lane.b32.xlu1 %v1238_v44, %s3403_s20  ;;  %1188 = vrot.lane.b32.xlu2 %v1003_v52, %s3404_s21  ;;  %v1163_v31 = vsel %vm373_vm1, %v1158_v26, %v1162_v27  ;;  %v1277_v38 = vrot.slane %v3551_v16, 1  ;;  %v1970_v39 = vor.u32 %v1968_v34, %v1966_v57  ;;  %v1012_v44 = vshrl.u32 %v3533_v55, 16 }
  0x25   : > { %2144 = vrot.lane.b32.xlu0 %v1959_v48, %s3404_s21  ;;  %v1974_v40 = vrot.slane %v1972_v35, 1  ;;  %v2198_v10 = vsel %vm618_vm0, %v2195_v19, %v2197_v37  ;;  %v1016_v46 = vshll.u32 %v3583_v36, 16  ;;  %v394_v48 = vshrl.u32 %v3537_v58, 16 }
  0x26   : > { %v1278_v41 = vsel %vm618_vm0, %v1275_v54, %v1277_v38  ;;  %v398_v49 = vshll.u32 %v3588_v43, 16  ;;  %v624_v50 = vrot.slane %v3588_v43, 1  ;;  %v1014_v52 = vor.u32 %v1012_v44, %v1010_v15  ;;  %v3603_v54 = vld [vmem:[%s3449_s19 + $0xbc] sm:$0xff]  ;;  %v3651_v44 = vld [vmem:[%s3449_s19 + $0xc4] sm:$0xff] }
  0x27   : > { %v1975_v47 = vsel %vm373_vm1, %v1970_v39, %v1974_v40  ;;  %v1018_v53 = vrot.slane %v1016_v46, 1  ;;  %v396_v56 = vor.u32 %v394_v48, %v392_v18  ;;  %v1976_v60 = vshrl.u32 %v3569_v32, 16 }
  0x28   : > { %v400_v57 = vrot.slane %v398_v49, 1  ;;  %v625_v59 = vsel %vm618_vm0, %v622_v30, %v624_v50  ;;  %v1164_v63 = vshrl.u32 %v3551_v16, 16  ;;  %v1241_v18 = vrot.slane %v3583_v36, 1 }
  0x29   : > { %v1019_v62 = vsel %vm373_vm1, %v1014_v52, %v1018_v53  ;;  %v1978_v11 = vor.u32 %v1976_v60, %v1974_v40  ;;  %v406_v21 = vshll.u32 %v3615_v14, 16  ;;  %v1279_v30 = vrot.slane %v3603_v54, 1  ;;  %v3671_v60 = vld [vmem:[%s3449_s19 + $0x34] sm:$0xff] }
  0x2a   : > { %v401_v9 = vsel %vm373_vm1, %v396_v56, %v400_v57  ;;  %v1166_v15 = vor.u32 %v1164_v63, %v1162_v27  ;;  %v2199_v27 = vrot.slane %v3599_v51, 1  ;;  %v1020_v34 = vshrl.u32 %v3583_v36, 16  ;;  %v3295_v56 = vld [vmem:[%s5033_s1] sm:$0x30] }
  0x2b   : > { %v408_v26 = vrot.slane %v406_v21, 1  ;;  %v626_v40 = vrot.slane %v3615_v14, 1  ;;  %v1984_v46 = vshrl.u32 %v3599_v51, 16  ;;  %v1172_v52 = vshrl.u32 %v3603_v54, 16 }
  0x2c   : > { %1323 = vrot.lane.b32.xlu1 %v1276_v61, %s3403_s20  ;;  %1226 = vrot.lane.b32.xlu2 %v1155_v12, %s3404_s21  ;;  %v1980_v61 = vshll.u32 %v3599_v51, 16 }
  0x2d   : > { %2146 = vrot.lane.b32.xlu0 %v1967_v6, %s3404_s21  ;;  %v1168_v6 = vshll.u32 %v3603_v54, 16 }
  0x2e   : > { %v1982_v12 = vrot.slane %v1980_v61, 1 }
  0x2f   : > { %v1170_v5 = vrot.slane %v1168_v6, 1  ;;  %v3676_v6 = vld [vmem:[%s3449_s19 + $0x28] sm:$0xff] }
  0x30   : > { %v1983_v19 = vsel %vm373_vm1, %v1978_v11, %v1982_v12 }
  0x31   : > { %v1171_v22 = vsel %vm373_vm1, %v1166_v15, %v1170_v5  ;;  %v1174_v11 = vor.u32 %v1172_v52, %v1170_v5  ;;  %v3039_v5 = vld [vmem:[%s5033_s1 + $0x8] sm:$0xf]  ;;  %v3242_v52 = vld [vmem:[%s5033_s1 + $0x10] sm:$0xf] }
  0x34   : > { %1190 = vrot.lane.b32.xlu1 %v1011_v20, %s3404_s21  ;;  %2243 = vrot.lane.b32.xlu2 %v2196_v25, %s3403_s20  ;;  %v402_v20 = vshrl.u32 %v3588_v43, 16 }
  0x35   : > { %572 = vrot.lane.b32.xlu0 %v393_v23, %s3404_s21  ;;  %v1242_v23 = vsel %vm618_vm0, %v1239_v29, %v1241_v18  ;;  %v2200_v29 = vsel %vm618_vm0, %v2197_v37, %v2199_v27 }
  0x36   : > { %v404_v25 = vor.u32 %v402_v20, %v400_v57  ;;  %v1032_v20 = vshll.u32 %v3671_v60, 16 }
  0x3c   : > { %1228 = vrot.lane.b32.xlu1 %v1163_v31, %s3404_s21  ;;  %670 = vrot.lane.b32.xlu2 %v623_v33, %s3403_s20  ;;  %v409_v31 = vsel %vm373_vm1, %v404_v25, %v408_v26  ;;  %v1280_v33 = vsel %vm618_vm0, %v1277_v38, %v1279_v30 }
  0x3d   : > { %1287 = vrot.lane.b32.xlu0 %v1240_v17, %s3403_s20  ;;  %v3631_v17 = vld [vmem:[%s3449_s19 + $0x2c] sm:$0xff] }
  0x3e   : > { %v1024_v35 = vshll.u32 %v3631_v17, 16  ;;  %v1243_v39 = vrot.slane %v3631_v17, 1 }
  0x40   : > { %v1026_v37 = vrot.slane %v1024_v35, 1  ;;  %v1244_v38 = vsel %vm618_vm0, %v1241_v18, %v1243_v39 }
  0x44   : > { %2245 = vrot.lane.b32.xlu1 %v2198_v10, %s3403_s20  ;;  %2148 = vrot.lane.b32.xlu2 %v1975_v47, %s3404_s21  ;;  %v3645_v10 = vld [vmem:[%s3449_s19 + $0x40] sm:$0xff]  ;;  %v627_v47 = vsel %vm618_vm0, %v624_v50, %v626_v40  ;;  %v1176_v50 = vshll.u32 %v3651_v44, 16 }
  0x45   : > { %1325 = vrot.lane.b32.xlu0 %v1278_v41, %s3403_s20  ;;  %v1022_v41 = vor.u32 %v1020_v34, %v1018_v53  ;;  %v1988_v48 = vshll.u32 %v3645_v10, 16  ;;  %v3067_v53 = vld [vmem:[%s5033_s1] sm:$0xf] }
  0x46   : > { %v3068_v57 = vor.u32 %v3295_v56, %v3067_v53  ;;  %v1178_v15 = vrot.slane %v1176_v50, 1  ;;  %v3345_v53 = vld [vmem:[%s5033_s1 + $0x10] sm:$0x30] }
  0x47   : > { %v1027_v49 = vsel %vm373_vm1, %v1022_v41, %v1026_v37  ;;  %v1990_v63 = vrot.slane %v1988_v48, 1  ;;  %v1180_v48 = vshrl.u32 %v3651_v44, 16  ;;  %v3243_v56 = vor.u32 %v3345_v53, %v3242_v52  ;;  %v3772_v52 = vld [vmem:[%s3449_s19 + $0x98] sm:$0xff] }
  0x48   : > { %v1657_v61 = vsel %vm1486_vm2, %v3068_v57, 0  ;;  %v1179_v25 = vsel %vm373_vm1, %v1174_v11, %v1178_v15 }
  0x49   : > { %1666 = vmatpush.bf16.msra.mxu1 %v1657_v61  ;;  %v1182_v57 = vor.u32 %v1180_v48, %v1178_v15 }
  0x4c   : > { %672 = vrot.lane.b32.xlu1 %v625_v59, %s3403_s20  ;;  %574 = vrot.lane.b32.xlu2 %v401_v9, %s3404_s21  ;;  %v1281_v59 = vrot.slane %v3651_v44, 1  ;;  %v2938_v9 = vld [vmem:[%s3449_s19 + $0xcc] sm:$0xf] }
  0x4d   : > { %1192 = vrot.lane.b32.xlu0 %v1019_v62, %s3404_s21  ;;  %v1986_v62 = vor.u32 %v1984_v46, %v1982_v12  ;;  %v990_v21 = vunpack.c.l.b16 %v2938_v9  ;;  %v410_v12 = vshrl.u32 %v3615_v14, 16 }
  0x4e   : > { %v1282_v18 = vsel %vm618_vm0, %v1279_v30, %v1281_v59  ;;  %v3320_v30 = vld [vmem:[%s5033_s1 + $0x8] sm:$0x30] }
  0x4f   : > { %v991_v34 = vpack.c.b16 %v990_v21, %v990_v21  ;;  %v412_v35 = vor.u32 %v410_v12, %v408_v26  ;;  %v3738_v12 = vld [vmem:[%s3449_s19 + $0x3c] sm:$0xff] }
  0x54   : > { %2150 = vrot.lane.b32.xlu1 %v1983_v19, %s3404_s21  ;;  %1289 = vrot.lane.b32.xlu2 %v1242_v23, %s3403_s20  ;;  %v1028_v19 = vshrl.u32 %v3631_v17, 16  ;;  %v414_v23 = vshll.u32 %v3676_v6, 16 }
  0x55   : > { %1230 = vrot.lane.b32.xlu0 %v1171_v22, %s3404_s21  ;;  %v1991_v22 = vsel %vm373_vm1, %v1986_v62, %v1990_v63  ;;  %v3717_v62 = vsel %vm1486_vm2, %v3243_v56, 0 }
  0x56   : > { %v416_v41 = vrot.slane %v414_v23, 1  ;;  %2451 = vmatpush.bf16.msra.mxu2 %v3717_v62 }
  0x5c   : > { %576 = vrot.lane.b32.xlu1 %v409_v31, %s3404_s21  ;;  %1327 = vrot.lane.b32.xlu2 %v1280_v33, %s3403_s20  ;;  %v3040_v31 = vor.u32 %v3320_v30, %v3039_v5  ;;  %v1034_v33 = vrot.slane %v1032_v20, 1  ;;  %v1992_v20 = vshrl.u32 %v3645_v10, 16  ;;  %v3747_v30 = vld [vmem:[%s3449_s19 + $0x30] sm:$0xff] }
  0x5d   : > { %2247 = vrot.lane.b32.xlu0 %v2200_v29, %s3403_s20  ;;  %v1030_v29 = vor.u32 %v1028_v19, %v1026_v37  ;;  %v417_v37 = vsel %vm373_vm1, %v412_v35, %v416_v41 }
  0x5e   : > { %v1488_v46 = vsel %vm1486_vm2, %v3040_v31, 0  ;;  %v1994_v23 = vor.u32 %v1992_v20, %v1990_v63  ;;  %v1036_v31 = vshrl.u32 %v3671_v60, 16  ;;  %v3755_v63 = vld [vmem:[%s3449_s19 + $0x90] sm:$0xff] }
  0x5f   : > { %3346 = vmatpush.bf16.msra.mxu3 %v1488_v46  ;;  %1497 = vmatpush.bf16.msra.mxu0 %v1488_v46  ;;  %v418_v46 = vshrl.u32 %v3676_v6, 16  ;;  %v518_v53 = vshll.u32 %v3755_v63, 16  ;;  %v522_v20 = vshrl.u32 %v3755_v63, 16 }
  0x60   : > { %v1038_v48 = vor.u32 %v1036_v31, %v1034_v33 }
  0x61   : > { %v420_v56 = vor.u32 %v418_v46, %v416_v41  ;;  %v3784_v41 = vrot.slane %v518_v53, 1  ;;  %v426_v53 = vshrl.u32 %v3747_v30, 16 }
  0x63   : > { %3347 = vmatpush.bf16.msrb.mxu3 %v1657_v61  ;;  %v628_v61 = vrot.slane %v3676_v6, 1 }
  0x64   : > { %1291 = vrot.lane.b32.xlu1 %v1244_v38, %s3403_s20  ;;  %1194 = vrot.lane.b32.xlu2 %v1027_v49, %s3404_s21  ;;  %v2201_v38 = vrot.slane %v3645_v10, 1  ;;  %v1184_v49 = vshll.u32 %v991_v34, 16 }
  0x65   : > { %674 = vrot.lane.b32.xlu0 %v627_v47, %s3403_s20  ;;  %v1035_v47 = vsel %vm373_vm1, %v1030_v29, %v1034_v33  ;;  %v629_v19 = vsel %vm618_vm0, %v626_v40, %v628_v61  ;;  %v1040_v29 = vshll.u32 %v3738_v12, 16 }
  0x66   : > { %v2202_v26 = vsel %vm618_vm0, %v2199_v27, %v2201_v38  ;;  %v1186_v50 = vrot.slane %v1184_v49, 1  ;;  %v1245_v27 = vrot.slane %v3671_v60, 1 }
  0x67   : > { %v3765_v49 = vrot.slane %v1040_v29, 1  ;;  %v524_v29 = vor.u32 %v522_v20, %v3784_v41 }
  0x68   : > { %v1187_v11 = vsel %vm373_vm1, %v1182_v57, %v1186_v50  ;;  %v1246_v15 = vsel %vm618_vm0, %v1243_v39, %v1245_v27  ;;  %v1283_v39 = vrot.slane %v991_v34, 1 }
  0x6a   : > { %v1284_v35 = vsel %vm618_vm0, %v1281_v59, %v1283_v39  ;;  %v630_v59 = vrot.slane %v3747_v30, 1 }
  0x6c   : > { %1329 = vrot.lane.b32.xlu1 %v1282_v18, %s3403_s20  ;;  %1232 = vrot.lane.b32.xlu2 %v1179_v25, %s3404_s21  ;;  %v3722_v18 = vld [vmem:[%s3449_s19 + $0x48] sm:$0xff]  ;;  %v631_v33 = vsel %vm618_vm0, %v628_v61, %v630_v59 }
  0x6d   : > { %2152 = vrot.lane.b32.xlu0 %v1991_v22, %s3404_s21  ;;  %v1996_v21 = vshll.u32 %v3722_v18, 16  ;;  %v2203_v22 = vrot.slane %v3722_v18, 1 }
  0x6f   : > { %v1998_v40 = vrot.slane %v1996_v21, 1  ;;  %v2204_v5 = vsel %vm618_vm0, %v2201_v38, %v2203_v22  ;;  %v422_v38 = vshll.u32 %v3747_v30, 16  ;;  %v526_v21 = vshll.u32 %v3772_v52, 16 }
  0x71   : > { %v1999_v34 = vsel %vm373_vm1, %v1994_v23, %v1998_v40 }
  0x74   : > { %1196 = vrot.lane.b32.xlu1 %v1035_v47, %s3404_s21  ;;  %2249 = vrot.lane.b32.xlu2 %v2202_v26, %s3403_s20 }
  0x75   : > { %578 = vrot.lane.b32.xlu0 %v417_v37, %s3404_s21  ;;  %v3768_v37 = vld [vmem:[%s3449_s19 + $0x50] sm:$0xff] }
  0x76   : > { %v571_v9 = vpop.permute.xlu2 %570 }
  0x77   : > { %v718_v47 = vsel %vm716_vm3, %v3458_v2, %v571_v9  ;;  %v424_v9 = vrot.slane %v422_v38, 1 }
  0x79   : > { %v425_v39 = vsel %vm373_vm1, %v420_v56, %v424_v9 }
  0x7c   : > { %1234 = vrot.lane.b32.xlu1 %v1187_v11, %s3404_s21  ;;  %676 = vrot.lane.b32.xlu2 %v629_v19, %s3403_s20  ;;  %v1043_v11 = vsel %vm373_vm1, %v1038_v48, %v3765_v49  ;;  %v2004_v19 = vshll.u32 %v3768_v37, 16 }
  0x7d   : > { %1293 = vrot.lane.b32.xlu0 %v1246_v15, %s3403_s20  ;;  %v2000_v15 = vshrl.u32 %v3722_v18, 16 }
  0x7e   : > { %v3741_v25 = vpop.permute.xlu2 %1188  ;;  %v3791_v23 = vrot.slane %v2004_v19, 1  ;;  %v2205_v19 = vrot.slane %v3768_v37, 1 }
  0x7f   : > { %v2002_v61 = vor.u32 %v2000_v15, %v1998_v40 }
  0x81   : > { %v2007_v48 = vsel %vm373_vm1, %v2002_v61, %v3791_v23 }
  0x84   : > { %2251 = vrot.lane.b32.xlu1 %v2204_v5, %s3403_s20  ;;  %2154 = vrot.lane.b32.xlu2 %v1999_v34, %s3404_s21  ;;  %v3794_v5 = vld [vmem:[%s3449_s19 + $0x38] sm:$0xff]  ;;  %v1247_v34 = vrot.slane %v3738_v12, 1 }
  0x85   : > { %1331 = vrot.lane.b32.xlu0 %v1284_v35, %s3403_s20  ;;  %v3798_v35 = vrot.slane %v526_v21, 1  ;;  %v430_v56 = vshll.u32 %v3794_v5, 16 }
  0x86   : > { %v1322_v26 = vpop.permute.xlu1 %1321  ;;  %v1227_v50 = vpop.permute.xlu2 %1226 }
  0x87   : > { %v669_v57 = vpop.permute.xlu0 %668 }
  0x88   : > { %v767_v2 = vsel %vm765_vm4, %v718_v47, %v669_v57  ;;  %v529_v57 = vsel %vm373_vm1, %v524_v29, %v3798_v35  ;;  %v2206_v29 = vsel %vm618_vm0, %v2203_v22, %v2205_v19  ;;  %v1372_v22 = vsel %vm716_vm3, %v3455_v1, %v1227_v50 }
  0x89   : > { %3069 = vmatmul.msk.bf16.vlgmr.msra.gmra.mxu1 %vm1437_vm5, %v767_v2  ;;  %v1248_v2 = vsel %vm618_vm0, %v1245_v27, %v1247_v34  ;;  %v656_v27 = vrot.slane %v3772_v52, 1 }
  0x8c   : > { %678 = vrot.lane.b32.xlu1 %v631_v33, %s3403_s20  ;;  %580 = vrot.lane.b32.xlu2 %v425_v39, %s3404_s21  ;;  %v3819_v33 = vrot.slane %v430_v56, 1 }
  0x8d   : > { %1198 = vrot.lane.b32.xlu0 %v1043_v11, %s3404_s21  ;;  %v1334_v11 = vsel %vm716_vm3, %v3496_v24, %v3741_v25  ;;  %v3836_v25 = vld [vmem:[%s3449_s19 + $0x44] sm:$0xff] }
  0x8e   : > { %v2242_v31 = vpop.permute.xlu1 %2241  ;;  %v3801_v38 = vpop.permute.xlu2 %2243 }
  0x8f   : > { %v1225_v46 = vpop.permute.xlu0 %1224 }
  0x90   : > { %v1370_v47 = vsel %vm716_vm3, %v3452_v0, %v1225_v46  ;;  %v1048_v46 = vshll.u32 %v3836_v25, 16 }
  0x91   : > { %v1418_v40 = vsel %vm765_vm4, %v1370_v47, %v1322_v26  ;;  %v428_v26 = vor.u32 %v426_v53, %v424_v9  ;;  %v1249_v47 = vrot.slane %v3836_v25, 1  ;;  %v3857_v53 = vld [vmem:[%s3449_s19 + $0x58] sm:$0xff] }
  0x92   : > { %3059 = vmatmul.msk.bf16.vlgmr.msra.gmra.mxu3 %vm1437_vm5, %v1418_v40  ;;  %v632_v40 = vrot.slane %v3794_v5, 1  ;;  %v2012_v50 = vshll.u32 %v3857_v53, 16 }
  0x93   : > { %3348 = vmatpush.bf16.msra.mxu3 %v3717_v62  ;;  %v5037_v62 = vrot.slane %v3755_v63, 1  ;;  %v433_v24 = vsel %vm373_vm1, %v428_v26, %v3819_v33 }
  0x94   : > { %2156 = vrot.lane.b32.xlu1 %v2007_v48, %s3404_s21  ;;  %1295 = vrot.lane.b32.xlu2 %v1248_v2, %s3403_s20  ;;  %v633_v1 = vsel %vm618_vm0, %v630_v59, %v632_v40  ;;  %v3884_v59 = vld [vmem:[%s3449_s19 + $0x4c] sm:$0xff] }
  0x95   : > { %606 = vrot.lane.b32.xlu0 %v529_v57, %s3404_s21 }
  0x96   : > { %v1286_v15 = vpop.permute.xlu1 %1285  ;;  %v671_v39 = vpop.permute.xlu2 %670 }
  0x97   : > { %v2145_v20 = vpop.permute.xlu0 %2144  ;;  %v1382_v21 = vsel %vm765_vm4, %v1334_v11, %v1286_v15  ;;  %v3864_v11 = vld [vmem:[%s3449_s19 + $0xa0] sm:$0xff]  ;;  %v1050_v15 = vrot.slane %v1048_v46, 1 }
  0x98   : > { %v2290_v9 = vsel %vm716_vm3, %v3467_v7, %v2145_v20  ;;  %3041 = vmatmul.msk.bf16.vlgmr.msra.gmra.mxu0 %vm1437_vm5, %v1382_v21  ;;  %v657_v7 = vsel %vm618_vm0, %v5037_v62, %v656_v27  ;;  %v1250_v20 = vsel %vm618_vm0, %v1247_v34, %v1249_v47  ;;  %v658_v34 = vrot.slane %v3864_v11, 1  ;;  %v3893_v46 = vld [vmem:[%s3449_s19 + $0x40] sm:$0xff] }
  0x99   : > { %v2338_v61 = vsel %vm765_vm4, %v2290_v9, %v2242_v31  ;;  %v1044_v31 = vshrl.u32 %v3738_v12, 16  ;;  %v530_v9 = vshrl.u32 %v3772_v52, 16 }
  0x9a   : > { %3244 = vmatmul.msk.bf16.vlgmr.msra.gmra.mxu2 %vm1437_vm5, %v2338_v61  ;;  %v534_v61 = vshll.u32 %v3864_v11, 16 }
  0x9b   : > { %v1046_v56 = vor.u32 %v1044_v31, %v3765_v49  ;;  %v2008_v49 = vshrl.u32 %v3768_v37, 16  ;;  %v3890_v31 = vrot.slane %v2012_v50, 1 }
  0x9c   : > { %582 = vrot.lane.b32.xlu1 %v433_v24, %s3404_s21  ;;  %704 = vrot.lane.b32.xlu2 %v657_v7, %s3403_s20 }
  0x9d   : > { %2253 = vrot.lane.b32.xlu0 %v2206_v29, %s3403_s20  ;;  %v1051_v21 = vsel %vm373_vm1, %v1046_v56, %v1050_v15  ;;  %v2010_v7 = vor.u32 %v2008_v49, %v3791_v23  ;;  %v438_v49 = vshll.u32 %v3893_v46, 16 }
  0x9e   : > { %v1324_v48 = vpop.permute.xlu1 %1323  ;;  %v3861_v26 = vpop.permute.xlu2 %2148 }
  0x9f   : > { %v2147_v57 = vpop.permute.xlu0 %2146  ;;  %v1420_v2 = vsel %vm765_vm4, %v1372_v22, %v1324_v48  ;;  %v532_v22 = vor.u32 %v530_v9, %v3798_v35  ;;  %v1056_v35 = vshll.u32 %v3884_v59, 16 }
  0xa0   : > { %v2292_v24 = vsel %vm716_vm3, %v3470_v8, %v2147_v57  ;;  %v536_v8 = vrot.slane %v534_v61, 1 }
  0xa1   : > { %v2340_v23 = vsel %vm765_vm4, %v2292_v24, %v3801_v38  ;;  %v3915_v50 = vrot.slane %v1056_v35, 1  ;;  %v3922_v24 = vrot.slane %v438_v49, 1  ;;  %v2294_v35 = vsel %vm716_vm3, %v3517_v42, %v3861_v26  ;;  %v3956_v26 = vld [vmem:[%s3449_s19 + $0x60] sm:$0xff] }
  0xa2   : > { %3060 = vmatmul.msk.bf16.gmra.mxu3 %vm1437_vm5, %v1420_v2  ;;  %v634_v49 = vrot.slane %v3893_v46, 1 }
  0xa4   : > { %1297 = vrot.lane.b32.xlu1 %v1250_v20, %s3403_s20  ;;  %1200 = vrot.lane.b32.xlu2 %v1051_v21, %s3404_s21  ;;  %v659_v20 = vsel %vm618_vm0, %v656_v27, %v658_v34  ;;  %v434_v27 = vshrl.u32 %v3794_v5, 16  ;;  %v3918_v21 = vld [vmem:[%s3449_s19 + $0xa8] sm:$0xff] }
  0xa5   : > { %680 = vrot.lane.b32.xlu0 %v633_v1, %s3403_s20  ;;  %v1052_v1 = vshrl.u32 %v3836_v25, 16 }
  0xa6   : > { %v1191_v29 = vpop.permute.xlu1 %1190  ;;  %v575_v56 = vpop.permute.xlu2 %574  ;;  %v436_v61 = vor.u32 %v434_v27, %v3819_v33  ;;  %v542_v33 = vshll.u32 %v3918_v21, 16  ;;  %v1251_v27 = vrot.slane %v3884_v59, 1 }
  0xa7   : > { %v573_v48 = vpop.permute.xlu0 %572  ;;  %v1054_v38 = vor.u32 %v1052_v1, %v1050_v15 }
  0xa8   : > { %v720_v2 = vsel %vm716_vm3, %v3461_v3, %v573_v48  ;;  %v2015_v3 = vsel %vm373_vm1, %v2010_v7, %v3890_v31  ;;  %v2207_v7 = vrot.slane %v3857_v53, 1  ;;  %v3940_v1 = vrot.slane %v542_v33, 1 }
  0xa9   : > { %v769_v57 = vsel %vm765_vm4, %v720_v2, %v671_v39  ;;  %v537_v39 = vsel %vm373_vm1, %v532_v22, %v536_v8  ;;  %v1336_v22 = vsel %vm716_vm3, %v3502_v28, %v1191_v29 }
  0xaa   : > { %3070 = vmatmul.msk.bf16.gmra.mxu1 %vm1437_vm5, %v769_v57  ;;  %3245 = vmatmul.msk.bf16.gmra.mxu2 %vm1437_vm5, %v2340_v23  ;;  %v538_v57 = vshrl.u32 %v3864_v11, 16  ;;  %v441_v23 = vsel %vm373_vm1, %v436_v61, %v3922_v24  ;;  %v2208_v28 = vsel %vm618_vm0, %v2205_v19, %v2207_v7 }
  0xac   : > { %706 = vrot.lane.b32.xlu1 %v659_v20, %s3403_s20  ;;  %608 = vrot.lane.b32.xlu2 %v537_v39, %s3404_s21  ;;  %v1059_v20 = vsel %vm373_vm1, %v1054_v38, %v3915_v50  ;;  %v540_v29 = vor.u32 %v538_v57, %v536_v8 }
  0xad   : > { %2158 = vrot.lane.b32.xlu0 %v2015_v3, %s3404_s21 }
  0xae   : > { %v1229_v9 = vpop.permute.xlu1 %1228  ;;  %v1290_v2 = vpop.permute.xlu2 %1289  ;;  %v545_v42 = vsel %vm373_vm1, %v540_v29, %v3940_v1 }
  0xaf   : > { %v1288_v48 = vpop.permute.xlu0 %1287  ;;  %v1374_v19 = vsel %vm716_vm3, %v3521_v45, %v1229_v9  ;;  %v1252_v45 = vsel %vm618_vm0, %v1249_v47, %v1251_v27  ;;  %v635_v9 = vsel %vm618_vm0, %v632_v40, %v634_v49  ;;  %v722_v47 = vsel %vm716_vm3, %v3537_v58, %v575_v56  ;;  %v3977_v40 = vld [vmem:[%s3449_s19 + $0x54] sm:$0xff]  ;;  %v3996_v56 = vld [vmem:[%s3449_s19 + $0x48] sm:$0xff] }
  0xb0   : > { %v1384_v15 = vsel %vm765_vm4, %v1336_v22, %v1288_v48  ;;  %v2016_v22 = vshrl.u32 %v3857_v53, 16  ;;  %v2020_v48 = vshll.u32 %v3956_v26, 16 }
  0xb1   : > { %3042 = vmatmul.msk.bf16.gmra.mxu0 %vm1437_vm5, %v1384_v15  ;;  %v2209_v15 = vrot.slane %v3956_v26, 1 }
  0xb2   : > { %v2018_v33 = vor.u32 %v2016_v22, %v3890_v31  ;;  %v4015_v22 = vld [vmem:[%s3449_s19 + $0xb0] sm:$0xff] }
  0xb3   : > { %v2210_v58 = vsel %vm618_vm0, %v2207_v7, %v2209_v15  ;;  %v446_v7 = vshll.u32 %v3996_v56, 16 }
  0xb4   : > { %1202 = vrot.lane.b32.xlu1 %v1059_v20, %s3404_s21  ;;  %2255 = vrot.lane.b32.xlu2 %v2208_v28, %s3403_s20  ;;  %v660_v20 = vrot.slane %v3918_v21, 1 }
  0xb5   : > { %584 = vrot.lane.b32.xlu0 %v441_v23, %s3404_s21 }
  0xb6   : > { %v2246_v3 = vpop.permute.xlu1 %2245  ;;  %v1328_v8 = vpop.permute.xlu2 %1327  ;;  %v661_v31 = vsel %vm618_vm0, %v658_v34, %v660_v20  ;;  %v636_v34 = vrot.slane %v3996_v56, 1 }
  0xb7   : > { %v1326_v39 = vpop.permute.xlu0 %1325  ;;  %v2342_v38 = vsel %vm765_vm4, %v2294_v35, %v2246_v3  ;;  %v2022_v3 = vrot.slane %v2020_v48, 1 }
  0xb8   : > { %v1422_v61 = vsel %vm765_vm4, %v1374_v19, %v1326_v39  ;;  %v1064_v39 = vshll.u32 %v3977_v40, 16 }
  0xb9   : > { %3061 = vmatmul.msk.bf16.gmra.mxu3 %vm1437_vm5, %v1422_v61  ;;  %v4008_v61 = vld [vmem:[%s3449_s19 + $0x68] sm:$0xff] }
  0xba   : > { %3246 = vmatmul.msk.bf16.gmra.mxu2 %vm1437_vm5, %v2342_v38  ;;  %v442_v38 = vshrl.u32 %v3893_v46, 16 }
  0xbc   : > { %610 = vrot.lane.b32.xlu1 %v545_v42, %s3404_s21  ;;  %682 = vrot.lane.b32.xlu2 %v635_v9, %s3403_s20  ;;  %v4012_v9 = vrot.slane %v1064_v39, 1  ;;  %v444_v48 = vor.u32 %v442_v38, %v3922_v24 }
  0xbd   : > { %1299 = vrot.lane.b32.xlu0 %v1252_v45, %s3403_s20 }
  0xbe   : > { %v673_v57 = vpop.permute.xlu1 %672  ;;  %v3981_v29 = vpop.permute.xlu2 %1194 }
  0xbf   : > { %v1193_v23 = vpop.permute.xlu0 %1192  ;;  %v771_v28 = vsel %vm765_vm4, %v722_v47, %v673_v57 }
  0xc0   : > { %v1338_v35 = vsel %vm716_vm3, %v3533_v55, %v1193_v23  ;;  %3071 = vmatmul.msk.bf16.gmra.mxu1 %vm1437_vm5, %v771_v28  ;;  %v1060_v55 = vshrl.u32 %v3884_v59, 16  ;;  %v448_v23 = vrot.slane %v446_v7, 1  ;;  %v1253_v7 = vrot.slane %v3977_v40, 1 }
  0xc1   : > { %v1386_v19 = vsel %vm765_vm4, %v1338_v35, %v1290_v2  ;;  %v2023_v2 = vsel %vm373_vm1, %v2018_v33, %v2022_v3  ;;  %v637_v35 = vsel %vm618_vm0, %v634_v49, %v636_v34 }
  0xc2   : > { %3043 = vmatmul.msk.bf16.gmra.mxu0 %vm1437_vm5, %v1386_v19  ;;  %v1062_v45 = vor.u32 %v1060_v55, %v3915_v50  ;;  %v2024_v50 = vshrl.u32 %v3956_v26, 16  ;;  %v2028_v19 = vshll.u32 %v4008_v61, 16  ;;  %v4037_v55 = vld [vmem:[%s3449_s19 + $0x50] sm:$0xff] }
  0xc4   : > { %2257 = vrot.lane.b32.xlu1 %v2210_v58, %s3403_s20  ;;  %2160 = vrot.lane.b32.xlu2 %v2023_v2, %s3404_s21  ;;  %v1067_v24 = vsel %vm373_vm1, %v1062_v45, %v4012_v9  ;;  %v546_v58 = vshrl.u32 %v3918_v21, 16  ;;  %v2026_v49 = vor.u32 %v2024_v50, %v2022_v3 }
  0xc5   : > { %708 = vrot.lane.b32.xlu0 %v661_v31, %s3403_s20  ;;  %v449_v31 = vsel %vm373_vm1, %v444_v48, %v448_v23 }
  0xc6   : > { %v2151_v42 = vpop.permute.xlu1 %2150  ;;  %v1233_v57 = vpop.permute.xlu2 %1232  ;;  %v548_v2 = vor.u32 %v546_v58, %v3940_v1  ;;  %v454_v1 = vshll.u32 %v4037_v55, 16  ;;  %v2211_v58 = vrot.slane %v4008_v61, 1 }
  0xc7   : > { %v1231_v47 = vpop.permute.xlu0 %1230  ;;  %v2296_v45 = vsel %vm716_vm3, %v3569_v32, %v2151_v42  ;;  %v1254_v32 = vsel %vm618_vm0, %v1251_v27, %v1253_v7 }
  0xc8   : > { %v1376_v33 = vsel %vm716_vm3, %v3551_v16, %v1231_v47  ;;  %v550_v16 = vshll.u32 %v4015_v22, 16  ;;  %v4059_v50 = vrot.slane %v454_v1, 1 }
  0xc9   : > { %v1424_v28 = vsel %vm765_vm4, %v1376_v33, %v1328_v8  ;;  %v4034_v8 = vrot.slane %v2028_v19, 1  ;;  %v1340_v19 = vsel %vm716_vm3, %v3583_v36, %v3981_v29  ;;  %v4076_v29 = vld [vmem:[%s3449_s19 + $0x5c] sm:$0xff] }
  0xca   : > { %3062 = vmatmul.msk.bf16.gmra.mxu3 %vm1437_vm5, %v1424_v28  ;;  %v4041_v38 = vrot.slane %v550_v16, 1  ;;  %v450_v28 = vshrl.u32 %v3996_v56, 16  ;;  %v662_v16 = vrot.slane %v4015_v22, 1 }
  0xcb   : > { %v2031_v33 = vsel %vm373_vm1, %v2026_v49, %v4034_v8 }
  0xcc   : > { %684 = vrot.lane.b32.xlu1 %v637_v35, %s3403_s20  ;;  %586 = vrot.lane.b32.xlu2 %v449_v31, %s3404_s21  ;;  %v553_v35 = vsel %vm373_vm1, %v548_v2, %v4041_v38  ;;  %v452_v42 = vor.u32 %v450_v28, %v448_v23 }
  0xcd   : > { %1204 = vrot.lane.b32.xlu0 %v1067_v24, %s3404_s21 }
  0xce   : > { %v577_v39 = vpop.permute.xlu1 %576  ;;  %v2250_v47 = vpop.permute.xlu2 %2249  ;;  %v457_v36 = vsel %vm373_vm1, %v452_v42, %v4059_v50 }
  0xcf   : > { %v2248_v48 = vpop.permute.xlu0 %2247  ;;  %v724_v27 = vsel %vm716_vm3, %v3588_v43, %v577_v39  ;;  %v2212_v43 = vsel %vm618_vm0, %v2209_v15, %v2211_v58  ;;  %v663_v39 = vsel %vm618_vm0, %v660_v20, %v662_v16  ;;  %v1378_v15 = vsel %vm716_vm3, %v3603_v54, %v1233_v57  ;;  %v4096_v20 = vld [vmem:[%s3449_s19 + $0x70] sm:$0xff] }
  0xd0   : > { %v2344_v3 = vsel %vm765_vm4, %v2296_v45, %v2248_v48  ;;  %v1068_v45 = vshrl.u32 %v3977_v40, 16  ;;  %v1072_v48 = vshll.u32 %v4076_v29, 16 }
  0xd1   : > { %3247 = vmatmul.msk.bf16.gmra.mxu2 %vm1437_vm5, %v2344_v3  ;;  %v1255_v3 = vrot.slane %v4076_v29, 1 }
  0xd2   : > { %v1070_v1 = vor.u32 %v1068_v45, %v4012_v9  ;;  %v4134_v45 = vld [vmem:[%s3449_s19 + $0x58] sm:$0xff] }
  0xd3   : > { %v1256_v9 = vsel %vm618_vm0, %v1253_v7, %v1255_v3 }
  0xd4   : > { %2162 = vrot.lane.b32.xlu1 %v2031_v33, %s3404_s21  ;;  %1301 = vrot.lane.b32.xlu2 %v1254_v32, %s3403_s20  ;;  %v638_v33 = vrot.slane %v4037_v55, 1 }
  0xd5   : > { %612 = vrot.lane.b32.xlu0 %v553_v35, %s3404_s21 }
  0xd6   : > { %v1292_v24 = vpop.permute.xlu1 %1291  ;;  %v677_v23 = vpop.permute.xlu2 %676  ;;  %v639_v57 = vsel %vm618_vm0, %v636_v34, %v638_v33  ;;  %v4127_v34 = vld [vmem:[%s3449_s19 + $0x64] sm:$0xff] }
  0xd7   : > { %v675_v31 = vpop.permute.xlu0 %674  ;;  %v1388_v49 = vsel %vm765_vm4, %v1340_v19, %v1292_v24  ;;  %v4106_v24 = vld [vmem:[%s3449_s19 + $0xb8] sm:$0xff] }
  0xd8   : > { %3044 = vmatmul.msk.bf16.gmra.mxu0 %vm1437_vm5, %v1388_v49  ;;  %v773_v2 = vsel %vm765_vm4, %v724_v27, %v675_v31  ;;  %v1074_v27 = vrot.slane %v1072_v48, 1  ;;  %v2036_v31 = vshll.u32 %v4096_v20, 16  ;;  %v554_v49 = vshrl.u32 %v4015_v22, 16  ;;  %v249_v48 = vld [vmem:[%s3449_s19 + $0xc0] sm:$0xf] }
  0xd9   : > { %3072 = vmatmul.msk.bf16.gmra.mxu1 %vm1437_vm5, %v773_v2  ;;  %v664_v7 = vrot.slane %v4106_v24, 1  ;;  %v558_v2 = vshll.u32 %v4106_v24, 16 }
  0xdc   : > { %588 = vrot.lane.b32.xlu1 %v457_v36, %s3404_s21  ;;  %710 = vrot.lane.b32.xlu2 %v663_v39, %s3403_s20  ;;  %v4131_v39 = vrot.slane %v2036_v31, 1 }
  0xdd   : > { %2259 = vrot.lane.b32.xlu0 %v2212_v43, %s3403_s20 }
  0xde   : > { %v1330_v28 = vpop.permute.xlu1 %1329  ;;  %v4100_v42 = vpop.permute.xlu2 %2154 }
  0xdf   : > { %v2153_v35 = vpop.permute.xlu0 %2152  ;;  %v1426_v32 = vsel %vm765_vm4, %v1378_v15, %v1330_v28  ;;  %v556_v15 = vor.u32 %v554_v49, %v4041_v38 }
  0xe0   : > { %v2298_v19 = vsel %vm716_vm3, %v3599_v51, %v2153_v35  ;;  %3063 = vmatmul.msk.bf16.gmra.mxu3 %vm1437_vm5, %v1426_v32  ;;  %v2032_v51 = vshrl.u32 %v4008_v61, 16  ;;  %v665_v32 = vsel %vm618_vm0, %v662_v16, %v664_v7 }
  0xe1   : > { %v2346_v54 = vsel %vm765_vm4, %v2298_v19, %v2250_v47  ;;  %v1075_v47 = vsel %vm373_vm1, %v1070_v1, %v1074_v27  ;;  %v560_v19 = vrot.slane %v558_v2, 1 }
  0xe2   : > { %3248 = vmatmul.msk.bf16.gmra.mxu2 %vm1437_vm5, %v2346_v54  ;;  %v2034_v43 = vor.u32 %v2032_v51, %v4034_v8  ;;  %v1076_v8 = vshrl.u32 %v4076_v29, 16  ;;  %v458_v51 = vshrl.u32 %v4037_v55, 16 }
  0xe3   : > { %v561_v31 = vsel %vm373_vm1, %v556_v15, %v560_v19 }
  0xe4   : > { %1303 = vrot.lane.b32.xlu1 %v1256_v9, %s3403_s20  ;;  %1206 = vrot.lane.b32.xlu2 %v1075_v47, %s3404_s21  ;;  %v1080_v9 = vshll.u32 %v4127_v34, 16  ;;  %v2039_v38 = vsel %vm373_vm1, %v2034_v43, %v4131_v39  ;;  %v1078_v16 = vor.u32 %v1076_v8, %v1074_v27  ;;  %v460_v2 = vor.u32 %v458_v51, %v4059_v50 }
  0xe5   : > { %686 = vrot.lane.b32.xlu0 %v639_v57, %s3403_s20  ;;  %v371_v57 = vunpack.c.l.b16 %v249_v48  ;;  %v2213_v48 = vrot.slane %v4096_v20, 1  ;;  %v1257_v51 = vrot.slane %v4127_v34, 1 }
  0xe6   : > { %v1197_v36 = vpop.permute.xlu1 %1196  ;;  %v581_v1 = vpop.permute.xlu2 %580 }
  0xe7   : > { %v579_v28 = vpop.permute.xlu0 %578  ;;  %v372_v47 = vpack.c.b16 %v371_v57, %v371_v57  ;;  %v1342_v15 = vsel %vm716_vm3, %v3631_v17, %v1197_v36  ;;  %v2300_v57 = vsel %vm716_vm3, %v3645_v10, %v4100_v42  ;;  %v4189_v42 = vld [vmem:[%s3449_s19 + $0x78] sm:$0xff] }
  0xe8   : > { %v726_v35 = vsel %vm716_vm3, %v3615_v14, %v579_v28  ;;  %v462_v14 = vshll.u32 %v4134_v45, 16 }
  0xe9   : > { %v775_v54 = vsel %vm765_vm4, %v726_v35, %v677_v23  ;;  %v4154_v23 = vrot.slane %v1080_v9, 1  ;;  %v566_v8 = vshll.u32 %v372_v47, 16  ;;  %v2214_v9 = vsel %vm618_vm0, %v2211_v58, %v2213_v48 }
  0xea   : > { %3073 = vmatmul.msk.bf16.gmra.mxu1 %vm1437_vm5, %v775_v54  ;;  %v4158_v43 = vrot.slane %v462_v14, 1  ;;  %v562_v54 = vshrl.u32 %v4106_v24, 16  ;;  %v640_v14 = vrot.slane %v4134_v45, 1 }
  0xeb   : > { %v1083_v27 = vsel %vm373_vm1, %v1078_v16, %v4154_v23  ;;  %v568_v36 = vrot.slane %v566_v8, 1 }
  0xec   : > { %712 = vrot.lane.b32.xlu1 %v665_v32, %s3403_s20  ;;  %614 = vrot.lane.b32.xlu2 %v561_v31, %s3404_s21  ;;  %v465_v50 = vsel %vm373_vm1, %v460_v2, %v4158_v43  ;;  %v564_v17 = vor.u32 %v562_v54, %v560_v19 }
  0xed   : > { %2164 = vrot.lane.b32.xlu0 %v2039_v38, %s3404_s21 }
  0xee   : > { %v1235_v49 = vpop.permute.xlu1 %1234  ;;  %v1296_v35 = vpop.permute.xlu2 %1295  ;;  %v569_v10 = vsel %vm373_vm1, %v564_v17, %v568_v36 }
  0xef   : > { %v1294_v28 = vpop.permute.xlu0 %1293  ;;  %v1380_v58 = vsel %vm716_vm3, %v3651_v44, %v1235_v49  ;;  %v1258_v44 = vsel %vm618_vm0, %v1255_v3, %v1257_v51  ;;  %v641_v49 = vsel %vm618_vm0, %v638_v33, %v640_v14  ;;  %v728_v3 = vsel %vm716_vm3, %v3676_v6, %v581_v1  ;;  %v4208_v33 = vld [vmem:[%s3449_s19 + $0x6c] sm:$0xff] }
  0xf0   : > { %v1390_v32 = vsel %vm765_vm4, %v1342_v15, %v1294_v28  ;;  %v2040_v15 = vshrl.u32 %v4096_v20, 16  ;;  %v2044_v28 = vshll.u32 %v4189_v42, 16 }
  0xf1   : > { %3045 = vmatmul.msk.bf16.gmra.mxu0 %vm1437_vm5, %v1390_v32  ;;  %v2215_v32 = vrot.slane %v4189_v42, 1 }
  0xf2   : > { %v2042_v8 = vor.u32 %v2040_v15, %v4131_v39  ;;  %v4248_v15 = vld [vmem:[%s3449_s19 + $0x80] sm:$0xff] }
  0xf3   : > { %v2216_v39 = vsel %vm618_vm0, %v2213_v48, %v2215_v32 }
  0xf4   : > { %1208 = vrot.lane.b32.xlu1 %v1083_v27, %s3404_s21  ;;  %2261 = vrot.lane.b32.xlu2 %v2214_v9, %s3403_s20  ;;  %v666_v27 = vrot.slane %v372_v47, 1  ;;  %v4218_v47 = vld [vmem:[%s3449_s19 + $0x60] sm:$0xff] }
  0xf5   : > { %590 = vrot.lane.b32.xlu0 %v465_v50, %s3404_s21  ;;  %v642_v48 = vrot.slane %v4218_v47, 1 }
  0xf6   : > { %v2252_v38 = vpop.permute.xlu1 %2251  ;;  %v705_v2 = vpop.permute.xlu2 %704  ;;  %v667_v1 = vsel %vm618_vm0, %v664_v7, %v666_v27  ;;  %v4240_v7 = vld [vmem:[%s3449_s19 + $0xb0] sm:$0xff] }
  0xf7   : > { %v1332_v31 = vpop.permute.xlu0 %1331  ;;  %v2348_v16 = vsel %vm765_vm4, %v2300_v57, %v2252_v38  ;;  %v2046_v57 = vrot.slane %v2044_v28, 1  ;;  %v4228_v38 = vld [vmem:[%s3449_s19 + $0xa8] sm:$0xff] }
  0xf8   : > { %v1428_v19 = vsel %vm765_vm4, %v1380_v58, %v1332_v31  ;;  %3249 = vmatmul.msk.bf16.gmra.mxu2 %vm1437_vm5, %v2348_v16  ;;  %v1088_v58 = vshll.u32 %v4208_v33, 16  ;;  %v470_v16 = vshll.u32 %v4218_v47, 16 }
  0xf9   : > { %3064 = vmatmul.msk.bf16.gmra.mxu3 %vm1437_vm5, %v1428_v19  ;;  %v2047_v31 = vsel %vm373_vm1, %v2042_v8, %v2046_v57  ;;  %v2092_v19 = vshll.u32 %v4228_v38, 16  ;;  %v643_v8 = vsel %vm618_vm0, %v640_v14, %v642_v48 }
  0xfc   : > { %616 = vrot.lane.b32.xlu1 %v569_v10, %s3404_s21  ;;  %688 = vrot.lane.b32.xlu2 %v641_v49, %s3403_s20  ;;  %v4245_v49 = vrot.slane %v1088_v58, 1  ;;  %v4275_v58 = vld [vmem:[%s3449_s19 + $0x68] sm:$0xff] }
  0xfd   : > { %1305 = vrot.lane.b32.xlu0 %v1258_v44, %s3403_s20 }
  0xfe   : > { %v679_v54 = vpop.permute.xlu1 %678  ;;  %v4212_v17 = vpop.permute.xlu2 %1200 }
  0xff   : > { %v1199_v50 = vpop.permute.xlu0 %1198  ;;  %v777_v9 = vsel %vm765_vm4, %v728_v3, %v679_v54 }
 0x100   : > { %v1344_v36 = vsel %vm716_vm3, %v3671_v60, %v1199_v50  ;;  %3074 = vmatmul.msk.bf16.gmra.mxu1 %vm1437_vm5, %v777_v9  ;;  %v1084_v60 = vshrl.u32 %v4127_v34, 16  ;;  %v472_v50 = vrot.slane %v470_v16, 1  ;;  %v4259_v9 = vrot.slane %v2092_v19, 1 }
 0x101   : > { %v1392_v6 = vsel %vm765_vm4, %v1344_v36, %v1296_v35  ;;  %v466_v35 = vshrl.u32 %v4134_v45, 16  ;;  %v2096_v36 = vshrl.u32 %v4228_v38, 16  ;;  %v1259_v19 = vrot.slane %v4208_v33, 1 }
 0x102   : > { %3046 = vmatmul.msk.bf16.gmra.mxu0 %vm1437_vm5, %v1392_v6  ;;  %v1086_v44 = vor.u32 %v1084_v60, %v4154_v23 }
 0x103   : > { %v468_v28 = vor.u32 %v466_v35, %v4158_v43  ;;  %v2100_v43 = vshll.u32 %v4240_v7, 16 }
 0x104   : > { %2263 = vrot.lane.b32.xlu1 %v2216_v39, %s3403_s20  ;;  %2166 = vrot.lane.b32.xlu2 %v2047_v31, %s3404_s21  ;;  %v1091_v6 = vsel %vm373_vm1, %v1086_v44, %v4245_v49  ;;  %v2048_v39 = vshrl.u32 %v4189_v42, 16 }
 0x105   : > { %714 = vrot.lane.b32.xlu0 %v667_v1, %s3403_s20  ;;  %v2052_v1 = vshll.u32 %v4248_v15, 16  ;;  %v473_v14 = vsel %vm373_vm1, %v468_v28, %v472_v50  ;;  %v4272_v60 = vrot.slane %v2100_v43, 1 }
 0x106   : > { %v2157_v10 = vpop.permute.xlu1 %2156  ;;  %v4251_v3 = vpop.permute.xlu2 %608  ;;  %v2050_v35 = vor.u32 %v2048_v39, %v2046_v57  ;;  %v478_v57 = vshll.u32 %v4275_v58, 16 }
 0x107   : > { %v607_v27 = vpop.permute.xlu0 %606  ;;  %v4278_v16 = vrot.slane %v2052_v1, 1  ;;  %v2302_v44 = vsel %vm716_vm3, %v3722_v18, %v2157_v10  ;;  %v1260_v18 = vsel %vm618_vm0, %v1257_v51, %v1259_v19  ;;  %v1668_v10 = vpop.f32.mrf.mxu1  ;;  %v1346_v1 = vsel %vm716_vm3, %v3738_v12, %v4212_v17 }
 0x108   : > { %v754_v54 = vsel %vm716_vm3, %v3755_v63, %v607_v27  ;;  %v4300_v39 = vrot.slane %v478_v57, 1  ;;  %v5038_v51 = vrot.slane %v4228_v38, 1 }
 0x109   : > { %v803_v23 = vsel %vm765_vm4, %v754_v54, %v705_v2  ;;  %v2098_v2 = vor.u32 %v2096_v36, %v4259_v9  ;;  %v2055_v36 = vsel %vm373_vm1, %v2050_v35, %v4278_v16  ;;  %v2217_v35 = vrot.slane %v4248_v15, 1 }
 0x10a   : > { %3087 = vmatmul.msk.bf16.vlgmr.msrb.gmra.mxu3 %vm1437_vm5, %v803_v23  ;;  %v474_v23 = vshrl.u32 %v4218_v47, 16 }
 0x10c   : > { %690 = vrot.lane.b32.xlu1 %v643_v8, %s3403_s20  ;;  %592 = vrot.lane.b32.xlu2 %v473_v14, %s3404_s21  ;;  %v2103_v8 = vsel %vm373_vm1, %v2098_v2, %v4272_v60  ;;  %v2229_v2 = vrot.slane %v4240_v7, 1 }
 0x10d   : > { %1210 = vrot.lane.b32.xlu0 %v1091_v6, %s3404_s21  ;;  %v476_v6 = vor.u32 %v474_v23, %v472_v50  ;;  %v1092_v23 = vshrl.u32 %v4208_v33, 16 }
 0x10e   : > { %v583_v31 = vpop.permute.xlu1 %582  ;;  %v2256_v27 = vpop.permute.xlu2 %2255 }
 0x10f   : > { %v2254_v28 = vpop.permute.xlu0 %2253  ;;  %v730_v50 = vsel %vm716_vm3, %v3747_v30, %v583_v31  ;;  %v481_v17 = vsel %vm373_vm1, %v476_v6, %v4300_v39  ;;  %v2230_v30 = vsel %vm618_vm0, %v5038_v51, %v2229_v2  ;;  %v2218_v31 = vsel %vm618_vm0, %v2215_v32, %v2217_v35  ;;  %v4345_v32 = vld [vmem:[%s3449_s19 + $0xb8] sm:$0xff] }
 0x110   : > { %v2350_v54 = vsel %vm765_vm4, %v2302_v44, %v2254_v28 }
 0x111   : > { %3250 = vmatmul.msk.bf16.gmra.mxu2 %vm1437_vm5, %v2350_v54 }
 0x114   : > { %2180 = vrot.lane.b32.xlu1 %v2103_v8, %s3404_s21  ;;  %1307 = vrot.lane.b32.xlu2 %v1260_v18, %s3403_s20  ;;  %v4320_v8 = vld [vmem:[%s3449_s19 + $0x74] sm:$0xff] }
 0x115   : > { %2168 = vrot.lane.b32.xlu0 %v2055_v36, %s3404_s21  ;;  %v4298_v43 = vpop.f32.mrf.mxu3  ;;  %v1499_v34 = vpop.f32.mrf.mxu0  ;;  %v4337_v36 = vld [vmem:[%s5034_s2] ss:$0 sm:$0xff]  ;;  %v1096_v18 = vshll.u32 %v4320_v8, 16 }
 0x116   : > { %v1298_v14 = vpop.permute.xlu1 %1297  ;;  %v4312_v54 = vpop.permute.xlu2 %682  ;;  %v1669_v57 = vadd.f32 %v1668_v10, %v1499_v34  ;;  %v756_v34 = vsel %vm716_vm3, %v3772_v52, %v4251_v3  ;;  %v4362_v52 = vld [vmem:[%s3449_s19 + $0x88] sm:$0xff] }
 0x117   : > { %v681_v44 = vpop.permute.xlu0 %680  ;;  %v1394_v28 = vsel %vm765_vm4, %v1346_v1, %v1298_v14  ;;  %v1261_v14 = vrot.slane %v4320_v8, 1  ;;  %v1670_v10 = vpop.f32.mrf.mxu1  ;;  %v1098_v3 = vrot.slane %v1096_v18, 1 }
 0x118   : > { %3047 = vmatmul.msk.bf16.gmra.mxu0 %vm1437_vm5, %v1394_v28  ;;  %v779_v12 = vsel %vm765_vm4, %v730_v50, %v681_v44  ;;  %v644_v28 = vrot.slane %v4275_v58, 1 }
 0x119   : > { %3075 = vmatmul.msk.bf16.gmra.mxu1 %vm1437_vm5, %v779_v12  ;;  %v1094_v12 = vor.u32 %v1092_v23, %v4245_v49 }
 0x11c   : > { %594 = vrot.lane.b32.xlu1 %v481_v17, %s3404_s21  ;;  %2265 = vrot.lane.b32.xlu2 %v2218_v31, %s3403_s20 }
 0x11d   : > { %2277 = vrot.lane.b32.xlu0 %v2230_v30, %s3403_s20  ;;  %v4341_v6 = vpop.f32.mrf.mxu3  ;;  %v2453_v1 = vpop.f32.mrf.mxu2 }
 0x11e   : > { %v2557_v50 = vadd.f32 %v2453_v1, %v1669_v57  ;;  %v707_v44 = vpop.permute.xlu1 %706  ;;  %v4355_v4 = vpop.permute.xlu2 %2160  ;;  %v2104_v57 = vshrl.u32 %v4240_v7, 16  ;;  %v2108_v1 = vshll.u32 %v4345_v32, 16 }
 0x11f   : > { %v2159_v17 = vpop.permute.xlu0 %2158  ;;  %v805_v30 = vsel %vm765_vm4, %v756_v34, %v707_v44  ;;  %v1501_v49 = vpop.f32.mrf.mxu0  ;;  %v1099_v34 = vsel %vm373_vm1, %v1094_v12, %v1098_v3  ;;  %v2060_v44 = vshll.u32 %v4362_v52, 16  ;;  %v4395_v12 = vld [vmem:[%s3449_s19 + $0x7c] sm:$0xff] }
 0x120   : > { %v2593_v62 = vadd.f32 %v4337_v36, %v2557_v50  ;;  %v2304_v31 = vsel %vm716_vm3, %v3768_v37, %v2159_v17  ;;  %3088 = vmatmul.msk.bf16.gmra.mxu3 %vm1437_vm5, %v805_v30  ;;  %v1262_v37 = vsel %vm618_vm0, %v1259_v19, %v1261_v14  ;;  %v2056_v50 = vshrl.u32 %v4248_v15, 16 }
 0x121   : > { %v2352_v23 = vsel %vm765_vm4, %v2304_v31, %v2256_v27  ;;  %v645_v27 = vsel %vm618_vm0, %v642_v48, %v644_v28  ;;  %v1671_v19 = vadd.f32 %v1670_v10, %v1501_v49  ;;  %v2106_v48 = vor.u32 %v2104_v57, %v4272_v60  ;;  %v4399_v49 = vld [vmem:[%s3449_s19 + $0x70] sm:$0xff] }
 0x122   : > { %v2625_v18 = vmax.f32 %v2593_v62, 0.0  ;;  %3251 = vmatmul.msk.bf16.gmra.mxu2 %vm1437_vm5, %v2352_v23  ;;  %v2219_v62 = vrot.slane %v4362_v52, 1  ;;  %v4392_v31 = vrot.slane %v2108_v1, 1 }
 0x124   : > { %2657 = vst.msk [vmem:[%s4367_s12] sm:$0xff] %vm716_vm3, %v2625_v18  ;;  %1309 = vrot.lane.b32.xlu1 %v1262_v37, %s3403_s20  ;;  %1212 = vrot.lane.b32.xlu2 %v1099_v34, %s3404_s21  ;;  %v2058_v37 = vor.u32 %v2056_v50, %v4278_v16  ;;  %v2220_v57 = vsel %vm618_vm0, %v2217_v35, %v2219_v62  ;;  %v2062_v34 = vrot.slane %v2060_v44, 1  ;;  %v1100_v50 = vshrl.u32 %v4320_v8, 16 }
 0x125   : > { %692 = vrot.lane.b32.xlu0 %v645_v27, %s3403_s20  ;;  %v1582_v17 = vpop.f32.mrf.mxu3  ;;  %v2455_v30 = vpop.f32.mrf.mxu2  ;;  %v486_v35 = vshll.u32 %v4399_v49, 16 }
 0x126   : > { %v2558_v23 = vadd.f32 %v2455_v30, %v1671_v19  ;;  %v1203_v10 = vpop.permute.xlu1 %1202  ;;  %v4410_v1 = vpop.permute.xlu2 %586  ;;  %v482_v17 = vshrl.u32 %v4275_v58, 16  ;;  %v2063_v44 = vsel %vm373_vm1, %v2058_v37, %v2062_v34  ;;  %v1102_v30 = vor.u32 %v1100_v50, %v1098_v3 }
 0x127   : > { %v585_v18 = vpop.permute.xlu0 %584  ;;  %v1673_v51 = vpop.f32.mrf.mxu1  ;;  %v2231_v37 = vrot.slane %v4345_v32, 1 }
 0x128   : > { %v2594_v27 = vadd.f32 %v4337_v36, %v2558_v23  ;;  %v732_v60 = vsel %vm716_vm3, %v3794_v5, %v585_v18  ;;  %v2111_v51 = vsel %vm373_vm1, %v2106_v48, %v4392_v31  ;;  %v1104_v5 = vshll.u32 %v4395_v12, 16  ;;  %v4429_v23 = vld [vmem:[%s3449_s19 + $0x90] sm:$0xff] }
 0x129   : > { %v781_v16 = vsel %vm765_vm4, %v732_v60, %v4312_v54  ;;  %v484_v60 = vor.u32 %v482_v17, %v4300_v39  ;;  %v2068_v39 = vshll.u32 %v4429_v23, 16 }
 0x12a   : > { %v2626_v19 = vmax.f32 %v2594_v27, 0.0  ;;  %3076 = vmatmul.msk.bf16.gmra.mxu1 %vm1437_vm5, %v781_v16  ;;  %v4426_v48 = vrot.slane %v1104_v5, 1  ;;  %v4433_v16 = vrot.slane %v486_v35, 1 }
 0x12c   : > { %2658 = vst.msk [vmem:[%s4367_s12 + $0x8] sm:$0xff] %vm716_vm3, %v2626_v19  ;;  %2267 = vrot.lane.b32.xlu1 %v2220_v57, %s3403_s20  ;;  %2170 = vrot.lane.b32.xlu2 %v2063_v44, %s3404_s21  ;;  %v1348_v57 = vsel %vm716_vm3, %v3836_v25, %v1203_v10  ;;  %v1107_v5 = vsel %vm373_vm1, %v1102_v30, %v4426_v48  ;;  %v2064_v19 = vshrl.u32 %v4362_v52, 16  ;;  %v4455_v30 = vrot.slane %v2068_v39, 1 }
 0x12d   : > { %2182 = vrot.lane.b32.xlu0 %v2111_v51, %s3404_s21  ;;  %v2458_v54 = vpop.f32.mrf.mxu2  ;;  %v489_v17 = vsel %vm373_vm1, %v484_v60, %v4433_v16  ;;  %v2232_v25 = vsel %vm618_vm0, %v2229_v2, %v2231_v37  ;;  %v4451_v10 = vpop.f32.mrf.mxu3 }
 0x12e   : > { %v1504_v18 = vpop.f32.mrf.mxu0  ;;  %v611_v27 = vpop.permute.xlu1 %610  ;;  %v2066_v54 = vor.u32 %v2064_v19, %v2062_v34 }
 0x12f   : > { %v1300_v51 = vpop.permute.xlu0 %1299  ;;  %v1302_v50 = vpop.permute.xlu2 %1301  ;;  %v2306_v18 = vsel %vm716_vm3, %v3857_v53, %v4355_v4 }
 0x130   : > { %v1396_v3 = vsel %vm765_vm4, %v1348_v57, %v1300_v51  ;;  %v1674_v35 = vpop.f32.mrf.mxu1  ;;  %v5039_v57 = vrot.slane %v4395_v12, 1  ;;  %v646_v51 = vrot.slane %v4399_v49, 1  ;;  %v2071_v53 = vsel %vm373_vm1, %v2066_v54, %v4455_v30 }
 0x131   : > { %3048 = vmatmul.msk.bf16.gmra.mxu0 %vm1437_vm5, %v1396_v3  ;;  %v758_v3 = vsel %vm716_vm3, %v3864_v11, %v611_v27 }
 0x132   : > { %v1264_v11 = vsel %vm618_vm0, %v1261_v14, %v5039_v57  ;;  %v647_v27 = vsel %vm618_vm0, %v644_v28, %v646_v51  ;;  %v2221_v28 = vrot.slane %v4429_v23, 1 }
 0x134   : > { %1214 = vrot.lane.b32.xlu1 %v1107_v5, %s3404_s21  ;;  %2279 = vrot.lane.b32.xlu2 %v2232_v25, %s3403_s20  ;;  %v4474_v25 = vld [vmem:[%s3449_s19 + $0xc0] sm:$0xff] }
 0x135   : > { %596 = vrot.lane.b32.xlu0 %v489_v17, %s3404_s21  ;;  %v2459_v44 = vpop.f32.mrf.mxu2 }
 0x136   : > { %v1505_v60 = vpop.f32.mrf.mxu0  ;;  %v2258_v2 = vpop.permute.xlu1 %2257 }
 0x137   : > { %v1675_v5 = vadd.f32 %v1674_v35, %v1505_v60  ;;  %v709_v34 = vpop.permute.xlu0 %708  ;;  %v2354_v19 = vsel %vm765_vm4, %v2306_v18, %v2258_v2  ;;  %v4468_v17 = vpop.permute.xlu2 %710  ;;  %v2112_v35 = vshrl.u32 %v4345_v32, 16  ;;  %v2116_v18 = vshll.u32 %v4474_v25, 16 }
 0x138   : > { %v807_v39 = vsel %vm765_vm4, %v758_v3, %v709_v34  ;;  %3252 = vmatmul.msk.bf16.gmra.mxu2 %vm1437_vm5, %v2354_v19  ;;  %v2233_v3 = vrot.slane %v4474_v25, 1  ;;  %v4500_v19 = vld [vmem:[%s3449_s19 + $0x84] sm:$0xff] }
 0x139   : > { %v2559_v4 = vadd.f32 %v2459_v44, %v1675_v5  ;;  %3089 = vmatmul.msk.bf16.gmra.mxu3 %vm1437_vm5, %v807_v39  ;;  %v734_v5 = vsel %vm716_vm3, %v3893_v46, %v4410_v1  ;;  %v2114_v39 = vor.u32 %v2112_v35, %v4392_v31  ;;  %v2118_v46 = vrot.slane %v2116_v18, 1  ;;  %v4523_v35 = vld [vmem:[%s3449_s19 + $0x78] sm:$0xff] }
 0x13a   : > { %v2234_v31 = vsel %vm618_vm0, %v2231_v37, %v2233_v3  ;;  %v490_v37 = vshrl.u32 %v4399_v49, 16 }
 0x13b   : > { %v2595_v44 = vadd.f32 %v4337_v36, %v2559_v4 }
 0x13c   : > { %v4488_v54 = vpop.f32.mrf.mxu3  ;;  %2172 = vrot.lane.b32.xlu1 %v2071_v53, %s3404_s21  ;;  %694 = vrot.lane.b32.xlu2 %v647_v27, %s3403_s20 }
 0x13d   : > { %v2627_v60 = vmax.f32 %v2595_v44, 0.0  ;;  %1311 = vrot.lane.b32.xlu0 %v1264_v11, %s3403_s20  ;;  %v2462_v14 = vpop.f32.mrf.mxu2  ;;  %v1677_v2 = vpop.f32.mrf.mxu1 }
 0x13e   : > { %v685_v34 = vpop.permute.xlu1 %684 }
 0x13f   : > { %2659 = vst.msk [vmem:[%s4367_s12 + $0x10] sm:$0xff] %vm716_vm3, %v2627_v60  ;;  %v1205_v4 = vpop.permute.xlu0 %1204  ;;  %v1508_v53 = vpop.f32.mrf.mxu0  ;;  %v783_v11 = vsel %vm765_vm4, %v734_v5, %v685_v34  ;;  %v1108_v60 = vshrl.u32 %v4395_v12, 16 }
 0x140   : > { %v1350_v44 = vsel %vm716_vm3, %v3884_v59, %v1205_v4  ;;  %v1678_v27 = vadd.f32 %v1677_v2, %v1508_v53  ;;  %3077 = vmatmul.msk.bf16.gmra.mxu1 %vm1437_vm5, %v783_v11  ;;  %v4509_v57 = vpop.permute.xlu2 %1206  ;;  %v2222_v59 = vsel %vm618_vm0, %v2219_v62, %v2221_v28  ;;  %v2119_v2 = vsel %vm373_vm1, %v2114_v39, %v2118_v46  ;;  %v4536_v11 = vld [vmem:[%s3449_s19 + $0xc8] sm:$0xff] }
 0x141   : > { %v1398_v1 = vsel %vm765_vm4, %v1350_v44, %v1302_v50  ;;  %v1112_v50 = vshll.u32 %v4500_v19, 16  ;;  %v494_v62 = vshll.u32 %v4523_v35, 16  ;;  %v5040_v53 = vrot.slane %v4523_v35, 1 }
 0x142   : > { %v2560_v18 = vadd.f32 %v2462_v14, %v1678_v27  ;;  %3049 = vmatmul.msk.bf16.gmra.mxu0 %vm1437_vm5, %v1398_v1  ;;  %v1110_v27 = vor.u32 %v1108_v60, %v4426_v48  ;;  %v2120_v60 = vshrl.u32 %v4474_v25, 16 }
 0x143   : > { %v4540_v1 = vrot.slane %v1112_v50, 1  ;;  %v2124_v50 = vshll.u32 %v4536_v11, 16 }
 0x144   : > { %v2596_v5 = vadd.f32 %v4337_v36, %v2560_v18  ;;  %v1588_v34 = vpop.f32.mrf.mxu3  ;;  %2281 = vrot.lane.b32.xlu1 %v2234_v31, %s3403_s20  ;;  %2184 = vrot.lane.b32.xlu2 %v2119_v2, %s3404_s21  ;;  %v4543_v31 = vld [vmem:[%s3449_s19 + $0x98] sm:$0xff]  ;;  %v492_v18 = vor.u32 %v490_v37, %v4433_v16  ;;  %v496_v2 = vrot.slane %v494_v62, 1  ;;  %v649_v16 = vsel %vm618_vm0, %v646_v51, %v5040_v53 }
 0x145   : > { %2269 = vrot.lane.b32.xlu0 %v2222_v59, %s3403_s20  ;;  %v2464_v14 = vpop.f32.mrf.mxu2  ;;  %v1679_v4 = vpop.f32.mrf.mxu1  ;;  %v2072_v37 = vshrl.u32 %v4429_v23, 16  ;;  %v2122_v51 = vor.u32 %v2120_v60, %v2118_v46  ;;  %v4569_v62 = vrot.slane %v2124_v50, 1  ;;  %v5043_v53 = vrot.slane %v4543_v31, 1 }
 0x146   : > { %v2628_v39 = vmax.f32 %v2596_v5, 0.0  ;;  %v2163_v44 = vpop.permute.xlu1 %2162  ;;  %v2076_v5 = vshll.u32 %v4543_v31, 16 }
 0x147   : > { %v613_v34 = vpop.permute.xlu0 %612  ;;  %v1510_v59 = vpop.f32.mrf.mxu0  ;;  %v2127_v50 = vsel %vm373_vm1, %v2122_v51, %v4569_v62 }
 0x148   : > { %2660 = vst.msk [vmem:[%s4367_s12 + $0x18] sm:$0xff] %vm716_vm3, %v2628_v39  ;;  %v760_v14 = vsel %vm716_vm3, %v3918_v21, %v613_v34  ;;  %v4550_v4 = vpop.permute.xlu2 %614  ;;  %v1115_v21 = vsel %vm373_vm1, %v1110_v27, %v4540_v1  ;;  %v4572_v39 = vld [vmem:[%s3449_s19 + $0x80] sm:$0xff]  ;;  %v2074_v27 = vor.u32 %v2072_v37, %v4455_v30  ;;  %v4576_v59 = vrot.slane %v2076_v5, 1 }
 0x149   : > { %v809_v48 = vsel %vm765_vm4, %v760_v14, %v4468_v17  ;;  %v497_v17 = vsel %vm373_vm1, %v492_v18, %v496_v2  ;;  %v5041_v14 = vrot.slane %v4500_v19, 1  ;;  %v2308_v18 = vsel %vm716_vm3, %v3956_v26, %v2163_v44 }
 0x14a   : > { %3090 = vmatmul.msk.bf16.gmra.mxu3 %vm1437_vm5, %v809_v48  ;;  %v498_v30 = vshrl.u32 %v4523_v35, 16  ;;  %v2079_v37 = vsel %vm373_vm1, %v2074_v27, %v4576_v59  ;;  %v5047_v26 = vrot.slane %v4395_v12, 1  ;;  %v1352_v27 = vsel %vm716_vm3, %v3977_v40, %v4509_v57 }
 0x14c   : > { %696 = vrot.lane.b32.xlu1 %v649_v16, %s3403_s20  ;;  %598 = vrot.lane.b32.xlu2 %v497_v17, %s3404_s21  ;;  %v1266_v44 = vsel %vm618_vm0, %v5047_v26, %v5041_v14  ;;  %v500_v51 = vor.u32 %v498_v30, %v496_v2  ;;  %v5042_v26 = vrot.slane %v4536_v11, 1  ;;  %v4617_v14 = vld [vmem:[%s3449_s19 + $0x8c] sm:$0xff] }
 0x14d   : > { %1216 = vrot.lane.b32.xlu0 %v1115_v21, %s3404_s21  ;;  %v4582_v60 = vpop.f32.mrf.mxu3  ;;  %v502_v21 = vshll.u32 %v4572_v39, 16 }
 0x14e   : > { %v589_v34 = vpop.permute.xlu1 %588 }
 0x14f   : > { %v2260_v48 = vpop.permute.xlu0 %2259 }
 0x150   : > { %v2356_v16 = vsel %vm765_vm4, %v2308_v18, %v2260_v48  ;;  %v2262_v46 = vpop.permute.xlu2 %2261  ;;  %v4598_v18 = vrot.slane %v502_v21, 1 }
 0x151   : > { %3253 = vmatmul.msk.bf16.gmra.mxu2 %vm1437_vm5, %v2356_v16 }
 0x152   : > { %v505_v57 = vsel %vm373_vm1, %v500_v51, %v4598_v18 }
 0x154   : > { %v2466_v5 = vpop.f32.mrf.mxu2  ;;  %2186 = vrot.lane.b32.xlu1 %v2127_v50, %s3404_s21  ;;  %1313 = vrot.lane.b32.xlu2 %v1266_v44, %s3403_s20  ;;  %v736_v50 = vsel %vm716_vm3, %v3996_v56, %v589_v34  ;;  %v2236_v56 = vsel %vm618_vm0, %v2233_v3, %v5042_v26  ;;  %v2224_v34 = vsel %vm618_vm0, %v2221_v28, %v5043_v53  ;;  %v5044_v28 = vrot.slane %v4572_v39, 1 }
 0x155   : > { %2174 = vrot.lane.b32.xlu0 %v2079_v37, %s3404_s21  ;;  %v1512_v17 = vpop.f32.mrf.mxu0 }
 0x156   : > { %v1681_v48 = vpop.f32.mrf.mxu1  ;;  %v1304_v16 = vpop.permute.xlu1 %1303 }
 0x157   : > { %v1682_v37 = vadd.f32 %v1681_v48, %v1512_v17  ;;  %v687_v2 = vpop.permute.xlu0 %686  ;;  %v1400_v30 = vsel %vm765_vm4, %v1352_v27, %v1304_v16  ;;  %v4630_v17 = vpop.f32.mrf.mxu3  ;;  %v1120_v48 = vshll.u32 %v4617_v14, 16 }
 0x158   : > { %3050 = vmatmul.msk.bf16.gmra.mxu0 %vm1437_vm5, %v1400_v30  ;;  %v785_v21 = vsel %vm765_vm4, %v736_v50, %v687_v2  ;;  %v4611_v44 = vpop.permute.xlu2 %688  ;;  %v1267_v50 = vrot.slane %v4617_v14, 1 }
 0x159   : > { %v2561_v40 = vadd.f32 %v2466_v5, %v1682_v37  ;;  %3078 = vmatmul.msk.bf16.gmra.mxu1 %vm1437_vm5, %v785_v21  ;;  %v1116_v5 = vshrl.u32 %v4500_v19, 16  ;;  %v762_v37 = vsel %vm716_vm3, %v4015_v22, %v4550_v4  ;;  %v4643_v21 = vld [vmem:[%s3449_s19 + $0xd0] sm:$0xff]  ;;  %v1122_v22 = vrot.slane %v1120_v48, 1 }
 0x15b   : > { %v2597_v51 = vadd.f32 %v4337_v36, %v2561_v40  ;;  %v1118_v40 = vor.u32 %v1116_v5, %v4540_v1  ;;  %v5048_v1 = vrot.slane %v4500_v19, 1 }
 0x15c   : > { %v2468_v27 = vpop.f32.mrf.mxu2  ;;  %600 = vrot.lane.b32.xlu1 %v505_v57, %s3404_s21  ;;  %2271 = vrot.lane.b32.xlu2 %v2224_v34, %s3403_s20 }
 0x15d   : > { %v2629_v3 = vmax.f32 %v2597_v51, 0.0  ;;  %2283 = vrot.lane.b32.xlu0 %v2236_v56, %s3403_s20  ;;  %v1514_v16 = vpop.f32.mrf.mxu0  ;;  %v1268_v5 = vsel %vm618_vm0, %v5048_v1, %v1267_v50  ;;  %v1123_v48 = vsel %vm373_vm1, %v1118_v40, %v1122_v22 }
 0x15e   : > { %v1683_v2 = vpop.f32.mrf.mxu1  ;;  %v713_v30 = vpop.permute.xlu1 %712 }
 0x15f   : > { %2661 = vst.msk [vmem:[%s4367_s12 + $0x20] sm:$0xff] %vm716_vm3, %v2629_v3  ;;  %v1684_v57 = vadd.f32 %v1683_v2, %v1514_v16  ;;  %v2165_v56 = vpop.permute.xlu0 %2164  ;;  %v811_v51 = vsel %vm765_vm4, %v762_v37, %v713_v30  ;;  %v5049_v3 = vrot.slane %v4523_v35, 1  ;;  %v4666_v16 = vld [vmem:[%s3449_s19 + $0xa0] sm:$0xff]  ;;  %v2080_v37 = vshrl.u32 %v4543_v31, 16 }
 0x160   : > { %v2310_v34 = vsel %vm716_vm3, %v4008_v61, %v2165_v56  ;;  %3091 = vmatmul.msk.bf16.gmra.mxu3 %vm1437_vm5, %v811_v51  ;;  %v4652_v26 = vpop.permute.xlu2 %2166  ;;  %v5045_v51 = vrot.slane %v4666_v16, 1 }
 0x161   : > { %v2562_v4 = vadd.f32 %v2468_v27, %v1684_v57  ;;  %v2358_v53 = vsel %vm765_vm4, %v2310_v34, %v2262_v46  ;;  %v651_v61 = vsel %vm618_vm0, %v5049_v3, %v5044_v28  ;;  %v2128_v27 = vshrl.u32 %v4536_v11, 16  ;;  %v4679_v34 = vld [vmem:[%s3449_s19 + $0x94] sm:$0xff] }
 0x162   : > { %3254 = vmatmul.msk.bf16.gmra.mxu2 %vm1437_vm5, %v2358_v53  ;;  %v2132_v46 = vshll.u32 %v4643_v21, 16  ;;  %v2084_v57 = vshll.u32 %v4666_v16, 16 }
 0x163   : > { %v2598_v2 = vadd.f32 %v4337_v36, %v2562_v4  ;;  %v1595_v30 = vpop.f32.mrf.mxu3  ;;  %v2130_v1 = vor.u32 %v2128_v27, %v4569_v62  ;;  %v4686_v4 = vld [vmem:[%s3449_s19 + $0x88] sm:$0xff]  ;;  %v5050_v62 = vrot.slane %v4543_v31, 1 }
 0x164   : > { %1315 = vrot.lane.b32.xlu1 %v1268_v5, %s3403_s20  ;;  %1218 = vrot.lane.b32.xlu2 %v1123_v48, %s3404_s21  ;;  %v4683_v3 = vrot.slane %v2132_v46, 1  ;;  %v2082_v5 = vor.u32 %v2080_v37, %v4576_v59  ;;  %v2086_v28 = vrot.slane %v2084_v57, 1  ;;  %v1124_v59 = vshrl.u32 %v4617_v14, 16 }
 0x165   : > { %v2630_v56 = vmax.f32 %v2598_v2, 0.0  ;;  %698 = vrot.lane.b32.xlu0 %v651_v61, %s3403_s20  ;;  %v2471_v53 = vpop.f32.mrf.mxu2  ;;  %v2226_v27 = vsel %vm618_vm0, %v5050_v62, %v5045_v51  ;;  %v1128_v46 = vshll.u32 %v4679_v34, 16  ;;  %v506_v37 = vshrl.u32 %v4572_v39, 16 }
 0x166   : > { %v1209_v40 = vpop.permute.xlu1 %1208  ;;  %v510_v57 = vshll.u32 %v4686_v4, 16  ;;  %v5046_v62 = vrot.slane %v4643_v21, 1 }
 0x167   : > { %2662 = vst.msk [vmem:[%s4367_s12 + $0x28] sm:$0xff] %vm716_vm3, %v2630_v56  ;;  %v591_v2 = vpop.permute.xlu0 %590  ;;  %v1686_v61 = vpop.f32.mrf.mxu1  ;;  %v1126_v56 = vor.u32 %v1124_v59, %v1122_v22  ;;  %v2088_v59 = vshrl.u32 %v4666_v16, 16 }
 0x168   : > { %v738_v30 = vsel %vm716_vm3, %v4037_v55, %v591_v2  ;;  %v4693_v53 = vpop.permute.xlu2 %592  ;;  %v2135_v55 = vsel %vm373_vm1, %v2130_v1, %v4683_v3  ;;  %v4712_v2 = vrot.slane %v1128_v46, 1  ;;  %v508_v1 = vor.u32 %v506_v37, %v4598_v18  ;;  %v3141_v46 = vld [vmem:[%s3449_s19 + $0xd8] sm:$0xf] }
 0x169   : > { %v787_v48 = vsel %vm765_vm4, %v738_v30, %v4611_v44  ;;  %v2087_v44 = vsel %vm373_vm1, %v2082_v5, %v2086_v28  ;;  %v1354_v5 = vsel %vm716_vm3, %v4076_v29, %v1209_v40  ;;  %v5051_v37 = vrot.slane %v4536_v11, 1 }
 0x16a   : > { %3079 = vmatmul.msk.bf16.gmra.mxu1 %vm1437_vm5, %v787_v48  ;;  %v4716_v48 = vrot.slane %v510_v57, 1  ;;  %v1131_v22 = vsel %vm373_vm1, %v1126_v56, %v4712_v2  ;;  %v2090_v56 = vor.u32 %v2088_v59, %v2086_v28 }
 0x16b   : > { %v2238_v29 = vsel %vm618_vm0, %v5051_v37, %v5046_v62  ;;  %v4734_v57 = vpop.f32.mrf.mxu3  ;;  %v652_v37 = vrot.slane %v4686_v4, 1 }
 0x16c   : > { %2273 = vrot.lane.b32.xlu1 %v2226_v27, %s3403_s20  ;;  %2176 = vrot.lane.b32.xlu2 %v2087_v44, %s3404_s21  ;;  %v513_v18 = vsel %vm373_vm1, %v508_v1, %v4716_v48  ;;  %v1946_v44 = vunpack.c.l.b16 %v3141_v46  ;;  %v2312_v1 = vsel %vm716_vm3, %v4096_v20, %v4652_v26  ;;  %v2095_v26 = vsel %vm373_vm1, %v2090_v56, %v4259_v9 }
 0x16d   : > { %2188 = vrot.lane.b32.xlu0 %v2135_v55, %s3404_s21  ;;  %v2472_v40 = vpop.f32.mrf.mxu2 }
 0x16e   : > { %v1517_v61 = vpop.f32.mrf.mxu0  ;;  %v617_v30 = vpop.permute.xlu1 %616  ;;  %v1947_v59 = vpack.c.b16 %v1946_v44, %v1946_v44 }
 0x16f   : > { %v1306_v27 = vpop.permute.xlu0 %1305  ;;  %v1687_v61 = vpop.f32.mrf.mxu1 }
 0x170   : > { %v1402_v55 = vsel %vm765_vm4, %v1354_v5, %v1306_v27  ;;  %v1308_v51 = vpop.permute.xlu2 %1307  ;;  %v2140_v44 = vshll.u32 %v1947_v59, 16 }
 0x171   : > { %3051 = vmatmul.msk.bf16.gmra.mxu0 %vm1437_vm5, %v1402_v55  ;;  %v1269_v55 = vrot.slane %v4679_v34, 1 }
 0x174   : > { %1220 = vrot.lane.b32.xlu1 %v1131_v22, %s3404_s21  ;;  %2285 = vrot.lane.b32.xlu2 %v2238_v29, %s3403_s20  ;;  %v764_v22 = vsel %vm716_vm3, %v4106_v24, %v617_v30  ;;  %v1270_v24 = vsel %vm618_vm0, %v1267_v50, %v1269_v55  ;;  %v5052_v30 = vrot.slane %v4572_v39, 1 }
 0x175   : > { %602 = vrot.lane.b32.xlu0 %v513_v18, %s3404_s21 }
 0x176   : > { %v1518_v5 = vpop.f32.mrf.mxu0  ;;  %v2264_v27 = vpop.permute.xlu1 %2263 }
 0x177   : > { %v1688_v46 = vadd.f32 %v1687_v61, %v1518_v5  ;;  %v715_v62 = vpop.permute.xlu0 %714  ;;  %v2360_v18 = vsel %vm765_vm4, %v2312_v1, %v2264_v27  ;;  %v2239_v5 = vrot.slane %v1947_v59, 1  ;;  %v740_v27 = vsel %vm716_vm3, %v4134_v45, %v4693_v53 }
 0x178   : > { %v813_v28 = vsel %vm765_vm4, %v764_v22, %v715_v62  ;;  %3255 = vmatmul.msk.bf16.gmra.mxu2 %vm1437_vm5, %v2360_v18  ;;  %v2266_v29 = vpop.permute.xlu2 %2265  ;;  %v653_v62 = vsel %vm618_vm0, %v5052_v30, %v652_v37  ;;  %v2142_v18 = vrot.slane %v2140_v44, 1  ;;  %v3377_v30 = vld [vmem:[%s3449_s19 + $0x64] sm:$0xff]  ;;  %v5053_v45 = vrot.slane %v4643_v21, 1 }
 0x179   : > { %v2563_v20 = vadd.f32 %v2472_v40, %v1688_v46  ;;  %3092 = vmatmul.msk.bf16.gmra.mxu3 %vm1437_vm5, %v813_v28  ;;  %v2136_v40 = vshrl.u32 %v4643_v21, 16  ;;  %v5054_v53 = vrot.slane %v4228_v38, 1 }
 0x17b   : > { %v2599_v61 = vadd.f32 %v4337_v36, %v2563_v20  ;;  %v2475_v1 = vpop.f32.mrf.mxu2  ;;  %v2138_v46 = vor.u32 %v2136_v40, %v4683_v3  ;;  %v2240_v3 = vsel %vm618_vm0, %v5053_v45, %v2239_v5  ;;  %v5055_v40 = vrot.slane %v4666_v16, 1 }
 0x17c   : > { %v4764_v9 = vpop.f32.mrf.mxu3  ;;  %2178 = vrot.lane.b32.xlu1 %v2095_v26, %s3404_s21  ;;  %700 = vrot.lane.b32.xlu2 %v653_v62, %s3403_s20 }
 0x17d   : > { %v2631_v56 = vmax.f32 %v2599_v61, 0.0  ;;  %1317 = vrot.lane.b32.xlu0 %v1270_v24, %s3403_s20  ;;  %v1690_v50 = vpop.f32.mrf.mxu1  ;;  %v2228_v44 = vsel %vm618_vm0, %v5055_v40, %v5054_v53 }
 0x17e   : > { %v691_v22 = vpop.permute.xlu1 %690 }
 0x17f   : > { %2663 = vst.msk [vmem:[%s4367_s12 + $0x30] sm:$0xff] %vm716_vm3, %v2631_v56  ;;  %v1211_v28 = vpop.permute.xlu0 %1210  ;;  %v1521_v20 = vpop.f32.mrf.mxu0  ;;  %v789_v26 = vsel %vm765_vm4, %v740_v27, %v691_v22  ;;  %v2143_v27 = vsel %vm373_vm1, %v2138_v46, %v2142_v18 }
 0x180   : > { %v1356_v24 = vsel %vm716_vm3, %v3377_v30, %v1211_v28  ;;  %v1691_v59 = vadd.f32 %v1690_v50, %v1521_v20  ;;  %3080 = vmatmul.msk.bf16.gmra.mxu1 %vm1437_vm5, %v789_v26  ;;  %v1213_v62 = vpop.permute.xlu2 %1212  ;;  %v1132_v50 = vshrl.u32 %v4679_v34, 16 }
 0x181   : > { %v1404_v61 = vsel %vm765_vm4, %v1356_v24, %v1308_v51  ;;  %v514_v51 = vshrl.u32 %v4686_v4, 16 }
 0x182   : > { %v2564_v56 = vadd.f32 %v2475_v1, %v1691_v59  ;;  %3052 = vmatmul.msk.bf16.gmra.mxu0 %vm1437_vm5, %v1404_v61  ;;  %v1134_v30 = vor.u32 %v1132_v50, %v4712_v2 }
 0x183   : > { %v2477_v22 = vpop.f32.mrf.mxu2  ;;  %v516_v24 = vor.u32 %v514_v51, %v4716_v48 }
 0x184   : > { %v2600_v28 = vadd.f32 %v4337_v36, %v2564_v56  ;;  %v1601_v5 = vpop.f32.mrf.mxu3  ;;  %2287 = vrot.lane.b32.xlu1 %v2240_v3, %s3403_s20  ;;  %2190 = vrot.lane.b32.xlu2 %v2143_v27, %s3404_s21  ;;  %v5056_v3 = vrot.slane %v3755_v63, 1  ;;  %v1139_v2 = vsel %vm373_vm1, %v1134_v30, %v3480_v13  ;;  %v5057_v13 = vrot.slane %v3452_v0, 1 }
 0x185   : > { %2275 = vrot.lane.b32.xlu0 %v2228_v44, %s3403_s20  ;;  %v1692_v20 = vpop.f32.mrf.mxu1  ;;  %v521_v48 = vsel %vm373_vm1, %v516_v24, %v3784_v41 }
 0x186   : > { %v2632_v1 = vmax.f32 %v2600_v28, 0.0  ;;  %v2181_v26 = vpop.permute.xlu1 %2180  ;;  %v655_v53 = vsel %vm618_vm0, %v652_v37, %v5056_v3  ;;  %v1272_v41 = vsel %vm618_vm0, %v1269_v55, %v5057_v13 }
 0x187   : > { %v2169_v46 = vpop.permute.xlu0 %2168  ;;  %v1523_v18 = vpop.f32.mrf.mxu0  ;;  %v2326_v63 = vsel %vm716_vm3, %v4228_v38, %v2181_v26  ;;  %v1358_v38 = vsel %vm716_vm3, %v4208_v33, %v1213_v62 }
 0x188   : > { %2664 = vst.msk [vmem:[%s4367_s12 + $0x38] sm:$0xff] %vm716_vm3, %v2632_v1  ;;  %v2314_v59 = vsel %vm716_vm3, %v4189_v42, %v2169_v46  ;;  %v2171_v61 = vpop.permute.xlu2 %2170 }
 0x189   : > { %v2362_v45 = vsel %vm765_vm4, %v2314_v59, %v2266_v29  ;;  %v2316_v24 = vsel %vm716_vm3, %v4248_v15, %v2171_v61 }
 0x18a   : > { %3256 = vmatmul.msk.bf16.gmra.mxu2 %vm1437_vm5, %v2362_v45 }
 0x18c   : > { %702 = vrot.lane.b32.xlu1 %v655_v53, %s3403_s20  ;;  %604 = vrot.lane.b32.xlu2 %v521_v48, %s3404_s21 }
 0x18d   : > { %1222 = vrot.lane.b32.xlu0 %v1139_v2, %s3404_s21  ;;  %v4819_v44 = vpop.f32.mrf.mxu3 }
 0x18e   : > { %v595_v42 = vpop.permute.xlu1 %594 }
 0x18f   : > { %v2278_v29 = vpop.permute.xlu0 %2277  ;;  %v742_v22 = vsel %vm716_vm3, %v4218_v47, %v595_v42 }
 0x190   : > { %v2374_v37 = vsel %vm765_vm4, %v2326_v63, %v2278_v29  ;;  %v2280_v40 = vpop.permute.xlu2 %2279 }
 0x191   : > { %3262 = vmatmul.msk.bf16.vlgmr.msra.gmra.mxu3 %vm1437_vm5, %v2374_v37 }
 0x194   : > { %v2479_v56 = vpop.f32.mrf.mxu2  ;;  %1319 = vrot.lane.b32.xlu2 %v1272_v41, %s3403_s20 }
 0x195   : > { %v1525_v50 = vpop.f32.mrf.mxu0  ;;  %v4836_v26 = vpop.f32.mrf.mxu3 }
 0x196   : > { %v1694_v27 = vpop.f32.mrf.mxu1  ;;  %v1310_v51 = vpop.permute.xlu1 %1309 }
 0x197   : > { %v1695_v28 = vadd.f32 %v1694_v27, %v1525_v50  ;;  %v1406_v0 = vsel %vm765_vm4, %v1358_v38, %v1310_v51  ;;  %v693_v5 = vpop.permute.xlu0 %692 }
 0x198   : > { %v791_v20 = vsel %vm765_vm4, %v742_v22, %v693_v5  ;;  %3053 = vmatmul.msk.bf16.gmra.mxu0 %vm1437_vm5, %v1406_v0  ;;  %v695_v55 = vpop.permute.xlu2 %694 }
 0x199   : > { %v2565_v1 = vadd.f32 %v2479_v56, %v1695_v28  ;;  %3081 = vmatmul.msk.bf16.gmra.mxu1 %vm1437_vm5, %v791_v20 }
 0x19b   : > { %v2601_v33 = vadd.f32 %v4337_v36, %v2565_v1 }
 0x19c   : > { %v2481_v62 = vpop.f32.mrf.mxu2 }
 0x19d   : > { %v2633_v30 = vmax.f32 %v2601_v33, 0.0  ;;  %v1527_v47 = vpop.f32.mrf.mxu0 }
 0x19e   : > { %v1696_v46 = vpop.f32.mrf.mxu1  ;;  %v2268_v18 = vpop.permute.xlu1 %2267 }
 0x19f   : > { %2665 = vst.msk [vmem:[%s4367_s12 + $0x40] sm:$0xff] %vm716_vm3, %v2633_v30  ;;  %v1697_v59 = vadd.f32 %v1696_v46, %v1527_v47  ;;  %v2364_v45 = vsel %vm765_vm4, %v2316_v24, %v2268_v18  ;;  %v2183_v3 = vpop.permute.xlu0 %2182 }
 0x1a0   : > { %v2328_v53 = vsel %vm716_vm3, %v4240_v7, %v2183_v3  ;;  %3257 = vmatmul.msk.bf16.gmra.mxu2 %vm1437_vm5, %v2364_v45  ;;  %v2185_v2 = vpop.permute.xlu2 %2184 }
 0x1a1   : > { %v2566_v48 = vadd.f32 %v2481_v62, %v1697_v59  ;;  %v2376_v42 = vsel %vm765_vm4, %v2328_v53, %v2280_v40  ;;  %v2330_v20 = vsel %vm716_vm3, %v4345_v32, %v2185_v2 }
 0x1a2   : > { %3263 = vmatmul.msk.bf16.gmra.mxu3 %vm1437_vm5, %v2376_v42 }
 0x1a3   : > { %v2602_v15 = vadd.f32 %v4337_v36, %v2566_v48  ;;  %v1751_v61 = vpop.f32.mrf.mxu3 }
 0x1a5   : > { %v2634_v63 = vmax.f32 %v2602_v15, 0.0  ;;  %v2484_v29 = vpop.f32.mrf.mxu2 }
 0x1a6   : > { %v1215_v37 = vpop.permute.xlu1 %1214 }
 0x1a7   : > { %2666 = vst.msk [vmem:[%s4367_s12 + $0x48] sm:$0xff] %vm716_vm3, %v2634_v63  ;;  %v597_v13 = vpop.permute.xlu0 %596  ;;  %v1699_v41 = vpop.f32.mrf.mxu1  ;;  %v1360_v27 = vsel %vm716_vm3, %v4320_v8, %v1215_v37 }
 0x1a8   : > { %v744_v7 = vsel %vm716_vm3, %v4275_v58, %v597_v13  ;;  %v599_v56 = vpop.permute.xlu2 %598 }
 0x1a9   : > { %v793_v50 = vsel %vm765_vm4, %v744_v7, %v695_v55  ;;  %v746_v3 = vsel %vm716_vm3, %v4399_v49, %v599_v56 }
 0x1aa   : > { %3082 = vmatmul.msk.bf16.gmra.mxu1 %vm1437_vm5, %v793_v50 }
 0x1ab   : > { %v4860_v5 = vpop.f32.mrf.mxu3 }
 0x1ad   : > { %v2485_v0 = vpop.f32.mrf.mxu2 }
 0x1ae   : > { %v1530_v40 = vpop.f32.mrf.mxu0  ;;  %v2173_v38 = vpop.permute.xlu1 %2172 }
 0x1af   : > { %v1312_v51 = vpop.permute.xlu0 %1311  ;;  %v1700_v58 = vpop.f32.mrf.mxu1  ;;  %v2318_v33 = vsel %vm716_vm3, %v4362_v52, %v2173_v38 }
 0x1b0   : > { %v1408_v22 = vsel %vm765_vm4, %v1360_v27, %v1312_v51  ;;  %v1314_v28 = vpop.permute.xlu2 %1313 }
 0x1b1   : > { %3054 = vmatmul.msk.bf16.gmra.mxu0 %vm1437_vm5, %v1408_v22 }
 0x1b6   : > { %v1531_v55 = vpop.f32.mrf.mxu0  ;;  %v2282_v1 = vpop.permute.xlu1 %2281 }
 0x1b7   : > { %v1701_v8 = vadd.f32 %v1700_v58, %v1531_v55  ;;  %v2378_v62 = vsel %vm765_vm4, %v2330_v20, %v2282_v1  ;;  %v2270_v30 = vpop.permute.xlu0 %2269 }
 0x1b8   : > { %v2366_v47 = vsel %vm765_vm4, %v2318_v33, %v2270_v30  ;;  %3264 = vmatmul.msk.bf16.gmra.mxu3 %vm1437_vm5, %v2378_v62  ;;  %v2272_v24 = vpop.permute.xlu2 %2271 }
 0x1b9   : > { %v2567_v46 = vadd.f32 %v2485_v0, %v1701_v8  ;;  %3258 = vmatmul.msk.bf16.gmra.mxu2 %vm1437_vm5, %v2366_v47 }
 0x1bb   : > { %v2603_v32 = vadd.f32 %v4337_v36, %v2567_v46  ;;  %v2488_v18 = vpop.f32.mrf.mxu2 }
 0x1bc   : > { %v4871_v59 = vpop.f32.mrf.mxu3 }
 0x1bd   : > { %v2635_v45 = vmax.f32 %v2603_v32, 0.0  ;;  %v1703_v52 = vpop.f32.mrf.mxu1 }
 0x1be   : > { %v697_v53 = vpop.permute.xlu1 %696 }
 0x1bf   : > { %2667 = vst.msk [vmem:[%s4367_s12 + $0x50] sm:$0xff] %vm716_vm3, %v2635_v45  ;;  %v795_v2 = vsel %vm765_vm4, %v746_v3, %v697_v53  ;;  %v1217_v48 = vpop.permute.xlu0 %1216  ;;  %v1534_v42 = vpop.f32.mrf.mxu0 }
 0x1c0   : > { %v1362_v15 = vsel %vm716_vm3, %v4395_v12, %v1217_v48  ;;  %v1704_v61 = vadd.f32 %v1703_v52, %v1534_v42  ;;  %3083 = vmatmul.msk.bf16.gmra.mxu1 %vm1437_vm5, %v795_v2  ;;  %v1219_v29 = vpop.permute.xlu2 %1218 }
 0x1c1   : > { %v1410_v63 = vsel %vm765_vm4, %v1362_v15, %v1314_v28 }
 0x1c2   : > { %v2568_v37 = vadd.f32 %v2488_v18, %v1704_v61  ;;  %3055 = vmatmul.msk.bf16.gmra.mxu0 %vm1437_vm5, %v1410_v63 }
 0x1c3   : > { %v2490_v49 = vpop.f32.mrf.mxu2 }
 0x1c4   : > { %v2604_v13 = vadd.f32 %v4337_v36, %v2568_v37  ;;  %v1757_v41 = vpop.f32.mrf.mxu3 }
 0x1c5   : > { %v1705_v7 = vpop.f32.mrf.mxu1 }
 0x1c6   : > { %v2636_v56 = vmax.f32 %v2604_v13, 0.0  ;;  %v2187_v50 = vpop.permute.xlu1 %2186 }
 0x1c7   : > { %v2175_v40 = vpop.permute.xlu0 %2174  ;;  %v1536_v38 = vpop.f32.mrf.mxu0  ;;  %v2332_v36 = vsel %vm716_vm3, %v4474_v25, %v2187_v50 }
 0x1c8   : > { %2668 = vst.msk [vmem:[%s4367_s12 + $0x58] sm:$0xff] %vm716_vm3, %v2636_v56  ;;  %v2320_v12 = vsel %vm716_vm3, %v4429_v23, %v2175_v40  ;;  %v2177_v51 = vpop.permute.xlu2 %2176  ;;  %v1364_v23 = vsel %vm716_vm3, %v4500_v19, %v1219_v29  ;;  %v4909_v19 = vld [vmem:[%s5034_s2] ss:$0 sm:$0xff] }
 0x1c9   : > { %v2368_v27 = vsel %vm765_vm4, %v2320_v12, %v2272_v24  ;;  %v2322_v3 = vsel %vm716_vm3, %v4543_v31, %v2177_v51 }
 0x1ca   : > { %3259 = vmatmul.msk.bf16.gmra.mxu2 %vm1437_vm5, %v2368_v27 }
 0x1cd   : > { %v4893_v58 = vpop.f32.mrf.mxu3 }
 0x1ce   : > { %v601_v22 = vpop.permute.xlu1 %600 }
 0x1cf   : > { %v2284_v28 = vpop.permute.xlu0 %2283  ;;  %v748_v62 = vsel %vm716_vm3, %v4523_v35, %v601_v22 }
 0x1d0   : > { %v2380_v0 = vsel %vm765_vm4, %v2332_v36, %v2284_v28  ;;  %v2286_v1 = vpop.permute.xlu2 %2285 }
 0x1d1   : > { %3265 = vmatmul.msk.bf16.gmra.mxu3 %vm1437_vm5, %v2380_v0 }
 0x1d4   : > { %v2492_v20 = vpop.f32.mrf.mxu2 }
 0x1d5   : > { %v1538_v55 = vpop.f32.mrf.mxu0  ;;  %v4904_v32 = vpop.f32.mrf.mxu3 }
 0x1d6   : > { %v1707_v33 = vpop.f32.mrf.mxu1  ;;  %v1316_v8 = vpop.permute.xlu1 %1315 }
 0x1d7   : > { %v1708_v30 = vadd.f32 %v1707_v33, %v1538_v55  ;;  %v1412_v25 = vsel %vm765_vm4, %v1364_v23, %v1316_v8  ;;  %v699_v47 = vpop.permute.xlu0 %698 }
 0x1d8   : > { %v797_v24 = vsel %vm765_vm4, %v748_v62, %v699_v47  ;;  %3056 = vmatmul.msk.bf16.gmra.mxu0 %vm1437_vm5, %v1412_v25  ;;  %v701_v63 = vpop.permute.xlu2 %700 }
 0x1d9   : > { %v2569_v46 = vadd.f32 %v2492_v20, %v1708_v30  ;;  %3084 = vmatmul.msk.bf16.gmra.mxu1 %vm1437_vm5, %v797_v24 }
 0x1db   : > { %v2605_v35 = vadd.f32 %v4909_v19, %v2569_v46 }
 0x1dc   : > { %v2494_v18 = vpop.f32.mrf.mxu2 }
 0x1dd   : > { %v2637_v45 = vmax.f32 %v2605_v35, 0.0  ;;  %v1540_v52 = vpop.f32.mrf.mxu0 }
 0x1de   : > { %v1709_v53 = vpop.f32.mrf.mxu1  ;;  %v2274_v2 = vpop.permute.xlu1 %2273 }
 0x1df   : > { %2669 = vst.msk [vmem:[%s4367_s12 + $0x60] sm:$0xff] %vm716_vm3, %v2637_v45  ;;  %v1710_v48 = vadd.f32 %v1709_v53, %v1540_v52  ;;  %v2370_v42 = vsel %vm765_vm4, %v2322_v3, %v2274_v2  ;;  %v2189_v15 = vpop.permute.xlu0 %2188 }
 0x1e0   : > { %v2334_v61 = vsel %vm716_vm3, %v4536_v11, %v2189_v15  ;;  %3260 = vmatmul.msk.bf16.gmra.mxu2 %vm1437_vm5, %v2370_v42  ;;  %v2191_v38 = vpop.permute.xlu2 %2190 }
 0x1e1   : > { %v2570_v29 = vadd.f32 %v2494_v18, %v1710_v48  ;;  %v2382_v37 = vsel %vm765_vm4, %v2334_v61, %v2286_v1  ;;  %v2336_v55 = vsel %vm716_vm3, %v4643_v21, %v2191_v38 }
 0x1e2   : > { %3266 = vmatmul.msk.bf16.gmra.mxu3 %vm1437_vm5, %v2382_v37 }
 0x1e3   : > { %v2606_v31 = vadd.f32 %v4909_v19, %v2570_v29  ;;  %v1764_v49 = vpop.f32.mrf.mxu3 }
 0x1e5   : > { %v2638_v13 = vmax.f32 %v2606_v31, 0.0  ;;  %v2497_v41 = vpop.f32.mrf.mxu2 }
 0x1e6   : > { %v1221_v7 = vpop.permute.xlu1 %1220 }
 0x1e7   : > { %2670 = vst.msk [vmem:[%s4367_s12 + $0x68] sm:$0xff] %vm716_vm3, %v2638_v13  ;;  %v603_v56 = vpop.permute.xlu0 %602  ;;  %v1712_v50 = vpop.f32.mrf.mxu1  ;;  %v1366_v51 = vsel %vm716_vm3, %v4617_v14, %v1221_v7 }
 0x1e8   : > { %v750_v11 = vsel %vm716_vm3, %v4572_v39, %v603_v56  ;;  %v605_v20 = vpop.permute.xlu2 %604 }
 0x1e9   : > { %v799_v40 = vsel %vm765_vm4, %v750_v11, %v701_v63 }
 0x1ea   : > { %3085 = vmatmul.msk.bf16.gmra.mxu1 %vm1437_vm5, %v799_v40 }
 0x1eb   : > { %v4933_v0 = vpop.f32.mrf.mxu3 }
 0x1ed   : > { %v2498_v28 = vpop.f32.mrf.mxu2 }
 0x1ee   : > { %v1543_v12 = vpop.f32.mrf.mxu0  ;;  %v2179_v27 = vpop.permute.xlu1 %2178 }
 0x1ef   : > { %v1318_v22 = vpop.permute.xlu0 %1317  ;;  %v1713_v39 = vpop.f32.mrf.mxu1  ;;  %v2324_v33 = vsel %vm716_vm3, %v4666_v16, %v2179_v27  ;;  %v752_v16 = vsel %vm716_vm3, %v4686_v4, %v605_v20  ;;  %v1749_v12 = vadd.f32 %v4836_v26, %v4341_v6 }
 0x1f0   : > { %v1414_v36 = vsel %vm765_vm4, %v1366_v51, %v1318_v22  ;;  %v1320_v45 = vpop.permute.xlu2 %1319 }
 0x1f1   : > { %3057 = vmatmul.msk.bf16.gmra.mxu0 %vm1437_vm5, %v1414_v36 }
 0x1f6   : > { %v1544_v1 = vpop.f32.mrf.mxu0  ;;  %v2288_v23 = vpop.permute.xlu1 %2287 }
 0x1f7   : > { %v1714_v14 = vadd.f32 %v1713_v39, %v1544_v1  ;;  %v2384_v8 = vsel %vm765_vm4, %v2336_v55, %v2288_v23  ;;  %v2276_v62 = vpop.permute.xlu0 %2275 }
 0x1f8   : > { %v2372_v30 = vsel %vm765_vm4, %v2324_v33, %v2276_v62  ;;  %3267 = vmatmul.msk.bf16.gmra.mxu3 %vm1437_vm5, %v2384_v8  ;;  %v1753_v8 = vadd.f32 %v4860_v5, %v4451_v10 }
 0x1f9   : > { %v2571_v25 = vadd.f32 %v2498_v28, %v1714_v14  ;;  %3261 = vmatmul.msk.bf16.gmra.mxu2 %vm1437_vm5, %v2372_v30 }
 0x1fb   : > { %v2607_v47 = vadd.f32 %v4909_v19, %v2571_v25  ;;  %v2501_v21 = vpop.f32.mrf.mxu2 }
 0x1fc   : > { %v4944_v24 = vpop.f32.mrf.mxu3 }
 0x1fd   : > { %v2639_v46 = vmax.f32 %v2607_v47, 0.0  ;;  %v1716_v35 = vpop.f32.mrf.mxu1 }
 0x1fe   : > { %v703_v18 = vpop.permute.xlu1 %702 }
 0x1ff   : > { %2671 = vst.msk [vmem:[%s4367_s12 + $0x70] sm:$0xff] %vm716_vm3, %v2639_v46  ;;  %v801_v52 = vsel %vm765_vm4, %v752_v16, %v703_v18  ;;  %v1223_v3 = vpop.permute.xlu0 %1222  ;;  %v1547_v53 = vpop.f32.mrf.mxu0 }
 0x200   : > { %v1368_v2 = vsel %vm716_vm3, %v4679_v34, %v1223_v3  ;;  %v1717_v48 = vadd.f32 %v1716_v35, %v1547_v53  ;;  %3086 = vmatmul.msk.bf16.gmra.mxu1 %vm1437_vm5, %v801_v52  ;;  %v1747_v34 = vadd.f32 %v4819_v44, %v4298_v43  ;;  %v1756_v52 = vadd.f32 %v4871_v59, %v4488_v54 }
 0x201   : > { %v1416_v42 = vsel %vm765_vm4, %v1368_v2, %v1320_v45 }
 0x202   : > { %v2572_v15 = vadd.f32 %v2501_v21, %v1717_v48  ;;  %3058 = vmatmul.msk.bf16.gmra.mxu0 %vm1437_vm5, %v1416_v42 }
 0x203   : > { %v2503_v4 = vpop.f32.mrf.mxu2 }
 0x204   : > { %v2608_v61 = vadd.f32 %v4909_v19, %v2572_v15  ;;  %v1770_v63 = vpop.f32.mrf.mxu3 }
 0x205   : > { %v1718_v29 = vpop.f32.mrf.mxu1 }
 0x206   : > { %v2640_v37 = vmax.f32 %v2608_v61, 0.0 }
 0x207   : > { %v1549_v31 = vpop.f32.mrf.mxu0 }
 0x208   : > { %2672 = vst.msk [vmem:[%s4367_s12 + $0x78] sm:$0xff] %vm716_vm3, %v2640_v37 }
 0x20d   : > { %v2505_v49 = vpop.f32.mrf.mxu2 }
 0x214   : > { %v2531_v13 = vpop.f32.mrf.mxu3 }
 0x215   : > { %v2581_v41 = vadd.f32 %v2531_v13, %v1747_v34  ;;  %v1551_v7 = vpop.f32.mrf.mxu0  ;;  %v2507_v27 = vpop.f32.mrf.mxu2  ;;  %v1760_v13 = vadd.f32 %v4893_v58, %v4582_v60 }
 0x216   : > { %v1720_v56 = vpop.f32.mrf.mxu1 }
 0x217   : > { %v2617_v50 = vadd.f32 %v4909_v19, %v2581_v41  ;;  %v1721_v11 = vadd.f32 %v1720_v56, %v1551_v7 }
 0x219   : > { %v2649_v40 = vmax.f32 %v2617_v50, 0.0  ;;  %v2573_v38 = vadd.f32 %v2505_v49, %v1721_v11 }
 0x21b   : > { %2681 = vst.msk [vmem:[%s4367_s12 + $0xc0] sm:$0xff] %vm716_vm3, %v2649_v40  ;;  %v2609_v51 = vadd.f32 %v4909_v19, %v2573_v38 }
 0x21c   : > { %v2533_v43 = vpop.f32.mrf.mxu3 }
 0x21d   : > { %v2641_v44 = vmax.f32 %v2609_v51, 0.0  ;;  %v2582_v22 = vadd.f32 %v2533_v43, %v1749_v12  ;;  %v1553_v36 = vpop.f32.mrf.mxu0 }
 0x21e   : > { %v1722_v28 = vpop.f32.mrf.mxu1 }
 0x21f   : > { %2673 = vst.msk [vmem:[%s4367_s12 + $0x80] sm:$0xff] %vm716_vm3, %v2641_v44  ;;  %v2618_v20 = vadd.f32 %v4909_v19, %v2582_v22  ;;  %v1723_v39 = vadd.f32 %v1722_v28, %v1553_v36 }
 0x221   : > { %v2650_v55 = vmax.f32 %v2618_v20, 0.0  ;;  %v2574_v1 = vadd.f32 %v2507_v27, %v1723_v39  ;;  %v1762_v27 = vadd.f32 %v4904_v32, %v4630_v17 }
 0x223   : > { %2682 = vst.msk [vmem:[%s4367_s12 + $0xc8] sm:$0xff] %vm716_vm3, %v2650_v55  ;;  %v2610_v6 = vadd.f32 %v4909_v19, %v2574_v1  ;;  %v2510_v26 = vpop.f32.mrf.mxu2 }
 0x225   : > { %v2642_v23 = vmax.f32 %v2610_v6, 0.0  ;;  %v2536_v33 = vpop.f32.mrf.mxu3 }
 0x227   : > { %2674 = vst.msk [vmem:[%s4367_s12 + $0x88] sm:$0xff] %vm716_vm3, %v2642_v23  ;;  %v1725_v14 = vpop.f32.mrf.mxu1  ;;  %v1766_v23 = vadd.f32 %v4933_v0, %v4734_v57 }
 0x22b   : > { %v2511_v46 = vpop.f32.mrf.mxu2 }
 0x22d   : > { %v2537_v62 = vpop.f32.mrf.mxu3 }
 0x22e   : > { %v2583_v30 = vadd.f32 %v2537_v62, %v1753_v8  ;;  %v1556_v25 = vpop.f32.mrf.mxu0 }
 0x22f   : > { %v1726_v35 = vpop.f32.mrf.mxu1 }
 0x230   : > { %v2619_v47 = vadd.f32 %v4909_v19, %v2583_v30 }
 0x232   : > { %v2651_v21 = vmax.f32 %v2619_v47, 0.0 }
 0x234   : > { %2683 = vst.msk [vmem:[%s4367_s12 + $0xd0] sm:$0xff] %vm716_vm3, %v2651_v21 }
 0x236   : > { %v1557_v16 = vpop.f32.mrf.mxu0 }
 0x237   : > { %v1727_v18 = vadd.f32 %v1726_v35, %v1557_v16  ;;  %v1769_v16 = vadd.f32 %v4944_v24, %v4764_v9 }
 0x239   : > { %v2575_v45 = vadd.f32 %v2511_v46, %v1727_v18 }
 0x23b   : > { %v2611_v10 = vadd.f32 %v4909_v19, %v2575_v45  ;;  %v2540_v5 = vpop.f32.mrf.mxu3 }
 0x23c   : > { %v2514_v3 = vpop.f32.mrf.mxu2  ;;  %v2584_v53 = vadd.f32 %v2540_v5, %v1756_v52 }
 0x23d   : > { %v2643_v2 = vmax.f32 %v2611_v10, 0.0  ;;  %v1729_v48 = vpop.f32.mrf.mxu1 }
 0x23e   : > { %v2620_v42 = vadd.f32 %v4909_v19, %v2584_v53 }
 0x23f   : > { %2675 = vst.msk [vmem:[%s4367_s12 + $0x90] sm:$0xff] %vm716_vm3, %v2643_v2  ;;  %v1560_v15 = vpop.f32.mrf.mxu0 }
 0x240   : > { %v2652_v4 = vmax.f32 %v2620_v42, 0.0  ;;  %v1730_v61 = vadd.f32 %v1729_v48, %v1560_v15 }
 0x242   : > { %2684 = vst.msk [vmem:[%s4367_s12 + $0xd8] sm:$0xff] %vm716_vm3, %v2652_v4  ;;  %v2576_v63 = vadd.f32 %v2514_v3, %v1730_v61 }
 0x243   : > { %v2542_v29 = vpop.f32.mrf.mxu3 }
 0x244   : > { %v2612_v54 = vadd.f32 %v4909_v19, %v2576_v63  ;;  %v2516_v59 = vpop.f32.mrf.mxu2 }
 0x245   : > { %v1731_v37 = vpop.f32.mrf.mxu1 }
 0x246   : > { %v2644_v31 = vmax.f32 %v2612_v54, 0.0 }
 0x247   : > { %v1562_v49 = vpop.f32.mrf.mxu0 }
 0x248   : > { %2676 = vst.msk [vmem:[%s4367_s12 + $0x98] sm:$0xff] %vm716_vm3, %v2644_v31 }
 0x24d   : > { %v2518_v34 = vpop.f32.mrf.mxu2 }
 0x254   : > { %v2544_v41 = vpop.f32.mrf.mxu3 }
 0x255   : > { %v2585_v7 = vadd.f32 %v2544_v41, %v1760_v13  ;;  %v1564_v56 = vpop.f32.mrf.mxu0  ;;  %v2520_v51 = vpop.f32.mrf.mxu2 }
 0x256   : > { %v1733_v50 = vpop.f32.mrf.mxu1 }
 0x257   : > { %v2621_v11 = vadd.f32 %v4909_v19, %v2585_v7  ;;  %v1734_v40 = vadd.f32 %v1733_v50, %v1564_v56 }
 0x259   : > { %v2653_v38 = vmax.f32 %v2621_v11, 0.0  ;;  %v2577_v12 = vadd.f32 %v2518_v34, %v1734_v40 }
 0x25b   : > { %2685 = vst.msk [vmem:[%s4367_s12 + $0xe0] sm:$0xff] %vm716_vm3, %v2653_v38  ;;  %v2613_v43 = vadd.f32 %v4909_v19, %v2577_v12 }
 0x25c   : > { %v2546_v60 = vpop.f32.mrf.mxu3 }
 0x25d   : > { %v2645_v58 = vmax.f32 %v2613_v43, 0.0  ;;  %v2586_v44 = vadd.f32 %v2546_v60, %v1762_v27  ;;  %v1566_v22 = vpop.f32.mrf.mxu0 }
 0x25e   : > { %v1735_v36 = vpop.f32.mrf.mxu1 }
 0x25f   : > { %2677 = vst.msk [vmem:[%s4367_s12 + $0xa0] sm:$0xff] %vm716_vm3, %v2645_v58  ;;  %v2622_v28 = vadd.f32 %v4909_v19, %v2586_v44  ;;  %v1736_v20 = vadd.f32 %v1735_v36, %v1566_v22 }
 0x261   : > { %v2654_v39 = vmax.f32 %v2622_v28, 0.0  ;;  %v2578_v55 = vadd.f32 %v2520_v51, %v1736_v20 }
 0x263   : > { %2686 = vst.msk [vmem:[%s4367_s12 + $0xe8] sm:$0xff] %vm716_vm3, %v2654_v39  ;;  %v2614_v17 = vadd.f32 %v4909_v19, %v2578_v55  ;;  %v2523_v32 = vpop.f32.mrf.mxu2 }
 0x265   : > { %v2646_v1 = vmax.f32 %v2614_v17, 0.0  ;;  %v2549_v6 = vpop.f32.mrf.mxu3 }
 0x267   : > { %2678 = vst.msk [vmem:[%s4367_s12 + $0xa8] sm:$0xff] %vm716_vm3, %v2646_v1  ;;  %v1738_v26 = vpop.f32.mrf.mxu1 }
 0x26b   : > { %v2524_v25 = vpop.f32.mrf.mxu2 }
 0x26d   : > { %v2550_v33 = vpop.f32.mrf.mxu3 }
 0x26e   : > { %v2587_v14 = vadd.f32 %v2550_v33, %v1766_v23  ;;  %v1569_v8 = vpop.f32.mrf.mxu0 }
 0x26f   : > { %v1739_v47 = vpop.f32.mrf.mxu1 }
 0x270   : > { %v2623_v62 = vadd.f32 %v4909_v19, %v2587_v14 }
 0x272   : > { %v2655_v30 = vmax.f32 %v2623_v62, 0.0 }
 0x274   : > { %2687 = vst.msk [vmem:[%s4367_s12 + $0xf0] sm:$0xff] %vm716_vm3, %v2655_v30 }
 0x276   : > { %v1570_v21 = vpop.f32.mrf.mxu0 }
 0x277   : > { %v1740_v46 = vadd.f32 %v1739_v47, %v1570_v21 }
 0x279   : > { %v2579_v35 = vadd.f32 %v2524_v25, %v1740_v46 }
 0x27b   : > { %v2615_v57 = vadd.f32 %v4909_v19, %v2579_v35  ;;  %v2553_v0 = vpop.f32.mrf.mxu3 }
 0x27c   : > { %v2527_v18 = vpop.f32.mrf.mxu2  ;;  %v2588_v45 = vadd.f32 %v2553_v0, %v1769_v16 }
 0x27d   : > { %v2647_v52 = vmax.f32 %v2615_v57, 0.0  ;;  %v1742_v10 = vpop.f32.mrf.mxu1 }
 0x27e   : > { %v2624_v5 = vadd.f32 %v4909_v19, %v2588_v45 }
 0x27f   : > { %2679 = vst.msk [vmem:[%s4367_s12 + $0xb0] sm:$0xff] %vm716_vm3, %v2647_v52  ;;  %v1573_v3 = vpop.f32.mrf.mxu0 }
 0x280   : > { %v2656_v53 = vmax.f32 %v2624_v5, 0.0  ;;  %v1743_v2 = vadd.f32 %v1742_v10, %v1573_v3 }
 0x282   : > { %2688 = vst.msk [vmem:[%s4367_s12 + $0xf8] sm:$0xff] %vm716_vm3, %v2656_v53  ;;  %v2580_v48 = vadd.f32 %v2527_v18, %v1743_v2 }
 0x283   : > { %v2555_v42 = vpop.f32.mrf.mxu3 }
 0x284   : > { %v2616_v9 = vadd.f32 %v4909_v19, %v2580_v48  ;;  %v2529_v24 = vpop.f32.mrf.mxu2 }
 0x285   : > { %v1744_v15 = vpop.f32.mrf.mxu1 }
 0x286   : > { %v2648_v4 = vmax.f32 %v2616_v9, 0.0 }
 0x287   : > { %v1575_v61 = vpop.f32.mrf.mxu0 }
 0x288   : > { %2680 = vst.msk [vmem:[%s4367_s12 + $0xb8] sm:$0xff] %vm716_vm3, %v2648_v4 }
 0x289 PF: > { %s13_s14 = sadd.s32 1, %s3401_s14   ;;  %s5058_s12 = smov %s3397_s13 }
 0x28a   : > { %p10_p5 = scmp.ge.s32.totalorder %s13_s14, 4   ;;  %s5059_s13 = smov %s5061_s15 }
 0x28c   :  { %12 = sbr.rel (!%p10_p5) target bundleno = 2 (0x2), region = 67 }

</bundles_post_ra>
